<compile_context>
chip_gen: v7x
topology: tpu7x:2x2x1
jax: 0.10.0
libtpu: 0.0.40
codegen_flags: <defaults>
</compile_context>

<pallas_src>
import functools

import numpy as np
import jax
import jax.numpy as jnp
from jax.experimental import pallas as pl
from jax.experimental.pallas import tpu as pltpu

VMEM_LIMIT_BYTES = 32 * 1024 * 1024  # safe on v5e/v6e (128 MiB) and v7x (64 MiB)
GN_EPS = 1e-8
N_DD_LAYERS = 7


# ----------------------------- Pallas kernels -----------------------------

def _conv_act_kernel(w_ref, a_ref, b_ref, al_ref, o_ref):
    # w: (Cout, K) bf16 ; a: (K, HW) bf16 (one sample) ; b: (Cout,1) f32 ; al: (1,1) f32
    y = jnp.dot(w_ref[...], a_ref[...], preferred_element_type=jnp.float32) + b_ref[...]
    al = al_ref[...]                      # alpha == 1.0 -> exact identity
    o_ref[...] = (jnp.maximum(y, 0.0) + al * jnp.minimum(y, 0.0)).astype(o_ref.dtype)


def _conv_gn_act_kernel(w_ref, a_ref, b_ref, g_ref, be_ref, al_ref, o_ref):
    # Fused conv + bias + GroupNorm(num_groups=1, eps=1e-8) + PReLU, one sample per step.
    y = jnp.dot(w_ref[...], a_ref[...], preferred_element_type=jnp.float32) + b_ref[...]
    mean = jnp.mean(y)
    var = jnp.mean((y - mean) * (y - mean))           # biased variance (torch GN)
    y = (y - mean) * jax.lax.rsqrt(var + GN_EPS)
    y = y * g_ref[...] + be_ref[...]                  # (Cout,1) lane broadcast
    al = al_ref[...]
    o_ref[...] = (jnp.maximum(y, 0.0) + al * jnp.minimum(y, 0.0)).astype(o_ref.dtype)


def _ddense_kernel(x_ref, a_mat_ref, win_ref, bin_ref, wmix_ref, dwb_ref, pww_ref,
                   pwb_ref, gg_ref, bb_ref, aa_ref, wout_ref, bout_ref, aio_ref,
                   o_ref, xs_ref, *, half, n_layers):
    # Whole dilatedDenseBlock for one sample.
    #   x: (mid, HW) bf16 ; a_mat: (n_layers*6, HW, HW) static shift matrices ;
    #   wmix: (n_layers*6, half, ROWS) mixing matrices (complex_cat + grouping folded in);
    #   xs scratch: (ROWS, HW) f32 activation stack [h, out1, ..., out7].
    f32 = jnp.float32
    x = x_ref[...].astype(f32)

    def prelu(v, a):                                  # a: (1,1)
        return jnp.maximum(v, 0.0) + a * jnp.minimum(v, 0.0)

    def conv_taps(wk_ref, v):                         # sum_k (W_k @ v) @ A[k]  (dilation 1)
        acc = None
        for k in range(6):
            t = jnp.dot(jnp.dot(wk_ref[k], v, preferred_element_type=f32),
                        a_mat_ref[k], preferred_element_type=f32)
            acc = t if acc is None else acc + t
        return acc

    xs_ref[...] = jnp.zeros_like(xs_ref)              # unwritten rows must read as 0

    # input conv (3,2), pad (1,1), dilation 1, + PReLU
    h = prelu(conv_taps(win_ref, x) + bin_ref[...], aio_ref[0])
    xs_ref[0:half, :] = h
    last = h

    for i in range(n_layers):
        xsv = xs_ref[...]                             # (ROWS, HW) f32
        acc = None
        for k in range(6):
            idx = i * 6 + k
            mixed = jnp.dot(wmix_ref[idx], xsv, preferred_element_type=f32)
            t = jnp.dot(mixed, a_mat_ref[idx], preferred_element_type=f32)
            acc = t if acc is None else acc + t
        dw = acc + dwb_ref[i]                                     # grouped dilated conv
        y = jnp.dot(pww_ref[i], dw, preferred_element_type=f32) + pwb_ref[i]   # 1x1
        mean = jnp.mean(y)
        var = jnp.mean((y - mean) * (y - mean))
        y = (y - mean) * jax.lax.rsqrt(var + GN_EPS)
        y = y * gg_ref[i] + bb_ref[i]
        y = prelu(y, aa_ref[i])
        xs_ref[(i + 1) * half:(i + 2) * half, :] = y
        last = y

    # output conv (3,2), pad (1,1), dilation 1, + PReLU
    o = prelu(conv_taps(wout_ref, last) + bout_ref[...], aio_ref[1])
    o_ref[...] = o.astype(o_ref.dtype)


# ----------------------------- kernel wrappers -----------------------------

def _conv_act(a, p):
    """a: (N, K, HW) -> (N, Cout, HW) bf16.  Conv + bias (+ identity act)."""
    N, K, HW = a.shape
    Cout = p['w'].shape[0]
    return pl.pallas_call(
        _conv_act_kernel,
        out_shape=jax.ShapeDtypeStruct((N, Cout, HW), jnp.bfloat16),
        grid=(N,),
        in_specs=[pl.BlockSpec((Cout, K), lambda n: (0, 0)),
                  pl.BlockSpec((None, K, HW), lambda n: (n, 0, 0)),
                  pl.BlockSpec((Cout, 1), lambda n: (0, 0)),
                  pl.BlockSpec((1, 1), lambda n: (0, 0))],
        out_specs=pl.BlockSpec((None, Cout, HW), lambda n: (n, 0, 0)),
        compiler_params=pltpu.CompilerParams(
            dimension_semantics=("parallel",),
            vmem_limit_bytes=VMEM_LIMIT_BYTES),
    )(p['w'], a.astype(jnp.bfloat16), p['b'], p['alpha'])


def _conv_gn_act(a, p):
    """a: (N, K, HW) -> (N, Cout, HW) bf16.  Conv + bias + GN(1) + PReLU, fused."""
    N, K, HW = a.shape
    Cout = p['w'].shape[0]
    return pl.pallas_call(
        _conv_gn_act_kernel,
        out_shape=jax.ShapeDtypeStruct((N, Cout, HW), jnp.bfloat16),
        grid=(N,),
        in_specs=[pl.BlockSpec((Cout, K), lambda n: (0, 0)),
                  pl.BlockSpec((None, K, HW), lambda n: (n, 0, 0)),
                  pl.BlockSpec((Cout, 1), lambda n: (0, 0)),
                  pl.BlockSpec((Cout, 1), lambda n: (0, 0)),
                  pl.BlockSpec((Cout, 1), lambda n: (0, 0)),
                  pl.BlockSpec((1, 1), lambda n: (0, 0))],
        out_specs=pl.BlockSpec((None, Cout, HW), lambda n: (n, 0, 0)),
        compiler_params=pltpu.CompilerParams(
            dimension_semantics=("parallel",),
            vmem_limit_bytes=VMEM_LIMIT_BYTES),
    )(p['w'], a.astype(jnp.bfloat16), p['b'], p['gamma'], p['beta'], p['alpha'])


def ddense_forward(x, q):
    """Entire dilatedDenseBlock in one pallas_call.  x: (N, mid, H, W) bf16."""
    N, C, H, W = x.shape
    HW = H * W
    half = C // 2
    rows = half * (N_DD_LAYERS + 1)
    kern = functools.partial(_ddense_kernel, half=half, n_layers=N_DD_LAYERS)
    const = lambda rank: (lambda n, _r=rank: (0,) * _r)
    out = pl.pallas_call(
        kern,
        out_shape=jax.ShapeDtypeStruct((N, C, HW), jnp.bfloat16),
        grid=(N,),
        in_specs=[pl.BlockSpec((None, C, HW), lambda n: (n, 0, 0)),
                  pl.BlockSpec(q['A'].shape, const(3)),
                  pl.BlockSpec(q['win'].shape, const(3)),
                  pl.BlockSpec(q['bin'].shape, const(2)),
                  pl.BlockSpec(q['wmix'].shape, const(3)),
                  pl.BlockSpec(q['dwb'].shape, const(3)),
                  pl.BlockSpec(q['pww'].shape, const(3)),
                  pl.BlockSpec(q['pwb'].shape, const(3)),
                  pl.BlockSpec(q['gg'].shape, const(3)),
                  pl.BlockSpec(q['bb'].shape, const(3)),
                  pl.BlockSpec(q['aa'].shape, const(3)),
                  pl.BlockSpec(q['wout'].shape, const(3)),
                  pl.BlockSpec(q['bout'].shape, const(2)),
                  pl.BlockSpec(q['aio'].shape, const(3))],
        out_specs=pl.BlockSpec((None, C, HW), lambda n: (n, 0, 0)),
        scratch_shapes=[pltpu.VMEM((rows, HW), jnp.float32)],
        compiler_params=pltpu.CompilerParams(
            dimension_semantics=("parallel",),
            vmem_limit_bytes=VMEM_LIMIT_BYTES),
    )(x.reshape(N, C, HW).astype(jnp.bfloat16), q['A'], q['win'], q['bin'], q['wmix'],
      q['dwb'], q['pww'], q['pwb'], q['gg'], q['bb'], q['aa'], q['wout'], q['bout'],
      q['aio'])
    return out.reshape(N, C, H, W)


# ---------------------- XLA layout glue (im2col / shuffle) ----------------------

def _im2col(x, kh, kw, stride, dilation, pad_h, pad_w_left):
    """x: (N, C, H, W) -> (N, C*kh*kw, Hout*Wout).  No transposes needed."""
    N, C, H, W = x.shape
    sh, sw = stride
    dh, dw = dilation
    xp = jnp.pad(x, ((0, 0), (0, 0), (pad_h, pad_h), (pad_w_left, 0)))
    Hp, Wp = H + 2 * pad_h, W + pad_w_left
    Hout = (Hp - (dh * (kh - 1) + 1)) // sh + 1
    Wout = (Wp - (dw * (kw - 1) + 1)) // sw + 1
    taps = []
    for i in range(kh):
        for j in range(kw):
            taps.append(xp[:, :,
                           i * dh: i * dh + sh * (Hout - 1) + 1: sh,
                           j * dw: j * dw + sw * (Wout - 1) + 1: sw])
    p = jnp.stack(taps, axis=2)                    # (N, C, kh*kw, Hout, Wout)
    return p.reshape(N, C * kh * kw, Hout * Wout), Hout, Wout


def subpixel_up_h(x, n):
    """SPCONV channel->height shuffle: out[b, c//n, h*n + c%n, w] = x[b, c, h, w]."""
    B, C, H, W = x.shape
    x = x.transpose(0, 3, 2, 1)                    # (B, W, H, C)
    x = x.reshape(B, W, H, C // n, n)
    x = x.transpose(0, 1, 2, 4, 3)                 # (B, W, H, n, C//n)
    x = x.reshape(B, W, H * n, C // n)
    return x.transpose(0, 3, 2, 1)                 # (B, C//n, H*n, W)


# ------------------------------ module stages ------------------------------

def conv1x1(x, p):                                 # plain 1x1 Conv2d (cat layers)
    N, C, H, W = x.shape
    y = _conv_act(x.reshape(N, C, H * W), p)
    return y.reshape(N, -1, H, W)


def inconv_forward(x, p):                          # INCONV: 1x1 conv + GN + PReLU (fused)
    N, C, H, W = x.shape
    y = _conv_gn_act(x.reshape(N, C, H * W), p)
    return y.reshape(N, -1, H, W)


def enc_forward(x, p):                             # CONV: causal (3,2) stride (2,1) + GN + PReLU
    a, Ho, Wo = _im2col(x, 3, 2, (2, 1), (1, 1), 1, 1)
    y = _conv_gn_act(a, p)
    return y.reshape(y.shape[0], y.shape[1], Ho, Wo)


def spconv_forward(x, p, n=2):                     # SPCONV: conv (+GN+PReLU fused) -> shuffle
    a, Ho, Wo = _im2col(x, 3, 2, (1, 1), (1, 1), 1, 1)
    y = _conv_gn_act(a, p)                         # gamma/beta pre-repeated per pre-shuffle ch
    y = y.reshape(y.shape[0], y.shape[1], Ho, Wo)
    return subpixel_up_h(y, n)


def msfed4_forward(x, ed1, ed2, ed3, ed4, ed5, Q):
    bf = jnp.bfloat16
    ed1, ed2, ed3, ed4, ed5 = (e.astype(bf) for e in (ed1, ed2, ed3, ed4, ed5))
    x_in = inconv_forward(x, Q['inconv'])
    out1 = enc_forward(conv1x1(jnp.concatenate([x_in, ed1], 1), Q['cat1e']), Q['en1'])
    out2 = enc_forward(conv1x1(jnp.concatenate([out1, ed2], 1), Q['cat2e']), Q['en2'])
    out3 = enc_forward(conv1x1(jnp.concatenate([out2, ed3], 1), Q['cat3e']), Q['en3'])
    out4 = enc_forward(conv1x1(jnp.concatenate([out3, ed4], 1), Q['cat4e']), Q['en4'])
    dd = ddense_forward(out4, Q['ddense'])
    out = spconv_forward(conv1x1(jnp.concatenate([dd, out4, ed5], 1), Q['cat1d']), Q['de1'])
    out = spconv_forward(conv1x1(jnp.concatenate([out, out3, ed4], 1), Q['cat2d']), Q['de2'])
    out = spconv_forward(conv1x1(jnp.concatenate([out, out2, ed3], 1), Q['cat3d']), Q['de3'])
    out = spconv_forward(conv1x1(jnp.concatenate([out, out1, ed2], 1), Q['cat4d']), Q['de4'])
    return out.astype(jnp.float32) + x_in.astype(jnp.float32)


# ------------------------------ parameters ------------------------------

def _conv_init(key, cout, cin_g, kh, kw):
    k1, k2 = jax.random.split(key)
    std = 1.0 / float(cin_g * kh * kw) ** 0.5
    return {'w': std * jax.random.normal(k1, (cout, cin_g, kh, kw), jnp.float32),
            'b': 0.05 * jax.random.normal(k2, (cout,), jnp.float32)}


def _gnp_init(c):
    return {'gamma': jnp.ones((c,), jnp.float32),
            'beta': jnp.zeros((c,), jnp.float32),
            'alpha': jnp.array(0.25, jnp.float32)}        # PReLU default init


def init_params(key, in_ch, mid_ch, out_ch):
    keys = iter(jax.random.split(key, 64))
    half = mid_ch // 2
    P = {}
    P['inconv'] = {**_conv_init(next(keys), out_ch, in_ch, 1, 1), **_gnp_init(out_ch)}
    P['cat1e'] = _conv_init(next(keys), out_ch, out_ch * 2, 1, 1)
    P['cat2e'] = _conv_init(next(keys), mid_ch, mid_ch * 2, 1, 1)
    P['cat3e'] = _conv_init(next(keys), mid_ch, mid_ch * 2, 1, 1)
    P['cat4e'] = _conv_init(next(keys), mid_ch, mid_ch * 2, 1, 1)
    P['en1'] = {**_conv_init(next(keys), mid_ch, out_ch, 3, 2), **_gnp_init(mid_ch)}
    P['en2'] = {**_conv_init(next(keys), mid_ch, mid_ch, 3, 2), **_gnp_init(mid_ch)}
    P['en3'] = {**_conv_init(next(keys), mid_ch, mid_ch, 3, 2), **_gnp_init(mid_ch)}
    P['en4'] = {**_conv_init(next(keys), mid_ch, mid_ch, 3, 2), **_gnp_init(mid_ch)}
    dd = {'in': _conv_init(next(keys), half, mid_ch, 3, 2),
          'prelu1': jnp.array(0.25, jnp.float32),
          'layers': [],
          'out': _conv_init(next(keys), mid_ch, half, 3, 2),
          'prelu2': jnp.array(0.25, jnp.float32)}
    for i in range(N_DD_LAYERS):
        dd['layers'].append({'depth': _conv_init(next(keys), half, i + 1, 3, 2),
                             'point': _conv_init(next(keys), half, half, 1, 1),
                             **_gnp_init(half)})
    P['ddense'] = dd
    P['cat1d'] = _conv_init(next(keys), mid_ch * 2, mid_ch * 3, 1, 1)
    P['cat2d'] = _conv_init(next(keys), mid_ch * 2, mid_ch * 3, 1, 1)
    P['cat3d'] = _conv_init(next(keys), mid_ch * 2, mid_ch * 3, 1, 1)
    P['cat4d'] = _conv_init(next(keys), mid_ch * 2, mid_ch * 3, 1, 1)
    P['de1'] = {**_conv_init(next(keys), mid_ch * 2, mid_ch * 2, 3, 2), **_gnp_init(mid_ch)}
    P['de2'] = {**_conv_init(next(keys), mid_ch * 2, mid_ch * 2, 3, 2), **_gnp_init(mid_ch)}
    P['de3'] = {**_conv_init(next(keys), mid_ch * 2, mid_ch * 2, 3, 2), **_gnp_init(mid_ch)}
    P['de4'] = {**_conv_init(next(keys), out_ch * 2, mid_ch * 2, 3, 2), **_gnp_init(out_ch)}
    return P


# ------------------------- kernel-ready parameter packing -------------------------

def _prep_plain(c):                                # 1x1 cat conv: bias only, identity act
    cout = c['w'].shape[0]
    return {'w': c['w'].reshape(cout, -1).astype(jnp.bfloat16),
            'b': c['b'].reshape(cout, 1).astype(jnp.float32),
            'alpha': jnp.ones((1, 1), jnp.float32)}


def _prep_gn(c, repeat=1):                         # conv + GN + PReLU params
    cout = c['w'].shape[0]
    g, bt = c['gamma'], c['beta']
    if repeat > 1:                                 # SPCONV: per pre-shuffle channel c -> c//n
        g = jnp.repeat(g, repeat)
        bt = jnp.repeat(bt, repeat)
    return {'w': c['w'].reshape(cout, -1).astype(jnp.bfloat16),
            'b': c['b'].reshape(cout, 1).astype(jnp.float32),
            'gamma': g.reshape(cout, 1).astype(jnp.float32),
            'beta': bt.reshape(cout, 1).astype(jnp.float32),
            'alpha': c['alpha'].reshape(1, 1).astype(jnp.float32)}


def _build_shift_mats(H, W, dils):
    """Static 0/1 matrices A[k]: shifted = x @ A, causal (3,2) taps, per dilation."""
    HW = H * W
    A = np.zeros((len(dils) * 6, HW, HW), np.float32)
    for i, d in enumerate(dils):
        for kh in range(3):
            for kw in range(2):
                k = i * 6 + kh * 2 + kw
                dh, dw = (kh - 1) * d, (kw - 1) * d
                for h in range(H):
                    for w in range(W):
                        hs, ws = h + dh, w + dw
                        if 0 <= hs < H and 0 <= ws < W:
                            A[k, hs * W + ws, h * W + w] = 1.0
    return A


def _prep_dense(dd, H, W):
    half, mid = dd['in']['w'].shape[0], dd['in']['w'].shape[1]
    rows = half * (N_DD_LAYERS + 1)
    hh = half // 2
    A = jnp.asarray(_build_shift_mats(H, W, [2 ** i for i in range(N_DD_LAYERS)]))
    win = jnp.transpose(dd['in']['w'].reshape(half, mid, 6), (2, 0, 1)).astype(jnp.float32)
    wout = jnp.transpose(dd['out']['w'].reshape(mid, half, 6), (2, 0, 1)).astype(jnp.float32)
    wmix, dwb, pww, pwb, gg, bb, aa = [], [], [], [], [], [], []
    eye = np.eye(half, dtype=np.float32)
    for i in range(N_DD_LAYERS):
        lp = dd['layers'][i]
        w = lp['depth']['w']                       # (half, i+1, 3, 2)
        cig = i + 1
        # TODO(synk): complex_cat is not defined in the reference source; this uses the
        # standard DCCRN-style ordering (first halves of [out_i,...,out_1,x] then second
        # halves), folded into the channel permutation below — verify against the reference.
        blocks = list(range(i, 0, -1)) + [0]       # newest output first, x (block 0) last
        perm = []
        for b_ in blocks:
            perm += [half * b_ + c for c in range(hh)]
        for b_ in blocks:
            perm += [half * b_ + c for c in range(hh, half)]
        P_perm = np.zeros((half * cig, rows), np.float32)
        P_perm[np.arange(half * cig), np.array(perm)] = 1.0
        mats = []
        for kh in range(3):
            for kw in range(2):
                wk = w[:, :, kh, kw]                                       # (half, cig)
                full = (wk[:, None, :] * eye[:, :, None]).reshape(half, half * cig)
                mats.append(jnp.asarray(full) @ jnp.asarray(P_perm))       # (half, rows)
        wmix.append(jnp.stack(mats))                                       # (6, half, rows)
        dwb.append(lp['depth']['b'].reshape(half, 1))
        pww.append(lp['point']['w'].reshape(half, half))
        pwb.append(lp['point']['b'].reshape(half, 1))
        gg.append(lp['gamma'].reshape(half, 1))
        bb.append(lp['beta'].reshape(half, 1))
        aa.append(lp['alpha'].reshape(1, 1))
    return {'A': A,
            'win': win, 'bin': dd['in']['b'].reshape(half, 1).astype(jnp.float32),
            'wmix': jnp.concatenate(wmix, axis=0).astype(jnp.float32),
            'dwb': jnp.stack(dwb).astype(jnp.float32),
            'pww': jnp.stack(pww).astype(jnp.float32),
            'pwb': jnp.stack(pwb).astype(jnp.float32),
            'gg': jnp.stack(gg).astype(jnp.float32),
            'bb': jnp.stack(bb).astype(jnp.float32),
            'aa': jnp.stack(aa).astype(jnp.float32),
            'wout': wout, 'bout': dd['out']['b'].reshape(mid, 1).astype(jnp.float32),
            'aio': jnp.stack([dd['prelu1'].reshape(1, 1),
                              dd['prelu2'].reshape(1, 1)]).astype(jnp.float32)}


def prepare_params(P, H, W):
    """Pack / pre-cast weights ONCE outside the jitted forward."""
    Q = {'inconv': _prep_gn(P['inconv']),
         'en1': _prep_gn(P['en1']), 'en2': _prep_gn(P['en2']),
         'en3': _prep_gn(P['en3']), 'en4': _prep_gn(P['en4']),
         'de1': _prep_gn(P['de1'], repeat=2), 'de2': _prep_gn(P['de2'], repeat=2),
         'de3': _prep_gn(P['de3'], repeat=2), 'de4': _prep_gn(P['de4'], repeat=2),
         'ddense': _prep_dense(P['ddense'], H // 16, W)}
    for k in ('cat1e', 'cat2e', 'cat3e', 'cat4e', 'cat1d', 'cat2d', 'cat3d', 'cat4d'):
        Q[k] = _prep_plain(P[k])
    return Q


# ------------------------------ main ------------------------------

if __name__ == "__main__":
    # H must be divisible by 2**4 = 16 (4 stride-2 encoders / 4 subpixel-x2 decoders).
    in_ch, mid_ch, out_ch = 2, 8, 4
    N, H, W = 2, 64, 8

    key = jax.random.PRNGKey(0)
    ks = jax.random.split(key, 7)
    x   = jax.random.normal(ks[0], (N, in_ch, H, W), jnp.float32)
    ed1 = jax.random.normal(ks[1], (N, out_ch, H, W), jnp.float32)
    ed2 = jax.random.normal(ks[2], (N, mid_ch, H // 2, W), jnp.float32)
    ed3 = jax.random.normal(ks[3], (N, mid_ch, H // 4, W), jnp.float32)
    ed4 = jax.random.normal(ks[4], (N, mid_ch, H // 8, W), jnp.float32)
    ed5 = jax.random.normal(ks[5], (N, mid_ch, H // 16, W), jnp.float32)

    P = init_params(ks[6], in_ch, mid_ch, out_ch)
    Q = prepare_params(P, H, W)          # weights packed / pre-cast once, outside jit

    fwd = jax.jit(msfed4_forward)
    out = jax.block_until_ready(fwd(x, ed1, ed2, ed3, ed4, ed5, Q))

    assert out.shape == (N, out_ch, H, W)
    assert bool(jnp.all(jnp.isfinite(out)))
    print("KERNEL_OK")
</pallas_src>

<mosaic_0001>
module attributes {stable_mosaic.version = 11 : i64} {
  func.func @_conv_gn_act_kernel(%arg0: i32, %arg1: memref<4x2xbf16, #tpu.memory_space<vmem>>, %arg2: memref<1x2x512xbf16, #tpu.memory_space<vmem>>, %arg3: memref<4x1xf32, #tpu.memory_space<vmem>>, %arg4: memref<4x1xf32, #tpu.memory_space<vmem>>, %arg5: memref<4x1xf32, #tpu.memory_space<vmem>>, %arg6: memref<1x1xf32, #tpu.memory_space<vmem>>, %arg7: memref<1x4x512xbf16, #tpu.memory_space<vmem>>) attributes {dimension_semantics = [#tpu.dimension_semantics<parallel>], iteration_bounds = array<i64: 2>, scalar_prefetch = 0 : i64, scratch_operands = 0 : i64, tpu.core_type = #tpu.core_type<tc>, window_params = [{pipeline_mode = #tpu.pipeline_mode<synchronous>, transform_indices = @transform_0, window_bounds = array<i64: 4, 2>}, {transform_indices = @transform_1, window_bounds = array<i64: 1, 2, 512>}, {pipeline_mode = #tpu.pipeline_mode<synchronous>, transform_indices = @transform_2, window_bounds = array<i64: 4, 1>}, {pipeline_mode = #tpu.pipeline_mode<synchronous>, transform_indices = @transform_3, window_bounds = array<i64: 4, 1>}, {pipeline_mode = #tpu.pipeline_mode<synchronous>, transform_indices = @transform_4, window_bounds = array<i64: 4, 1>}, {pipeline_mode = #tpu.pipeline_mode<synchronous>, transform_indices = @transform_5, window_bounds = array<i64: 1, 1>}, {transform_indices = @transform_6, window_bounds = array<i64: 1, 4, 512>}]} {
    %c0 = arith.constant 0 : index
    %c0_0 = arith.constant 0 : index
    %0 = vector.load %arg1[%c0, %c0_0] : memref<4x2xbf16, #tpu.memory_space<vmem>>, vector<4x2xbf16>
    %c0_1 = arith.constant 0 : index
    %c0_2 = arith.constant 0 : index
    %c0_3 = arith.constant 0 : index
    %1 = vector.load %arg2[%c0_1, %c0_2, %c0_3] : memref<1x2x512xbf16, #tpu.memory_space<vmem>>, vector<1x2x512xbf16>
    %2 = vector.shape_cast %1 : vector<1x2x512xbf16> to vector<2x512xbf16>
    %cst = arith.constant dense<0.000000e+00> : vector<4x512xf32>
    %3 = tpu.matmul %0, %2, %cst {dimension_numbers = #tpu.dot_dimension_numbers<[1], [0], [0], [1], [0, 0, 1, 1], [], []>} : vector<4x2xbf16>, vector<2x512xbf16>, vector<4x512xf32> -> vector<4x512xf32>
    %c0_4 = arith.constant 0 : index
    %c0_5 = arith.constant 0 : index
    %4 = vector.load %arg3[%c0_4, %c0_5] : memref<4x1xf32, #tpu.memory_space<vmem>>, vector<4x1xf32>
    %5 = vector.broadcast %4 : vector<4x1xf32> to vector<4x512xf32>
    %6 = arith.addf %3, %5 : vector<4x512xf32>
    %7 = vector.shape_cast %6 : vector<4x512xf32> to vector<1x4x512xf32>
    %cst_6 = arith.constant dense<0.000000e+00> : vector<1xf32>
    %8 = vector.multi_reduction <add>, %7, %cst_6 [1, 2] : vector<1x4x512xf32> to vector<1xf32>
    %9 = vector.shape_cast %8 : vector<1xf32> to vector<1x1x1xf32>
    %10 = vector.extract %9[0, 0, 0] : f32 from vector<1x1x1xf32>
    %cst_7 = arith.constant 2.048000e+03 : f32
    %11 = arith.divf %10, %cst_7 : f32
    %12 = vector.broadcast %11 : f32 to vector<4x512xf32>
    %13 = arith.subf %6, %12 : vector<4x512xf32>
    %14 = vector.broadcast %11 : f32 to vector<4x512xf32>
    %15 = arith.subf %6, %14 : vector<4x512xf32>
    %16 = arith.mulf %13, %15 : vector<4x512xf32>
    %17 = vector.shape_cast %16 : vector<4x512xf32> to vector<1x4x512xf32>
    %cst_8 = arith.constant dense<0.000000e+00> : vector<1xf32>
    %18 = vector.multi_reduction <add>, %17, %cst_8 [1, 2] : vector<1x4x512xf32> to vector<1xf32>
    %19 = vector.shape_cast %18 : vector<1xf32> to vector<1x1x1xf32>
    %20 = vector.extract %19[0, 0, 0] : f32 from vector<1x1x1xf32>
    %cst_9 = arith.constant 2.048000e+03 : f32
    %21 = arith.divf %20, %cst_9 : f32
    %22 = vector.broadcast %11 : f32 to vector<4x512xf32>
    %23 = arith.subf %6, %22 : vector<4x512xf32>
    %cst_10 = arith.constant 9.99999993E-9 : f32
    %24 = arith.addf %21, %cst_10 : f32
    %25 = math.rsqrt %24 : f32
    %26 = vector.broadcast %25 : f32 to vector<4x512xf32>
    %27 = arith.mulf %23, %26 : vector<4x512xf32>
    %c0_11 = arith.constant 0 : index
    %c0_12 = arith.constant 0 : index
    %28 = vector.load %arg4[%c0_11, %c0_12] : memref<4x1xf32, #tpu.memory_space<vmem>>, vector<4x1xf32>
    %29 = vector.broadcast %28 : vector<4x1xf32> to vector<4x512xf32>
    %30 = arith.mulf %27, %29 : vector<4x512xf32>
    %c0_13 = arith.constant 0 : index
    %c0_14 = arith.constant 0 : index
    %31 = vector.load %arg5[%c0_13, %c0_14] : memref<4x1xf32, #tpu.memory_space<vmem>>, vector<4x1xf32>
    %32 = vector.broadcast %31 : vector<4x1xf32> to vector<4x512xf32>
    %33 = arith.addf %30, %32 : vector<4x512xf32>
    %c0_15 = arith.constant 0 : index
    %c0_16 = arith.constant 0 : index
    %34 = vector.load %arg6[%c0_15, %c0_16] : memref<1x1xf32, #tpu.memory_space<vmem>>, vector<1x1xf32>
    %cst_17 = arith.constant 0.000000e+00 : f32
    %35 = vector.broadcast %cst_17 : f32 to vector<4x512xf32>
    %36 = arith.maximumf %33, %35 : vector<4x512xf32>
    %cst_18 = arith.constant 0.000000e+00 : f32
    %37 = vector.broadcast %cst_18 : f32 to vector<4x512xf32>
    %38 = arith.minimumf %33, %37 : vector<4x512xf32>
    %39 = vector.broadcast %34 : vector<1x1xf32> to vector<4x512xf32>
    %40 = arith.mulf %39, %38 : vector<4x512xf32>
    %41 = arith.addf %36, %40 : vector<4x512xf32>
    %42 = arith.truncf %41 : vector<4x512xf32> to vector<4x512xbf16>
    %c0_19 = arith.constant 0 : index
    %c0_20 = arith.constant 0 : index
    %c0_21 = arith.constant 0 : index
    %43 = vector.load %arg7[%c0_19, %c0_20, %c0_21] : memref<1x4x512xbf16, #tpu.memory_space<vmem>>, vector<1x4x512xbf16>
    %44 = vector.shape_cast %43 : vector<1x4x512xbf16> to vector<4x512xbf16>
    %45 = vector.shape_cast %42 : vector<4x512xbf16> to vector<1x4x512xbf16>
    tpu.vector_store %arg7[%c0_19, %c0_20, %c0_21], %45 {strides = array<i32>} : memref<1x4x512xbf16, #tpu.memory_space<vmem>>, vector<1x4x512xbf16>,
    return
  }
  func.func @transform_0(%arg0: i32) -> (i32, i32) {
    %c0_i32 = arith.constant 0 : i32
    %c0_i32_0 = arith.constant 0 : i32
    %c0_i32_1 = arith.constant 0 : i32
    return %c0_i32, %c0_i32_0 : i32, i32
  }
  func.func @transform_1(%arg0: i32) -> (i32, i32, i32) {
    %c0_i32 = arith.constant 0 : i32
    %c0_i32_0 = arith.constant 0 : i32
    %c0_i32_1 = arith.constant 0 : i32
    return %arg0, %c0_i32, %c0_i32_0 : i32, i32, i32
  }
  func.func @transform_2(%arg0: i32) -> (i32, i32) {
    %c0_i32 = arith.constant 0 : i32
    %c0_i32_0 = arith.constant 0 : i32
    %c0_i32_1 = arith.constant 0 : i32
    return %c0_i32, %c0_i32_0 : i32, i32
  }
  func.func @transform_3(%arg0: i32) -> (i32, i32) {
    %c0_i32 = arith.constant 0 : i32
    %c0_i32_0 = arith.constant 0 : i32
    %c0_i32_1 = arith.constant 0 : i32
    return %c0_i32, %c0_i32_0 : i32, i32
  }
  func.func @transform_4(%arg0: i32) -> (i32, i32) {
    %c0_i32 = arith.constant 0 : i32
    %c0_i32_0 = arith.constant 0 : i32
    %c0_i32_1 = arith.constant 0 : i32
    return %c0_i32, %c0_i32_0 : i32, i32
  }
  func.func @transform_5(%arg0: i32) -> (i32, i32) {
    %c0_i32 = arith.constant 0 : i32
    %c0_i32_0 = arith.constant 0 : i32
    %c0_i32_1 = arith.constant 0 : i32
    return %c0_i32, %c0_i32_0 : i32, i32
  }
  func.func @transform_6(%arg0: i32) -> (i32, i32, i32) {
    %c0_i32 = arith.constant 0 : i32
    %c0_i32_0 = arith.constant 0 : i32
    %c0_i32_1 = arith.constant 0 : i32
    return %arg0, %c0_i32, %c0_i32_0 : i32, i32, i32
  }
}

module attributes {stable_mosaic.version = 11 : i64} {
  func.func @_conv_act_kernel(%arg0: i32, %arg1: memref<4x8xbf16, #tpu.memory_space<vmem>>, %arg2: memref<1x8x512xbf16, #tpu.memory_space<vmem>>, %arg3: memref<4x1xf32, #tpu.memory_space<vmem>>, %arg4: memref<1x1xf32, #tpu.memory_space<vmem>>, %arg5: memref<1x4x512xbf16, #tpu.memory_space<vmem>>) attributes {dimension_semantics = [#tpu.dimension_semantics<parallel>], iteration_bounds = array<i64: 2>, scalar_prefetch = 0 : i64, scratch_operands = 0 : i64, tpu.core_type = #tpu.core_type<tc>, window_params = [{pipeline_mode = #tpu.pipeline_mode<synchronous>, transform_indices = @transform_0, window_bounds = array<i64: 4, 8>}, {transform_indices = @transform_1, window_bounds = array<i64: 1, 8, 512>}, {pipeline_mode = #tpu.pipeline_mode<synchronous>, transform_indices = @transform_2, window_bounds = array<i64: 4, 1>}, {pipeline_mode = #tpu.pipeline_mode<synchronous>, transform_indices = @transform_3, window_bounds = array<i64: 1, 1>}, {transform_indices = @transform_4, window_bounds = array<i64: 1, 4, 512>}]} {
    %c0 = arith.constant 0 : index
    %c0_0 = arith.constant 0 : index
    %0 = vector.load %arg1[%c0, %c0_0] : memref<4x8xbf16, #tpu.memory_space<vmem>>, vector<4x8xbf16>
    %c0_1 = arith.constant 0 : index
    %c0_2 = arith.constant 0 : index
    %c0_3 = arith.constant 0 : index
    %1 = vector.load %arg2[%c0_1, %c0_2, %c0_3] : memref<1x8x512xbf16, #tpu.memory_space<vmem>>, vector<1x8x512xbf16>
    %2 = vector.shape_cast %1 : vector<1x8x512xbf16> to vector<8x512xbf16>
    %cst = arith.constant dense<0.000000e+00> : vector<4x512xf32>
    %3 = tpu.matmul %0, %2, %cst {dimension_numbers = #tpu.dot_dimension_numbers<[1], [0], [0], [1], [0, 0, 1, 1], [], []>} : vector<4x8xbf16>, vector<8x512xbf16>, vector<4x512xf32> -> vector<4x512xf32>
    %c0_4 = arith.constant 0 : index
    %c0_5 = arith.constant 0 : index
    %4 = vector.load %arg3[%c0_4, %c0_5] : memref<4x1xf32, #tpu.memory_space<vmem>>, vector<4x1xf32>
    %5 = vector.broadcast %4 : vector<4x1xf32> to vector<4x512xf32>
    %6 = arith.addf %3, %5 : vector<4x512xf32>
    %c0_6 = arith.constant 0 : index
    %c0_7 = arith.constant 0 : index
    %7 = vector.load %arg4[%c0_6, %c0_7] : memref<1x1xf32, #tpu.memory_space<vmem>>, vector<1x1xf32>
    %cst_8 = arith.constant 0.000000e+00 : f32
    %8 = vector.broadcast %cst_8 : f32 to vector<4x512xf32>
    %9 = arith.maximumf %6, %8 : vector<4x512xf32>
    %cst_9 = arith.constant 0.000000e+00 : f32
    %10 = vector.broadcast %cst_9 : f32 to vector<4x512xf32>
    %11 = arith.minimumf %6, %10 : vector<4x512xf32>
    %12 = vector.broadcast %7 : vector<1x1xf32> to vector<4x512xf32>
    %13 = arith.mulf %12, %11 : vector<4x512xf32>
    %14 = arith.addf %9, %13 : vector<4x512xf32>
    %15 = arith.truncf %14 : vector<4x512xf32> to vector<4x512xbf16>
    %c0_10 = arith.constant 0 : index
    %c0_11 = arith.constant 0 : index
    %c0_12 = arith.constant 0 : index
    %16 = vector.load %arg5[%c0_10, %c0_11, %c0_12] : memref<1x4x512xbf16, #tpu.memory_space<vmem>>, vector<1x4x512xbf16>
    %17 = vector.shape_cast %16 : vector<1x4x512xbf16> to vector<4x512xbf16>
    %18 = vector.shape_cast %15 : vector<4x512xbf16> to vector<1x4x512xbf16>
    tpu.vector_store %arg5[%c0_10, %c0_11, %c0_12], %18 {strides = array<i32>} : memref<1x4x512xbf16, #tpu.memory_space<vmem>>, vector<1x4x512xbf16>,
    return
  }
  func.func @transform_0(%arg0: i32) -> (i32, i32) {
    %c0_i32 = arith.constant 0 : i32
    %c0_i32_0 = arith.constant 0 : i32
    %c0_i32_1 = arith.constant 0 : i32
    return %c0_i32, %c0_i32_0 : i32, i32
  }
  func.func @transform_1(%arg0: i32) -> (i32, i32, i32) {
    %c0_i32 = arith.constant 0 : i32
    %c0_i32_0 = arith.constant 0 : i32
    %c0_i32_1 = arith.constant 0 : i32
    return %arg0, %c0_i32, %c0_i32_0 : i32, i32, i32
  }
  func.func @transform_2(%arg0: i32) -> (i32, i32) {
    %c0_i32 = arith.constant 0 : i32
    %c0_i32_0 = arith.constant 0 : i32
    %c0_i32_1 = arith.constant 0 : i32
    return %c0_i32, %c0_i32_0 : i32, i32
  }
  func.func @transform_3(%arg0: i32) -> (i32, i32) {
    %c0_i32 = arith.constant 0 : i32
    %c0_i32_0 = arith.constant 0 : i32
    %c0_i32_1 = arith.constant 0 : i32
    return %c0_i32, %c0_i32_0 : i32, i32
  }
  func.func @transform_4(%arg0: i32) -> (i32, i32, i32) {
    %c0_i32 = arith.constant 0 : i32
    %c0_i32_0 = arith.constant 0 : i32
    %c0_i32_1 = arith.constant 0 : i32
    return %arg0, %c0_i32, %c0_i32_0 : i32, i32, i32
  }
}

module attributes {stable_mosaic.version = 11 : i64} {
  func.func @_conv_gn_act_kernel(%arg0: i32, %arg1: memref<8x24xbf16, #tpu.memory_space<vmem>>, %arg2: memref<1x24x256xbf16, #tpu.memory_space<vmem>>, %arg3: memref<8x1xf32, #tpu.memory_space<vmem>>, %arg4: memref<8x1xf32, #tpu.memory_space<vmem>>, %arg5: memref<8x1xf32, #tpu.memory_space<vmem>>, %arg6: memref<1x1xf32, #tpu.memory_space<vmem>>, %arg7: memref<1x8x256xbf16, #tpu.memory_space<vmem>>) attributes {dimension_semantics = [#tpu.dimension_semantics<parallel>], iteration_bounds = array<i64: 2>, scalar_prefetch = 0 : i64, scratch_operands = 0 : i64, tpu.core_type = #tpu.core_type<tc>, window_params = [{pipeline_mode = #tpu.pipeline_mode<synchronous>, transform_indices = @transform_0, window_bounds = array<i64: 8, 24>}, {transform_indices = @transform_1, window_bounds = array<i64: 1, 24, 256>}, {pipeline_mode = #tpu.pipeline_mode<synchronous>, transform_indices = @transform_2, window_bounds = array<i64: 8, 1>}, {pipeline_mode = #tpu.pipeline_mode<synchronous>, transform_indices = @transform_3, window_bounds = array<i64: 8, 1>}, {pipeline_mode = #tpu.pipeline_mode<synchronous>, transform_indices = @transform_4, window_bounds = array<i64: 8, 1>}, {pipeline_mode = #tpu.pipeline_mode<synchronous>, transform_indices = @transform_5, window_bounds = array<i64: 1, 1>}, {transform_indices = @transform_6, window_bounds = array<i64: 1, 8, 256>}]} {
    %c0 = arith.constant 0 : index
    %c0_0 = arith.constant 0 : index
    %0 = vector.load %arg1[%c0, %c0_0] : memref<8x24xbf16, #tpu.memory_space<vmem>>, vector<8x24xbf16>
    %c0_1 = arith.constant 0 : index
    %c0_2 = arith.constant 0 : index
    %c0_3 = arith.constant 0 : index
    %1 = vector.load %arg2[%c0_1, %c0_2, %c0_3] : memref<1x24x256xbf16, #tpu.memory_space<vmem>>, vector<1x24x256xbf16>
    %2 = vector.shape_cast %1 : vector<1x24x256xbf16> to vector<24x256xbf16>
    %cst = arith.constant dense<0.000000e+00> : vector<8x256xf32>
    %3 = tpu.matmul %0, %2, %cst {dimension_numbers = #tpu.dot_dimension_numbers<[1], [0], [0], [1], [0, 0, 1, 1], [], []>} : vector<8x24xbf16>, vector<24x256xbf16>, vector<8x256xf32> -> vector<8x256xf32>
    %c0_4 = arith.constant 0 : index
    %c0_5 = arith.constant 0 : index
    %4 = vector.load %arg3[%c0_4, %c0_5] : memref<8x1xf32, #tpu.memory_space<vmem>>, vector<8x1xf32>
    %5 = vector.broadcast %4 : vector<8x1xf32> to vector<8x256xf32>
    %6 = arith.addf %3, %5 : vector<8x256xf32>
    %7 = vector.shape_cast %6 : vector<8x256xf32> to vector<1x8x256xf32>
    %cst_6 = arith.constant dense<0.000000e+00> : vector<1xf32>
    %8 = vector.multi_reduction <add>, %7, %cst_6 [1, 2] : vector<1x8x256xf32> to vector<1xf32>
    %9 = vector.shape_cast %8 : vector<1xf32> to vector<1x1x1xf32>
    %10 = vector.extract %9[0, 0, 0] : f32 from vector<1x1x1xf32>
    %cst_7 = arith.constant 2.048000e+03 : f32
    %11 = arith.divf %10, %cst_7 : f32
    %12 = vector.broadcast %11 : f32 to vector<8x256xf32>
    %13 = arith.subf %6, %12 : vector<8x256xf32>
    %14 = vector.broadcast %11 : f32 to vector<8x256xf32>
    %15 = arith.subf %6, %14 : vector<8x256xf32>
    %16 = arith.mulf %13, %15 : vector<8x256xf32>
    %17 = vector.shape_cast %16 : vector<8x256xf32> to vector<1x8x256xf32>
    %cst_8 = arith.constant dense<0.000000e+00> : vector<1xf32>
    %18 = vector.multi_reduction <add>, %17, %cst_8 [1, 2] : vector<1x8x256xf32> to vector<1xf32>
    %19 = vector.shape_cast %18 : vector<1xf32> to vector<1x1x1xf32>
    %20 = vector.extract %19[0, 0, 0] : f32 from vector<1x1x1xf32>
    %cst_9 = arith.constant 2.048000e+03 : f32
    %21 = arith.divf %20, %cst_9 : f32
    %22 = vector.broadcast %11 : f32 to vector<8x256xf32>
    %23 = arith.subf %6, %22 : vector<8x256xf32>
    %cst_10 = arith.constant 9.99999993E-9 : f32
    %24 = arith.addf %21, %cst_10 : f32
    %25 = math.rsqrt %24 : f32
    %26 = vector.broadcast %25 : f32 to vector<8x256xf32>
    %27 = arith.mulf %23, %26 : vector<8x256xf32>
    %c0_11 = arith.constant 0 : index
    %c0_12 = arith.constant 0 : index
    %28 = vector.load %arg4[%c0_11, %c0_12] : memref<8x1xf32, #tpu.memory_space<vmem>>, vector<8x1xf32>
    %29 = vector.broadcast %28 : vector<8x1xf32> to vector<8x256xf32>
    %30 = arith.mulf %27, %29 : vector<8x256xf32>
    %c0_13 = arith.constant 0 : index
    %c0_14 = arith.constant 0 : index
    %31 = vector.load %arg5[%c0_13, %c0_14] : memref<8x1xf32, #tpu.memory_space<vmem>>, vector<8x1xf32>
    %32 = vector.broadcast %31 : vector<8x1xf32> to vector<8x256xf32>
    %33 = arith.addf %30, %32 : vector<8x256xf32>
    %c0_15 = arith.constant 0 : index
    %c0_16 = arith.constant 0 : index
    %34 = vector.load %arg6[%c0_15, %c0_16] : memref<1x1xf32, #tpu.memory_space<vmem>>, vector<1x1xf32>
    %cst_17 = arith.constant 0.000000e+00 : f32
    %35 = vector.broadcast %cst_17 : f32 to vector<8x256xf32>
    %36 = arith.maximumf %33, %35 : vector<8x256xf32>
    %cst_18 = arith.constant 0.000000e+00 : f32
    %37 = vector.broadcast %cst_18 : f32 to vector<8x256xf32>
    %38 = arith.minimumf %33, %37 : vector<8x256xf32>
    %39 = vector.broadcast %34 : vector<1x1xf32> to vector<8x256xf32>
    %40 = arith.mulf %39, %38 : vector<8x256xf32>
    %41 = arith.addf %36, %40 : vector<8x256xf32>
    %42 = arith.truncf %41 : vector<8x256xf32> to vector<8x256xbf16>
    %c0_19 = arith.constant 0 : index
    %c0_20 = arith.constant 0 : index
    %c0_21 = arith.constant 0 : index
    %43 = vector.load %arg7[%c0_19, %c0_20, %c0_21] : memref<1x8x256xbf16, #tpu.memory_space<vmem>>, vector<1x8x256xbf16>
    %44 = vector.shape_cast %43 : vector<1x8x256xbf16> to vector<8x256xbf16>
    %45 = vector.shape_cast %42 : vector<8x256xbf16> to vector<1x8x256xbf16>
    tpu.vector_store %arg7[%c0_19, %c0_20, %c0_21], %45 {strides = array<i32>} : memref<1x8x256xbf16, #tpu.memory_space<vmem>>, vector<1x8x256xbf16>,
    return
  }
  func.func @transform_0(%arg0: i32) -> (i32, i32) {
    %c0_i32 = arith.constant 0 : i32
    %c0_i32_0 = arith.constant 0 : i32
    %c0_i32_1 = arith.constant 0 : i32
    return %c0_i32, %c0_i32_0 : i32, i32
  }
  func.func @transform_1(%arg0: i32) -> (i32, i32, i32) {
    %c0_i32 = arith.constant 0 : i32
    %c0_i32_0 = arith.constant 0 : i32
    %c0_i32_1 = arith.constant 0 : i32
    return %arg0, %c0_i32, %c0_i32_0 : i32, i32, i32
  }
  func.func @transform_2(%arg0: i32) -> (i32, i32) {
    %c0_i32 = arith.constant 0 : i32
    %c0_i32_0 = arith.constant 0 : i32
    %c0_i32_1 = arith.constant 0 : i32
    return %c0_i32, %c0_i32_0 : i32, i32
  }
  func.func @transform_3(%arg0: i32) -> (i32, i32) {
    %c0_i32 = arith.constant 0 : i32
    %c0_i32_0 = arith.constant 0 : i32
    %c0_i32_1 = arith.constant 0 : i32
    return %c0_i32, %c0_i32_0 : i32, i32
  }
  func.func @transform_4(%arg0: i32) -> (i32, i32) {
    %c0_i32 = arith.constant 0 : i32
    %c0_i32_0 = arith.constant 0 : i32
    %c0_i32_1 = arith.constant 0 : i32
    return %c0_i32, %c0_i32_0 : i32, i32
  }
  func.func @transform_5(%arg0: i32) -> (i32, i32) {
    %c0_i32 = arith.constant 0 : i32
    %c0_i32_0 = arith.constant 0 : i32
    %c0_i32_1 = arith.constant 0 : i32
    return %c0_i32, %c0_i32_0 : i32, i32
  }
  func.func @transform_6(%arg0: i32) -> (i32, i32, i32) {
    %c0_i32 = arith.constant 0 : i32
    %c0_i32_0 = arith.constant 0 : i32
    %c0_i32_1 = arith.constant 0 : i32
    return %arg0, %c0_i32, %c0_i32_0 : i32, i32, i32
  }
}

module attributes {stable_mosaic.version = 11 : i64} {
  func.func @_conv_act_kernel(%arg0: i32, %arg1: memref<8x16xbf16, #tpu.memory_space<vmem>>, %arg2: memref<1x16x256xbf16, #tpu.memory_space<vmem>>, %arg3: memref<8x1xf32, #tpu.memory_space<vmem>>, %arg4: memref<1x1xf32, #tpu.memory_space<vmem>>, %arg5: memref<1x8x256xbf16, #tpu.memory_space<vmem>>) attributes {dimension_semantics = [#tpu.dimension_semantics<parallel>], iteration_bounds = array<i64: 2>, scalar_prefetch = 0 : i64, scratch_operands = 0 : i64, tpu.core_type = #tpu.core_type<tc>, window_params = [{pipeline_mode = #tpu.pipeline_mode<synchronous>, transform_indices = @transform_0, window_bounds = array<i64: 8, 16>}, {transform_indices = @transform_1, window_bounds = array<i64: 1, 16, 256>}, {pipeline_mode = #tpu.pipeline_mode<synchronous>, transform_indices = @transform_2, window_bounds = array<i64: 8, 1>}, {pipeline_mode = #tpu.pipeline_mode<synchronous>, transform_indices = @transform_3, window_bounds = array<i64: 1, 1>}, {transform_indices = @transform_4, window_bounds = array<i64: 1, 8, 256>}]} {
    %c0 = arith.constant 0 : index
    %c0_0 = arith.constant 0 : index
    %0 = vector.load %arg1[%c0, %c0_0] : memref<8x16xbf16, #tpu.memory_space<vmem>>, vector<8x16xbf16>
    %c0_1 = arith.constant 0 : index
    %c0_2 = arith.constant 0 : index
    %c0_3 = arith.constant 0 : index
    %1 = vector.load %arg2[%c0_1, %c0_2, %c0_3] : memref<1x16x256xbf16, #tpu.memory_space<vmem>>, vector<1x16x256xbf16>
    %2 = vector.shape_cast %1 : vector<1x16x256xbf16> to vector<16x256xbf16>
    %cst = arith.constant dense<0.000000e+00> : vector<8x256xf32>
    %3 = tpu.matmul %0, %2, %cst {dimension_numbers = #tpu.dot_dimension_numbers<[1], [0], [0], [1], [0, 0, 1, 1], [], []>} : vector<8x16xbf16>, vector<16x256xbf16>, vector<8x256xf32> -> vector<8x256xf32>
    %c0_4 = arith.constant 0 : index
    %c0_5 = arith.constant 0 : index
    %4 = vector.load %arg3[%c0_4, %c0_5] : memref<8x1xf32, #tpu.memory_space<vmem>>, vector<8x1xf32>
    %5 = vector.broadcast %4 : vector<8x1xf32> to vector<8x256xf32>
    %6 = arith.addf %3, %5 : vector<8x256xf32>
    %c0_6 = arith.constant 0 : index
    %c0_7 = arith.constant 0 : index
    %7 = vector.load %arg4[%c0_6, %c0_7] : memref<1x1xf32, #tpu.memory_space<vmem>>, vector<1x1xf32>
    %cst_8 = arith.constant 0.000000e+00 : f32
    %8 = vector.broadcast %cst_8 : f32 to vector<8x256xf32>
    %9 = arith.maximumf %6, %8 : vector<8x256xf32>
    %cst_9 = arith.constant 0.000000e+00 : f32
    %10 = vector.broadcast %cst_9 : f32 to vector<8x256xf32>
    %11 = arith.minimumf %6, %10 : vector<8x256xf32>
    %12 = vector.broadcast %7 : vector<1x1xf32> to vector<8x256xf32>
    %13 = arith.mulf %12, %11 : vector<8x256xf32>
    %14 = arith.addf %9, %13 : vector<8x256xf32>
    %15 = arith.truncf %14 : vector<8x256xf32> to vector<8x256xbf16>
    %c0_10 = arith.constant 0 : index
    %c0_11 = arith.constant 0 : index
    %c0_12 = arith.constant 0 : index
    %16 = vector.load %arg5[%c0_10, %c0_11, %c0_12] : memref<1x8x256xbf16, #tpu.memory_space<vmem>>, vector<1x8x256xbf16>
    %17 = vector.shape_cast %16 : vector<1x8x256xbf16> to vector<8x256xbf16>
    %18 = vector.shape_cast %15 : vector<8x256xbf16> to vector<1x8x256xbf16>
    tpu.vector_store %arg5[%c0_10, %c0_11, %c0_12], %18 {strides = array<i32>} : memref<1x8x256xbf16, #tpu.memory_space<vmem>>, vector<1x8x256xbf16>,
    return
  }
  func.func @transform_0(%arg0: i32) -> (i32, i32) {
    %c0_i32 = arith.constant 0 : i32
    %c0_i32_0 = arith.constant 0 : i32
    %c0_i32_1 = arith.constant 0 : i32
    return %c0_i32, %c0_i32_0 : i32, i32
  }
  func.func @transform_1(%arg0: i32) -> (i32, i32, i32) {
    %c0_i32 = arith.constant 0 : i32
    %c0_i32_0 = arith.constant 0 : i32
    %c0_i32_1 = arith.constant 0 : i32
    return %arg0, %c0_i32, %c0_i32_0 : i32, i32, i32
  }
  func.func @transform_2(%arg0: i32) -> (i32, i32) {
    %c0_i32 = arith.constant 0 : i32
    %c0_i32_0 = arith.constant 0 : i32
    %c0_i32_1 = arith.constant 0 : i32
    return %c0_i32, %c0_i32_0 : i32, i32
  }
  func.func @transform_3(%arg0: i32) -> (i32, i32) {
    %c0_i32 = arith.constant 0 : i32
    %c0_i32_0 = arith.constant 0 : i32
    %c0_i32_1 = arith.constant 0 : i32
    return %c0_i32, %c0_i32_0 : i32, i32
  }
  func.func @transform_4(%arg0: i32) -> (i32, i32, i32) {
    %c0_i32 = arith.constant 0 : i32
    %c0_i32_0 = arith.constant 0 : i32
    %c0_i32_1 = arith.constant 0 : i32
    return %arg0, %c0_i32, %c0_i32_0 : i32, i32, i32
  }
}

module attributes {stable_mosaic.version = 11 : i64} {
  func.func @_conv_gn_act_kernel(%arg0: i32, %arg1: memref<8x48xbf16, #tpu.memory_space<vmem>>, %arg2: memref<1x48x128xbf16, #tpu.memory_space<vmem>>, %arg3: memref<8x1xf32, #tpu.memory_space<vmem>>, %arg4: memref<8x1xf32, #tpu.memory_space<vmem>>, %arg5: memref<8x1xf32, #tpu.memory_space<vmem>>, %arg6: memref<1x1xf32, #tpu.memory_space<vmem>>, %arg7: memref<1x8x128xbf16, #tpu.memory_space<vmem>>) attributes {dimension_semantics = [#tpu.dimension_semantics<parallel>], iteration_bounds = array<i64: 2>, scalar_prefetch = 0 : i64, scratch_operands = 0 : i64, tpu.core_type = #tpu.core_type<tc>, window_params = [{pipeline_mode = #tpu.pipeline_mode<synchronous>, transform_indices = @transform_0, window_bounds = array<i64: 8, 48>}, {transform_indices = @transform_1, window_bounds = array<i64: 1, 48, 128>}, {pipeline_mode = #tpu.pipeline_mode<synchronous>, transform_indices = @transform_2, window_bounds = array<i64: 8, 1>}, {pipeline_mode = #tpu.pipeline_mode<synchronous>, transform_indices = @transform_3, window_bounds = array<i64: 8, 1>}, {pipeline_mode = #tpu.pipeline_mode<synchronous>, transform_indices = @transform_4, window_bounds = array<i64: 8, 1>}, {pipeline_mode = #tpu.pipeline_mode<synchronous>, transform_indices = @transform_5, window_bounds = array<i64: 1, 1>}, {transform_indices = @transform_6, window_bounds = array<i64: 1, 8, 128>}]} {
    %c0 = arith.constant 0 : index
    %c0_0 = arith.constant 0 : index
    %0 = vector.load %arg1[%c0, %c0_0] : memref<8x48xbf16, #tpu.memory_space<vmem>>, vector<8x48xbf16>
    %c0_1 = arith.constant 0 : index
    %c0_2 = arith.constant 0 : index
    %c0_3 = arith.constant 0 : index
    %1 = vector.load %arg2[%c0_1, %c0_2, %c0_3] : memref<1x48x128xbf16, #tpu.memory_space<vmem>>, vector<1x48x128xbf16>
    %2 = vector.shape_cast %1 : vector<1x48x128xbf16> to vector<48x128xbf16>
    %cst = arith.constant dense<0.000000e+00> : vector<8x128xf32>
    %3 = tpu.matmul %0, %2, %cst {dimension_numbers = #tpu.dot_dimension_numbers<[1], [0], [0], [1], [0, 0, 1, 1], [], []>} : vector<8x48xbf16>, vector<48x128xbf16>, vector<8x128xf32> -> vector<8x128xf32>
    %c0_4 = arith.constant 0 : index
    %c0_5 = arith.constant 0 : index
    %4 = vector.load %arg3[%c0_4, %c0_5] : memref<8x1xf32, #tpu.memory_space<vmem>>, vector<8x1xf32>
    %5 = vector.broadcast %4 : vector<8x1xf32> to vector<8x128xf32>
    %6 = arith.addf %3, %5 : vector<8x128xf32>
    %7 = vector.shape_cast %6 : vector<8x128xf32> to vector<1x8x128xf32>
    %cst_6 = arith.constant dense<0.000000e+00> : vector<1xf32>
    %8 = vector.multi_reduction <add>, %7, %cst_6 [1, 2] : vector<1x8x128xf32> to vector<1xf32>
    %9 = vector.shape_cast %8 : vector<1xf32> to vector<1x1x1xf32>
    %10 = vector.extract %9[0, 0, 0] : f32 from vector<1x1x1xf32>
    %cst_7 = arith.constant 1.024000e+03 : f32
    %11 = arith.divf %10, %cst_7 : f32
    %12 = vector.broadcast %11 : f32 to vector<8x128xf32>
    %13 = arith.subf %6, %12 : vector<8x128xf32>
    %14 = vector.broadcast %11 : f32 to vector<8x128xf32>
    %15 = arith.subf %6, %14 : vector<8x128xf32>
    %16 = arith.mulf %13, %15 : vector<8x128xf32>
    %17 = vector.shape_cast %16 : vector<8x128xf32> to vector<1x8x128xf32>
    %cst_8 = arith.constant dense<0.000000e+00> : vector<1xf32>
    %18 = vector.multi_reduction <add>, %17, %cst_8 [1, 2] : vector<1x8x128xf32> to vector<1xf32>
    %19 = vector.shape_cast %18 : vector<1xf32> to vector<1x1x1xf32>
    %20 = vector.extract %19[0, 0, 0] : f32 from vector<1x1x1xf32>
    %cst_9 = arith.constant 1.024000e+03 : f32
    %21 = arith.divf %20, %cst_9 : f32
    %22 = vector.broadcast %11 : f32 to vector<8x128xf32>
    %23 = arith.subf %6, %22 : vector<8x128xf32>
    %cst_10 = arith.constant 9.99999993E-9 : f32
    %24 = arith.addf %21, %cst_10 : f32
    %25 = math.rsqrt %24 : f32
    %26 = vector.broadcast %25 : f32 to vector<8x128xf32>
    %27 = arith.mulf %23, %26 : vector<8x128xf32>
    %c0_11 = arith.constant 0 : index
    %c0_12 = arith.constant 0 : index
    %28 = vector.load %arg4[%c0_11, %c0_12] : memref<8x1xf32, #tpu.memory_space<vmem>>, vector<8x1xf32>
    %29 = vector.broadcast %28 : vector<8x1xf32> to vector<8x128xf32>
    %30 = arith.mulf %27, %29 : vector<8x128xf32>
    %c0_13 = arith.constant 0 : index
    %c0_14 = arith.constant 0 : index
    %31 = vector.load %arg5[%c0_13, %c0_14] : memref<8x1xf32, #tpu.memory_space<vmem>>, vector<8x1xf32>
    %32 = vector.broadcast %31 : vector<8x1xf32> to vector<8x128xf32>
    %33 = arith.addf %30, %32 : vector<8x128xf32>
    %c0_15 = arith.constant 0 : index
    %c0_16 = arith.constant 0 : index
    %34 = vector.load %arg6[%c0_15, %c0_16] : memref<1x1xf32, #tpu.memory_space<vmem>>, vector<1x1xf32>
    %cst_17 = arith.constant 0.000000e+00 : f32
    %35 = vector.broadcast %cst_17 : f32 to vector<8x128xf32>
    %36 = arith.maximumf %33, %35 : vector<8x128xf32>
    %cst_18 = arith.constant 0.000000e+00 : f32
    %37 = vector.broadcast %cst_18 : f32 to vector<8x128xf32>
    %38 = arith.minimumf %33, %37 : vector<8x128xf32>
    %39 = vector.broadcast %34 : vector<1x1xf32> to vector<8x128xf32>
    %40 = arith.mulf %39, %38 : vector<8x128xf32>
    %41 = arith.addf %36, %40 : vector<8x128xf32>
    %42 = arith.truncf %41 : vector<8x128xf32> to vector<8x128xbf16>
    %c0_19 = arith.constant 0 : index
    %c0_20 = arith.constant 0 : index
    %c0_21 = arith.constant 0 : index
    %43 = vector.load %arg7[%c0_19, %c0_20, %c0_21] : memref<1x8x128xbf16, #tpu.memory_space<vmem>>, vector<1x8x128xbf16>
    %44 = vector.shape_cast %43 : vector<1x8x128xbf16> to vector<8x128xbf16>
    %45 = vector.shape_cast %42 : vector<8x128xbf16> to vector<1x8x128xbf16>
    tpu.vector_store %arg7[%c0_19, %c0_20, %c0_21], %45 {strides = array<i32>} : memref<1x8x128xbf16, #tpu.memory_space<vmem>>, vector<1x8x128xbf16>,
    return
  }
  func.func @transform_0(%arg0: i32) -> (i32, i32) {
    %c0_i32 = arith.constant 0 : i32
    %c0_i32_0 = arith.constant 0 : i32
    %c0_i32_1 = arith.constant 0 : i32
    return %c0_i32, %c0_i32_0 : i32, i32
  }
  func.func @transform_1(%arg0: i32) -> (i32, i32, i32) {
    %c0_i32 = arith.constant 0 : i32
    %c0_i32_0 = arith.constant 0 : i32
    %c0_i32_1 = arith.constant 0 : i32
    return %arg0, %c0_i32, %c0_i32_0 : i32, i32, i32
  }
  func.func @transform_2(%arg0: i32) -> (i32, i32) {
    %c0_i32 = arith.constant 0 : i32
    %c0_i32_0 = arith.constant 0 : i32
    %c0_i32_1 = arith.constant 0 : i32
    return %c0_i32, %c0_i32_0 : i32, i32
  }
  func.func @transform_3(%arg0: i32) -> (i32, i32) {
    %c0_i32 = arith.constant 0 : i32
    %c0_i32_0 = arith.constant 0 : i32
    %c0_i32_1 = arith.constant 0 : i32
    return %c0_i32, %c0_i32_0 : i32, i32
  }
  func.func @transform_4(%arg0: i32) -> (i32, i32) {
    %c0_i32 = arith.constant 0 : i32
    %c0_i32_0 = arith.constant 0 : i32
    %c0_i32_1 = arith.constant 0 : i32
    return %c0_i32, %c0_i32_0 : i32, i32
  }
  func.func @transform_5(%arg0: i32) -> (i32, i32) {
    %c0_i32 = arith.constant 0 : i32
    %c0_i32_0 = arith.constant 0 : i32
    %c0_i32_1 = arith.constant 0 : i32
    return %c0_i32, %c0_i32_0 : i32, i32
  }
  func.func @transform_6(%arg0: i32) -> (i32, i32, i32) {
    %c0_i32 = arith.constant 0 : i32
    %c0_i32_0 = arith.constant 0 : i32
    %c0_i32_1 = arith.constant 0 : i32
    return %arg0, %c0_i32, %c0_i32_0 : i32, i32, i32
  }
}

module attributes {stable_mosaic.version = 11 : i64} {
  func.func @_conv_act_kernel(%arg0: i32, %arg1: memref<8x16xbf16, #tpu.memory_space<vmem>>, %arg2: memref<1x16x128xbf16, #tpu.memory_space<vmem>>, %arg3: memref<8x1xf32, #tpu.memory_space<vmem>>, %arg4: memref<1x1xf32, #tpu.memory_space<vmem>>, %arg5: memref<1x8x128xbf16, #tpu.memory_space<vmem>>) attributes {dimension_semantics = [#tpu.dimension_semantics<parallel>], iteration_bounds = array<i64: 2>, scalar_prefetch = 0 : i64, scratch_operands = 0 : i64, tpu.core_type = #tpu.core_type<tc>, window_params = [{pipeline_mode = #tpu.pipeline_mode<synchronous>, transform_indices = @transform_0, window_bounds = array<i64: 8, 16>}, {transform_indices = @transform_1, window_bounds = array<i64: 1, 16, 128>}, {pipeline_mode = #tpu.pipeline_mode<synchronous>, transform_indices = @transform_2, window_bounds = array<i64: 8, 1>}, {pipeline_mode = #tpu.pipeline_mode<synchronous>, transform_indices = @transform_3, window_bounds = array<i64: 1, 1>}, {transform_indices = @transform_4, window_bounds = array<i64: 1, 8, 128>}]} {
    %c0 = arith.constant 0 : index
    %c0_0 = arith.constant 0 : index
    %0 = vector.load %arg1[%c0, %c0_0] : memref<8x16xbf16, #tpu.memory_space<vmem>>, vector<8x16xbf16>
    %c0_1 = arith.constant 0 : index
    %c0_2 = arith.constant 0 : index
    %c0_3 = arith.constant 0 : index
    %1 = vector.load %arg2[%c0_1, %c0_2, %c0_3] : memref<1x16x128xbf16, #tpu.memory_space<vmem>>, vector<1x16x128xbf16>
    %2 = vector.shape_cast %1 : vector<1x16x128xbf16> to vector<16x128xbf16>
    %cst = arith.constant dense<0.000000e+00> : vector<8x128xf32>
    %3 = tpu.matmul %0, %2, %cst {dimension_numbers = #tpu.dot_dimension_numbers<[1], [0], [0], [1], [0, 0, 1, 1], [], []>} : vector<8x16xbf16>, vector<16x128xbf16>, vector<8x128xf32> -> vector<8x128xf32>
    %c0_4 = arith.constant 0 : index
    %c0_5 = arith.constant 0 : index
    %4 = vector.load %arg3[%c0_4, %c0_5] : memref<8x1xf32, #tpu.memory_space<vmem>>, vector<8x1xf32>
    %5 = vector.broadcast %4 : vector<8x1xf32> to vector<8x128xf32>
    %6 = arith.addf %3, %5 : vector<8x128xf32>
    %c0_6 = arith.constant 0 : index
    %c0_7 = arith.constant 0 : index
    %7 = vector.load %arg4[%c0_6, %c0_7] : memref<1x1xf32, #tpu.memory_space<vmem>>, vector<1x1xf32>
    %cst_8 = arith.constant 0.000000e+00 : f32
    %8 = vector.broadcast %cst_8 : f32 to vector<8x128xf32>
    %9 = arith.maximumf %6, %8 : vector<8x128xf32>
    %cst_9 = arith.constant 0.000000e+00 : f32
    %10 = vector.broadcast %cst_9 : f32 to vector<8x128xf32>
    %11 = arith.minimumf %6, %10 : vector<8x128xf32>
    %12 = vector.broadcast %7 : vector<1x1xf32> to vector<8x128xf32>
    %13 = arith.mulf %12, %11 : vector<8x128xf32>
    %14 = arith.addf %9, %13 : vector<8x128xf32>
    %15 = arith.truncf %14 : vector<8x128xf32> to vector<8x128xbf16>
    %c0_10 = arith.constant 0 : index
    %c0_11 = arith.constant 0 : index
    %c0_12 = arith.constant 0 : index
    %16 = vector.load %arg5[%c0_10, %c0_11, %c0_12] : memref<1x8x128xbf16, #tpu.memory_space<vmem>>, vector<1x8x128xbf16>
    %17 = vector.shape_cast %16 : vector<1x8x128xbf16> to vector<8x128xbf16>
    %18 = vector.shape_cast %15 : vector<8x128xbf16> to vector<1x8x128xbf16>
    tpu.vector_store %arg5[%c0_10, %c0_11, %c0_12], %18 {strides = array<i32>} : memref<1x8x128xbf16, #tpu.memory_space<vmem>>, vector<1x8x128xbf16>,
    return
  }
  func.func @transform_0(%arg0: i32) -> (i32, i32) {
    %c0_i32 = arith.constant 0 : i32
    %c0_i32_0 = arith.constant 0 : i32
    %c0_i32_1 = arith.constant 0 : i32
    return %c0_i32, %c0_i32_0 : i32, i32
  }
  func.func @transform_1(%arg0: i32) -> (i32, i32, i32) {
    %c0_i32 = arith.constant 0 : i32
    %c0_i32_0 = arith.constant 0 : i32
    %c0_i32_1 = arith.constant 0 : i32
    return %arg0, %c0_i32, %c0_i32_0 : i32, i32, i32
  }
  func.func @transform_2(%arg0: i32) -> (i32, i32) {
    %c0_i32 = arith.constant 0 : i32
    %c0_i32_0 = arith.constant 0 : i32
    %c0_i32_1 = arith.constant 0 : i32
    return %c0_i32, %c0_i32_0 : i32, i32
  }
  func.func @transform_3(%arg0: i32) -> (i32, i32) {
    %c0_i32 = arith.constant 0 : i32
    %c0_i32_0 = arith.constant 0 : i32
    %c0_i32_1 = arith.constant 0 : i32
    return %c0_i32, %c0_i32_0 : i32, i32
  }
  func.func @transform_4(%arg0: i32) -> (i32, i32, i32) {
    %c0_i32 = arith.constant 0 : i32
    %c0_i32_0 = arith.constant 0 : i32
    %c0_i32_1 = arith.constant 0 : i32
    return %arg0, %c0_i32, %c0_i32_0 : i32, i32, i32
  }
}

module attributes {stable_mosaic.version = 11 : i64} {
  func.func @_conv_gn_act_kernel(%arg0: i32, %arg1: memref<8x48xbf16, #tpu.memory_space<vmem>>, %arg2: memref<1x48x64xbf16, #tpu.memory_space<vmem>>, %arg3: memref<8x1xf32, #tpu.memory_space<vmem>>, %arg4: memref<8x1xf32, #tpu.memory_space<vmem>>, %arg5: memref<8x1xf32, #tpu.memory_space<vmem>>, %arg6: memref<1x1xf32, #tpu.memory_space<vmem>>, %arg7: memref<1x8x64xbf16, #tpu.memory_space<vmem>>) attributes {dimension_semantics = [#tpu.dimension_semantics<parallel>], iteration_bounds = array<i64: 2>, scalar_prefetch = 0 : i64, scratch_operands = 0 : i64, tpu.core_type = #tpu.core_type<tc>, window_params = [{pipeline_mode = #tpu.pipeline_mode<synchronous>, transform_indices = @transform_0, window_bounds = array<i64: 8, 48>}, {transform_indices = @transform_1, window_bounds = array<i64: 1, 48, 64>}, {pipeline_mode = #tpu.pipeline_mode<synchronous>, transform_indices = @transform_2, window_bounds = array<i64: 8, 1>}, {pipeline_mode = #tpu.pipeline_mode<synchronous>, transform_indices = @transform_3, window_bounds = array<i64: 8, 1>}, {pipeline_mode = #tpu.pipeline_mode<synchronous>, transform_indices = @transform_4, window_bounds = array<i64: 8, 1>}, {pipeline_mode = #tpu.pipeline_mode<synchronous>, transform_indices = @transform_5, window_bounds = array<i64: 1, 1>}, {transform_indices = @transform_6, window_bounds = array<i64: 1, 8, 64>}]} {
    %c0 = arith.constant 0 : index
    %c0_0 = arith.constant 0 : index
    %0 = vector.load %arg1[%c0, %c0_0] : memref<8x48xbf16, #tpu.memory_space<vmem>>, vector<8x48xbf16>
    %c0_1 = arith.constant 0 : index
    %c0_2 = arith.constant 0 : index
    %c0_3 = arith.constant 0 : index
    %1 = vector.load %arg2[%c0_1, %c0_2, %c0_3] : memref<1x48x64xbf16, #tpu.memory_space<vmem>>, vector<1x48x64xbf16>
    %2 = vector.shape_cast %1 : vector<1x48x64xbf16> to vector<48x64xbf16>
    %cst = arith.constant dense<0.000000e+00> : vector<8x64xf32>
    %3 = tpu.matmul %0, %2, %cst {dimension_numbers = #tpu.dot_dimension_numbers<[1], [0], [0], [1], [0, 0, 1, 1], [], []>} : vector<8x48xbf16>, vector<48x64xbf16>, vector<8x64xf32> -> vector<8x64xf32>
    %c0_4 = arith.constant 0 : index
    %c0_5 = arith.constant 0 : index
    %4 = vector.load %arg3[%c0_4, %c0_5] : memref<8x1xf32, #tpu.memory_space<vmem>>, vector<8x1xf32>
    %5 = vector.broadcast %4 : vector<8x1xf32> to vector<8x64xf32>
    %6 = arith.addf %3, %5 : vector<8x64xf32>
    %7 = vector.shape_cast %6 : vector<8x64xf32> to vector<1x8x64xf32>
    %cst_6 = arith.constant dense<0.000000e+00> : vector<1xf32>
    %8 = vector.multi_reduction <add>, %7, %cst_6 [1, 2] : vector<1x8x64xf32> to vector<1xf32>
    %9 = vector.shape_cast %8 : vector<1xf32> to vector<1x1x1xf32>
    %10 = vector.extract %9[0, 0, 0] : f32 from vector<1x1x1xf32>
    %cst_7 = arith.constant 5.120000e+02 : f32
    %11 = arith.divf %10, %cst_7 : f32
    %12 = vector.broadcast %11 : f32 to vector<8x64xf32>
    %13 = arith.subf %6, %12 : vector<8x64xf32>
    %14 = vector.broadcast %11 : f32 to vector<8x64xf32>
    %15 = arith.subf %6, %14 : vector<8x64xf32>
    %16 = arith.mulf %13, %15 : vector<8x64xf32>
    %17 = vector.shape_cast %16 : vector<8x64xf32> to vector<1x8x64xf32>
    %cst_8 = arith.constant dense<0.000000e+00> : vector<1xf32>
    %18 = vector.multi_reduction <add>, %17, %cst_8 [1, 2] : vector<1x8x64xf32> to vector<1xf32>
    %19 = vector.shape_cast %18 : vector<1xf32> to vector<1x1x1xf32>
    %20 = vector.extract %19[0, 0, 0] : f32 from vector<1x1x1xf32>
    %cst_9 = arith.constant 5.120000e+02 : f32
    %21 = arith.divf %20, %cst_9 : f32
    %22 = vector.broadcast %11 : f32 to vector<8x64xf32>
    %23 = arith.subf %6, %22 : vector<8x64xf32>
    %cst_10 = arith.constant 9.99999993E-9 : f32
    %24 = arith.addf %21, %cst_10 : f32
    %25 = math.rsqrt %24 : f32
    %26 = vector.broadcast %25 : f32 to vector<8x64xf32>
    %27 = arith.mulf %23, %26 : vector<8x64xf32>
    %c0_11 = arith.constant 0 : index
    %c0_12 = arith.constant 0 : index
    %28 = vector.load %arg4[%c0_11, %c0_12] : memref<8x1xf32, #tpu.memory_space<vmem>>, vector<8x1xf32>
    %29 = vector.broadcast %28 : vector<8x1xf32> to vector<8x64xf32>
    %30 = arith.mulf %27, %29 : vector<8x64xf32>
    %c0_13 = arith.constant 0 : index
    %c0_14 = arith.constant 0 : index
    %31 = vector.load %arg5[%c0_13, %c0_14] : memref<8x1xf32, #tpu.memory_space<vmem>>, vector<8x1xf32>
    %32 = vector.broadcast %31 : vector<8x1xf32> to vector<8x64xf32>
    %33 = arith.addf %30, %32 : vector<8x64xf32>
    %c0_15 = arith.constant 0 : index
    %c0_16 = arith.constant 0 : index
    %34 = vector.load %arg6[%c0_15, %c0_16] : memref<1x1xf32, #tpu.memory_space<vmem>>, vector<1x1xf32>
    %cst_17 = arith.constant 0.000000e+00 : f32
    %35 = vector.broadcast %cst_17 : f32 to vector<8x64xf32>
    %36 = arith.maximumf %33, %35 : vector<8x64xf32>
    %cst_18 = arith.constant 0.000000e+00 : f32
    %37 = vector.broadcast %cst_18 : f32 to vector<8x64xf32>
    %38 = arith.minimumf %33, %37 : vector<8x64xf32>
    %39 = vector.broadcast %34 : vector<1x1xf32> to vector<8x64xf32>
    %40 = arith.mulf %39, %38 : vector<8x64xf32>
    %41 = arith.addf %36, %40 : vector<8x64xf32>
    %42 = arith.truncf %41 : vector<8x64xf32> to vector<8x64xbf16>
    %c0_19 = arith.constant 0 : index
    %c0_20 = arith.constant 0 : index
    %c0_21 = arith.constant 0 : index
    %43 = vector.load %arg7[%c0_19, %c0_20, %c0_21] : memref<1x8x64xbf16, #tpu.memory_space<vmem>>, vector<1x8x64xbf16>
    %44 = vector.shape_cast %43 : vector<1x8x64xbf16> to vector<8x64xbf16>
    %45 = vector.shape_cast %42 : vector<8x64xbf16> to vector<1x8x64xbf16>
    tpu.vector_store %arg7[%c0_19, %c0_20, %c0_21], %45 {strides = array<i32>} : memref<1x8x64xbf16, #tpu.memory_space<vmem>>, vector<1x8x64xbf16>,
    return
  }
  func.func @transform_0(%arg0: i32) -> (i32, i32) {
    %c0_i32 = arith.constant 0 : i32
    %c0_i32_0 = arith.constant 0 : i32
    %c0_i32_1 = arith.constant 0 : i32
    return %c0_i32, %c0_i32_0 : i32, i32
  }
  func.func @transform_1(%arg0: i32) -> (i32, i32, i32) {
    %c0_i32 = arith.constant 0 : i32
    %c0_i32_0 = arith.constant 0 : i32
    %c0_i32_1 = arith.constant 0 : i32
    return %arg0, %c0_i32, %c0_i32_0 : i32, i32, i32
  }
  func.func @transform_2(%arg0: i32) -> (i32, i32) {
    %c0_i32 = arith.constant 0 : i32
    %c0_i32_0 = arith.constant 0 : i32
    %c0_i32_1 = arith.constant 0 : i32
    return %c0_i32, %c0_i32_0 : i32, i32
  }
  func.func @transform_3(%arg0: i32) -> (i32, i32) {
    %c0_i32 = arith.constant 0 : i32
    %c0_i32_0 = arith.constant 0 : i32
    %c0_i32_1 = arith.constant 0 : i32
    return %c0_i32, %c0_i32_0 : i32, i32
  }
  func.func @transform_4(%arg0: i32) -> (i32, i32) {
    %c0_i32 = arith.constant 0 : i32
    %c0_i32_0 = arith.constant 0 : i32
    %c0_i32_1 = arith.constant 0 : i32
    return %c0_i32, %c0_i32_0 : i32, i32
  }
  func.func @transform_5(%arg0: i32) -> (i32, i32) {
    %c0_i32 = arith.constant 0 : i32
    %c0_i32_0 = arith.constant 0 : i32
    %c0_i32_1 = arith.constant 0 : i32
    return %c0_i32, %c0_i32_0 : i32, i32
  }
  func.func @transform_6(%arg0: i32) -> (i32, i32, i32) {
    %c0_i32 = arith.constant 0 : i32
    %c0_i32_0 = arith.constant 0 : i32
    %c0_i32_1 = arith.constant 0 : i32
    return %arg0, %c0_i32, %c0_i32_0 : i32, i32, i32
  }
}

module attributes {stable_mosaic.version = 11 : i64} {
  func.func @_conv_act_kernel(%arg0: i32, %arg1: memref<8x16xbf16, #tpu.memory_space<vmem>>, %arg2: memref<1x16x64xbf16, #tpu.memory_space<vmem>>, %arg3: memref<8x1xf32, #tpu.memory_space<vmem>>, %arg4: memref<1x1xf32, #tpu.memory_space<vmem>>, %arg5: memref<1x8x64xbf16, #tpu.memory_space<vmem>>) attributes {dimension_semantics = [#tpu.dimension_semantics<parallel>], iteration_bounds = array<i64: 2>, scalar_prefetch = 0 : i64, scratch_operands = 0 : i64, tpu.core_type = #tpu.core_type<tc>, window_params = [{pipeline_mode = #tpu.pipeline_mode<synchronous>, transform_indices = @transform_0, window_bounds = array<i64: 8, 16>}, {transform_indices = @transform_1, window_bounds = array<i64: 1, 16, 64>}, {pipeline_mode = #tpu.pipeline_mode<synchronous>, transform_indices = @transform_2, window_bounds = array<i64: 8, 1>}, {pipeline_mode = #tpu.pipeline_mode<synchronous>, transform_indices = @transform_3, window_bounds = array<i64: 1, 1>}, {transform_indices = @transform_4, window_bounds = array<i64: 1, 8, 64>}]} {
    %c0 = arith.constant 0 : index
    %c0_0 = arith.constant 0 : index
    %0 = vector.load %arg1[%c0, %c0_0] : memref<8x16xbf16, #tpu.memory_space<vmem>>, vector<8x16xbf16>
    %c0_1 = arith.constant 0 : index
    %c0_2 = arith.constant 0 : index
    %c0_3 = arith.constant 0 : index
    %1 = vector.load %arg2[%c0_1, %c0_2, %c0_3] : memref<1x16x64xbf16, #tpu.memory_space<vmem>>, vector<1x16x64xbf16>
    %2 = vector.shape_cast %1 : vector<1x16x64xbf16> to vector<16x64xbf16>
    %cst = arith.constant dense<0.000000e+00> : vector<8x64xf32>
    %3 = tpu.matmul %0, %2, %cst {dimension_numbers = #tpu.dot_dimension_numbers<[1], [0], [0], [1], [0, 0, 1, 1], [], []>} : vector<8x16xbf16>, vector<16x64xbf16>, vector<8x64xf32> -> vector<8x64xf32>
    %c0_4 = arith.constant 0 : index
    %c0_5 = arith.constant 0 : index
    %4 = vector.load %arg3[%c0_4, %c0_5] : memref<8x1xf32, #tpu.memory_space<vmem>>, vector<8x1xf32>
    %5 = vector.broadcast %4 : vector<8x1xf32> to vector<8x64xf32>
    %6 = arith.addf %3, %5 : vector<8x64xf32>
    %c0_6 = arith.constant 0 : index
    %c0_7 = arith.constant 0 : index
    %7 = vector.load %arg4[%c0_6, %c0_7] : memref<1x1xf32, #tpu.memory_space<vmem>>, vector<1x1xf32>
    %cst_8 = arith.constant 0.000000e+00 : f32
    %8 = vector.broadcast %cst_8 : f32 to vector<8x64xf32>
    %9 = arith.maximumf %6, %8 : vector<8x64xf32>
    %cst_9 = arith.constant 0.000000e+00 : f32
    %10 = vector.broadcast %cst_9 : f32 to vector<8x64xf32>
    %11 = arith.minimumf %6, %10 : vector<8x64xf32>
    %12 = vector.broadcast %7 : vector<1x1xf32> to vector<8x64xf32>
    %13 = arith.mulf %12, %11 : vector<8x64xf32>
    %14 = arith.addf %9, %13 : vector<8x64xf32>
    %15 = arith.truncf %14 : vector<8x64xf32> to vector<8x64xbf16>
    %c0_10 = arith.constant 0 : index
    %c0_11 = arith.constant 0 : index
    %c0_12 = arith.constant 0 : index
    %16 = vector.load %arg5[%c0_10, %c0_11, %c0_12] : memref<1x8x64xbf16, #tpu.memory_space<vmem>>, vector<1x8x64xbf16>
    %17 = vector.shape_cast %16 : vector<1x8x64xbf16> to vector<8x64xbf16>
    %18 = vector.shape_cast %15 : vector<8x64xbf16> to vector<1x8x64xbf16>
    tpu.vector_store %arg5[%c0_10, %c0_11, %c0_12], %18 {strides = array<i32>} : memref<1x8x64xbf16, #tpu.memory_space<vmem>>, vector<1x8x64xbf16>,
    return
  }
  func.func @transform_0(%arg0: i32) -> (i32, i32) {
    %c0_i32 = arith.constant 0 : i32
    %c0_i32_0 = arith.constant 0 : i32
    %c0_i32_1 = arith.constant 0 : i32
    return %c0_i32, %c0_i32_0 : i32, i32
  }
  func.func @transform_1(%arg0: i32) -> (i32, i32, i32) {
    %c0_i32 = arith.constant 0 : i32
    %c0_i32_0 = arith.constant 0 : i32
    %c0_i32_1 = arith.constant 0 : i32
    return %arg0, %c0_i32, %c0_i32_0 : i32, i32, i32
  }
  func.func @transform_2(%arg0: i32) -> (i32, i32) {
    %c0_i32 = arith.constant 0 : i32
    %c0_i32_0 = arith.constant 0 : i32
    %c0_i32_1 = arith.constant 0 : i32
    return %c0_i32, %c0_i32_0 : i32, i32
  }
  func.func @transform_3(%arg0: i32) -> (i32, i32) {
    %c0_i32 = arith.constant 0 : i32
    %c0_i32_0 = arith.constant 0 : i32
    %c0_i32_1 = arith.constant 0 : i32
    return %c0_i32, %c0_i32_0 : i32, i32
  }
  func.func @transform_4(%arg0: i32) -> (i32, i32, i32) {
    %c0_i32 = arith.constant 0 : i32
    %c0_i32_0 = arith.constant 0 : i32
    %c0_i32_1 = arith.constant 0 : i32
    return %arg0, %c0_i32, %c0_i32_0 : i32, i32, i32
  }
}

module attributes {stable_mosaic.version = 11 : i64} {
  func.func @_conv_gn_act_kernel(%arg0: i32, %arg1: memref<8x48xbf16, #tpu.memory_space<vmem>>, %arg2: memref<1x48x32xbf16, #tpu.memory_space<vmem>>, %arg3: memref<8x1xf32, #tpu.memory_space<vmem>>, %arg4: memref<8x1xf32, #tpu.memory_space<vmem>>, %arg5: memref<8x1xf32, #tpu.memory_space<vmem>>, %arg6: memref<1x1xf32, #tpu.memory_space<vmem>>, %arg7: memref<1x8x32xbf16, #tpu.memory_space<vmem>>) attributes {dimension_semantics = [#tpu.dimension_semantics<parallel>], iteration_bounds = array<i64: 2>, scalar_prefetch = 0 : i64, scratch_operands = 0 : i64, tpu.core_type = #tpu.core_type<tc>, window_params = [{pipeline_mode = #tpu.pipeline_mode<synchronous>, transform_indices = @transform_0, window_bounds = array<i64: 8, 48>}, {transform_indices = @transform_1, window_bounds = array<i64: 1, 48, 32>}, {pipeline_mode = #tpu.pipeline_mode<synchronous>, transform_indices = @transform_2, window_bounds = array<i64: 8, 1>}, {pipeline_mode = #tpu.pipeline_mode<synchronous>, transform_indices = @transform_3, window_bounds = array<i64: 8, 1>}, {pipeline_mode = #tpu.pipeline_mode<synchronous>, transform_indices = @transform_4, window_bounds = array<i64: 8, 1>}, {pipeline_mode = #tpu.pipeline_mode<synchronous>, transform_indices = @transform_5, window_bounds = array<i64: 1, 1>}, {transform_indices = @transform_6, window_bounds = array<i64: 1, 8, 32>}]} {
    %c0 = arith.constant 0 : index
    %c0_0 = arith.constant 0 : index
    %0 = vector.load %arg1[%c0, %c0_0] : memref<8x48xbf16, #tpu.memory_space<vmem>>, vector<8x48xbf16>
    %c0_1 = arith.constant 0 : index
    %c0_2 = arith.constant 0 : index
    %c0_3 = arith.constant 0 : index
    %1 = vector.load %arg2[%c0_1, %c0_2, %c0_3] : memref<1x48x32xbf16, #tpu.memory_space<vmem>>, vector<1x48x32xbf16>
    %2 = vector.shape_cast %1 : vector<1x48x32xbf16> to vector<48x32xbf16>
    %cst = arith.constant dense<0.000000e+00> : vector<8x32xf32>
    %3 = tpu.matmul %0, %2, %cst {dimension_numbers = #tpu.dot_dimension_numbers<[1], [0], [0], [1], [0, 0, 1, 1], [], []>} : vector<8x48xbf16>, vector<48x32xbf16>, vector<8x32xf32> -> vector<8x32xf32>
    %c0_4 = arith.constant 0 : index
    %c0_5 = arith.constant 0 : index
    %4 = vector.load %arg3[%c0_4, %c0_5] : memref<8x1xf32, #tpu.memory_space<vmem>>, vector<8x1xf32>
    %5 = vector.broadcast %4 : vector<8x1xf32> to vector<8x32xf32>
    %6 = arith.addf %3, %5 : vector<8x32xf32>
    %7 = vector.shape_cast %6 : vector<8x32xf32> to vector<1x8x32xf32>
    %cst_6 = arith.constant dense<0.000000e+00> : vector<1xf32>
    %8 = vector.multi_reduction <add>, %7, %cst_6 [1, 2] : vector<1x8x32xf32> to vector<1xf32>
    %9 = vector.shape_cast %8 : vector<1xf32> to vector<1x1x1xf32>
    %10 = vector.extract %9[0, 0, 0] : f32 from vector<1x1x1xf32>
    %cst_7 = arith.constant 2.560000e+02 : f32
    %11 = arith.divf %10, %cst_7 : f32
    %12 = vector.broadcast %11 : f32 to vector<8x32xf32>
    %13 = arith.subf %6, %12 : vector<8x32xf32>
    %14 = vector.broadcast %11 : f32 to vector<8x32xf32>
    %15 = arith.subf %6, %14 : vector<8x32xf32>
    %16 = arith.mulf %13, %15 : vector<8x32xf32>
    %17 = vector.shape_cast %16 : vector<8x32xf32> to vector<1x8x32xf32>
    %cst_8 = arith.constant dense<0.000000e+00> : vector<1xf32>
    %18 = vector.multi_reduction <add>, %17, %cst_8 [1, 2] : vector<1x8x32xf32> to vector<1xf32>
    %19 = vector.shape_cast %18 : vector<1xf32> to vector<1x1x1xf32>
    %20 = vector.extract %19[0, 0, 0] : f32 from vector<1x1x1xf32>
    %cst_9 = arith.constant 2.560000e+02 : f32
    %21 = arith.divf %20, %cst_9 : f32
    %22 = vector.broadcast %11 : f32 to vector<8x32xf32>
    %23 = arith.subf %6, %22 : vector<8x32xf32>
    %cst_10 = arith.constant 9.99999993E-9 : f32
    %24 = arith.addf %21, %cst_10 : f32
    %25 = math.rsqrt %24 : f32
    %26 = vector.broadcast %25 : f32 to vector<8x32xf32>
    %27 = arith.mulf %23, %26 : vector<8x32xf32>
    %c0_11 = arith.constant 0 : index
    %c0_12 = arith.constant 0 : index
    %28 = vector.load %arg4[%c0_11, %c0_12] : memref<8x1xf32, #tpu.memory_space<vmem>>, vector<8x1xf32>
    %29 = vector.broadcast %28 : vector<8x1xf32> to vector<8x32xf32>
    %30 = arith.mulf %27, %29 : vector<8x32xf32>
    %c0_13 = arith.constant 0 : index
    %c0_14 = arith.constant 0 : index
    %31 = vector.load %arg5[%c0_13, %c0_14] : memref<8x1xf32, #tpu.memory_space<vmem>>, vector<8x1xf32>
    %32 = vector.broadcast %31 : vector<8x1xf32> to vector<8x32xf32>
    %33 = arith.addf %30, %32 : vector<8x32xf32>
    %c0_15 = arith.constant 0 : index
    %c0_16 = arith.constant 0 : index
    %34 = vector.load %arg6[%c0_15, %c0_16] : memref<1x1xf32, #tpu.memory_space<vmem>>, vector<1x1xf32>
    %cst_17 = arith.constant 0.000000e+00 : f32
    %35 = vector.broadcast %cst_17 : f32 to vector<8x32xf32>
    %36 = arith.maximumf %33, %35 : vector<8x32xf32>
    %cst_18 = arith.constant 0.000000e+00 : f32
    %37 = vector.broadcast %cst_18 : f32 to vector<8x32xf32>
    %38 = arith.minimumf %33, %37 : vector<8x32xf32>
    %39 = vector.broadcast %34 : vector<1x1xf32> to vector<8x32xf32>
    %40 = arith.mulf %39, %38 : vector<8x32xf32>
    %41 = arith.addf %36, %40 : vector<8x32xf32>
    %42 = arith.truncf %41 : vector<8x32xf32> to vector<8x32xbf16>
    %c0_19 = arith.constant 0 : index
    %c0_20 = arith.constant 0 : index
    %c0_21 = arith.constant 0 : index
    %43 = vector.load %arg7[%c0_19, %c0_20, %c0_21] : memref<1x8x32xbf16, #tpu.memory_space<vmem>>, vector<1x8x32xbf16>
    %44 = vector.shape_cast %43 : vector<1x8x32xbf16> to vector<8x32xbf16>
    %45 = vector.shape_cast %42 : vector<8x32xbf16> to vector<1x8x32xbf16>
    tpu.vector_store %arg7[%c0_19, %c0_20, %c0_21], %45 {strides = array<i32>} : memref<1x8x32xbf16, #tpu.memory_space<vmem>>, vector<1x8x32xbf16>,
    return
  }
  func.func @transform_0(%arg0: i32) -> (i32, i32) {
    %c0_i32 = arith.constant 0 : i32
    %c0_i32_0 = arith.constant 0 : i32
    %c0_i32_1 = arith.constant 0 : i32
    return %c0_i32, %c0_i32_0 : i32, i32
  }
  func.func @transform_1(%arg0: i32) -> (i32, i32, i32) {
    %c0_i32 = arith.constant 0 : i32
    %c0_i32_0 = arith.constant 0 : i32
    %c0_i32_1 = arith.constant 0 : i32
    return %arg0, %c0_i32, %c0_i32_0 : i32, i32, i32
  }
  func.func @transform_2(%arg0: i32) -> (i32, i32) {
    %c0_i32 = arith.constant 0 : i32
    %c0_i32_0 = arith.constant 0 : i32
    %c0_i32_1 = arith.constant 0 : i32
    return %c0_i32, %c0_i32_0 : i32, i32
  }
  func.func @transform_3(%arg0: i32) -> (i32, i32) {
    %c0_i32 = arith.constant 0 : i32
    %c0_i32_0 = arith.constant 0 : i32
    %c0_i32_1 = arith.constant 0 : i32
    return %c0_i32, %c0_i32_0 : i32, i32
  }
  func.func @transform_4(%arg0: i32) -> (i32, i32) {
    %c0_i32 = arith.constant 0 : i32
    %c0_i32_0 = arith.constant 0 : i32
    %c0_i32_1 = arith.constant 0 : i32
    return %c0_i32, %c0_i32_0 : i32, i32
  }
  func.func @transform_5(%arg0: i32) -> (i32, i32) {
    %c0_i32 = arith.constant 0 : i32
    %c0_i32_0 = arith.constant 0 : i32
    %c0_i32_1 = arith.constant 0 : i32
    return %c0_i32, %c0_i32_0 : i32, i32
  }
  func.func @transform_6(%arg0: i32) -> (i32, i32, i32) {
    %c0_i32 = arith.constant 0 : i32
    %c0_i32_0 = arith.constant 0 : i32
    %c0_i32_1 = arith.constant 0 : i32
    return %arg0, %c0_i32, %c0_i32_0 : i32, i32, i32
  }
}

module attributes {stable_mosaic.version = 11 : i64} {
  func.func @_conv_act_kernel(%arg0: i32, %arg1: memref<16x24xbf16, #tpu.memory_space<vmem>>, %arg2: memref<1x24x32xbf16, #tpu.memory_space<vmem>>, %arg3: memref<16x1xf32, #tpu.memory_space<vmem>>, %arg4: memref<1x1xf32, #tpu.memory_space<vmem>>, %arg5: memref<1x16x32xbf16, #tpu.memory_space<vmem>>) attributes {dimension_semantics = [#tpu.dimension_semantics<parallel>], iteration_bounds = array<i64: 2>, scalar_prefetch = 0 : i64, scratch_operands = 0 : i64, tpu.core_type = #tpu.core_type<tc>, window_params = [{pipeline_mode = #tpu.pipeline_mode<synchronous>, transform_indices = @transform_0, window_bounds = array<i64: 16, 24>}, {transform_indices = @transform_1, window_bounds = array<i64: 1, 24, 32>}, {pipeline_mode = #tpu.pipeline_mode<synchronous>, transform_indices = @transform_2, window_bounds = array<i64: 16, 1>}, {pipeline_mode = #tpu.pipeline_mode<synchronous>, transform_indices = @transform_3, window_bounds = array<i64: 1, 1>}, {transform_indices = @transform_4, window_bounds = array<i64: 1, 16, 32>}]} {
    %c0 = arith.constant 0 : index
    %c0_0 = arith.constant 0 : index
    %0 = vector.load %arg1[%c0, %c0_0] : memref<16x24xbf16, #tpu.memory_space<vmem>>, vector<16x24xbf16>
    %c0_1 = arith.constant 0 : index
    %c0_2 = arith.constant 0 : index
    %c0_3 = arith.constant 0 : index
    %1 = vector.load %arg2[%c0_1, %c0_2, %c0_3] : memref<1x24x32xbf16, #tpu.memory_space<vmem>>, vector<1x24x32xbf16>
    %2 = vector.shape_cast %1 : vector<1x24x32xbf16> to vector<24x32xbf16>
    %cst = arith.constant dense<0.000000e+00> : vector<16x32xf32>
    %3 = tpu.matmul %0, %2, %cst {dimension_numbers = #tpu.dot_dimension_numbers<[1], [0], [0], [1], [0, 0, 1, 1], [], []>} : vector<16x24xbf16>, vector<24x32xbf16>, vector<16x32xf32> -> vector<16x32xf32>
    %c0_4 = arith.constant 0 : index
    %c0_5 = arith.constant 0 : index
    %4 = vector.load %arg3[%c0_4, %c0_5] : memref<16x1xf32, #tpu.memory_space<vmem>>, vector<16x1xf32>
    %5 = vector.broadcast %4 : vector<16x1xf32> to vector<16x32xf32>
    %6 = arith.addf %3, %5 : vector<16x32xf32>
    %c0_6 = arith.constant 0 : index
    %c0_7 = arith.constant 0 : index
    %7 = vector.load %arg4[%c0_6, %c0_7] : memref<1x1xf32, #tpu.memory_space<vmem>>, vector<1x1xf32>
    %cst_8 = arith.constant 0.000000e+00 : f32
    %8 = vector.broadcast %cst_8 : f32 to vector<16x32xf32>
    %9 = arith.maximumf %6, %8 : vector<16x32xf32>
    %cst_9 = arith.constant 0.000000e+00 : f32
    %10 = vector.broadcast %cst_9 : f32 to vector<16x32xf32>
    %11 = arith.minimumf %6, %10 : vector<16x32xf32>
    %12 = vector.broadcast %7 : vector<1x1xf32> to vector<16x32xf32>
    %13 = arith.mulf %12, %11 : vector<16x32xf32>
    %14 = arith.addf %9, %13 : vector<16x32xf32>
    %15 = arith.truncf %14 : vector<16x32xf32> to vector<16x32xbf16>
    %c0_10 = arith.constant 0 : index
    %c0_11 = arith.constant 0 : index
    %c0_12 = arith.constant 0 : index
    %16 = vector.load %arg5[%c0_10, %c0_11, %c0_12] : memref<1x16x32xbf16, #tpu.memory_space<vmem>>, vector<1x16x32xbf16>
    %17 = vector.shape_cast %16 : vector<1x16x32xbf16> to vector<16x32xbf16>
    %18 = vector.shape_cast %15 : vector<16x32xbf16> to vector<1x16x32xbf16>
    tpu.vector_store %arg5[%c0_10, %c0_11, %c0_12], %18 {strides = array<i32>} : memref<1x16x32xbf16, #tpu.memory_space<vmem>>, vector<1x16x32xbf16>,
    return
  }
  func.func @transform_0(%arg0: i32) -> (i32, i32) {
    %c0_i32 = arith.constant 0 : i32
    %c0_i32_0 = arith.constant 0 : i32
    %c0_i32_1 = arith.constant 0 : i32
    return %c0_i32, %c0_i32_0 : i32, i32
  }
  func.func @transform_1(%arg0: i32) -> (i32, i32, i32) {
    %c0_i32 = arith.constant 0 : i32
    %c0_i32_0 = arith.constant 0 : i32
    %c0_i32_1 = arith.constant 0 : i32
    return %arg0, %c0_i32, %c0_i32_0 : i32, i32, i32
  }
  func.func @transform_2(%arg0: i32) -> (i32, i32) {
    %c0_i32 = arith.constant 0 : i32
    %c0_i32_0 = arith.constant 0 : i32
    %c0_i32_1 = arith.constant 0 : i32
    return %c0_i32, %c0_i32_0 : i32, i32
  }
  func.func @transform_3(%arg0: i32) -> (i32, i32) {
    %c0_i32 = arith.constant 0 : i32
    %c0_i32_0 = arith.constant 0 : i32
    %c0_i32_1 = arith.constant 0 : i32
    return %c0_i32, %c0_i32_0 : i32, i32
  }
  func.func @transform_4(%arg0: i32) -> (i32, i32, i32) {
    %c0_i32 = arith.constant 0 : i32
    %c0_i32_0 = arith.constant 0 : i32
    %c0_i32_1 = arith.constant 0 : i32
    return %arg0, %c0_i32, %c0_i32_0 : i32, i32, i32
  }
}

module attributes {stable_mosaic.version = 11 : i64} {
  func.func @_ddense_kernel(%arg0: i32, %arg1: memref<1x8x32xbf16, #tpu.memory_space<vmem>>, %arg2: memref<42x32x32xf32, #tpu.memory_space<vmem>>, %arg3: memref<6x4x8xf32, #tpu.memory_space<vmem>>, %arg4: memref<4x1xf32, #tpu.memory_space<vmem>>, %arg5: memref<42x4x32xf32, #tpu.memory_space<vmem>>, %arg6: memref<7x4x1xf32, #tpu.memory_space<vmem>>, %arg7: memref<7x4x4xf32, #tpu.memory_space<vmem>>, %arg8: memref<7x4x1xf32, #tpu.memory_space<vmem>>, %arg9: memref<7x4x1xf32, #tpu.memory_space<vmem>>, %arg10: memref<7x4x1xf32, #tpu.memory_space<vmem>>, %arg11: memref<7x1x1xf32, #tpu.memory_space<vmem>>, %arg12: memref<6x8x4xf32, #tpu.memory_space<vmem>>, %arg13: memref<8x1xf32, #tpu.memory_space<vmem>>, %arg14: memref<2x1x1xf32, #tpu.memory_space<vmem>>, %arg15: memref<1x8x32xbf16, #tpu.memory_space<vmem>>, %arg16: memref<32x32xf32, #tpu.memory_space<vmem>>) attributes {dimension_semantics = [#tpu.dimension_semantics<parallel>], iteration_bounds = array<i64: 2>, scalar_prefetch = 0 : i64, scratch_operands = 1 : i64, tpu.core_type = #tpu.core_type<tc>, window_params = [{transform_indices = @transform_0, window_bounds = array<i64: 1, 8, 32>}, {pipeline_mode = #tpu.pipeline_mode<synchronous>, transform_indices = @transform_1, window_bounds = array<i64: 42, 32, 32>}, {pipeline_mode = #tpu.pipeline_mode<synchronous>, transform_indices = @transform_2, window_bounds = array<i64: 6, 4, 8>}, {pipeline_mode = #tpu.pipeline_mode<synchronous>, transform_indices = @transform_3, window_bounds = array<i64: 4, 1>}, {pipeline_mode = #tpu.pipeline_mode<synchronous>, transform_indices = @transform_4, window_bounds = array<i64: 42, 4, 32>}, {pipeline_mode = #tpu.pipeline_mode<synchronous>, transform_indices = @transform_5, window_bounds = array<i64: 7, 4, 1>}, {pipeline_mode = #tpu.pipeline_mode<synchronous>, transform_indices = @transform_6, window_bounds = array<i64: 7, 4, 4>}, {pipeline_mode = #tpu.pipeline_mode<synchronous>, transform_indices = @transform_7, window_bounds = array<i64: 7, 4, 1>}, {pipeline_mode = #tpu.pipeline_mode<synchronous>, transform_indices = @transform_8, window_bounds = array<i64: 7, 4, 1>}, {pipeline_mode = #tpu.pipeline_mode<synchronous>, transform_indices = @transform_9, window_bounds = array<i64: 7, 4, 1>}, {pipeline_mode = #tpu.pipeline_mode<synchronous>, transform_indices = @transform_10, window_bounds = array<i64: 7, 1, 1>}, {pipeline_mode = #tpu.pipeline_mode<synchronous>, transform_indices = @transform_11, window_bounds = array<i64: 6, 8, 4>}, {pipeline_mode = #tpu.pipeline_mode<synchronous>, transform_indices = @transform_12, window_bounds = array<i64: 8, 1>}, {pipeline_mode = #tpu.pipeline_mode<synchronous>, transform_indices = @transform_13, window_bounds = array<i64: 2, 1, 1>}, {transform_indices = @transform_14, window_bounds = array<i64: 1, 8, 32>}]} {
    %c0 = arith.constant 0 : index
    %c0_0 = arith.constant 0 : index
    %c0_1 = arith.constant 0 : index
    %0 = vector.load %arg1[%c0, %c0_0, %c0_1] : memref<1x8x32xbf16, #tpu.memory_space<vmem>>, vector<1x8x32xbf16>
    %1 = vector.shape_cast %0 : vector<1x8x32xbf16> to vector<8x32xbf16>
    %2 = arith.extf %1 : vector<8x32xbf16> to vector<8x32xf32>
    %cst = arith.constant 0.000000e+00 : f32
    %3 = vector.broadcast %cst : f32 to vector<32x32xf32>
    %c0_2 = arith.constant 0 : index
    %c0_3 = arith.constant 0 : index
    %4 = vector.load %arg16[%c0_2, %c0_3] : memref<32x32xf32, #tpu.memory_space<vmem>>, vector<32x32xf32>
    tpu.vector_store %arg16[%c0_2, %c0_3], %3 {strides = array<i32>} : memref<32x32xf32, #tpu.memory_space<vmem>>, vector<32x32xf32>,
    %c0_4 = arith.constant 0 : index
    %c0_5 = arith.constant 0 : index
    %c0_6 = arith.constant 0 : index
    %5 = vector.load %arg3[%c0_4, %c0_5, %c0_6] : memref<6x4x8xf32, #tpu.memory_space<vmem>>, vector<1x4x8xf32>
    %6 = vector.shape_cast %5 : vector<1x4x8xf32> to vector<4x8xf32>
    %cst_7 = arith.constant dense<0.000000e+00> : vector<4x32xf32>
    %7 = tpu.matmul %6, %2, %cst_7 {dimension_numbers = #tpu.dot_dimension_numbers<[1], [0], [0], [1], [0, 0, 1, 1], [], []>} : vector<4x8xf32>, vector<8x32xf32>, vector<4x32xf32> -> vector<4x32xf32>
    %c0_8 = arith.constant 0 : index
    %c0_9 = arith.constant 0 : index
    %c0_10 = arith.constant 0 : index
    %8 = vector.load %arg2[%c0_8, %c0_9, %c0_10] : memref<42x32x32xf32, #tpu.memory_space<vmem>>, vector<1x32x32xf32>
    %9 = vector.shape_cast %8 : vector<1x32x32xf32> to vector<32x32xf32>
    %cst_11 = arith.constant dense<0.000000e+00> : vector<4x32xf32>
    %10 = tpu.matmul %7, %9, %cst_11 {dimension_numbers = #tpu.dot_dimension_numbers<[1], [0], [0], [1], [0, 0, 1, 1], [], []>} : vector<4x32xf32>, vector<32x32xf32>, vector<4x32xf32> -> vector<4x32xf32>
    %c1 = arith.constant 1 : index
    %c0_12 = arith.constant 0 : index
    %c0_13 = arith.constant 0 : index
    %11 = vector.load %arg3[%c1, %c0_12, %c0_13] : memref<6x4x8xf32, #tpu.memory_space<vmem>>, vector<1x4x8xf32>
    %12 = vector.shape_cast %11 : vector<1x4x8xf32> to vector<4x8xf32>
    %cst_14 = arith.constant dense<0.000000e+00> : vector<4x32xf32>
    %13 = tpu.matmul %12, %2, %cst_14 {dimension_numbers = #tpu.dot_dimension_numbers<[1], [0], [0], [1], [0, 0, 1, 1], [], []>} : vector<4x8xf32>, vector<8x32xf32>, vector<4x32xf32> -> vector<4x32xf32>
    %c1_15 = arith.constant 1 : index
    %c0_16 = arith.constant 0 : index
    %c0_17 = arith.constant 0 : index
    %14 = vector.load %arg2[%c1_15, %c0_16, %c0_17] : memref<42x32x32xf32, #tpu.memory_space<vmem>>, vector<1x32x32xf32>
    %15 = vector.shape_cast %14 : vector<1x32x32xf32> to vector<32x32xf32>
    %cst_18 = arith.constant dense<0.000000e+00> : vector<4x32xf32>
    %16 = tpu.matmul %13, %15, %cst_18 {dimension_numbers = #tpu.dot_dimension_numbers<[1], [0], [0], [1], [0, 0, 1, 1], [], []>} : vector<4x32xf32>, vector<32x32xf32>, vector<4x32xf32> -> vector<4x32xf32>
    %17 = arith.addf %10, %16 : vector<4x32xf32>
    %c2 = arith.constant 2 : index
    %c0_19 = arith.constant 0 : index
    %c0_20 = arith.constant 0 : index
    %18 = vector.load %arg3[%c2, %c0_19, %c0_20] : memref<6x4x8xf32, #tpu.memory_space<vmem>>, vector<1x4x8xf32>
    %19 = vector.shape_cast %18 : vector<1x4x8xf32> to vector<4x8xf32>
    %cst_21 = arith.constant dense<0.000000e+00> : vector<4x32xf32>
    %20 = tpu.matmul %19, %2, %cst_21 {dimension_numbers = #tpu.dot_dimension_numbers<[1], [0], [0], [1], [0, 0, 1, 1], [], []>} : vector<4x8xf32>, vector<8x32xf32>, vector<4x32xf32> -> vector<4x32xf32>
    %c2_22 = arith.constant 2 : index
    %c0_23 = arith.constant 0 : index
    %c0_24 = arith.constant 0 : index
    %21 = vector.load %arg2[%c2_22, %c0_23, %c0_24] : memref<42x32x32xf32, #tpu.memory_space<vmem>>, vector<1x32x32xf32>
    %22 = vector.shape_cast %21 : vector<1x32x32xf32> to vector<32x32xf32>
    %cst_25 = arith.constant dense<0.000000e+00> : vector<4x32xf32>
    %23 = tpu.matmul %20, %22, %cst_25 {dimension_numbers = #tpu.dot_dimension_numbers<[1], [0], [0], [1], [0, 0, 1, 1], [], []>} : vector<4x32xf32>, vector<32x32xf32>, vector<4x32xf32> -> vector<4x32xf32>
    %24 = arith.addf %17, %23 : vector<4x32xf32>
    %c3 = arith.constant 3 : index
    %c0_26 = arith.constant 0 : index
    %c0_27 = arith.constant 0 : index
    %25 = vector.load %arg3[%c3, %c0_26, %c0_27] : memref<6x4x8xf32, #tpu.memory_space<vmem>>, vector<1x4x8xf32>
    %26 = vector.shape_cast %25 : vector<1x4x8xf32> to vector<4x8xf32>
    %cst_28 = arith.constant dense<0.000000e+00> : vector<4x32xf32>
    %27 = tpu.matmul %26, %2, %cst_28 {dimension_numbers = #tpu.dot_dimension_numbers<[1], [0], [0], [1], [0, 0, 1, 1], [], []>} : vector<4x8xf32>, vector<8x32xf32>, vector<4x32xf32> -> vector<4x32xf32>
    %c3_29 = arith.constant 3 : index
    %c0_30 = arith.constant 0 : index
    %c0_31 = arith.constant 0 : index
    %28 = vector.load %arg2[%c3_29, %c0_30, %c0_31] : memref<42x32x32xf32, #tpu.memory_space<vmem>>, vector<1x32x32xf32>
    %29 = vector.shape_cast %28 : vector<1x32x32xf32> to vector<32x32xf32>
    %cst_32 = arith.constant dense<0.000000e+00> : vector<4x32xf32>
    %30 = tpu.matmul %27, %29, %cst_32 {dimension_numbers = #tpu.dot_dimension_numbers<[1], [0], [0], [1], [0, 0, 1, 1], [], []>} : vector<4x32xf32>, vector<32x32xf32>, vector<4x32xf32> -> vector<4x32xf32>
    %31 = arith.addf %24, %30 : vector<4x32xf32>
    %c4 = arith.constant 4 : index
    %c0_33 = arith.constant 0 : index
    %c0_34 = arith.constant 0 : index
    %32 = vector.load %arg3[%c4, %c0_33, %c0_34] : memref<6x4x8xf32, #tpu.memory_space<vmem>>, vector<1x4x8xf32>
    %33 = vector.shape_cast %32 : vector<1x4x8xf32> to vector<4x8xf32>
    %cst_35 = arith.constant dense<0.000000e+00> : vector<4x32xf32>
    %34 = tpu.matmul %33, %2, %cst_35 {dimension_numbers = #tpu.dot_dimension_numbers<[1], [0], [0], [1], [0, 0, 1, 1], [], []>} : vector<4x8xf32>, vector<8x32xf32>, vector<4x32xf32> -> vector<4x32xf32>
    %c4_36 = arith.constant 4 : index
    %c0_37 = arith.constant 0 : index
    %c0_38 = arith.constant 0 : index
    %35 = vector.load %arg2[%c4_36, %c0_37, %c0_38] : memref<42x32x32xf32, #tpu.memory_space<vmem>>, vector<1x32x32xf32>
    %36 = vector.shape_cast %35 : vector<1x32x32xf32> to vector<32x32xf32>
    %cst_39 = arith.constant dense<0.000000e+00> : vector<4x32xf32>
    %37 = tpu.matmul %34, %36, %cst_39 {dimension_numbers = #tpu.dot_dimension_numbers<[1], [0], [0], [1], [0, 0, 1, 1], [], []>} : vector<4x32xf32>, vector<32x32xf32>, vector<4x32xf32> -> vector<4x32xf32>
    %38 = arith.addf %31, %37 : vector<4x32xf32>
    %c5 = arith.constant 5 : index
    %c0_40 = arith.constant 0 : index
    %c0_41 = arith.constant 0 : index
    %39 = vector.load %arg3[%c5, %c0_40, %c0_41] : memref<6x4x8xf32, #tpu.memory_space<vmem>>, vector<1x4x8xf32>
    %40 = vector.shape_cast %39 : vector<1x4x8xf32> to vector<4x8xf32>
    %cst_42 = arith.constant dense<0.000000e+00> : vector<4x32xf32>
    %41 = tpu.matmul %40, %2, %cst_42 {dimension_numbers = #tpu.dot_dimension_numbers<[1], [0], [0], [1], [0, 0, 1, 1], [], []>} : vector<4x8xf32>, vector<8x32xf32>, vector<4x32xf32> -> vector<4x32xf32>
    %c5_43 = arith.constant 5 : index
    %c0_44 = arith.constant 0 : index
    %c0_45 = arith.constant 0 : index
    %42 = vector.load %arg2[%c5_43, %c0_44, %c0_45] : memref<42x32x32xf32, #tpu.memory_space<vmem>>, vector<1x32x32xf32>
    %43 = vector.shape_cast %42 : vector<1x32x32xf32> to vector<32x32xf32>
    %cst_46 = arith.constant dense<0.000000e+00> : vector<4x32xf32>
    %44 = tpu.matmul %41, %43, %cst_46 {dimension_numbers = #tpu.dot_dimension_numbers<[1], [0], [0], [1], [0, 0, 1, 1], [], []>} : vector<4x32xf32>, vector<32x32xf32>, vector<4x32xf32> -> vector<4x32xf32>
    %45 = arith.addf %38, %44 : vector<4x32xf32>
    %c0_47 = arith.constant 0 : index
    %c0_48 = arith.constant 0 : index
    %46 = vector.load %arg4[%c0_47, %c0_48] : memref<4x1xf32, #tpu.memory_space<vmem>>, vector<4x1xf32>
    %47 = vector.broadcast %46 : vector<4x1xf32> to vector<4x32xf32>
    %48 = arith.addf %45, %47 : vector<4x32xf32>
    %c0_49 = arith.constant 0 : index
    %c0_50 = arith.constant 0 : index
    %c0_51 = arith.constant 0 : index
    %49 = vector.load %arg14[%c0_49, %c0_50, %c0_51] : memref<2x1x1xf32, #tpu.memory_space<vmem>>, vector<1x1x1xf32>
    %50 = vector.shape_cast %49 : vector<1x1x1xf32> to vector<1x1xf32>
    %cst_52 = arith.constant 0.000000e+00 : f32
    %51 = vector.broadcast %cst_52 : f32 to vector<4x32xf32>
    %52 = arith.maximumf %48, %51 : vector<4x32xf32>
    %cst_53 = arith.constant 0.000000e+00 : f32
    %53 = vector.broadcast %cst_53 : f32 to vector<4x32xf32>
    %54 = arith.minimumf %48, %53 : vector<4x32xf32>
    %55 = vector.broadcast %50 : vector<1x1xf32> to vector<4x32xf32>
    %56 = arith.mulf %55, %54 : vector<4x32xf32>
    %57 = arith.addf %52, %56 : vector<4x32xf32>
    %c0_54 = arith.constant 0 : index
    %c0_55 = arith.constant 0 : index
    %58 = vector.load %arg16[%c0_54, %c0_55] : memref<32x32xf32, #tpu.memory_space<vmem>>, vector<4x32xf32>
    tpu.vector_store %arg16[%c0_54, %c0_55], %57 {strides = array<i32>} : memref<32x32xf32, #tpu.memory_space<vmem>>, vector<4x32xf32>,
    %c0_56 = arith.constant 0 : index
    %c0_57 = arith.constant 0 : index
    %59 = vector.load %arg16[%c0_56, %c0_57] : memref<32x32xf32, #tpu.memory_space<vmem>>, vector<32x32xf32>
    %c0_58 = arith.constant 0 : index
    %c0_59 = arith.constant 0 : index
    %c0_60 = arith.constant 0 : index
    %60 = vector.load %arg5[%c0_58, %c0_59, %c0_60] : memref<42x4x32xf32, #tpu.memory_space<vmem>>, vector<1x4x32xf32>
    %61 = vector.shape_cast %60 : vector<1x4x32xf32> to vector<4x32xf32>
    %cst_61 = arith.constant dense<0.000000e+00> : vector<4x32xf32>
    %62 = tpu.matmul %61, %59, %cst_61 {dimension_numbers = #tpu.dot_dimension_numbers<[1], [0], [0], [1], [0, 0, 1, 1], [], []>} : vector<4x32xf32>, vector<32x32xf32>, vector<4x32xf32> -> vector<4x32xf32>
    %c0_62 = arith.constant 0 : index
    %c0_63 = arith.constant 0 : index
    %c0_64 = arith.constant 0 : index
    %63 = vector.load %arg2[%c0_62, %c0_63, %c0_64] : memref<42x32x32xf32, #tpu.memory_space<vmem>>, vector<1x32x32xf32>
    %64 = vector.shape_cast %63 : vector<1x32x32xf32> to vector<32x32xf32>
    %cst_65 = arith.constant dense<0.000000e+00> : vector<4x32xf32>
    %65 = tpu.matmul %62, %64, %cst_65 {dimension_numbers = #tpu.dot_dimension_numbers<[1], [0], [0], [1], [0, 0, 1, 1], [], []>} : vector<4x32xf32>, vector<32x32xf32>, vector<4x32xf32> -> vector<4x32xf32>
    %c1_66 = arith.constant 1 : index
    %c0_67 = arith.constant 0 : index
    %c0_68 = arith.constant 0 : index
    %66 = vector.load %arg5[%c1_66, %c0_67, %c0_68] : memref<42x4x32xf32, #tpu.memory_space<vmem>>, vector<1x4x32xf32>
    %67 = vector.shape_cast %66 : vector<1x4x32xf32> to vector<4x32xf32>
    %cst_69 = arith.constant dense<0.000000e+00> : vector<4x32xf32>
    %68 = tpu.matmul %67, %59, %cst_69 {dimension_numbers = #tpu.dot_dimension_numbers<[1], [0], [0], [1], [0, 0, 1, 1], [], []>} : vector<4x32xf32>, vector<32x32xf32>, vector<4x32xf32> -> vector<4x32xf32>
    %c1_70 = arith.constant 1 : index
    %c0_71 = arith.constant 0 : index
    %c0_72 = arith.constant 0 : index
    %69 = vector.load %arg2[%c1_70, %c0_71, %c0_72] : memref<42x32x32xf32, #tpu.memory_space<vmem>>, vector<1x32x32xf32>
    %70 = vector.shape_cast %69 : vector<1x32x32xf32> to vector<32x32xf32>
    %cst_73 = arith.constant dense<0.000000e+00> : vector<4x32xf32>
    %71 = tpu.matmul %68, %70, %cst_73 {dimension_numbers = #tpu.dot_dimension_numbers<[1], [0], [0], [1], [0, 0, 1, 1], [], []>} : vector<4x32xf32>, vector<32x32xf32>, vector<4x32xf32> -> vector<4x32xf32>
    %72 = arith.addf %65, %71 : vector<4x32xf32>
    %c2_74 = arith.constant 2 : index
    %c0_75 = arith.constant 0 : index
    %c0_76 = arith.constant 0 : index
    %73 = vector.load %arg5[%c2_74, %c0_75, %c0_76] : memref<42x4x32xf32, #tpu.memory_space<vmem>>, vector<1x4x32xf32>
    %74 = vector.shape_cast %73 : vector<1x4x32xf32> to vector<4x32xf32>
    %cst_77 = arith.constant dense<0.000000e+00> : vector<4x32xf32>
    %75 = tpu.matmul %74, %59, %cst_77 {dimension_numbers = #tpu.dot_dimension_numbers<[1], [0], [0], [1], [0, 0, 1, 1], [], []>} : vector<4x32xf32>, vector<32x32xf32>, vector<4x32xf32> -> vector<4x32xf32>
    %c2_78 = arith.constant 2 : index
    %c0_79 = arith.constant 0 : index
    %c0_80 = arith.constant 0 : index
    %76 = vector.load %arg2[%c2_78, %c0_79, %c0_80] : memref<42x32x32xf32, #tpu.memory_space<vmem>>, vector<1x32x32xf32>
    %77 = vector.shape_cast %76 : vector<1x32x32xf32> to vector<32x32xf32>
    %cst_81 = arith.constant dense<0.000000e+00> : vector<4x32xf32>
    %78 = tpu.matmul %75, %77, %cst_81 {dimension_numbers = #tpu.dot_dimension_numbers<[1], [0], [0], [1], [0, 0, 1, 1], [], []>} : vector<4x32xf32>, vector<32x32xf32>, vector<4x32xf32> -> vector<4x32xf32>
    %79 = arith.addf %72, %78 : vector<4x32xf32>
    %c3_82 = arith.constant 3 : index
    %c0_83 = arith.constant 0 : index
    %c0_84 = arith.constant 0 : index
    %80 = vector.load %arg5[%c3_82, %c0_83, %c0_84] : memref<42x4x32xf32, #tpu.memory_space<vmem>>, vector<1x4x32xf32>
    %81 = vector.shape_cast %80 : vector<1x4x32xf32> to vector<4x32xf32>
    %cst_85 = arith.constant dense<0.000000e+00> : vector<4x32xf32>
    %82 = tpu.matmul %81, %59, %cst_85 {dimension_numbers = #tpu.dot_dimension_numbers<[1], [0], [0], [1], [0, 0, 1, 1], [], []>} : vector<4x32xf32>, vector<32x32xf32>, vector<4x32xf32> -> vector<4x32xf32>
    %c3_86 = arith.constant 3 : index
    %c0_87 = arith.constant 0 : index
    %c0_88 = arith.constant 0 : index
    %83 = vector.load %arg2[%c3_86, %c0_87, %c0_88] : memref<42x32x32xf32, #tpu.memory_space<vmem>>, vector<1x32x32xf32>
    %84 = vector.shape_cast %83 : vector<1x32x32xf32> to vector<32x32xf32>
    %cst_89 = arith.constant dense<0.000000e+00> : vector<4x32xf32>
    %85 = tpu.matmul %82, %84, %cst_89 {dimension_numbers = #tpu.dot_dimension_numbers<[1], [0], [0], [1], [0, 0, 1, 1], [], []>} : vector<4x32xf32>, vector<32x32xf32>, vector<4x32xf32> -> vector<4x32xf32>
    %86 = arith.addf %79, %85 : vector<4x32xf32>
    %c4_90 = arith.constant 4 : index
    %c0_91 = arith.constant 0 : index
    %c0_92 = arith.constant 0 : index
    %87 = vector.load %arg5[%c4_90, %c0_91, %c0_92] : memref<42x4x32xf32, #tpu.memory_space<vmem>>, vector<1x4x32xf32>
    %88 = vector.shape_cast %87 : vector<1x4x32xf32> to vector<4x32xf32>
    %cst_93 = arith.constant dense<0.000000e+00> : vector<4x32xf32>
    %89 = tpu.matmul %88, %59, %cst_93 {dimension_numbers = #tpu.dot_dimension_numbers<[1], [0], [0], [1], [0, 0, 1, 1], [], []>} : vector<4x32xf32>, vector<32x32xf32>, vector<4x32xf32> -> vector<4x32xf32>
    %c4_94 = arith.constant 4 : index
    %c0_95 = arith.constant 0 : index
    %c0_96 = arith.constant 0 : index
    %90 = vector.load %arg2[%c4_94, %c0_95, %c0_96] : memref<42x32x32xf32, #tpu.memory_space<vmem>>, vector<1x32x32xf32>
    %91 = vector.shape_cast %90 : vector<1x32x32xf32> to vector<32x32xf32>
    %cst_97 = arith.constant dense<0.000000e+00> : vector<4x32xf32>
    %92 = tpu.matmul %89, %91, %cst_97 {dimension_numbers = #tpu.dot_dimension_numbers<[1], [0], [0], [1], [0, 0, 1, 1], [], []>} : vector<4x32xf32>, vector<32x32xf32>, vector<4x32xf32> -> vector<4x32xf32>
    %93 = arith.addf %86, %92 : vector<4x32xf32>
    %c5_98 = arith.constant 5 : index
    %c0_99 = arith.constant 0 : index
    %c0_100 = arith.constant 0 : index
    %94 = vector.load %arg5[%c5_98, %c0_99, %c0_100] : memref<42x4x32xf32, #tpu.memory_space<vmem>>, vector<1x4x32xf32>
    %95 = vector.shape_cast %94 : vector<1x4x32xf32> to vector<4x32xf32>
    %cst_101 = arith.constant dense<0.000000e+00> : vector<4x32xf32>
    %96 = tpu.matmul %95, %59, %cst_101 {dimension_numbers = #tpu.dot_dimension_numbers<[1], [0], [0], [1], [0, 0, 1, 1], [], []>} : vector<4x32xf32>, vector<32x32xf32>, vector<4x32xf32> -> vector<4x32xf32>
    %c5_102 = arith.constant 5 : index
    %c0_103 = arith.constant 0 : index
    %c0_104 = arith.constant 0 : index
    %97 = vector.load %arg2[%c5_102, %c0_103, %c0_104] : memref<42x32x32xf32, #tpu.memory_space<vmem>>, vector<1x32x32xf32>
    %98 = vector.shape_cast %97 : vector<1x32x32xf32> to vector<32x32xf32>
    %cst_105 = arith.constant dense<0.000000e+00> : vector<4x32xf32>
    %99 = tpu.matmul %96, %98, %cst_105 {dimension_numbers = #tpu.dot_dimension_numbers<[1], [0], [0], [1], [0, 0, 1, 1], [], []>} : vector<4x32xf32>, vector<32x32xf32>, vector<4x32xf32> -> vector<4x32xf32>
    %100 = arith.addf %93, %99 : vector<4x32xf32>
    %c0_106 = arith.constant 0 : index
    %c0_107 = arith.constant 0 : index
    %c0_108 = arith.constant 0 : index
    %101 = vector.load %arg6[%c0_106, %c0_107, %c0_108] : memref<7x4x1xf32, #tpu.memory_space<vmem>>, vector<1x4x1xf32>
    %102 = vector.shape_cast %101 : vector<1x4x1xf32> to vector<4x1xf32>
    %103 = vector.broadcast %102 : vector<4x1xf32> to vector<4x32xf32>
    %104 = arith.addf %100, %103 : vector<4x32xf32>
    %c0_109 = arith.constant 0 : index
    %c0_110 = arith.constant 0 : index
    %c0_111 = arith.constant 0 : index
    %105 = vector.load %arg7[%c0_109, %c0_110, %c0_111] : memref<7x4x4xf32, #tpu.memory_space<vmem>>, vector<1x4x4xf32>
    %106 = vector.shape_cast %105 : vector<1x4x4xf32> to vector<4x4xf32>
    %cst_112 = arith.constant dense<0.000000e+00> : vector<4x32xf32>
    %107 = tpu.matmul %106, %104, %cst_112 {dimension_numbers = #tpu.dot_dimension_numbers<[1], [0], [0], [1], [0, 0, 1, 1], [], []>} : vector<4x4xf32>, vector<4x32xf32>, vector<4x32xf32> -> vector<4x32xf32>
    %c0_113 = arith.constant 0 : index
    %c0_114 = arith.constant 0 : index
    %c0_115 = arith.constant 0 : index
    %108 = vector.load %arg8[%c0_113, %c0_114, %c0_115] : memref<7x4x1xf32, #tpu.memory_space<vmem>>, vector<1x4x1xf32>
    %109 = vector.shape_cast %108 : vector<1x4x1xf32> to vector<4x1xf32>
    %110 = vector.broadcast %109 : vector<4x1xf32> to vector<4x32xf32>
    %111 = arith.addf %107, %110 : vector<4x32xf32>
    %112 = vector.shape_cast %111 : vector<4x32xf32> to vector<1x4x32xf32>
    %cst_116 = arith.constant dense<0.000000e+00> : vector<1xf32>
    %113 = vector.multi_reduction <add>, %112, %cst_116 [1, 2] : vector<1x4x32xf32> to vector<1xf32>
    %114 = vector.shape_cast %113 : vector<1xf32> to vector<1x1x1xf32>
    %115 = vector.extract %114[0, 0, 0] : f32 from vector<1x1x1xf32>
    %cst_117 = arith.constant 1.280000e+02 : f32
    %116 = arith.divf %115, %cst_117 : f32
    %117 = vector.broadcast %116 : f32 to vector<4x32xf32>
    %118 = arith.subf %111, %117 : vector<4x32xf32>
    %119 = vector.broadcast %116 : f32 to vector<4x32xf32>
    %120 = arith.subf %111, %119 : vector<4x32xf32>
    %121 = arith.mulf %118, %120 : vector<4x32xf32>
    %122 = vector.shape_cast %121 : vector<4x32xf32> to vector<1x4x32xf32>
    %cst_118 = arith.constant dense<0.000000e+00> : vector<1xf32>
    %123 = vector.multi_reduction <add>, %122, %cst_118 [1, 2] : vector<1x4x32xf32> to vector<1xf32>
    %124 = vector.shape_cast %123 : vector<1xf32> to vector<1x1x1xf32>
    %125 = vector.extract %124[0, 0, 0] : f32 from vector<1x1x1xf32>
    %cst_119 = arith.constant 1.280000e+02 : f32
    %126 = arith.divf %125, %cst_119 : f32
    %127 = vector.broadcast %116 : f32 to vector<4x32xf32>
    %128 = arith.subf %111, %127 : vector<4x32xf32>
    %cst_120 = arith.constant 9.99999993E-9 : f32
    %129 = arith.addf %126, %cst_120 : f32
    %130 = math.rsqrt %129 : f32
    %131 = vector.broadcast %130 : f32 to vector<4x32xf32>
    %132 = arith.mulf %128, %131 : vector<4x32xf32>
    %c0_121 = arith.constant 0 : index
    %c0_122 = arith.constant 0 : index
    %c0_123 = arith.constant 0 : index
    %133 = vector.load %arg9[%c0_121, %c0_122, %c0_123] : memref<7x4x1xf32, #tpu.memory_space<vmem>>, vector<1x4x1xf32>
    %134 = vector.shape_cast %133 : vector<1x4x1xf32> to vector<4x1xf32>
    %135 = vector.broadcast %134 : vector<4x1xf32> to vector<4x32xf32>
    %136 = arith.mulf %132, %135 : vector<4x32xf32>
    %c0_124 = arith.constant 0 : index
    %c0_125 = arith.constant 0 : index
    %c0_126 = arith.constant 0 : index
    %137 = vector.load %arg10[%c0_124, %c0_125, %c0_126] : memref<7x4x1xf32, #tpu.memory_space<vmem>>, vector<1x4x1xf32>
    %138 = vector.shape_cast %137 : vector<1x4x1xf32> to vector<4x1xf32>
    %139 = vector.broadcast %138 : vector<4x1xf32> to vector<4x32xf32>
    %140 = arith.addf %136, %139 : vector<4x32xf32>
    %c0_127 = arith.constant 0 : index
    %c0_128 = arith.constant 0 : index
    %c0_129 = arith.constant 0 : index
    %141 = vector.load %arg11[%c0_127, %c0_128, %c0_129] : memref<7x1x1xf32, #tpu.memory_space<vmem>>, vector<1x1x1xf32>
    %142 = vector.shape_cast %141 : vector<1x1x1xf32> to vector<1x1xf32>
    %cst_130 = arith.constant 0.000000e+00 : f32
    %143 = vector.broadcast %cst_130 : f32 to vector<4x32xf32>
    %144 = arith.maximumf %140, %143 : vector<4x32xf32>
    %cst_131 = arith.constant 0.000000e+00 : f32
    %145 = vector.broadcast %cst_131 : f32 to vector<4x32xf32>
    %146 = arith.minimumf %140, %145 : vector<4x32xf32>
    %147 = vector.broadcast %142 : vector<1x1xf32> to vector<4x32xf32>
    %148 = arith.mulf %147, %146 : vector<4x32xf32>
    %149 = arith.addf %144, %148 : vector<4x32xf32>
    %c4_132 = arith.constant 4 : index
    %c0_133 = arith.constant 0 : index
    %150 = vector.load %arg16[%c4_132, %c0_133] : memref<32x32xf32, #tpu.memory_space<vmem>>, vector<4x32xf32>
    tpu.vector_store %arg16[%c4_132, %c0_133], %149 {strides = array<i32>} : memref<32x32xf32, #tpu.memory_space<vmem>>, vector<4x32xf32>,
    %c0_134 = arith.constant 0 : index
    %c0_135 = arith.constant 0 : index
    %151 = vector.load %arg16[%c0_134, %c0_135] : memref<32x32xf32, #tpu.memory_space<vmem>>, vector<32x32xf32>
    %c6 = arith.constant 6 : index
    %c0_136 = arith.constant 0 : index
    %c0_137 = arith.constant 0 : index
    %152 = vector.load %arg5[%c6, %c0_136, %c0_137] : memref<42x4x32xf32, #tpu.memory_space<vmem>>, vector<1x4x32xf32>
    %153 = vector.shape_cast %152 : vector<1x4x32xf32> to vector<4x32xf32>
    %cst_138 = arith.constant dense<0.000000e+00> : vector<4x32xf32>
    %154 = tpu.matmul %153, %151, %cst_138 {dimension_numbers = #tpu.dot_dimension_numbers<[1], [0], [0], [1], [0, 0, 1, 1], [], []>} : vector<4x32xf32>, vector<32x32xf32>, vector<4x32xf32> -> vector<4x32xf32>
    %c6_139 = arith.constant 6 : index
    %c0_140 = arith.constant 0 : index
    %c0_141 = arith.constant 0 : index
    %155 = vector.load %arg2[%c6_139, %c0_140, %c0_141] : memref<42x32x32xf32, #tpu.memory_space<vmem>>, vector<1x32x32xf32>
    %156 = vector.shape_cast %155 : vector<1x32x32xf32> to vector<32x32xf32>
    %cst_142 = arith.constant dense<0.000000e+00> : vector<4x32xf32>
    %157 = tpu.matmul %154, %156, %cst_142 {dimension_numbers = #tpu.dot_dimension_numbers<[1], [0], [0], [1], [0, 0, 1, 1], [], []>} : vector<4x32xf32>, vector<32x32xf32>, vector<4x32xf32> -> vector<4x32xf32>
    %c7 = arith.constant 7 : index
    %c0_143 = arith.constant 0 : index
    %c0_144 = arith.constant 0 : index
    %158 = vector.load %arg5[%c7, %c0_143, %c0_144] : memref<42x4x32xf32, #tpu.memory_space<vmem>>, vector<1x4x32xf32>
    %159 = vector.shape_cast %158 : vector<1x4x32xf32> to vector<4x32xf32>
    %cst_145 = arith.constant dense<0.000000e+00> : vector<4x32xf32>
    %160 = tpu.matmul %159, %151, %cst_145 {dimension_numbers = #tpu.dot_dimension_numbers<[1], [0], [0], [1], [0, 0, 1, 1], [], []>} : vector<4x32xf32>, vector<32x32xf32>, vector<4x32xf32> -> vector<4x32xf32>
    %c7_146 = arith.constant 7 : index
    %c0_147 = arith.constant 0 : index
    %c0_148 = arith.constant 0 : index
    %161 = vector.load %arg2[%c7_146, %c0_147, %c0_148] : memref<42x32x32xf32, #tpu.memory_space<vmem>>, vector<1x32x32xf32>
    %162 = vector.shape_cast %161 : vector<1x32x32xf32> to vector<32x32xf32>
    %cst_149 = arith.constant dense<0.000000e+00> : vector<4x32xf32>
    %163 = tpu.matmul %160, %162, %cst_149 {dimension_numbers = #tpu.dot_dimension_numbers<[1], [0], [0], [1], [0, 0, 1, 1], [], []>} : vector<4x32xf32>, vector<32x32xf32>, vector<4x32xf32> -> vector<4x32xf32>
    %164 = arith.addf %157, %163 : vector<4x32xf32>
    %c8 = arith.constant 8 : index
    %c0_150 = arith.constant 0 : index
    %c0_151 = arith.constant 0 : index
    %165 = vector.load %arg5[%c8, %c0_150, %c0_151] : memref<42x4x32xf32, #tpu.memory_space<vmem>>, vector<1x4x32xf32>
    %166 = vector.shape_cast %165 : vector<1x4x32xf32> to vector<4x32xf32>
    %cst_152 = arith.constant dense<0.000000e+00> : vector<4x32xf32>
    %167 = tpu.matmul %166, %151, %cst_152 {dimension_numbers = #tpu.dot_dimension_numbers<[1], [0], [0], [1], [0, 0, 1, 1], [], []>} : vector<4x32xf32>, vector<32x32xf32>, vector<4x32xf32> -> vector<4x32xf32>
    %c8_153 = arith.constant 8 : index
    %c0_154 = arith.constant 0 : index
    %c0_155 = arith.constant 0 : index
    %168 = vector.load %arg2[%c8_153, %c0_154, %c0_155] : memref<42x32x32xf32, #tpu.memory_space<vmem>>, vector<1x32x32xf32>
    %169 = vector.shape_cast %168 : vector<1x32x32xf32> to vector<32x32xf32>
    %cst_156 = arith.constant dense<0.000000e+00> : vector<4x32xf32>
    %170 = tpu.matmul %167, %169, %cst_156 {dimension_numbers = #tpu.dot_dimension_numbers<[1], [0], [0], [1], [0, 0, 1, 1], [], []>} : vector<4x32xf32>, vector<32x32xf32>, vector<4x32xf32> -> vector<4x32xf32>
    %171 = arith.addf %164, %170 : vector<4x32xf32>
    %c9 = arith.constant 9 : index
    %c0_157 = arith.constant 0 : index
    %c0_158 = arith.constant 0 : index
    %172 = vector.load %arg5[%c9, %c0_157, %c0_158] : memref<42x4x32xf32, #tpu.memory_space<vmem>>, vector<1x4x32xf32>
    %173 = vector.shape_cast %172 : vector<1x4x32xf32> to vector<4x32xf32>
    %cst_159 = arith.constant dense<0.000000e+00> : vector<4x32xf32>
    %174 = tpu.matmul %173, %151, %cst_159 {dimension_numbers = #tpu.dot_dimension_numbers<[1], [0], [0], [1], [0, 0, 1, 1], [], []>} : vector<4x32xf32>, vector<32x32xf32>, vector<4x32xf32> -> vector<4x32xf32>
    %c9_160 = arith.constant 9 : index
    %c0_161 = arith.constant 0 : index
    %c0_162 = arith.constant 0 : index
    %175 = vector.load %arg2[%c9_160, %c0_161, %c0_162] : memref<42x32x32xf32, #tpu.memory_space<vmem>>, vector<1x32x32xf32>
    %176 = vector.shape_cast %175 : vector<1x32x32xf32> to vector<32x32xf32>
    %cst_163 = arith.constant dense<0.000000e+00> : vector<4x32xf32>
    %177 = tpu.matmul %174, %176, %cst_163 {dimension_numbers = #tpu.dot_dimension_numbers<[1], [0], [0], [1], [0, 0, 1, 1], [], []>} : vector<4x32xf32>, vector<32x32xf32>, vector<4x32xf32> -> vector<4x32xf32>
    %178 = arith.addf %171, %177 : vector<4x32xf32>
    %c10 = arith.constant 10 : index
    %c0_164 = arith.constant 0 : index
    %c0_165 = arith.constant 0 : index
    %179 = vector.load %arg5[%c10, %c0_164, %c0_165] : memref<42x4x32xf32, #tpu.memory_space<vmem>>, vector<1x4x32xf32>
    %180 = vector.shape_cast %179 : vector<1x4x32xf32> to vector<4x32xf32>
    %cst_166 = arith.constant dense<0.000000e+00> : vector<4x32xf32>
    %181 = tpu.matmul %180, %151, %cst_166 {dimension_numbers = #tpu.dot_dimension_numbers<[1], [0], [0], [1], [0, 0, 1, 1], [], []>} : vector<4x32xf32>, vector<32x32xf32>, vector<4x32xf32> -> vector<4x32xf32>
    %c10_167 = arith.constant 10 : index
    %c0_168 = arith.constant 0 : index
    %c0_169 = arith.constant 0 : index
    %182 = vector.load %arg2[%c10_167, %c0_168, %c0_169] : memref<42x32x32xf32, #tpu.memory_space<vmem>>, vector<1x32x32xf32>
    %183 = vector.shape_cast %182 : vector<1x32x32xf32> to vector<32x32xf32>
    %cst_170 = arith.constant dense<0.000000e+00> : vector<4x32xf32>
    %184 = tpu.matmul %181, %183, %cst_170 {dimension_numbers = #tpu.dot_dimension_numbers<[1], [0], [0], [1], [0, 0, 1, 1], [], []>} : vector<4x32xf32>, vector<32x32xf32>, vector<4x32xf32> -> vector<4x32xf32>
    %185 = arith.addf %178, %184 : vector<4x32xf32>
    %c11 = arith.constant 11 : index
    %c0_171 = arith.constant 0 : index
    %c0_172 = arith.constant 0 : index
    %186 = vector.load %arg5[%c11, %c0_171, %c0_172] : memref<42x4x32xf32, #tpu.memory_space<vmem>>, vector<1x4x32xf32>
    %187 = vector.shape_cast %186 : vector<1x4x32xf32> to vector<4x32xf32>
    %cst_173 = arith.constant dense<0.000000e+00> : vector<4x32xf32>
    %188 = tpu.matmul %187, %151, %cst_173 {dimension_numbers = #tpu.dot_dimension_numbers<[1], [0], [0], [1], [0, 0, 1, 1], [], []>} : vector<4x32xf32>, vector<32x32xf32>, vector<4x32xf32> -> vector<4x32xf32>
    %c11_174 = arith.constant 11 : index
    %c0_175 = arith.constant 0 : index
    %c0_176 = arith.constant 0 : index
    %189 = vector.load %arg2[%c11_174, %c0_175, %c0_176] : memref<42x32x32xf32, #tpu.memory_space<vmem>>, vector<1x32x32xf32>
    %190 = vector.shape_cast %189 : vector<1x32x32xf32> to vector<32x32xf32>
    %cst_177 = arith.constant dense<0.000000e+00> : vector<4x32xf32>
    %191 = tpu.matmul %188, %190, %cst_177 {dimension_numbers = #tpu.dot_dimension_numbers<[1], [0], [0], [1], [0, 0, 1, 1], [], []>} : vector<4x32xf32>, vector<32x32xf32>, vector<4x32xf32> -> vector<4x32xf32>
    %192 = arith.addf %185, %191 : vector<4x32xf32>
    %c1_178 = arith.constant 1 : index
    %c0_179 = arith.constant 0 : index
    %c0_180 = arith.constant 0 : index
    %193 = vector.load %arg6[%c1_178, %c0_179, %c0_180] : memref<7x4x1xf32, #tpu.memory_space<vmem>>, vector<1x4x1xf32>
    %194 = vector.shape_cast %193 : vector<1x4x1xf32> to vector<4x1xf32>
    %195 = vector.broadcast %194 : vector<4x1xf32> to vector<4x32xf32>
    %196 = arith.addf %192, %195 : vector<4x32xf32>
    %c1_181 = arith.constant 1 : index
    %c0_182 = arith.constant 0 : index
    %c0_183 = arith.constant 0 : index
    %197 = vector.load %arg7[%c1_181, %c0_182, %c0_183] : memref<7x4x4xf32, #tpu.memory_space<vmem>>, vector<1x4x4xf32>
    %198 = vector.shape_cast %197 : vector<1x4x4xf32> to vector<4x4xf32>
    %cst_184 = arith.constant dense<0.000000e+00> : vector<4x32xf32>
    %199 = tpu.matmul %198, %196, %cst_184 {dimension_numbers = #tpu.dot_dimension_numbers<[1], [0], [0], [1], [0, 0, 1, 1], [], []>} : vector<4x4xf32>, vector<4x32xf32>, vector<4x32xf32> -> vector<4x32xf32>
    %c1_185 = arith.constant 1 : index
    %c0_186 = arith.constant 0 : index
    %c0_187 = arith.constant 0 : index
    %200 = vector.load %arg8[%c1_185, %c0_186, %c0_187] : memref<7x4x1xf32, #tpu.memory_space<vmem>>, vector<1x4x1xf32>
    %201 = vector.shape_cast %200 : vector<1x4x1xf32> to vector<4x1xf32>
    %202 = vector.broadcast %201 : vector<4x1xf32> to vector<4x32xf32>
    %203 = arith.addf %199, %202 : vector<4x32xf32>
    %204 = vector.shape_cast %203 : vector<4x32xf32> to vector<1x4x32xf32>
    %cst_188 = arith.constant dense<0.000000e+00> : vector<1xf32>
    %205 = vector.multi_reduction <add>, %204, %cst_188 [1, 2] : vector<1x4x32xf32> to vector<1xf32>
    %206 = vector.shape_cast %205 : vector<1xf32> to vector<1x1x1xf32>
    %207 = vector.extract %206[0, 0, 0] : f32 from vector<1x1x1xf32>
    %cst_189 = arith.constant 1.280000e+02 : f32
    %208 = arith.divf %207, %cst_189 : f32
    %209 = vector.broadcast %208 : f32 to vector<4x32xf32>
    %210 = arith.subf %203, %209 : vector<4x32xf32>
    %211 = vector.broadcast %208 : f32 to vector<4x32xf32>
    %212 = arith.subf %203, %211 : vector<4x32xf32>
    %213 = arith.mulf %210, %212 : vector<4x32xf32>
    %214 = vector.shape_cast %213 : vector<4x32xf32> to vector<1x4x32xf32>
    %cst_190 = arith.constant dense<0.000000e+00> : vector<1xf32>
    %215 = vector.multi_reduction <add>, %214, %cst_190 [1, 2] : vector<1x4x32xf32> to vector<1xf32>
    %216 = vector.shape_cast %215 : vector<1xf32> to vector<1x1x1xf32>
    %217 = vector.extract %216[0, 0, 0] : f32 from vector<1x1x1xf32>
    %cst_191 = arith.constant 1.280000e+02 : f32
    %218 = arith.divf %217, %cst_191 : f32
    %219 = vector.broadcast %208 : f32 to vector<4x32xf32>
    %220 = arith.subf %203, %219 : vector<4x32xf32>
    %cst_192 = arith.constant 9.99999993E-9 : f32
    %221 = arith.addf %218, %cst_192 : f32
    %222 = math.rsqrt %221 : f32
    %223 = vector.broadcast %222 : f32 to vector<4x32xf32>
    %224 = arith.mulf %220, %223 : vector<4x32xf32>
    %c1_193 = arith.constant 1 : index
    %c0_194 = arith.constant 0 : index
    %c0_195 = arith.constant 0 : index
    %225 = vector.load %arg9[%c1_193, %c0_194, %c0_195] : memref<7x4x1xf32, #tpu.memory_space<vmem>>, vector<1x4x1xf32>
    %226 = vector.shape_cast %225 : vector<1x4x1xf32> to vector<4x1xf32>
    %227 = vector.broadcast %226 : vector<4x1xf32> to vector<4x32xf32>
    %228 = arith.mulf %224, %227 : vector<4x32xf32>
    %c1_196 = arith.constant 1 : index
    %c0_197 = arith.constant 0 : index
    %c0_198 = arith.constant 0 : index
    %229 = vector.load %arg10[%c1_196, %c0_197, %c0_198] : memref<7x4x1xf32, #tpu.memory_space<vmem>>, vector<1x4x1xf32>
    %230 = vector.shape_cast %229 : vector<1x4x1xf32> to vector<4x1xf32>
    %231 = vector.broadcast %230 : vector<4x1xf32> to vector<4x32xf32>
    %232 = arith.addf %228, %231 : vector<4x32xf32>
    %c1_199 = arith.constant 1 : index
    %c0_200 = arith.constant 0 : index
    %c0_201 = arith.constant 0 : index
    %233 = vector.load %arg11[%c1_199, %c0_200, %c0_201] : memref<7x1x1xf32, #tpu.memory_space<vmem>>, vector<1x1x1xf32>
    %234 = vector.shape_cast %233 : vector<1x1x1xf32> to vector<1x1xf32>
    %cst_202 = arith.constant 0.000000e+00 : f32
    %235 = vector.broadcast %cst_202 : f32 to vector<4x32xf32>
    %236 = arith.maximumf %232, %235 : vector<4x32xf32>
    %cst_203 = arith.constant 0.000000e+00 : f32
    %237 = vector.broadcast %cst_203 : f32 to vector<4x32xf32>
    %238 = arith.minimumf %232, %237 : vector<4x32xf32>
    %239 = vector.broadcast %234 : vector<1x1xf32> to vector<4x32xf32>
    %240 = arith.mulf %239, %238 : vector<4x32xf32>
    %241 = arith.addf %236, %240 : vector<4x32xf32>
    %c8_204 = arith.constant 8 : index
    %c0_205 = arith.constant 0 : index
    %242 = vector.load %arg16[%c8_204, %c0_205] : memref<32x32xf32, #tpu.memory_space<vmem>>, vector<4x32xf32>
    tpu.vector_store %arg16[%c8_204, %c0_205], %241 {strides = array<i32>} : memref<32x32xf32, #tpu.memory_space<vmem>>, vector<4x32xf32>,
    %c0_206 = arith.constant 0 : index
    %c0_207 = arith.constant 0 : index
    %243 = vector.load %arg16[%c0_206, %c0_207] : memref<32x32xf32, #tpu.memory_space<vmem>>, vector<32x32xf32>
    %c12 = arith.constant 12 : index
    %c0_208 = arith.constant 0 : index
    %c0_209 = arith.constant 0 : index
    %244 = vector.load %arg5[%c12, %c0_208, %c0_209] : memref<42x4x32xf32, #tpu.memory_space<vmem>>, vector<1x4x32xf32>
    %245 = vector.shape_cast %244 : vector<1x4x32xf32> to vector<4x32xf32>
    %cst_210 = arith.constant dense<0.000000e+00> : vector<4x32xf32>
    %246 = tpu.matmul %245, %243, %cst_210 {dimension_numbers = #tpu.dot_dimension_numbers<[1], [0], [0], [1], [0, 0, 1, 1], [], []>} : vector<4x32xf32>, vector<32x32xf32>, vector<4x32xf32> -> vector<4x32xf32>
    %c12_211 = arith.constant 12 : index
    %c0_212 = arith.constant 0 : index
    %c0_213 = arith.constant 0 : index
    %247 = vector.load %arg2[%c12_211, %c0_212, %c0_213] : memref<42x32x32xf32, #tpu.memory_space<vmem>>, vector<1x32x32xf32>
    %248 = vector.shape_cast %247 : vector<1x32x32xf32> to vector<32x32xf32>
    %cst_214 = arith.constant dense<0.000000e+00> : vector<4x32xf32>
    %249 = tpu.matmul %246, %248, %cst_214 {dimension_numbers = #tpu.dot_dimension_numbers<[1], [0], [0], [1], [0, 0, 1, 1], [], []>} : vector<4x32xf32>, vector<32x32xf32>, vector<4x32xf32> -> vector<4x32xf32>
    %c13 = arith.constant 13 : index
    %c0_215 = arith.constant 0 : index
    %c0_216 = arith.constant 0 : index
    %250 = vector.load %arg5[%c13, %c0_215, %c0_216] : memref<42x4x32xf32, #tpu.memory_space<vmem>>, vector<1x4x32xf32>
    %251 = vector.shape_cast %250 : vector<1x4x32xf32> to vector<4x32xf32>
    %cst_217 = arith.constant dense<0.000000e+00> : vector<4x32xf32>
    %252 = tpu.matmul %251, %243, %cst_217 {dimension_numbers = #tpu.dot_dimension_numbers<[1], [0], [0], [1], [0, 0, 1, 1], [], []>} : vector<4x32xf32>, vector<32x32xf32>, vector<4x32xf32> -> vector<4x32xf32>
    %c13_218 = arith.constant 13 : index
    %c0_219 = arith.constant 0 : index
    %c0_220 = arith.constant 0 : index
    %253 = vector.load %arg2[%c13_218, %c0_219, %c0_220] : memref<42x32x32xf32, #tpu.memory_space<vmem>>, vector<1x32x32xf32>
    %254 = vector.shape_cast %253 : vector<1x32x32xf32> to vector<32x32xf32>
    %cst_221 = arith.constant dense<0.000000e+00> : vector<4x32xf32>
    %255 = tpu.matmul %252, %254, %cst_221 {dimension_numbers = #tpu.dot_dimension_numbers<[1], [0], [0], [1], [0, 0, 1, 1], [], []>} : vector<4x32xf32>, vector<32x32xf32>, vector<4x32xf32> -> vector<4x32xf32>
    %256 = arith.addf %249, %255 : vector<4x32xf32>
    %c14 = arith.constant 14 : index
    %c0_222 = arith.constant 0 : index
    %c0_223 = arith.constant 0 : index
    %257 = vector.load %arg5[%c14, %c0_222, %c0_223] : memref<42x4x32xf32, #tpu.memory_space<vmem>>, vector<1x4x32xf32>
    %258 = vector.shape_cast %257 : vector<1x4x32xf32> to vector<4x32xf32>
    %cst_224 = arith.constant dense<0.000000e+00> : vector<4x32xf32>
    %259 = tpu.matmul %258, %243, %cst_224 {dimension_numbers = #tpu.dot_dimension_numbers<[1], [0], [0], [1], [0, 0, 1, 1], [], []>} : vector<4x32xf32>, vector<32x32xf32>, vector<4x32xf32> -> vector<4x32xf32>
    %c14_225 = arith.constant 14 : index
    %c0_226 = arith.constant 0 : index
    %c0_227 = arith.constant 0 : index
    %260 = vector.load %arg2[%c14_225, %c0_226, %c0_227] : memref<42x32x32xf32, #tpu.memory_space<vmem>>, vector<1x32x32xf32>
    %261 = vector.shape_cast %260 : vector<1x32x32xf32> to vector<32x32xf32>
    %cst_228 = arith.constant dense<0.000000e+00> : vector<4x32xf32>
    %262 = tpu.matmul %259, %261, %cst_228 {dimension_numbers = #tpu.dot_dimension_numbers<[1], [0], [0], [1], [0, 0, 1, 1], [], []>} : vector<4x32xf32>, vector<32x32xf32>, vector<4x32xf32> -> vector<4x32xf32>
    %263 = arith.addf %256, %262 : vector<4x32xf32>
    %c15 = arith.constant 15 : index
    %c0_229 = arith.constant 0 : index
    %c0_230 = arith.constant 0 : index
    %264 = vector.load %arg5[%c15, %c0_229, %c0_230] : memref<42x4x32xf32, #tpu.memory_space<vmem>>, vector<1x4x32xf32>
    %265 = vector.shape_cast %264 : vector<1x4x32xf32> to vector<4x32xf32>
    %cst_231 = arith.constant dense<0.000000e+00> : vector<4x32xf32>
    %266 = tpu.matmul %265, %243, %cst_231 {dimension_numbers = #tpu.dot_dimension_numbers<[1], [0], [0], [1], [0, 0, 1, 1], [], []>} : vector<4x32xf32>, vector<32x32xf32>, vector<4x32xf32> -> vector<4x32xf32>
    %c15_232 = arith.constant 15 : index
    %c0_233 = arith.constant 0 : index
    %c0_234 = arith.constant 0 : index
    %267 = vector.load %arg2[%c15_232, %c0_233, %c0_234] : memref<42x32x32xf32, #tpu.memory_space<vmem>>, vector<1x32x32xf32>
    %268 = vector.shape_cast %267 : vector<1x32x32xf32> to vector<32x32xf32>
    %cst_235 = arith.constant dense<0.000000e+00> : vector<4x32xf32>
    %269 = tpu.matmul %266, %268, %cst_235 {dimension_numbers = #tpu.dot_dimension_numbers<[1], [0], [0], [1], [0, 0, 1, 1], [], []>} : vector<4x32xf32>, vector<32x32xf32>, vector<4x32xf32> -> vector<4x32xf32>
    %270 = arith.addf %263, %269 : vector<4x32xf32>
    %c16 = arith.constant 16 : index
    %c0_236 = arith.constant 0 : index
    %c0_237 = arith.constant 0 : index
    %271 = vector.load %arg5[%c16, %c0_236, %c0_237] : memref<42x4x32xf32, #tpu.memory_space<vmem>>, vector<1x4x32xf32>
    %272 = vector.shape_cast %271 : vector<1x4x32xf32> to vector<4x32xf32>
    %cst_238 = arith.constant dense<0.000000e+00> : vector<4x32xf32>
    %273 = tpu.matmul %272, %243, %cst_238 {dimension_numbers = #tpu.dot_dimension_numbers<[1], [0], [0], [1], [0, 0, 1, 1], [], []>} : vector<4x32xf32>, vector<32x32xf32>, vector<4x32xf32> -> vector<4x32xf32>
    %c16_239 = arith.constant 16 : index
    %c0_240 = arith.constant 0 : index
    %c0_241 = arith.constant 0 : index
    %274 = vector.load %arg2[%c16_239, %c0_240, %c0_241] : memref<42x32x32xf32, #tpu.memory_space<vmem>>, vector<1x32x32xf32>
    %275 = vector.shape_cast %274 : vector<1x32x32xf32> to vector<32x32xf32>
    %cst_242 = arith.constant dense<0.000000e+00> : vector<4x32xf32>
    %276 = tpu.matmul %273, %275, %cst_242 {dimension_numbers = #tpu.dot_dimension_numbers<[1], [0], [0], [1], [0, 0, 1, 1], [], []>} : vector<4x32xf32>, vector<32x32xf32>, vector<4x32xf32> -> vector<4x32xf32>
    %277 = arith.addf %270, %276 : vector<4x32xf32>
    %c17 = arith.constant 17 : index
    %c0_243 = arith.constant 0 : index
    %c0_244 = arith.constant 0 : index
    %278 = vector.load %arg5[%c17, %c0_243, %c0_244] : memref<42x4x32xf32, #tpu.memory_space<vmem>>, vector<1x4x32xf32>
    %279 = vector.shape_cast %278 : vector<1x4x32xf32> to vector<4x32xf32>
    %cst_245 = arith.constant dense<0.000000e+00> : vector<4x32xf32>
    %280 = tpu.matmul %279, %243, %cst_245 {dimension_numbers = #tpu.dot_dimension_numbers<[1], [0], [0], [1], [0, 0, 1, 1], [], []>} : vector<4x32xf32>, vector<32x32xf32>, vector<4x32xf32> -> vector<4x32xf32>
    %c17_246 = arith.constant 17 : index
    %c0_247 = arith.constant 0 : index
    %c0_248 = arith.constant 0 : index
    %281 = vector.load %arg2[%c17_246, %c0_247, %c0_248] : memref<42x32x32xf32, #tpu.memory_space<vmem>>, vector<1x32x32xf32>
    %282 = vector.shape_cast %281 : vector<1x32x32xf32> to vector<32x32xf32>
    %cst_249 = arith.constant dense<0.000000e+00> : vector<4x32xf32>
    %283 = tpu.matmul %280, %282, %cst_249 {dimension_numbers = #tpu.dot_dimension_numbers<[1], [0], [0], [1], [0, 0, 1, 1], [], []>} : vector<4x32xf32>, vector<32x32xf32>, vector<4x32xf32> -> vector<4x32xf32>
    %284 = arith.addf %277, %283 : vector<4x32xf32>
    %c2_250 = arith.constant 2 : index
    %c0_251 = arith.constant 0 : index
    %c0_252 = arith.constant 0 : index
    %285 = vector.load %arg6[%c2_250, %c0_251, %c0_252] : memref<7x4x1xf32, #tpu.memory_space<vmem>>, vector<1x4x1xf32>
    %286 = vector.shape_cast %285 : vector<1x4x1xf32> to vector<4x1xf32>
    %287 = vector.broadcast %286 : vector<4x1xf32> to vector<4x32xf32>
    %288 = arith.addf %284, %287 : vector<4x32xf32>
    %c2_253 = arith.constant 2 : index
    %c0_254 = arith.constant 0 : index
    %c0_255 = arith.constant 0 : index
    %289 = vector.load %arg7[%c2_253, %c0_254, %c0_255] : memref<7x4x4xf32, #tpu.memory_space<vmem>>, vector<1x4x4xf32>
    %290 = vector.shape_cast %289 : vector<1x4x4xf32> to vector<4x4xf32>
    %cst_256 = arith.constant dense<0.000000e+00> : vector<4x32xf32>
    %291 = tpu.matmul %290, %288, %cst_256 {dimension_numbers = #tpu.dot_dimension_numbers<[1], [0], [0], [1], [0, 0, 1, 1], [], []>} : vector<4x4xf32>, vector<4x32xf32>, vector<4x32xf32> -> vector<4x32xf32>
    %c2_257 = arith.constant 2 : index
    %c0_258 = arith.constant 0 : index
    %c0_259 = arith.constant 0 : index
    %292 = vector.load %arg8[%c2_257, %c0_258, %c0_259] : memref<7x4x1xf32, #tpu.memory_space<vmem>>, vector<1x4x1xf32>
    %293 = vector.shape_cast %292 : vector<1x4x1xf32> to vector<4x1xf32>
    %294 = vector.broadcast %293 : vector<4x1xf32> to vector<4x32xf32>
    %295 = arith.addf %291, %294 : vector<4x32xf32>
    %296 = vector.shape_cast %295 : vector<4x32xf32> to vector<1x4x32xf32>
    %cst_260 = arith.constant dense<0.000000e+00> : vector<1xf32>
    %297 = vector.multi_reduction <add>, %296, %cst_260 [1, 2] : vector<1x4x32xf32> to vector<1xf32>
    %298 = vector.shape_cast %297 : vector<1xf32> to vector<1x1x1xf32>
    %299 = vector.extract %298[0, 0, 0] : f32 from vector<1x1x1xf32>
    %cst_261 = arith.constant 1.280000e+02 : f32
    %300 = arith.divf %299, %cst_261 : f32
    %301 = vector.broadcast %300 : f32 to vector<4x32xf32>
    %302 = arith.subf %295, %301 : vector<4x32xf32>
    %303 = vector.broadcast %300 : f32 to vector<4x32xf32>
    %304 = arith.subf %295, %303 : vector<4x32xf32>
    %305 = arith.mulf %302, %304 : vector<4x32xf32>
    %306 = vector.shape_cast %305 : vector<4x32xf32> to vector<1x4x32xf32>
    %cst_262 = arith.constant dense<0.000000e+00> : vector<1xf32>
    %307 = vector.multi_reduction <add>, %306, %cst_262 [1, 2] : vector<1x4x32xf32> to vector<1xf32>
    %308 = vector.shape_cast %307 : vector<1xf32> to vector<1x1x1xf32>
    %309 = vector.extract %308[0, 0, 0] : f32 from vector<1x1x1xf32>
    %cst_263 = arith.constant 1.280000e+02 : f32
    %310 = arith.divf %309, %cst_263 : f32
    %311 = vector.broadcast %300 : f32 to vector<4x32xf32>
    %312 = arith.subf %295, %311 : vector<4x32xf32>
    %cst_264 = arith.constant 9.99999993E-9 : f32
    %313 = arith.addf %310, %cst_264 : f32
    %314 = math.rsqrt %313 : f32
    %315 = vector.broadcast %314 : f32 to vector<4x32xf32>
    %316 = arith.mulf %312, %315 : vector<4x32xf32>
    %c2_265 = arith.constant 2 : index
    %c0_266 = arith.constant 0 : index
    %c0_267 = arith.constant 0 : index
    %317 = vector.load %arg9[%c2_265, %c0_266, %c0_267] : memref<7x4x1xf32, #tpu.memory_space<vmem>>, vector<1x4x1xf32>
    %318 = vector.shape_cast %317 : vector<1x4x1xf32> to vector<4x1xf32>
    %319 = vector.broadcast %318 : vector<4x1xf32> to vector<4x32xf32>
    %320 = arith.mulf %316, %319 : vector<4x32xf32>
    %c2_268 = arith.constant 2 : index
    %c0_269 = arith.constant 0 : index
    %c0_270 = arith.constant 0 : index
    %321 = vector.load %arg10[%c2_268, %c0_269, %c0_270] : memref<7x4x1xf32, #tpu.memory_space<vmem>>, vector<1x4x1xf32>
    %322 = vector.shape_cast %321 : vector<1x4x1xf32> to vector<4x1xf32>
    %323 = vector.broadcast %322 : vector<4x1xf32> to vector<4x32xf32>
    %324 = arith.addf %320, %323 : vector<4x32xf32>
    %c2_271 = arith.constant 2 : index
    %c0_272 = arith.constant 0 : index
    %c0_273 = arith.constant 0 : index
    %325 = vector.load %arg11[%c2_271, %c0_272, %c0_273] : memref<7x1x1xf32, #tpu.memory_space<vmem>>, vector<1x1x1xf32>
    %326 = vector.shape_cast %325 : vector<1x1x1xf32> to vector<1x1xf32>
    %cst_274 = arith.constant 0.000000e+00 : f32
    %327 = vector.broadcast %cst_274 : f32 to vector<4x32xf32>
    %328 = arith.maximumf %324, %327 : vector<4x32xf32>
    %cst_275 = arith.constant 0.000000e+00 : f32
    %329 = vector.broadcast %cst_275 : f32 to vector<4x32xf32>
    %330 = arith.minimumf %324, %329 : vector<4x32xf32>
    %331 = vector.broadcast %326 : vector<1x1xf32> to vector<4x32xf32>
    %332 = arith.mulf %331, %330 : vector<4x32xf32>
    %333 = arith.addf %328, %332 : vector<4x32xf32>
    %c12_276 = arith.constant 12 : index
    %c0_277 = arith.constant 0 : index
    %334 = vector.load %arg16[%c12_276, %c0_277] : memref<32x32xf32, #tpu.memory_space<vmem>>, vector<4x32xf32>
    tpu.vector_store %arg16[%c12_276, %c0_277], %333 {strides = array<i32>} : memref<32x32xf32, #tpu.memory_space<vmem>>, vector<4x32xf32>,
    %c0_278 = arith.constant 0 : index
    %c0_279 = arith.constant 0 : index
    %335 = vector.load %arg16[%c0_278, %c0_279] : memref<32x32xf32, #tpu.memory_space<vmem>>, vector<32x32xf32>
    %c18 = arith.constant 18 : index
    %c0_280 = arith.constant 0 : index
    %c0_281 = arith.constant 0 : index
    %336 = vector.load %arg5[%c18, %c0_280, %c0_281] : memref<42x4x32xf32, #tpu.memory_space<vmem>>, vector<1x4x32xf32>
    %337 = vector.shape_cast %336 : vector<1x4x32xf32> to vector<4x32xf32>
    %cst_282 = arith.constant dense<0.000000e+00> : vector<4x32xf32>
    %338 = tpu.matmul %337, %335, %cst_282 {dimension_numbers = #tpu.dot_dimension_numbers<[1], [0], [0], [1], [0, 0, 1, 1], [], []>} : vector<4x32xf32>, vector<32x32xf32>, vector<4x32xf32> -> vector<4x32xf32>
    %c18_283 = arith.constant 18 : index
    %c0_284 = arith.constant 0 : index
    %c0_285 = arith.constant 0 : index
    %339 = vector.load %arg2[%c18_283, %c0_284, %c0_285] : memref<42x32x32xf32, #tpu.memory_space<vmem>>, vector<1x32x32xf32>
    %340 = vector.shape_cast %339 : vector<1x32x32xf32> to vector<32x32xf32>
    %cst_286 = arith.constant dense<0.000000e+00> : vector<4x32xf32>
    %341 = tpu.matmul %338, %340, %cst_286 {dimension_numbers = #tpu.dot_dimension_numbers<[1], [0], [0], [1], [0, 0, 1, 1], [], []>} : vector<4x32xf32>, vector<32x32xf32>, vector<4x32xf32> -> vector<4x32xf32>
    %c19 = arith.constant 19 : index
    %c0_287 = arith.constant 0 : index
    %c0_288 = arith.constant 0 : index
    %342 = vector.load %arg5[%c19, %c0_287, %c0_288] : memref<42x4x32xf32, #tpu.memory_space<vmem>>, vector<1x4x32xf32>
    %343 = vector.shape_cast %342 : vector<1x4x32xf32> to vector<4x32xf32>
    %cst_289 = arith.constant dense<0.000000e+00> : vector<4x32xf32>
    %344 = tpu.matmul %343, %335, %cst_289 {dimension_numbers = #tpu.dot_dimension_numbers<[1], [0], [0], [1], [0, 0, 1, 1], [], []>} : vector<4x32xf32>, vector<32x32xf32>, vector<4x32xf32> -> vector<4x32xf32>
    %c19_290 = arith.constant 19 : index
    %c0_291 = arith.constant 0 : index
    %c0_292 = arith.constant 0 : index
    %345 = vector.load %arg2[%c19_290, %c0_291, %c0_292] : memref<42x32x32xf32, #tpu.memory_space<vmem>>, vector<1x32x32xf32>
    %346 = vector.shape_cast %345 : vector<1x32x32xf32> to vector<32x32xf32>
    %cst_293 = arith.constant dense<0.000000e+00> : vector<4x32xf32>
    %347 = tpu.matmul %344, %346, %cst_293 {dimension_numbers = #tpu.dot_dimension_numbers<[1], [0], [0], [1], [0, 0, 1, 1], [], []>} : vector<4x32xf32>, vector<32x32xf32>, vector<4x32xf32> -> vector<4x32xf32>
    %348 = arith.addf %341, %347 : vector<4x32xf32>
    %c20 = arith.constant 20 : index
    %c0_294 = arith.constant 0 : index
    %c0_295 = arith.constant 0 : index
    %349 = vector.load %arg5[%c20, %c0_294, %c0_295] : memref<42x4x32xf32, #tpu.memory_space<vmem>>, vector<1x4x32xf32>
    %350 = vector.shape_cast %349 : vector<1x4x32xf32> to vector<4x32xf32>
    %cst_296 = arith.constant dense<0.000000e+00> : vector<4x32xf32>
    %351 = tpu.matmul %350, %335, %cst_296 {dimension_numbers = #tpu.dot_dimension_numbers<[1], [0], [0], [1], [0, 0, 1, 1], [], []>} : vector<4x32xf32>, vector<32x32xf32>, vector<4x32xf32> -> vector<4x32xf32>
    %c20_297 = arith.constant 20 : index
    %c0_298 = arith.constant 0 : index
    %c0_299 = arith.constant 0 : index
    %352 = vector.load %arg2[%c20_297, %c0_298, %c0_299] : memref<42x32x32xf32, #tpu.memory_space<vmem>>, vector<1x32x32xf32>
    %353 = vector.shape_cast %352 : vector<1x32x32xf32> to vector<32x32xf32>
    %cst_300 = arith.constant dense<0.000000e+00> : vector<4x32xf32>
    %354 = tpu.matmul %351, %353, %cst_300 {dimension_numbers = #tpu.dot_dimension_numbers<[1], [0], [0], [1], [0, 0, 1, 1], [], []>} : vector<4x32xf32>, vector<32x32xf32>, vector<4x32xf32> -> vector<4x32xf32>
    %355 = arith.addf %348, %354 : vector<4x32xf32>
    %c21 = arith.constant 21 : index
    %c0_301 = arith.constant 0 : index
    %c0_302 = arith.constant 0 : index
    %356 = vector.load %arg5[%c21, %c0_301, %c0_302] : memref<42x4x32xf32, #tpu.memory_space<vmem>>, vector<1x4x32xf32>
    %357 = vector.shape_cast %356 : vector<1x4x32xf32> to vector<4x32xf32>
    %cst_303 = arith.constant dense<0.000000e+00> : vector<4x32xf32>
    %358 = tpu.matmul %357, %335, %cst_303 {dimension_numbers = #tpu.dot_dimension_numbers<[1], [0], [0], [1], [0, 0, 1, 1], [], []>} : vector<4x32xf32>, vector<32x32xf32>, vector<4x32xf32> -> vector<4x32xf32>
    %c21_304 = arith.constant 21 : index
    %c0_305 = arith.constant 0 : index
    %c0_306 = arith.constant 0 : index
    %359 = vector.load %arg2[%c21_304, %c0_305, %c0_306] : memref<42x32x32xf32, #tpu.memory_space<vmem>>, vector<1x32x32xf32>
    %360 = vector.shape_cast %359 : vector<1x32x32xf32> to vector<32x32xf32>
    %cst_307 = arith.constant dense<0.000000e+00> : vector<4x32xf32>
    %361 = tpu.matmul %358, %360, %cst_307 {dimension_numbers = #tpu.dot_dimension_numbers<[1], [0], [0], [1], [0, 0, 1, 1], [], []>} : vector<4x32xf32>, vector<32x32xf32>, vector<4x32xf32> -> vector<4x32xf32>
    %362 = arith.addf %355, %361 : vector<4x32xf32>
    %c22 = arith.constant 22 : index
    %c0_308 = arith.constant 0 : index
    %c0_309 = arith.constant 0 : index
    %363 = vector.load %arg5[%c22, %c0_308, %c0_309] : memref<42x4x32xf32, #tpu.memory_space<vmem>>, vector<1x4x32xf32>
    %364 = vector.shape_cast %363 : vector<1x4x32xf32> to vector<4x32xf32>
    %cst_310 = arith.constant dense<0.000000e+00> : vector<4x32xf32>
    %365 = tpu.matmul %364, %335, %cst_310 {dimension_numbers = #tpu.dot_dimension_numbers<[1], [0], [0], [1], [0, 0, 1, 1], [], []>} : vector<4x32xf32>, vector<32x32xf32>, vector<4x32xf32> -> vector<4x32xf32>
    %c22_311 = arith.constant 22 : index
    %c0_312 = arith.constant 0 : index
    %c0_313 = arith.constant 0 : index
    %366 = vector.load %arg2[%c22_311, %c0_312, %c0_313] : memref<42x32x32xf32, #tpu.memory_space<vmem>>, vector<1x32x32xf32>
    %367 = vector.shape_cast %366 : vector<1x32x32xf32> to vector<32x32xf32>
    %cst_314 = arith.constant dense<0.000000e+00> : vector<4x32xf32>
    %368 = tpu.matmul %365, %367, %cst_314 {dimension_numbers = #tpu.dot_dimension_numbers<[1], [0], [0], [1], [0, 0, 1, 1], [], []>} : vector<4x32xf32>, vector<32x32xf32>, vector<4x32xf32> -> vector<4x32xf32>
    %369 = arith.addf %362, %368 : vector<4x32xf32>
    %c23 = arith.constant 23 : index
    %c0_315 = arith.constant 0 : index
    %c0_316 = arith.constant 0 : index
    %370 = vector.load %arg5[%c23, %c0_315, %c0_316] : memref<42x4x32xf32, #tpu.memory_space<vmem>>, vector<1x4x32xf32>
    %371 = vector.shape_cast %370 : vector<1x4x32xf32> to vector<4x32xf32>
    %cst_317 = arith.constant dense<0.000000e+00> : vector<4x32xf32>
    %372 = tpu.matmul %371, %335, %cst_317 {dimension_numbers = #tpu.dot_dimension_numbers<[1], [0], [0], [1], [0, 0, 1, 1], [], []>} : vector<4x32xf32>, vector<32x32xf32>, vector<4x32xf32> -> vector<4x32xf32>
    %c23_318 = arith.constant 23 : index
    %c0_319 = arith.constant 0 : index
    %c0_320 = arith.constant 0 : index
    %373 = vector.load %arg2[%c23_318, %c0_319, %c0_320] : memref<42x32x32xf32, #tpu.memory_space<vmem>>, vector<1x32x32xf32>
    %374 = vector.shape_cast %373 : vector<1x32x32xf32> to vector<32x32xf32>
    %cst_321 = arith.constant dense<0.000000e+00> : vector<4x32xf32>
    %375 = tpu.matmul %372, %374, %cst_321 {dimension_numbers = #tpu.dot_dimension_numbers<[1], [0], [0], [1], [0, 0, 1, 1], [], []>} : vector<4x32xf32>, vector<32x32xf32>, vector<4x32xf32> -> vector<4x32xf32>
    %376 = arith.addf %369, %375 : vector<4x32xf32>
    %c3_322 = arith.constant 3 : index
    %c0_323 = arith.constant 0 : index
    %c0_324 = arith.constant 0 : index
    %377 = vector.load %arg6[%c3_322, %c0_323, %c0_324] : memref<7x4x1xf32, #tpu.memory_space<vmem>>, vector<1x4x1xf32>
    %378 = vector.shape_cast %377 : vector<1x4x1xf32> to vector<4x1xf32>
    %379 = vector.broadcast %378 : vector<4x1xf32> to vector<4x32xf32>
    %380 = arith.addf %376, %379 : vector<4x32xf32>
    %c3_325 = arith.constant 3 : index
    %c0_326 = arith.constant 0 : index
    %c0_327 = arith.constant 0 : index
    %381 = vector.load %arg7[%c3_325, %c0_326, %c0_327] : memref<7x4x4xf32, #tpu.memory_space<vmem>>, vector<1x4x4xf32>
    %382 = vector.shape_cast %381 : vector<1x4x4xf32> to vector<4x4xf32>
    %cst_328 = arith.constant dense<0.000000e+00> : vector<4x32xf32>
    %383 = tpu.matmul %382, %380, %cst_328 {dimension_numbers = #tpu.dot_dimension_numbers<[1], [0], [0], [1], [0, 0, 1, 1], [], []>} : vector<4x4xf32>, vector<4x32xf32>, vector<4x32xf32> -> vector<4x32xf32>
    %c3_329 = arith.constant 3 : index
    %c0_330 = arith.constant 0 : index
    %c0_331 = arith.constant 0 : index
    %384 = vector.load %arg8[%c3_329, %c0_330, %c0_331] : memref<7x4x1xf32, #tpu.memory_space<vmem>>, vector<1x4x1xf32>
    %385 = vector.shape_cast %384 : vector<1x4x1xf32> to vector<4x1xf32>
    %386 = vector.broadcast %385 : vector<4x1xf32> to vector<4x32xf32>
    %387 = arith.addf %383, %386 : vector<4x32xf32>
    %388 = vector.shape_cast %387 : vector<4x32xf32> to vector<1x4x32xf32>
    %cst_332 = arith.constant dense<0.000000e+00> : vector<1xf32>
    %389 = vector.multi_reduction <add>, %388, %cst_332 [1, 2] : vector<1x4x32xf32> to vector<1xf32>
    %390 = vector.shape_cast %389 : vector<1xf32> to vector<1x1x1xf32>
    %391 = vector.extract %390[0, 0, 0] : f32 from vector<1x1x1xf32>
    %cst_333 = arith.constant 1.280000e+02 : f32
    %392 = arith.divf %391, %cst_333 : f32
    %393 = vector.broadcast %392 : f32 to vector<4x32xf32>
    %394 = arith.subf %387, %393 : vector<4x32xf32>
    %395 = vector.broadcast %392 : f32 to vector<4x32xf32>
    %396 = arith.subf %387, %395 : vector<4x32xf32>
    %397 = arith.mulf %394, %396 : vector<4x32xf32>
    %398 = vector.shape_cast %397 : vector<4x32xf32> to vector<1x4x32xf32>
    %cst_334 = arith.constant dense<0.000000e+00> : vector<1xf32>
    %399 = vector.multi_reduction <add>, %398, %cst_334 [1, 2] : vector<1x4x32xf32> to vector<1xf32>
    %400 = vector.shape_cast %399 : vector<1xf32> to vector<1x1x1xf32>
    %401 = vector.extract %400[0, 0, 0] : f32 from vector<1x1x1xf32>
    %cst_335 = arith.constant 1.280000e+02 : f32
    %402 = arith.divf %401, %cst_335 : f32
    %403 = vector.broadcast %392 : f32 to vector<4x32xf32>
    %404 = arith.subf %387, %403 : vector<4x32xf32>
    %cst_336 = arith.constant 9.99999993E-9 : f32
    %405 = arith.addf %402, %cst_336 : f32
    %406 = math.rsqrt %405 : f32
    %407 = vector.broadcast %406 : f32 to vector<4x32xf32>
    %408 = arith.mulf %404, %407 : vector<4x32xf32>
    %c3_337 = arith.constant 3 : index
    %c0_338 = arith.constant 0 : index
    %c0_339 = arith.constant 0 : index
    %409 = vector.load %arg9[%c3_337, %c0_338, %c0_339] : memref<7x4x1xf32, #tpu.memory_space<vmem>>, vector<1x4x1xf32>
    %410 = vector.shape_cast %409 : vector<1x4x1xf32> to vector<4x1xf32>
    %411 = vector.broadcast %410 : vector<4x1xf32> to vector<4x32xf32>
    %412 = arith.mulf %408, %411 : vector<4x32xf32>
    %c3_340 = arith.constant 3 : index
    %c0_341 = arith.constant 0 : index
    %c0_342 = arith.constant 0 : index
    %413 = vector.load %arg10[%c3_340, %c0_341, %c0_342] : memref<7x4x1xf32, #tpu.memory_space<vmem>>, vector<1x4x1xf32>
    %414 = vector.shape_cast %413 : vector<1x4x1xf32> to vector<4x1xf32>
    %415 = vector.broadcast %414 : vector<4x1xf32> to vector<4x32xf32>
    %416 = arith.addf %412, %415 : vector<4x32xf32>
    %c3_343 = arith.constant 3 : index
    %c0_344 = arith.constant 0 : index
    %c0_345 = arith.constant 0 : index
    %417 = vector.load %arg11[%c3_343, %c0_344, %c0_345] : memref<7x1x1xf32, #tpu.memory_space<vmem>>, vector<1x1x1xf32>
    %418 = vector.shape_cast %417 : vector<1x1x1xf32> to vector<1x1xf32>
    %cst_346 = arith.constant 0.000000e+00 : f32
    %419 = vector.broadcast %cst_346 : f32 to vector<4x32xf32>
    %420 = arith.maximumf %416, %419 : vector<4x32xf32>
    %cst_347 = arith.constant 0.000000e+00 : f32
    %421 = vector.broadcast %cst_347 : f32 to vector<4x32xf32>
    %422 = arith.minimumf %416, %421 : vector<4x32xf32>
    %423 = vector.broadcast %418 : vector<1x1xf32> to vector<4x32xf32>
    %424 = arith.mulf %423, %422 : vector<4x32xf32>
    %425 = arith.addf %420, %424 : vector<4x32xf32>
    %c16_348 = arith.constant 16 : index
    %c0_349 = arith.constant 0 : index
    %426 = vector.load %arg16[%c16_348, %c0_349] : memref<32x32xf32, #tpu.memory_space<vmem>>, vector<4x32xf32>
    tpu.vector_store %arg16[%c16_348, %c0_349], %425 {strides = array<i32>} : memref<32x32xf32, #tpu.memory_space<vmem>>, vector<4x32xf32>,
    %c0_350 = arith.constant 0 : index
    %c0_351 = arith.constant 0 : index
    %427 = vector.load %arg16[%c0_350, %c0_351] : memref<32x32xf32, #tpu.memory_space<vmem>>, vector<32x32xf32>
    %c24 = arith.constant 24 : index
    %c0_352 = arith.constant 0 : index
    %c0_353 = arith.constant 0 : index
    %428 = vector.load %arg5[%c24, %c0_352, %c0_353] : memref<42x4x32xf32, #tpu.memory_space<vmem>>, vector<1x4x32xf32>
    %429 = vector.shape_cast %428 : vector<1x4x32xf32> to vector<4x32xf32>
    %cst_354 = arith.constant dense<0.000000e+00> : vector<4x32xf32>
    %430 = tpu.matmul %429, %427, %cst_354 {dimension_numbers = #tpu.dot_dimension_numbers<[1], [0], [0], [1], [0, 0, 1, 1], [], []>} : vector<4x32xf32>, vector<32x32xf32>, vector<4x32xf32> -> vector<4x32xf32>
    %c24_355 = arith.constant 24 : index
    %c0_356 = arith.constant 0 : index
    %c0_357 = arith.constant 0 : index
    %431 = vector.load %arg2[%c24_355, %c0_356, %c0_357] : memref<42x32x32xf32, #tpu.memory_space<vmem>>, vector<1x32x32xf32>
    %432 = vector.shape_cast %431 : vector<1x32x32xf32> to vector<32x32xf32>
    %cst_358 = arith.constant dense<0.000000e+00> : vector<4x32xf32>
    %433 = tpu.matmul %430, %432, %cst_358 {dimension_numbers = #tpu.dot_dimension_numbers<[1], [0], [0], [1], [0, 0, 1, 1], [], []>} : vector<4x32xf32>, vector<32x32xf32>, vector<4x32xf32> -> vector<4x32xf32>
    %c25 = arith.constant 25 : index
    %c0_359 = arith.constant 0 : index
    %c0_360 = arith.constant 0 : index
    %434 = vector.load %arg5[%c25, %c0_359, %c0_360] : memref<42x4x32xf32, #tpu.memory_space<vmem>>, vector<1x4x32xf32>
    %435 = vector.shape_cast %434 : vector<1x4x32xf32> to vector<4x32xf32>
    %cst_361 = arith.constant dense<0.000000e+00> : vector<4x32xf32>
    %436 = tpu.matmul %435, %427, %cst_361 {dimension_numbers = #tpu.dot_dimension_numbers<[1], [0], [0], [1], [0, 0, 1, 1], [], []>} : vector<4x32xf32>, vector<32x32xf32>, vector<4x32xf32> -> vector<4x32xf32>
    %c25_362 = arith.constant 25 : index
    %c0_363 = arith.constant 0 : index
    %c0_364 = arith.constant 0 : index
    %437 = vector.load %arg2[%c25_362, %c0_363, %c0_364] : memref<42x32x32xf32, #tpu.memory_space<vmem>>, vector<1x32x32xf32>
    %438 = vector.shape_cast %437 : vector<1x32x32xf32> to vector<32x32xf32>
    %cst_365 = arith.constant dense<0.000000e+00> : vector<4x32xf32>
    %439 = tpu.matmul %436, %438, %cst_365 {dimension_numbers = #tpu.dot_dimension_numbers<[1], [0], [0], [1], [0, 0, 1, 1], [], []>} : vector<4x32xf32>, vector<32x32xf32>, vector<4x32xf32> -> vector<4x32xf32>
    %440 = arith.addf %433, %439 : vector<4x32xf32>
    %c26 = arith.constant 26 : index
    %c0_366 = arith.constant 0 : index
    %c0_367 = arith.constant 0 : index
    %441 = vector.load %arg5[%c26, %c0_366, %c0_367] : memref<42x4x32xf32, #tpu.memory_space<vmem>>, vector<1x4x32xf32>
    %442 = vector.shape_cast %441 : vector<1x4x32xf32> to vector<4x32xf32>
    %cst_368 = arith.constant dense<0.000000e+00> : vector<4x32xf32>
    %443 = tpu.matmul %442, %427, %cst_368 {dimension_numbers = #tpu.dot_dimension_numbers<[1], [0], [0], [1], [0, 0, 1, 1], [], []>} : vector<4x32xf32>, vector<32x32xf32>, vector<4x32xf32> -> vector<4x32xf32>
    %c26_369 = arith.constant 26 : index
    %c0_370 = arith.constant 0 : index
    %c0_371 = arith.constant 0 : index
    %444 = vector.load %arg2[%c26_369, %c0_370, %c0_371] : memref<42x32x32xf32, #tpu.memory_space<vmem>>, vector<1x32x32xf32>
    %445 = vector.shape_cast %444 : vector<1x32x32xf32> to vector<32x32xf32>
    %cst_372 = arith.constant dense<0.000000e+00> : vector<4x32xf32>
    %446 = tpu.matmul %443, %445, %cst_372 {dimension_numbers = #tpu.dot_dimension_numbers<[1], [0], [0], [1], [0, 0, 1, 1], [], []>} : vector<4x32xf32>, vector<32x32xf32>, vector<4x32xf32> -> vector<4x32xf32>
    %447 = arith.addf %440, %446 : vector<4x32xf32>
    %c27 = arith.constant 27 : index
    %c0_373 = arith.constant 0 : index
    %c0_374 = arith.constant 0 : index
    %448 = vector.load %arg5[%c27, %c0_373, %c0_374] : memref<42x4x32xf32, #tpu.memory_space<vmem>>, vector<1x4x32xf32>
    %449 = vector.shape_cast %448 : vector<1x4x32xf32> to vector<4x32xf32>
    %cst_375 = arith.constant dense<0.000000e+00> : vector<4x32xf32>
    %450 = tpu.matmul %449, %427, %cst_375 {dimension_numbers = #tpu.dot_dimension_numbers<[1], [0], [0], [1], [0, 0, 1, 1], [], []>} : vector<4x32xf32>, vector<32x32xf32>, vector<4x32xf32> -> vector<4x32xf32>
    %c27_376 = arith.constant 27 : index
    %c0_377 = arith.constant 0 : index
    %c0_378 = arith.constant 0 : index
    %451 = vector.load %arg2[%c27_376, %c0_377, %c0_378] : memref<42x32x32xf32, #tpu.memory_space<vmem>>, vector<1x32x32xf32>
    %452 = vector.shape_cast %451 : vector<1x32x32xf32> to vector<32x32xf32>
    %cst_379 = arith.constant dense<0.000000e+00> : vector<4x32xf32>
    %453 = tpu.matmul %450, %452, %cst_379 {dimension_numbers = #tpu.dot_dimension_numbers<[1], [0], [0], [1], [0, 0, 1, 1], [], []>} : vector<4x32xf32>, vector<32x32xf32>, vector<4x32xf32> -> vector<4x32xf32>
    %454 = arith.addf %447, %453 : vector<4x32xf32>
    %c28 = arith.constant 28 : index
    %c0_380 = arith.constant 0 : index
    %c0_381 = arith.constant 0 : index
    %455 = vector.load %arg5[%c28, %c0_380, %c0_381] : memref<42x4x32xf32, #tpu.memory_space<vmem>>, vector<1x4x32xf32>
    %456 = vector.shape_cast %455 : vector<1x4x32xf32> to vector<4x32xf32>
    %cst_382 = arith.constant dense<0.000000e+00> : vector<4x32xf32>
    %457 = tpu.matmul %456, %427, %cst_382 {dimension_numbers = #tpu.dot_dimension_numbers<[1], [0], [0], [1], [0, 0, 1, 1], [], []>} : vector<4x32xf32>, vector<32x32xf32>, vector<4x32xf32> -> vector<4x32xf32>
    %c28_383 = arith.constant 28 : index
    %c0_384 = arith.constant 0 : index
    %c0_385 = arith.constant 0 : index
    %458 = vector.load %arg2[%c28_383, %c0_384, %c0_385] : memref<42x32x32xf32, #tpu.memory_space<vmem>>, vector<1x32x32xf32>
    %459 = vector.shape_cast %458 : vector<1x32x32xf32> to vector<32x32xf32>
    %cst_386 = arith.constant dense<0.000000e+00> : vector<4x32xf32>
    %460 = tpu.matmul %457, %459, %cst_386 {dimension_numbers = #tpu.dot_dimension_numbers<[1], [0], [0], [1], [0, 0, 1, 1], [], []>} : vector<4x32xf32>, vector<32x32xf32>, vector<4x32xf32> -> vector<4x32xf32>
    %461 = arith.addf %454, %460 : vector<4x32xf32>
    %c29 = arith.constant 29 : index
    %c0_387 = arith.constant 0 : index
    %c0_388 = arith.constant 0 : index
    %462 = vector.load %arg5[%c29, %c0_387, %c0_388] : memref<42x4x32xf32, #tpu.memory_space<vmem>>, vector<1x4x32xf32>
    %463 = vector.shape_cast %462 : vector<1x4x32xf32> to vector<4x32xf32>
    %cst_389 = arith.constant dense<0.000000e+00> : vector<4x32xf32>
    %464 = tpu.matmul %463, %427, %cst_389 {dimension_numbers = #tpu.dot_dimension_numbers<[1], [0], [0], [1], [0, 0, 1, 1], [], []>} : vector<4x32xf32>, vector<32x32xf32>, vector<4x32xf32> -> vector<4x32xf32>
    %c29_390 = arith.constant 29 : index
    %c0_391 = arith.constant 0 : index
    %c0_392 = arith.constant 0 : index
    %465 = vector.load %arg2[%c29_390, %c0_391, %c0_392] : memref<42x32x32xf32, #tpu.memory_space<vmem>>, vector<1x32x32xf32>
    %466 = vector.shape_cast %465 : vector<1x32x32xf32> to vector<32x32xf32>
    %cst_393 = arith.constant dense<0.000000e+00> : vector<4x32xf32>
    %467 = tpu.matmul %464, %466, %cst_393 {dimension_numbers = #tpu.dot_dimension_numbers<[1], [0], [0], [1], [0, 0, 1, 1], [], []>} : vector<4x32xf32>, vector<32x32xf32>, vector<4x32xf32> -> vector<4x32xf32>
    %468 = arith.addf %461, %467 : vector<4x32xf32>
    %c4_394 = arith.constant 4 : index
    %c0_395 = arith.constant 0 : index
    %c0_396 = arith.constant 0 : index
    %469 = vector.load %arg6[%c4_394, %c0_395, %c0_396] : memref<7x4x1xf32, #tpu.memory_space<vmem>>, vector<1x4x1xf32>
    %470 = vector.shape_cast %469 : vector<1x4x1xf32> to vector<4x1xf32>
    %471 = vector.broadcast %470 : vector<4x1xf32> to vector<4x32xf32>
    %472 = arith.addf %468, %471 : vector<4x32xf32>
    %c4_397 = arith.constant 4 : index
    %c0_398 = arith.constant 0 : index
    %c0_399 = arith.constant 0 : index
    %473 = vector.load %arg7[%c4_397, %c0_398, %c0_399] : memref<7x4x4xf32, #tpu.memory_space<vmem>>, vector<1x4x4xf32>
    %474 = vector.shape_cast %473 : vector<1x4x4xf32> to vector<4x4xf32>
    %cst_400 = arith.constant dense<0.000000e+00> : vector<4x32xf32>
    %475 = tpu.matmul %474, %472, %cst_400 {dimension_numbers = #tpu.dot_dimension_numbers<[1], [0], [0], [1], [0, 0, 1, 1], [], []>} : vector<4x4xf32>, vector<4x32xf32>, vector<4x32xf32> -> vector<4x32xf32>
    %c4_401 = arith.constant 4 : index
    %c0_402 = arith.constant 0 : index
    %c0_403 = arith.constant 0 : index
    %476 = vector.load %arg8[%c4_401, %c0_402, %c0_403] : memref<7x4x1xf32, #tpu.memory_space<vmem>>, vector<1x4x1xf32>
    %477 = vector.shape_cast %476 : vector<1x4x1xf32> to vector<4x1xf32>
    %478 = vector.broadcast %477 : vector<4x1xf32> to vector<4x32xf32>
    %479 = arith.addf %475, %478 : vector<4x32xf32>
    %480 = vector.shape_cast %479 : vector<4x32xf32> to vector<1x4x32xf32>
    %cst_404 = arith.constant dense<0.000000e+00> : vector<1xf32>
    %481 = vector.multi_reduction <add>, %480, %cst_404 [1, 2] : vector<1x4x32xf32> to vector<1xf32>
    %482 = vector.shape_cast %481 : vector<1xf32> to vector<1x1x1xf32>
    %483 = vector.extract %482[0, 0, 0] : f32 from vector<1x1x1xf32>
    %cst_405 = arith.constant 1.280000e+02 : f32
    %484 = arith.divf %483, %cst_405 : f32
    %485 = vector.broadcast %484 : f32 to vector<4x32xf32>
    %486 = arith.subf %479, %485 : vector<4x32xf32>
    %487 = vector.broadcast %484 : f32 to vector<4x32xf32>
    %488 = arith.subf %479, %487 : vector<4x32xf32>
    %489 = arith.mulf %486, %488 : vector<4x32xf32>
    %490 = vector.shape_cast %489 : vector<4x32xf32> to vector<1x4x32xf32>
    %cst_406 = arith.constant dense<0.000000e+00> : vector<1xf32>
    %491 = vector.multi_reduction <add>, %490, %cst_406 [1, 2] : vector<1x4x32xf32> to vector<1xf32>
    %492 = vector.shape_cast %491 : vector<1xf32> to vector<1x1x1xf32>
    %493 = vector.extract %492[0, 0, 0] : f32 from vector<1x1x1xf32>
    %cst_407 = arith.constant 1.280000e+02 : f32
    %494 = arith.divf %493, %cst_407 : f32
    %495 = vector.broadcast %484 : f32 to vector<4x32xf32>
    %496 = arith.subf %479, %495 : vector<4x32xf32>
    %cst_408 = arith.constant 9.99999993E-9 : f32
    %497 = arith.addf %494, %cst_408 : f32
    %498 = math.rsqrt %497 : f32
    %499 = vector.broadcast %498 : f32 to vector<4x32xf32>
    %500 = arith.mulf %496, %499 : vector<4x32xf32>
    %c4_409 = arith.constant 4 : index
    %c0_410 = arith.constant 0 : index
    %c0_411 = arith.constant 0 : index
    %501 = vector.load %arg9[%c4_409, %c0_410, %c0_411] : memref<7x4x1xf32, #tpu.memory_space<vmem>>, vector<1x4x1xf32>
    %502 = vector.shape_cast %501 : vector<1x4x1xf32> to vector<4x1xf32>
    %503 = vector.broadcast %502 : vector<4x1xf32> to vector<4x32xf32>
    %504 = arith.mulf %500, %503 : vector<4x32xf32>
    %c4_412 = arith.constant 4 : index
    %c0_413 = arith.constant 0 : index
    %c0_414 = arith.constant 0 : index
    %505 = vector.load %arg10[%c4_412, %c0_413, %c0_414] : memref<7x4x1xf32, #tpu.memory_space<vmem>>, vector<1x4x1xf32>
    %506 = vector.shape_cast %505 : vector<1x4x1xf32> to vector<4x1xf32>
    %507 = vector.broadcast %506 : vector<4x1xf32> to vector<4x32xf32>
    %508 = arith.addf %504, %507 : vector<4x32xf32>
    %c4_415 = arith.constant 4 : index
    %c0_416 = arith.constant 0 : index
    %c0_417 = arith.constant 0 : index
    %509 = vector.load %arg11[%c4_415, %c0_416, %c0_417] : memref<7x1x1xf32, #tpu.memory_space<vmem>>, vector<1x1x1xf32>
    %510 = vector.shape_cast %509 : vector<1x1x1xf32> to vector<1x1xf32>
    %cst_418 = arith.constant 0.000000e+00 : f32
    %511 = vector.broadcast %cst_418 : f32 to vector<4x32xf32>
    %512 = arith.maximumf %508, %511 : vector<4x32xf32>
    %cst_419 = arith.constant 0.000000e+00 : f32
    %513 = vector.broadcast %cst_419 : f32 to vector<4x32xf32>
    %514 = arith.minimumf %508, %513 : vector<4x32xf32>
    %515 = vector.broadcast %510 : vector<1x1xf32> to vector<4x32xf32>
    %516 = arith.mulf %515, %514 : vector<4x32xf32>
    %517 = arith.addf %512, %516 : vector<4x32xf32>
    %c20_420 = arith.constant 20 : index
    %c0_421 = arith.constant 0 : index
    %518 = vector.load %arg16[%c20_420, %c0_421] : memref<32x32xf32, #tpu.memory_space<vmem>>, vector<4x32xf32>
    tpu.vector_store %arg16[%c20_420, %c0_421], %517 {strides = array<i32>} : memref<32x32xf32, #tpu.memory_space<vmem>>, vector<4x32xf32>,
    %c0_422 = arith.constant 0 : index
    %c0_423 = arith.constant 0 : index
    %519 = vector.load %arg16[%c0_422, %c0_423] : memref<32x32xf32, #tpu.memory_space<vmem>>, vector<32x32xf32>
    %c30 = arith.constant 30 : index
    %c0_424 = arith.constant 0 : index
    %c0_425 = arith.constant 0 : index
    %520 = vector.load %arg5[%c30, %c0_424, %c0_425] : memref<42x4x32xf32, #tpu.memory_space<vmem>>, vector<1x4x32xf32>
    %521 = vector.shape_cast %520 : vector<1x4x32xf32> to vector<4x32xf32>
    %cst_426 = arith.constant dense<0.000000e+00> : vector<4x32xf32>
    %522 = tpu.matmul %521, %519, %cst_426 {dimension_numbers = #tpu.dot_dimension_numbers<[1], [0], [0], [1], [0, 0, 1, 1], [], []>} : vector<4x32xf32>, vector<32x32xf32>, vector<4x32xf32> -> vector<4x32xf32>
    %c30_427 = arith.constant 30 : index
    %c0_428 = arith.constant 0 : index
    %c0_429 = arith.constant 0 : index
    %523 = vector.load %arg2[%c30_427, %c0_428, %c0_429] : memref<42x32x32xf32, #tpu.memory_space<vmem>>, vector<1x32x32xf32>
    %524 = vector.shape_cast %523 : vector<1x32x32xf32> to vector<32x32xf32>
    %cst_430 = arith.constant dense<0.000000e+00> : vector<4x32xf32>
    %525 = tpu.matmul %522, %524, %cst_430 {dimension_numbers = #tpu.dot_dimension_numbers<[1], [0], [0], [1], [0, 0, 1, 1], [], []>} : vector<4x32xf32>, vector<32x32xf32>, vector<4x32xf32> -> vector<4x32xf32>
    %c31 = arith.constant 31 : index
    %c0_431 = arith.constant 0 : index
    %c0_432 = arith.constant 0 : index
    %526 = vector.load %arg5[%c31, %c0_431, %c0_432] : memref<42x4x32xf32, #tpu.memory_space<vmem>>, vector<1x4x32xf32>
    %527 = vector.shape_cast %526 : vector<1x4x32xf32> to vector<4x32xf32>
    %cst_433 = arith.constant dense<0.000000e+00> : vector<4x32xf32>
    %528 = tpu.matmul %527, %519, %cst_433 {dimension_numbers = #tpu.dot_dimension_numbers<[1], [0], [0], [1], [0, 0, 1, 1], [], []>} : vector<4x32xf32>, vector<32x32xf32>, vector<4x32xf32> -> vector<4x32xf32>
    %c31_434 = arith.constant 31 : index
    %c0_435 = arith.constant 0 : index
    %c0_436 = arith.constant 0 : index
    %529 = vector.load %arg2[%c31_434, %c0_435, %c0_436] : memref<42x32x32xf32, #tpu.memory_space<vmem>>, vector<1x32x32xf32>
    %530 = vector.shape_cast %529 : vector<1x32x32xf32> to vector<32x32xf32>
    %cst_437 = arith.constant dense<0.000000e+00> : vector<4x32xf32>
    %531 = tpu.matmul %528, %530, %cst_437 {dimension_numbers = #tpu.dot_dimension_numbers<[1], [0], [0], [1], [0, 0, 1, 1], [], []>} : vector<4x32xf32>, vector<32x32xf32>, vector<4x32xf32> -> vector<4x32xf32>
    %532 = arith.addf %525, %531 : vector<4x32xf32>
    %c32 = arith.constant 32 : index
    %c0_438 = arith.constant 0 : index
    %c0_439 = arith.constant 0 : index
    %533 = vector.load %arg5[%c32, %c0_438, %c0_439] : memref<42x4x32xf32, #tpu.memory_space<vmem>>, vector<1x4x32xf32>
    %534 = vector.shape_cast %533 : vector<1x4x32xf32> to vector<4x32xf32>
    %cst_440 = arith.constant dense<0.000000e+00> : vector<4x32xf32>
    %535 = tpu.matmul %534, %519, %cst_440 {dimension_numbers = #tpu.dot_dimension_numbers<[1], [0], [0], [1], [0, 0, 1, 1], [], []>} : vector<4x32xf32>, vector<32x32xf32>, vector<4x32xf32> -> vector<4x32xf32>
    %c32_441 = arith.constant 32 : index
    %c0_442 = arith.constant 0 : index
    %c0_443 = arith.constant 0 : index
    %536 = vector.load %arg2[%c32_441, %c0_442, %c0_443] : memref<42x32x32xf32, #tpu.memory_space<vmem>>, vector<1x32x32xf32>
    %537 = vector.shape_cast %536 : vector<1x32x32xf32> to vector<32x32xf32>
    %cst_444 = arith.constant dense<0.000000e+00> : vector<4x32xf32>
    %538 = tpu.matmul %535, %537, %cst_444 {dimension_numbers = #tpu.dot_dimension_numbers<[1], [0], [0], [1], [0, 0, 1, 1], [], []>} : vector<4x32xf32>, vector<32x32xf32>, vector<4x32xf32> -> vector<4x32xf32>
    %539 = arith.addf %532, %538 : vector<4x32xf32>
    %c33 = arith.constant 33 : index
    %c0_445 = arith.constant 0 : index
    %c0_446 = arith.constant 0 : index
    %540 = vector.load %arg5[%c33, %c0_445, %c0_446] : memref<42x4x32xf32, #tpu.memory_space<vmem>>, vector<1x4x32xf32>
    %541 = vector.shape_cast %540 : vector<1x4x32xf32> to vector<4x32xf32>
    %cst_447 = arith.constant dense<0.000000e+00> : vector<4x32xf32>
    %542 = tpu.matmul %541, %519, %cst_447 {dimension_numbers = #tpu.dot_dimension_numbers<[1], [0], [0], [1], [0, 0, 1, 1], [], []>} : vector<4x32xf32>, vector<32x32xf32>, vector<4x32xf32> -> vector<4x32xf32>
    %c33_448 = arith.constant 33 : index
    %c0_449 = arith.constant 0 : index
    %c0_450 = arith.constant 0 : index
    %543 = vector.load %arg2[%c33_448, %c0_449, %c0_450] : memref<42x32x32xf32, #tpu.memory_space<vmem>>, vector<1x32x32xf32>
    %544 = vector.shape_cast %543 : vector<1x32x32xf32> to vector<32x32xf32>
    %cst_451 = arith.constant dense<0.000000e+00> : vector<4x32xf32>
    %545 = tpu.matmul %542, %544, %cst_451 {dimension_numbers = #tpu.dot_dimension_numbers<[1], [0], [0], [1], [0, 0, 1, 1], [], []>} : vector<4x32xf32>, vector<32x32xf32>, vector<4x32xf32> -> vector<4x32xf32>
    %546 = arith.addf %539, %545 : vector<4x32xf32>
    %c34 = arith.constant 34 : index
    %c0_452 = arith.constant 0 : index
    %c0_453 = arith.constant 0 : index
    %547 = vector.load %arg5[%c34, %c0_452, %c0_453] : memref<42x4x32xf32, #tpu.memory_space<vmem>>, vector<1x4x32xf32>
    %548 = vector.shape_cast %547 : vector<1x4x32xf32> to vector<4x32xf32>
    %cst_454 = arith.constant dense<0.000000e+00> : vector<4x32xf32>
    %549 = tpu.matmul %548, %519, %cst_454 {dimension_numbers = #tpu.dot_dimension_numbers<[1], [0], [0], [1], [0, 0, 1, 1], [], []>} : vector<4x32xf32>, vector<32x32xf32>, vector<4x32xf32> -> vector<4x32xf32>
    %c34_455 = arith.constant 34 : index
    %c0_456 = arith.constant 0 : index
    %c0_457 = arith.constant 0 : index
    %550 = vector.load %arg2[%c34_455, %c0_456, %c0_457] : memref<42x32x32xf32, #tpu.memory_space<vmem>>, vector<1x32x32xf32>
    %551 = vector.shape_cast %550 : vector<1x32x32xf32> to vector<32x32xf32>
    %cst_458 = arith.constant dense<0.000000e+00> : vector<4x32xf32>
    %552 = tpu.matmul %549, %551, %cst_458 {dimension_numbers = #tpu.dot_dimension_numbers<[1], [0], [0], [1], [0, 0, 1, 1], [], []>} : vector<4x32xf32>, vector<32x32xf32>, vector<4x32xf32> -> vector<4x32xf32>
    %553 = arith.addf %546, %552 : vector<4x32xf32>
    %c35 = arith.constant 35 : index
    %c0_459 = arith.constant 0 : index
    %c0_460 = arith.constant 0 : index
    %554 = vector.load %arg5[%c35, %c0_459, %c0_460] : memref<42x4x32xf32, #tpu.memory_space<vmem>>, vector<1x4x32xf32>
    %555 = vector.shape_cast %554 : vector<1x4x32xf32> to vector<4x32xf32>
    %cst_461 = arith.constant dense<0.000000e+00> : vector<4x32xf32>
    %556 = tpu.matmul %555, %519, %cst_461 {dimension_numbers = #tpu.dot_dimension_numbers<[1], [0], [0], [1], [0, 0, 1, 1], [], []>} : vector<4x32xf32>, vector<32x32xf32>, vector<4x32xf32> -> vector<4x32xf32>
    %c35_462 = arith.constant 35 : index
    %c0_463 = arith.constant 0 : index
    %c0_464 = arith.constant 0 : index
    %557 = vector.load %arg2[%c35_462, %c0_463, %c0_464] : memref<42x32x32xf32, #tpu.memory_space<vmem>>, vector<1x32x32xf32>
    %558 = vector.shape_cast %557 : vector<1x32x32xf32> to vector<32x32xf32>
    %cst_465 = arith.constant dense<0.000000e+00> : vector<4x32xf32>
    %559 = tpu.matmul %556, %558, %cst_465 {dimension_numbers = #tpu.dot_dimension_numbers<[1], [0], [0], [1], [0, 0, 1, 1], [], []>} : vector<4x32xf32>, vector<32x32xf32>, vector<4x32xf32> -> vector<4x32xf32>
    %560 = arith.addf %553, %559 : vector<4x32xf32>
    %c5_466 = arith.constant 5 : index
    %c0_467 = arith.constant 0 : index
    %c0_468 = arith.constant 0 : index
    %561 = vector.load %arg6[%c5_466, %c0_467, %c0_468] : memref<7x4x1xf32, #tpu.memory_space<vmem>>, vector<1x4x1xf32>
    %562 = vector.shape_cast %561 : vector<1x4x1xf32> to vector<4x1xf32>
    %563 = vector.broadcast %562 : vector<4x1xf32> to vector<4x32xf32>
    %564 = arith.addf %560, %563 : vector<4x32xf32>
    %c5_469 = arith.constant 5 : index
    %c0_470 = arith.constant 0 : index
    %c0_471 = arith.constant 0 : index
    %565 = vector.load %arg7[%c5_469, %c0_470, %c0_471] : memref<7x4x4xf32, #tpu.memory_space<vmem>>, vector<1x4x4xf32>
    %566 = vector.shape_cast %565 : vector<1x4x4xf32> to vector<4x4xf32>
    %cst_472 = arith.constant dense<0.000000e+00> : vector<4x32xf32>
    %567 = tpu.matmul %566, %564, %cst_472 {dimension_numbers = #tpu.dot_dimension_numbers<[1], [0], [0], [1], [0, 0, 1, 1], [], []>} : vector<4x4xf32>, vector<4x32xf32>, vector<4x32xf32> -> vector<4x32xf32>
    %c5_473 = arith.constant 5 : index
    %c0_474 = arith.constant 0 : index
    %c0_475 = arith.constant 0 : index
    %568 = vector.load %arg8[%c5_473, %c0_474, %c0_475] : memref<7x4x1xf32, #tpu.memory_space<vmem>>, vector<1x4x1xf32>
    %569 = vector.shape_cast %568 : vector<1x4x1xf32> to vector<4x1xf32>
    %570 = vector.broadcast %569 : vector<4x1xf32> to vector<4x32xf32>
    %571 = arith.addf %567, %570 : vector<4x32xf32>
    %572 = vector.shape_cast %571 : vector<4x32xf32> to vector<1x4x32xf32>
    %cst_476 = arith.constant dense<0.000000e+00> : vector<1xf32>
    %573 = vector.multi_reduction <add>, %572, %cst_476 [1, 2] : vector<1x4x32xf32> to vector<1xf32>
    %574 = vector.shape_cast %573 : vector<1xf32> to vector<1x1x1xf32>
    %575 = vector.extract %574[0, 0, 0] : f32 from vector<1x1x1xf32>
    %cst_477 = arith.constant 1.280000e+02 : f32
    %576 = arith.divf %575, %cst_477 : f32
    %577 = vector.broadcast %576 : f32 to vector<4x32xf32>
    %578 = arith.subf %571, %577 : vector<4x32xf32>
    %579 = vector.broadcast %576 : f32 to vector<4x32xf32>
    %580 = arith.subf %571, %579 : vector<4x32xf32>
    %581 = arith.mulf %578, %580 : vector<4x32xf32>
    %582 = vector.shape_cast %581 : vector<4x32xf32> to vector<1x4x32xf32>
    %cst_478 = arith.constant dense<0.000000e+00> : vector<1xf32>
    %583 = vector.multi_reduction <add>, %582, %cst_478 [1, 2] : vector<1x4x32xf32> to vector<1xf32>
    %584 = vector.shape_cast %583 : vector<1xf32> to vector<1x1x1xf32>
    %585 = vector.extract %584[0, 0, 0] : f32 from vector<1x1x1xf32>
    %cst_479 = arith.constant 1.280000e+02 : f32
    %586 = arith.divf %585, %cst_479 : f32
    %587 = vector.broadcast %576 : f32 to vector<4x32xf32>
    %588 = arith.subf %571, %587 : vector<4x32xf32>
    %cst_480 = arith.constant 9.99999993E-9 : f32
    %589 = arith.addf %586, %cst_480 : f32
    %590 = math.rsqrt %589 : f32
    %591 = vector.broadcast %590 : f32 to vector<4x32xf32>
    %592 = arith.mulf %588, %591 : vector<4x32xf32>
    %c5_481 = arith.constant 5 : index
    %c0_482 = arith.constant 0 : index
    %c0_483 = arith.constant 0 : index
    %593 = vector.load %arg9[%c5_481, %c0_482, %c0_483] : memref<7x4x1xf32, #tpu.memory_space<vmem>>, vector<1x4x1xf32>
    %594 = vector.shape_cast %593 : vector<1x4x1xf32> to vector<4x1xf32>
    %595 = vector.broadcast %594 : vector<4x1xf32> to vector<4x32xf32>
    %596 = arith.mulf %592, %595 : vector<4x32xf32>
    %c5_484 = arith.constant 5 : index
    %c0_485 = arith.constant 0 : index
    %c0_486 = arith.constant 0 : index
    %597 = vector.load %arg10[%c5_484, %c0_485, %c0_486] : memref<7x4x1xf32, #tpu.memory_space<vmem>>, vector<1x4x1xf32>
    %598 = vector.shape_cast %597 : vector<1x4x1xf32> to vector<4x1xf32>
    %599 = vector.broadcast %598 : vector<4x1xf32> to vector<4x32xf32>
    %600 = arith.addf %596, %599 : vector<4x32xf32>
    %c5_487 = arith.constant 5 : index
    %c0_488 = arith.constant 0 : index
    %c0_489 = arith.constant 0 : index
    %601 = vector.load %arg11[%c5_487, %c0_488, %c0_489] : memref<7x1x1xf32, #tpu.memory_space<vmem>>, vector<1x1x1xf32>
    %602 = vector.shape_cast %601 : vector<1x1x1xf32> to vector<1x1xf32>
    %cst_490 = arith.constant 0.000000e+00 : f32
    %603 = vector.broadcast %cst_490 : f32 to vector<4x32xf32>
    %604 = arith.maximumf %600, %603 : vector<4x32xf32>
    %cst_491 = arith.constant 0.000000e+00 : f32
    %605 = vector.broadcast %cst_491 : f32 to vector<4x32xf32>
    %606 = arith.minimumf %600, %605 : vector<4x32xf32>
    %607 = vector.broadcast %602 : vector<1x1xf32> to vector<4x32xf32>
    %608 = arith.mulf %607, %606 : vector<4x32xf32>
    %609 = arith.addf %604, %608 : vector<4x32xf32>
    %c24_492 = arith.constant 24 : index
    %c0_493 = arith.constant 0 : index
    %610 = vector.load %arg16[%c24_492, %c0_493] : memref<32x32xf32, #tpu.memory_space<vmem>>, vector<4x32xf32>
    tpu.vector_store %arg16[%c24_492, %c0_493], %609 {strides = array<i32>} : memref<32x32xf32, #tpu.memory_space<vmem>>, vector<4x32xf32>,
    %c0_494 = arith.constant 0 : index
    %c0_495 = arith.constant 0 : index
    %611 = vector.load %arg16[%c0_494, %c0_495] : memref<32x32xf32, #tpu.memory_space<vmem>>, vector<32x32xf32>
    %c36 = arith.constant 36 : index
    %c0_496 = arith.constant 0 : index
    %c0_497 = arith.constant 0 : index
    %612 = vector.load %arg5[%c36, %c0_496, %c0_497] : memref<42x4x32xf32, #tpu.memory_space<vmem>>, vector<1x4x32xf32>
    %613 = vector.shape_cast %612 : vector<1x4x32xf32> to vector<4x32xf32>
    %cst_498 = arith.constant dense<0.000000e+00> : vector<4x32xf32>
    %614 = tpu.matmul %613, %611, %cst_498 {dimension_numbers = #tpu.dot_dimension_numbers<[1], [0], [0], [1], [0, 0, 1, 1], [], []>} : vector<4x32xf32>, vector<32x32xf32>, vector<4x32xf32> -> vector<4x32xf32>
    %c36_499 = arith.constant 36 : index
    %c0_500 = arith.constant 0 : index
    %c0_501 = arith.constant 0 : index
    %615 = vector.load %arg2[%c36_499, %c0_500, %c0_501] : memref<42x32x32xf32, #tpu.memory_space<vmem>>, vector<1x32x32xf32>
    %616 = vector.shape_cast %615 : vector<1x32x32xf32> to vector<32x32xf32>
    %cst_502 = arith.constant dense<0.000000e+00> : vector<4x32xf32>
    %617 = tpu.matmul %614, %616, %cst_502 {dimension_numbers = #tpu.dot_dimension_numbers<[1], [0], [0], [1], [0, 0, 1, 1], [], []>} : vector<4x32xf32>, vector<32x32xf32>, vector<4x32xf32> -> vector<4x32xf32>
    %c37 = arith.constant 37 : index
    %c0_503 = arith.constant 0 : index
    %c0_504 = arith.constant 0 : index
    %618 = vector.load %arg5[%c37, %c0_503, %c0_504] : memref<42x4x32xf32, #tpu.memory_space<vmem>>, vector<1x4x32xf32>
    %619 = vector.shape_cast %618 : vector<1x4x32xf32> to vector<4x32xf32>
    %cst_505 = arith.constant dense<0.000000e+00> : vector<4x32xf32>
    %620 = tpu.matmul %619, %611, %cst_505 {dimension_numbers = #tpu.dot_dimension_numbers<[1], [0], [0], [1], [0, 0, 1, 1], [], []>} : vector<4x32xf32>, vector<32x32xf32>, vector<4x32xf32> -> vector<4x32xf32>
    %c37_506 = arith.constant 37 : index
    %c0_507 = arith.constant 0 : index
    %c0_508 = arith.constant 0 : index
    %621 = vector.load %arg2[%c37_506, %c0_507, %c0_508] : memref<42x32x32xf32, #tpu.memory_space<vmem>>, vector<1x32x32xf32>
    %622 = vector.shape_cast %621 : vector<1x32x32xf32> to vector<32x32xf32>
    %cst_509 = arith.constant dense<0.000000e+00> : vector<4x32xf32>
    %623 = tpu.matmul %620, %622, %cst_509 {dimension_numbers = #tpu.dot_dimension_numbers<[1], [0], [0], [1], [0, 0, 1, 1], [], []>} : vector<4x32xf32>, vector<32x32xf32>, vector<4x32xf32> -> vector<4x32xf32>
    %624 = arith.addf %617, %623 : vector<4x32xf32>
    %c38 = arith.constant 38 : index
    %c0_510 = arith.constant 0 : index
    %c0_511 = arith.constant 0 : index
    %625 = vector.load %arg5[%c38, %c0_510, %c0_511] : memref<42x4x32xf32, #tpu.memory_space<vmem>>, vector<1x4x32xf32>
    %626 = vector.shape_cast %625 : vector<1x4x32xf32> to vector<4x32xf32>
    %cst_512 = arith.constant dense<0.000000e+00> : vector<4x32xf32>
    %627 = tpu.matmul %626, %611, %cst_512 {dimension_numbers = #tpu.dot_dimension_numbers<[1], [0], [0], [1], [0, 0, 1, 1], [], []>} : vector<4x32xf32>, vector<32x32xf32>, vector<4x32xf32> -> vector<4x32xf32>
    %c38_513 = arith.constant 38 : index
    %c0_514 = arith.constant 0 : index
    %c0_515 = arith.constant 0 : index
    %628 = vector.load %arg2[%c38_513, %c0_514, %c0_515] : memref<42x32x32xf32, #tpu.memory_space<vmem>>, vector<1x32x32xf32>
    %629 = vector.shape_cast %628 : vector<1x32x32xf32> to vector<32x32xf32>
    %cst_516 = arith.constant dense<0.000000e+00> : vector<4x32xf32>
    %630 = tpu.matmul %627, %629, %cst_516 {dimension_numbers = #tpu.dot_dimension_numbers<[1], [0], [0], [1], [0, 0, 1, 1], [], []>} : vector<4x32xf32>, vector<32x32xf32>, vector<4x32xf32> -> vector<4x32xf32>
    %631 = arith.addf %624, %630 : vector<4x32xf32>
    %c39 = arith.constant 39 : index
    %c0_517 = arith.constant 0 : index
    %c0_518 = arith.constant 0 : index
    %632 = vector.load %arg5[%c39, %c0_517, %c0_518] : memref<42x4x32xf32, #tpu.memory_space<vmem>>, vector<1x4x32xf32>
    %633 = vector.shape_cast %632 : vector<1x4x32xf32> to vector<4x32xf32>
    %cst_519 = arith.constant dense<0.000000e+00> : vector<4x32xf32>
    %634 = tpu.matmul %633, %611, %cst_519 {dimension_numbers = #tpu.dot_dimension_numbers<[1], [0], [0], [1], [0, 0, 1, 1], [], []>} : vector<4x32xf32>, vector<32x32xf32>, vector<4x32xf32> -> vector<4x32xf32>
    %c39_520 = arith.constant 39 : index
    %c0_521 = arith.constant 0 : index
    %c0_522 = arith.constant 0 : index
    %635 = vector.load %arg2[%c39_520, %c0_521, %c0_522] : memref<42x32x32xf32, #tpu.memory_space<vmem>>, vector<1x32x32xf32>
    %636 = vector.shape_cast %635 : vector<1x32x32xf32> to vector<32x32xf32>
    %cst_523 = arith.constant dense<0.000000e+00> : vector<4x32xf32>
    %637 = tpu.matmul %634, %636, %cst_523 {dimension_numbers = #tpu.dot_dimension_numbers<[1], [0], [0], [1], [0, 0, 1, 1], [], []>} : vector<4x32xf32>, vector<32x32xf32>, vector<4x32xf32> -> vector<4x32xf32>
    %638 = arith.addf %631, %637 : vector<4x32xf32>
    %c40 = arith.constant 40 : index
    %c0_524 = arith.constant 0 : index
    %c0_525 = arith.constant 0 : index
    %639 = vector.load %arg5[%c40, %c0_524, %c0_525] : memref<42x4x32xf32, #tpu.memory_space<vmem>>, vector<1x4x32xf32>
    %640 = vector.shape_cast %639 : vector<1x4x32xf32> to vector<4x32xf32>
    %cst_526 = arith.constant dense<0.000000e+00> : vector<4x32xf32>
    %641 = tpu.matmul %640, %611, %cst_526 {dimension_numbers = #tpu.dot_dimension_numbers<[1], [0], [0], [1], [0, 0, 1, 1], [], []>} : vector<4x32xf32>, vector<32x32xf32>, vector<4x32xf32> -> vector<4x32xf32>
    %c40_527 = arith.constant 40 : index
    %c0_528 = arith.constant 0 : index
    %c0_529 = arith.constant 0 : index
    %642 = vector.load %arg2[%c40_527, %c0_528, %c0_529] : memref<42x32x32xf32, #tpu.memory_space<vmem>>, vector<1x32x32xf32>
    %643 = vector.shape_cast %642 : vector<1x32x32xf32> to vector<32x32xf32>
    %cst_530 = arith.constant dense<0.000000e+00> : vector<4x32xf32>
    %644 = tpu.matmul %641, %643, %cst_530 {dimension_numbers = #tpu.dot_dimension_numbers<[1], [0], [0], [1], [0, 0, 1, 1], [], []>} : vector<4x32xf32>, vector<32x32xf32>, vector<4x32xf32> -> vector<4x32xf32>
    %645 = arith.addf %638, %644 : vector<4x32xf32>
    %c41 = arith.constant 41 : index
    %c0_531 = arith.constant 0 : index
    %c0_532 = arith.constant 0 : index
    %646 = vector.load %arg5[%c41, %c0_531, %c0_532] : memref<42x4x32xf32, #tpu.memory_space<vmem>>, vector<1x4x32xf32>
    %647 = vector.shape_cast %646 : vector<1x4x32xf32> to vector<4x32xf32>
    %cst_533 = arith.constant dense<0.000000e+00> : vector<4x32xf32>
    %648 = tpu.matmul %647, %611, %cst_533 {dimension_numbers = #tpu.dot_dimension_numbers<[1], [0], [0], [1], [0, 0, 1, 1], [], []>} : vector<4x32xf32>, vector<32x32xf32>, vector<4x32xf32> -> vector<4x32xf32>
    %c41_534 = arith.constant 41 : index
    %c0_535 = arith.constant 0 : index
    %c0_536 = arith.constant 0 : index
    %649 = vector.load %arg2[%c41_534, %c0_535, %c0_536] : memref<42x32x32xf32, #tpu.memory_space<vmem>>, vector<1x32x32xf32>
    %650 = vector.shape_cast %649 : vector<1x32x32xf32> to vector<32x32xf32>
    %cst_537 = arith.constant dense<0.000000e+00> : vector<4x32xf32>
    %651 = tpu.matmul %648, %650, %cst_537 {dimension_numbers = #tpu.dot_dimension_numbers<[1], [0], [0], [1], [0, 0, 1, 1], [], []>} : vector<4x32xf32>, vector<32x32xf32>, vector<4x32xf32> -> vector<4x32xf32>
    %652 = arith.addf %645, %651 : vector<4x32xf32>
    %c6_538 = arith.constant 6 : index
    %c0_539 = arith.constant 0 : index
    %c0_540 = arith.constant 0 : index
    %653 = vector.load %arg6[%c6_538, %c0_539, %c0_540] : memref<7x4x1xf32, #tpu.memory_space<vmem>>, vector<1x4x1xf32>
    %654 = vector.shape_cast %653 : vector<1x4x1xf32> to vector<4x1xf32>
    %655 = vector.broadcast %654 : vector<4x1xf32> to vector<4x32xf32>
    %656 = arith.addf %652, %655 : vector<4x32xf32>
    %c6_541 = arith.constant 6 : index
    %c0_542 = arith.constant 0 : index
    %c0_543 = arith.constant 0 : index
    %657 = vector.load %arg7[%c6_541, %c0_542, %c0_543] : memref<7x4x4xf32, #tpu.memory_space<vmem>>, vector<1x4x4xf32>
    %658 = vector.shape_cast %657 : vector<1x4x4xf32> to vector<4x4xf32>
    %cst_544 = arith.constant dense<0.000000e+00> : vector<4x32xf32>
    %659 = tpu.matmul %658, %656, %cst_544 {dimension_numbers = #tpu.dot_dimension_numbers<[1], [0], [0], [1], [0, 0, 1, 1], [], []>} : vector<4x4xf32>, vector<4x32xf32>, vector<4x32xf32> -> vector<4x32xf32>
    %c6_545 = arith.constant 6 : index
    %c0_546 = arith.constant 0 : index
    %c0_547 = arith.constant 0 : index
    %660 = vector.load %arg8[%c6_545, %c0_546, %c0_547] : memref<7x4x1xf32, #tpu.memory_space<vmem>>, vector<1x4x1xf32>
    %661 = vector.shape_cast %660 : vector<1x4x1xf32> to vector<4x1xf32>
    %662 = vector.broadcast %661 : vector<4x1xf32> to vector<4x32xf32>
    %663 = arith.addf %659, %662 : vector<4x32xf32>
    %664 = vector.shape_cast %663 : vector<4x32xf32> to vector<1x4x32xf32>
    %cst_548 = arith.constant dense<0.000000e+00> : vector<1xf32>
    %665 = vector.multi_reduction <add>, %664, %cst_548 [1, 2] : vector<1x4x32xf32> to vector<1xf32>
    %666 = vector.shape_cast %665 : vector<1xf32> to vector<1x1x1xf32>
    %667 = vector.extract %666[0, 0, 0] : f32 from vector<1x1x1xf32>
    %cst_549 = arith.constant 1.280000e+02 : f32
    %668 = arith.divf %667, %cst_549 : f32
    %669 = vector.broadcast %668 : f32 to vector<4x32xf32>
    %670 = arith.subf %663, %669 : vector<4x32xf32>
    %671 = vector.broadcast %668 : f32 to vector<4x32xf32>
    %672 = arith.subf %663, %671 : vector<4x32xf32>
    %673 = arith.mulf %670, %672 : vector<4x32xf32>
    %674 = vector.shape_cast %673 : vector<4x32xf32> to vector<1x4x32xf32>
    %cst_550 = arith.constant dense<0.000000e+00> : vector<1xf32>
    %675 = vector.multi_reduction <add>, %674, %cst_550 [1, 2] : vector<1x4x32xf32> to vector<1xf32>
    %676 = vector.shape_cast %675 : vector<1xf32> to vector<1x1x1xf32>
    %677 = vector.extract %676[0, 0, 0] : f32 from vector<1x1x1xf32>
    %cst_551 = arith.constant 1.280000e+02 : f32
    %678 = arith.divf %677, %cst_551 : f32
    %679 = vector.broadcast %668 : f32 to vector<4x32xf32>
    %680 = arith.subf %663, %679 : vector<4x32xf32>
    %cst_552 = arith.constant 9.99999993E-9 : f32
    %681 = arith.addf %678, %cst_552 : f32
    %682 = math.rsqrt %681 : f32
    %683 = vector.broadcast %682 : f32 to vector<4x32xf32>
    %684 = arith.mulf %680, %683 : vector<4x32xf32>
    %c6_553 = arith.constant 6 : index
    %c0_554 = arith.constant 0 : index
    %c0_555 = arith.constant 0 : index
    %685 = vector.load %arg9[%c6_553, %c0_554, %c0_555] : memref<7x4x1xf32, #tpu.memory_space<vmem>>, vector<1x4x1xf32>
    %686 = vector.shape_cast %685 : vector<1x4x1xf32> to vector<4x1xf32>
    %687 = vector.broadcast %686 : vector<4x1xf32> to vector<4x32xf32>
    %688 = arith.mulf %684, %687 : vector<4x32xf32>
    %c6_556 = arith.constant 6 : index
    %c0_557 = arith.constant 0 : index
    %c0_558 = arith.constant 0 : index
    %689 = vector.load %arg10[%c6_556, %c0_557, %c0_558] : memref<7x4x1xf32, #tpu.memory_space<vmem>>, vector<1x4x1xf32>
    %690 = vector.shape_cast %689 : vector<1x4x1xf32> to vector<4x1xf32>
    %691 = vector.broadcast %690 : vector<4x1xf32> to vector<4x32xf32>
    %692 = arith.addf %688, %691 : vector<4x32xf32>
    %c6_559 = arith.constant 6 : index
    %c0_560 = arith.constant 0 : index
    %c0_561 = arith.constant 0 : index
    %693 = vector.load %arg11[%c6_559, %c0_560, %c0_561] : memref<7x1x1xf32, #tpu.memory_space<vmem>>, vector<1x1x1xf32>
    %694 = vector.shape_cast %693 : vector<1x1x1xf32> to vector<1x1xf32>
    %cst_562 = arith.constant 0.000000e+00 : f32
    %695 = vector.broadcast %cst_562 : f32 to vector<4x32xf32>
    %696 = arith.maximumf %692, %695 : vector<4x32xf32>
    %cst_563 = arith.constant 0.000000e+00 : f32
    %697 = vector.broadcast %cst_563 : f32 to vector<4x32xf32>
    %698 = arith.minimumf %692, %697 : vector<4x32xf32>
    %699 = vector.broadcast %694 : vector<1x1xf32> to vector<4x32xf32>
    %700 = arith.mulf %699, %698 : vector<4x32xf32>
    %701 = arith.addf %696, %700 : vector<4x32xf32>
    %c28_564 = arith.constant 28 : index
    %c0_565 = arith.constant 0 : index
    %702 = vector.load %arg16[%c28_564, %c0_565] : memref<32x32xf32, #tpu.memory_space<vmem>>, vector<4x32xf32>
    tpu.vector_store %arg16[%c28_564, %c0_565], %701 {strides = array<i32>} : memref<32x32xf32, #tpu.memory_space<vmem>>, vector<4x32xf32>,
    %c0_566 = arith.constant 0 : index
    %c0_567 = arith.constant 0 : index
    %c0_568 = arith.constant 0 : index
    %703 = vector.load %arg12[%c0_566, %c0_567, %c0_568] : memref<6x8x4xf32, #tpu.memory_space<vmem>>, vector<1x8x4xf32>
    %704 = vector.shape_cast %703 : vector<1x8x4xf32> to vector<8x4xf32>
    %cst_569 = arith.constant dense<0.000000e+00> : vector<8x32xf32>
    %705 = tpu.matmul %704, %701, %cst_569 {dimension_numbers = #tpu.dot_dimension_numbers<[1], [0], [0], [1], [0, 0, 1, 1], [], []>} : vector<8x4xf32>, vector<4x32xf32>, vector<8x32xf32> -> vector<8x32xf32>
    %c0_570 = arith.constant 0 : index
    %c0_571 = arith.constant 0 : index
    %c0_572 = arith.constant 0 : index
    %706 = vector.load %arg2[%c0_570, %c0_571, %c0_572] : memref<42x32x32xf32, #tpu.memory_space<vmem>>, vector<1x32x32xf32>
    %707 = vector.shape_cast %706 : vector<1x32x32xf32> to vector<32x32xf32>
    %cst_573 = arith.constant dense<0.000000e+00> : vector<8x32xf32>
    %708 = tpu.matmul %705, %707, %cst_573 {dimension_numbers = #tpu.dot_dimension_numbers<[1], [0], [0], [1], [0, 0, 1, 1], [], []>} : vector<8x32xf32>, vector<32x32xf32>, vector<8x32xf32> -> vector<8x32xf32>
    %c1_574 = arith.constant 1 : index
    %c0_575 = arith.constant 0 : index
    %c0_576 = arith.constant 0 : index
    %709 = vector.load %arg12[%c1_574, %c0_575, %c0_576] : memref<6x8x4xf32, #tpu.memory_space<vmem>>, vector<1x8x4xf32>
    %710 = vector.shape_cast %709 : vector<1x8x4xf32> to vector<8x4xf32>
    %cst_577 = arith.constant dense<0.000000e+00> : vector<8x32xf32>
    %711 = tpu.matmul %710, %701, %cst_577 {dimension_numbers = #tpu.dot_dimension_numbers<[1], [0], [0], [1], [0, 0, 1, 1], [], []>} : vector<8x4xf32>, vector<4x32xf32>, vector<8x32xf32> -> vector<8x32xf32>
    %c1_578 = arith.constant 1 : index
    %c0_579 = arith.constant 0 : index
    %c0_580 = arith.constant 0 : index
    %712 = vector.load %arg2[%c1_578, %c0_579, %c0_580] : memref<42x32x32xf32, #tpu.memory_space<vmem>>, vector<1x32x32xf32>
    %713 = vector.shape_cast %712 : vector<1x32x32xf32> to vector<32x32xf32>
    %cst_581 = arith.constant dense<0.000000e+00> : vector<8x32xf32>
    %714 = tpu.matmul %711, %713, %cst_581 {dimension_numbers = #tpu.dot_dimension_numbers<[1], [0], [0], [1], [0, 0, 1, 1], [], []>} : vector<8x32xf32>, vector<32x32xf32>, vector<8x32xf32> -> vector<8x32xf32>
    %715 = arith.addf %708, %714 : vector<8x32xf32>
    %c2_582 = arith.constant 2 : index
    %c0_583 = arith.constant 0 : index
    %c0_584 = arith.constant 0 : index
    %716 = vector.load %arg12[%c2_582, %c0_583, %c0_584] : memref<6x8x4xf32, #tpu.memory_space<vmem>>, vector<1x8x4xf32>
    %717 = vector.shape_cast %716 : vector<1x8x4xf32> to vector<8x4xf32>
    %cst_585 = arith.constant dense<0.000000e+00> : vector<8x32xf32>
    %718 = tpu.matmul %717, %701, %cst_585 {dimension_numbers = #tpu.dot_dimension_numbers<[1], [0], [0], [1], [0, 0, 1, 1], [], []>} : vector<8x4xf32>, vector<4x32xf32>, vector<8x32xf32> -> vector<8x32xf32>
    %c2_586 = arith.constant 2 : index
    %c0_587 = arith.constant 0 : index
    %c0_588 = arith.constant 0 : index
    %719 = vector.load %arg2[%c2_586, %c0_587, %c0_588] : memref<42x32x32xf32, #tpu.memory_space<vmem>>, vector<1x32x32xf32>
    %720 = vector.shape_cast %719 : vector<1x32x32xf32> to vector<32x32xf32>
    %cst_589 = arith.constant dense<0.000000e+00> : vector<8x32xf32>
    %721 = tpu.matmul %718, %720, %cst_589 {dimension_numbers = #tpu.dot_dimension_numbers<[1], [0], [0], [1], [0, 0, 1, 1], [], []>} : vector<8x32xf32>, vector<32x32xf32>, vector<8x32xf32> -> vector<8x32xf32>
    %722 = arith.addf %715, %721 : vector<8x32xf32>
    %c3_590 = arith.constant 3 : index
    %c0_591 = arith.constant 0 : index
    %c0_592 = arith.constant 0 : index
    %723 = vector.load %arg12[%c3_590, %c0_591, %c0_592] : memref<6x8x4xf32, #tpu.memory_space<vmem>>, vector<1x8x4xf32>
    %724 = vector.shape_cast %723 : vector<1x8x4xf32> to vector<8x4xf32>
    %cst_593 = arith.constant dense<0.000000e+00> : vector<8x32xf32>
    %725 = tpu.matmul %724, %701, %cst_593 {dimension_numbers = #tpu.dot_dimension_numbers<[1], [0], [0], [1], [0, 0, 1, 1], [], []>} : vector<8x4xf32>, vector<4x32xf32>, vector<8x32xf32> -> vector<8x32xf32>
    %c3_594 = arith.constant 3 : index
    %c0_595 = arith.constant 0 : index
    %c0_596 = arith.constant 0 : index
    %726 = vector.load %arg2[%c3_594, %c0_595, %c0_596] : memref<42x32x32xf32, #tpu.memory_space<vmem>>, vector<1x32x32xf32>
    %727 = vector.shape_cast %726 : vector<1x32x32xf32> to vector<32x32xf32>
    %cst_597 = arith.constant dense<0.000000e+00> : vector<8x32xf32>
    %728 = tpu.matmul %725, %727, %cst_597 {dimension_numbers = #tpu.dot_dimension_numbers<[1], [0], [0], [1], [0, 0, 1, 1], [], []>} : vector<8x32xf32>, vector<32x32xf32>, vector<8x32xf32> -> vector<8x32xf32>
    %729 = arith.addf %722, %728 : vector<8x32xf32>
    %c4_598 = arith.constant 4 : index
    %c0_599 = arith.constant 0 : index
    %c0_600 = arith.constant 0 : index
    %730 = vector.load %arg12[%c4_598, %c0_599, %c0_600] : memref<6x8x4xf32, #tpu.memory_space<vmem>>, vector<1x8x4xf32>
    %731 = vector.shape_cast %730 : vector<1x8x4xf32> to vector<8x4xf32>
    %cst_601 = arith.constant dense<0.000000e+00> : vector<8x32xf32>
    %732 = tpu.matmul %731, %701, %cst_601 {dimension_numbers = #tpu.dot_dimension_numbers<[1], [0], [0], [1], [0, 0, 1, 1], [], []>} : vector<8x4xf32>, vector<4x32xf32>, vector<8x32xf32> -> vector<8x32xf32>
    %c4_602 = arith.constant 4 : index
    %c0_603 = arith.constant 0 : index
    %c0_604 = arith.constant 0 : index
    %733 = vector.load %arg2[%c4_602, %c0_603, %c0_604] : memref<42x32x32xf32, #tpu.memory_space<vmem>>, vector<1x32x32xf32>
    %734 = vector.shape_cast %733 : vector<1x32x32xf32> to vector<32x32xf32>
    %cst_605 = arith.constant dense<0.000000e+00> : vector<8x32xf32>
    %735 = tpu.matmul %732, %734, %cst_605 {dimension_numbers = #tpu.dot_dimension_numbers<[1], [0], [0], [1], [0, 0, 1, 1], [], []>} : vector<8x32xf32>, vector<32x32xf32>, vector<8x32xf32> -> vector<8x32xf32>
    %736 = arith.addf %729, %735 : vector<8x32xf32>
    %c5_606 = arith.constant 5 : index
    %c0_607 = arith.constant 0 : index
    %c0_608 = arith.constant 0 : index
    %737 = vector.load %arg12[%c5_606, %c0_607, %c0_608] : memref<6x8x4xf32, #tpu.memory_space<vmem>>, vector<1x8x4xf32>
    %738 = vector.shape_cast %737 : vector<1x8x4xf32> to vector<8x4xf32>
    %cst_609 = arith.constant dense<0.000000e+00> : vector<8x32xf32>
    %739 = tpu.matmul %738, %701, %cst_609 {dimension_numbers = #tpu.dot_dimension_numbers<[1], [0], [0], [1], [0, 0, 1, 1], [], []>} : vector<8x4xf32>, vector<4x32xf32>, vector<8x32xf32> -> vector<8x32xf32>
    %c5_610 = arith.constant 5 : index
    %c0_611 = arith.constant 0 : index
    %c0_612 = arith.constant 0 : index
    %740 = vector.load %arg2[%c5_610, %c0_611, %c0_612] : memref<42x32x32xf32, #tpu.memory_space<vmem>>, vector<1x32x32xf32>
    %741 = vector.shape_cast %740 : vector<1x32x32xf32> to vector<32x32xf32>
    %cst_613 = arith.constant dense<0.000000e+00> : vector<8x32xf32>
    %742 = tpu.matmul %739, %741, %cst_613 {dimension_numbers = #tpu.dot_dimension_numbers<[1], [0], [0], [1], [0, 0, 1, 1], [], []>} : vector<8x32xf32>, vector<32x32xf32>, vector<8x32xf32> -> vector<8x32xf32>
    %743 = arith.addf %736, %742 : vector<8x32xf32>
    %c0_614 = arith.constant 0 : index
    %c0_615 = arith.constant 0 : index
    %744 = vector.load %arg13[%c0_614, %c0_615] : memref<8x1xf32, #tpu.memory_space<vmem>>, vector<8x1xf32>
    %745 = vector.broadcast %744 : vector<8x1xf32> to vector<8x32xf32>
    %746 = arith.addf %743, %745 : vector<8x32xf32>
    %c1_616 = arith.constant 1 : index
    %c0_617 = arith.constant 0 : index
    %c0_618 = arith.constant 0 : index
    %747 = vector.load %arg14[%c1_616, %c0_617, %c0_618] : memref<2x1x1xf32, #tpu.memory_space<vmem>>, vector<1x1x1xf32>
    %748 = vector.shape_cast %747 : vector<1x1x1xf32> to vector<1x1xf32>
    %cst_619 = arith.constant 0.000000e+00 : f32
    %749 = vector.broadcast %cst_619 : f32 to vector<8x32xf32>
    %750 = arith.maximumf %746, %749 : vector<8x32xf32>
    %cst_620 = arith.constant 0.000000e+00 : f32
    %751 = vector.broadcast %cst_620 : f32 to vector<8x32xf32>
    %752 = arith.minimumf %746, %751 : vector<8x32xf32>
    %753 = vector.broadcast %748 : vector<1x1xf32> to vector<8x32xf32>
    %754 = arith.mulf %753, %752 : vector<8x32xf32>
    %755 = arith.addf %750, %754 : vector<8x32xf32>
    %756 = arith.truncf %755 : vector<8x32xf32> to vector<8x32xbf16>
    %c0_621 = arith.constant 0 : index
    %c0_622 = arith.constant 0 : index
    %c0_623 = arith.constant 0 : index
    %757 = vector.load %arg15[%c0_621, %c0_622, %c0_623] : memref<1x8x32xbf16, #tpu.memory_space<vmem>>, vector<1x8x32xbf16>
    %758 = vector.shape_cast %757 : vector<1x8x32xbf16> to vector<8x32xbf16>
    %759 = vector.shape_cast %756 : vector<8x32xbf16> to vector<1x8x32xbf16>
    tpu.vector_store %arg15[%c0_621, %c0_622, %c0_623], %759 {strides = array<i32>} : memref<1x8x32xbf16, #tpu.memory_space<vmem>>, vector<1x8x32xbf16>,
    return
  }
  func.func @transform_0(%arg0: i32) -> (i32, i32, i32) {
    %c0_i32 = arith.constant 0 : i32
    %c0_i32_0 = arith.constant 0 : i32
    %c0_i32_1 = arith.constant 0 : i32
    return %arg0, %c0_i32, %c0_i32_0 : i32, i32, i32
  }
  func.func @transform_1(%arg0: i32) -> (i32, i32, i32) {
    %c0_i32 = arith.constant 0 : i32
    %c0_i32_0 = arith.constant 0 : i32
    %c0_i32_1 = arith.constant 0 : i32
    %c0_i32_2 = arith.constant 0 : i32
    return %c0_i32, %c0_i32_0, %c0_i32_1 : i32, i32, i32
  }
  func.func @transform_2(%arg0: i32) -> (i32, i32, i32) {
    %c0_i32 = arith.constant 0 : i32
    %c0_i32_0 = arith.constant 0 : i32
    %c0_i32_1 = arith.constant 0 : i32
    %c0_i32_2 = arith.constant 0 : i32
    return %c0_i32, %c0_i32_0, %c0_i32_1 : i32, i32, i32
  }
  func.func @transform_3(%arg0: i32) -> (i32, i32) {
    %c0_i32 = arith.constant 0 : i32
    %c0_i32_0 = arith.constant 0 : i32
    %c0_i32_1 = arith.constant 0 : i32
    return %c0_i32, %c0_i32_0 : i32, i32
  }
  func.func @transform_4(%arg0: i32) -> (i32, i32, i32) {
    %c0_i32 = arith.constant 0 : i32
    %c0_i32_0 = arith.constant 0 : i32
    %c0_i32_1 = arith.constant 0 : i32
    %c0_i32_2 = arith.constant 0 : i32
    return %c0_i32, %c0_i32_0, %c0_i32_1 : i32, i32, i32
  }
  func.func @transform_5(%arg0: i32) -> (i32, i32, i32) {
    %c0_i32 = arith.constant 0 : i32
    %c0_i32_0 = arith.constant 0 : i32
    %c0_i32_1 = arith.constant 0 : i32
    %c0_i32_2 = arith.constant 0 : i32
    return %c0_i32, %c0_i32_0, %c0_i32_1 : i32, i32, i32
  }
  func.func @transform_6(%arg0: i32) -> (i32, i32, i32) {
    %c0_i32 = arith.constant 0 : i32
    %c0_i32_0 = arith.constant 0 : i32
    %c0_i32_1 = arith.constant 0 : i32
    %c0_i32_2 = arith.constant 0 : i32
    return %c0_i32, %c0_i32_0, %c0_i32_1 : i32, i32, i32
  }
  func.func @transform_7(%arg0: i32) -> (i32, i32, i32) {
    %c0_i32 = arith.constant 0 : i32
    %c0_i32_0 = arith.constant 0 : i32
    %c0_i32_1 = arith.constant 0 : i32
    %c0_i32_2 = arith.constant 0 : i32
    return %c0_i32, %c0_i32_0, %c0_i32_1 : i32, i32, i32
  }
  func.func @transform_8(%arg0: i32) -> (i32, i32, i32) {
    %c0_i32 = arith.constant 0 : i32
    %c0_i32_0 = arith.constant 0 : i32
    %c0_i32_1 = arith.constant 0 : i32
    %c0_i32_2 = arith.constant 0 : i32
    return %c0_i32, %c0_i32_0, %c0_i32_1 : i32, i32, i32
  }
  func.func @transform_9(%arg0: i32) -> (i32, i32, i32) {
    %c0_i32 = arith.constant 0 : i32
    %c0_i32_0 = arith.constant 0 : i32
    %c0_i32_1 = arith.constant 0 : i32
    %c0_i32_2 = arith.constant 0 : i32
    return %c0_i32, %c0_i32_0, %c0_i32_1 : i32, i32, i32
  }
  func.func @transform_10(%arg0: i32) -> (i32, i32, i32) {
    %c0_i32 = arith.constant 0 : i32
    %c0_i32_0 = arith.constant 0 : i32
    %c0_i32_1 = arith.constant 0 : i32
    %c0_i32_2 = arith.constant 0 : i32
    return %c0_i32, %c0_i32_0, %c0_i32_1 : i32, i32, i32
  }
  func.func @transform_11(%arg0: i32) -> (i32, i32, i32) {
    %c0_i32 = arith.constant 0 : i32
    %c0_i32_0 = arith.constant 0 : i32
    %c0_i32_1 = arith.constant 0 : i32
    %c0_i32_2 = arith.constant 0 : i32
    return %c0_i32, %c0_i32_0, %c0_i32_1 : i32, i32, i32
  }
  func.func @transform_12(%arg0: i32) -> (i32, i32) {
    %c0_i32 = arith.constant 0 : i32
    %c0_i32_0 = arith.constant 0 : i32
    %c0_i32_1 = arith.constant 0 : i32
    return %c0_i32, %c0_i32_0 : i32, i32
  }
  func.func @transform_13(%arg0: i32) -> (i32, i32, i32) {
    %c0_i32 = arith.constant 0 : i32
    %c0_i32_0 = arith.constant 0 : i32
    %c0_i32_1 = arith.constant 0 : i32
    %c0_i32_2 = arith.constant 0 : i32
    return %c0_i32, %c0_i32_0, %c0_i32_1 : i32, i32, i32
  }
  func.func @transform_14(%arg0: i32) -> (i32, i32, i32) {
    %c0_i32 = arith.constant 0 : i32
    %c0_i32_0 = arith.constant 0 : i32
    %c0_i32_1 = arith.constant 0 : i32
    return %arg0, %c0_i32, %c0_i32_0 : i32, i32, i32
  }
}

module attributes {stable_mosaic.version = 11 : i64} {
  func.func @_conv_gn_act_kernel(%arg0: i32, %arg1: memref<16x96xbf16, #tpu.memory_space<vmem>>, %arg2: memref<1x96x32xbf16, #tpu.memory_space<vmem>>, %arg3: memref<16x1xf32, #tpu.memory_space<vmem>>, %arg4: memref<16x1xf32, #tpu.memory_space<vmem>>, %arg5: memref<16x1xf32, #tpu.memory_space<vmem>>, %arg6: memref<1x1xf32, #tpu.memory_space<vmem>>, %arg7: memref<1x16x32xbf16, #tpu.memory_space<vmem>>) attributes {dimension_semantics = [#tpu.dimension_semantics<parallel>], iteration_bounds = array<i64: 2>, scalar_prefetch = 0 : i64, scratch_operands = 0 : i64, tpu.core_type = #tpu.core_type<tc>, window_params = [{pipeline_mode = #tpu.pipeline_mode<synchronous>, transform_indices = @transform_0, window_bounds = array<i64: 16, 96>}, {transform_indices = @transform_1, window_bounds = array<i64: 1, 96, 32>}, {pipeline_mode = #tpu.pipeline_mode<synchronous>, transform_indices = @transform_2, window_bounds = array<i64: 16, 1>}, {pipeline_mode = #tpu.pipeline_mode<synchronous>, transform_indices = @transform_3, window_bounds = array<i64: 16, 1>}, {pipeline_mode = #tpu.pipeline_mode<synchronous>, transform_indices = @transform_4, window_bounds = array<i64: 16, 1>}, {pipeline_mode = #tpu.pipeline_mode<synchronous>, transform_indices = @transform_5, window_bounds = array<i64: 1, 1>}, {transform_indices = @transform_6, window_bounds = array<i64: 1, 16, 32>}]} {
    %c0 = arith.constant 0 : index
    %c0_0 = arith.constant 0 : index
    %0 = vector.load %arg1[%c0, %c0_0] : memref<16x96xbf16, #tpu.memory_space<vmem>>, vector<16x96xbf16>
    %c0_1 = arith.constant 0 : index
    %c0_2 = arith.constant 0 : index
    %c0_3 = arith.constant 0 : index
    %1 = vector.load %arg2[%c0_1, %c0_2, %c0_3] : memref<1x96x32xbf16, #tpu.memory_space<vmem>>, vector<1x96x32xbf16>
    %2 = vector.shape_cast %1 : vector<1x96x32xbf16> to vector<96x32xbf16>
    %cst = arith.constant dense<0.000000e+00> : vector<16x32xf32>
    %3 = tpu.matmul %0, %2, %cst {dimension_numbers = #tpu.dot_dimension_numbers<[1], [0], [0], [1], [0, 0, 1, 1], [], []>} : vector<16x96xbf16>, vector<96x32xbf16>, vector<16x32xf32> -> vector<16x32xf32>
    %c0_4 = arith.constant 0 : index
    %c0_5 = arith.constant 0 : index
    %4 = vector.load %arg3[%c0_4, %c0_5] : memref<16x1xf32, #tpu.memory_space<vmem>>, vector<16x1xf32>
    %5 = vector.broadcast %4 : vector<16x1xf32> to vector<16x32xf32>
    %6 = arith.addf %3, %5 : vector<16x32xf32>
    %7 = vector.shape_cast %6 : vector<16x32xf32> to vector<1x16x32xf32>
    %cst_6 = arith.constant dense<0.000000e+00> : vector<1xf32>
    %8 = vector.multi_reduction <add>, %7, %cst_6 [1, 2] : vector<1x16x32xf32> to vector<1xf32>
    %9 = vector.shape_cast %8 : vector<1xf32> to vector<1x1x1xf32>
    %10 = vector.extract %9[0, 0, 0] : f32 from vector<1x1x1xf32>
    %cst_7 = arith.constant 5.120000e+02 : f32
    %11 = arith.divf %10, %cst_7 : f32
    %12 = vector.broadcast %11 : f32 to vector<16x32xf32>
    %13 = arith.subf %6, %12 : vector<16x32xf32>
    %14 = vector.broadcast %11 : f32 to vector<16x32xf32>
    %15 = arith.subf %6, %14 : vector<16x32xf32>
    %16 = arith.mulf %13, %15 : vector<16x32xf32>
    %17 = vector.shape_cast %16 : vector<16x32xf32> to vector<1x16x32xf32>
    %cst_8 = arith.constant dense<0.000000e+00> : vector<1xf32>
    %18 = vector.multi_reduction <add>, %17, %cst_8 [1, 2] : vector<1x16x32xf32> to vector<1xf32>
    %19 = vector.shape_cast %18 : vector<1xf32> to vector<1x1x1xf32>
    %20 = vector.extract %19[0, 0, 0] : f32 from vector<1x1x1xf32>
    %cst_9 = arith.constant 5.120000e+02 : f32
    %21 = arith.divf %20, %cst_9 : f32
    %22 = vector.broadcast %11 : f32 to vector<16x32xf32>
    %23 = arith.subf %6, %22 : vector<16x32xf32>
    %cst_10 = arith.constant 9.99999993E-9 : f32
    %24 = arith.addf %21, %cst_10 : f32
    %25 = math.rsqrt %24 : f32
    %26 = vector.broadcast %25 : f32 to vector<16x32xf32>
    %27 = arith.mulf %23, %26 : vector<16x32xf32>
    %c0_11 = arith.constant 0 : index
    %c0_12 = arith.constant 0 : index
    %28 = vector.load %arg4[%c0_11, %c0_12] : memref<16x1xf32, #tpu.memory_space<vmem>>, vector<16x1xf32>
    %29 = vector.broadcast %28 : vector<16x1xf32> to vector<16x32xf32>
    %30 = arith.mulf %27, %29 : vector<16x32xf32>
    %c0_13 = arith.constant 0 : index
    %c0_14 = arith.constant 0 : index
    %31 = vector.load %arg5[%c0_13, %c0_14] : memref<16x1xf32, #tpu.memory_space<vmem>>, vector<16x1xf32>
    %32 = vector.broadcast %31 : vector<16x1xf32> to vector<16x32xf32>
    %33 = arith.addf %30, %32 : vector<16x32xf32>
    %c0_15 = arith.constant 0 : index
    %c0_16 = arith.constant 0 : index
    %34 = vector.load %arg6[%c0_15, %c0_16] : memref<1x1xf32, #tpu.memory_space<vmem>>, vector<1x1xf32>
    %cst_17 = arith.constant 0.000000e+00 : f32
    %35 = vector.broadcast %cst_17 : f32 to vector<16x32xf32>
    %36 = arith.maximumf %33, %35 : vector<16x32xf32>
    %cst_18 = arith.constant 0.000000e+00 : f32
    %37 = vector.broadcast %cst_18 : f32 to vector<16x32xf32>
    %38 = arith.minimumf %33, %37 : vector<16x32xf32>
    %39 = vector.broadcast %34 : vector<1x1xf32> to vector<16x32xf32>
    %40 = arith.mulf %39, %38 : vector<16x32xf32>
    %41 = arith.addf %36, %40 : vector<16x32xf32>
    %42 = arith.truncf %41 : vector<16x32xf32> to vector<16x32xbf16>
    %c0_19 = arith.constant 0 : index
    %c0_20 = arith.constant 0 : index
    %c0_21 = arith.constant 0 : index
    %43 = vector.load %arg7[%c0_19, %c0_20, %c0_21] : memref<1x16x32xbf16, #tpu.memory_space<vmem>>, vector<1x16x32xbf16>
    %44 = vector.shape_cast %43 : vector<1x16x32xbf16> to vector<16x32xbf16>
    %45 = vector.shape_cast %42 : vector<16x32xbf16> to vector<1x16x32xbf16>
    tpu.vector_store %arg7[%c0_19, %c0_20, %c0_21], %45 {strides = array<i32>} : memref<1x16x32xbf16, #tpu.memory_space<vmem>>, vector<1x16x32xbf16>,
    return
  }
  func.func @transform_0(%arg0: i32) -> (i32, i32) {
    %c0_i32 = arith.constant 0 : i32
    %c0_i32_0 = arith.constant 0 : i32
    %c0_i32_1 = arith.constant 0 : i32
    return %c0_i32, %c0_i32_0 : i32, i32
  }
  func.func @transform_1(%arg0: i32) -> (i32, i32, i32) {
    %c0_i32 = arith.constant 0 : i32
    %c0_i32_0 = arith.constant 0 : i32
    %c0_i32_1 = arith.constant 0 : i32
    return %arg0, %c0_i32, %c0_i32_0 : i32, i32, i32
  }
  func.func @transform_2(%arg0: i32) -> (i32, i32) {
    %c0_i32 = arith.constant 0 : i32
    %c0_i32_0 = arith.constant 0 : i32
    %c0_i32_1 = arith.constant 0 : i32
    return %c0_i32, %c0_i32_0 : i32, i32
  }
  func.func @transform_3(%arg0: i32) -> (i32, i32) {
    %c0_i32 = arith.constant 0 : i32
    %c0_i32_0 = arith.constant 0 : i32
    %c0_i32_1 = arith.constant 0 : i32
    return %c0_i32, %c0_i32_0 : i32, i32
  }
  func.func @transform_4(%arg0: i32) -> (i32, i32) {
    %c0_i32 = arith.constant 0 : i32
    %c0_i32_0 = arith.constant 0 : i32
    %c0_i32_1 = arith.constant 0 : i32
    return %c0_i32, %c0_i32_0 : i32, i32
  }
  func.func @transform_5(%arg0: i32) -> (i32, i32) {
    %c0_i32 = arith.constant 0 : i32
    %c0_i32_0 = arith.constant 0 : i32
    %c0_i32_1 = arith.constant 0 : i32
    return %c0_i32, %c0_i32_0 : i32, i32
  }
  func.func @transform_6(%arg0: i32) -> (i32, i32, i32) {
    %c0_i32 = arith.constant 0 : i32
    %c0_i32_0 = arith.constant 0 : i32
    %c0_i32_1 = arith.constant 0 : i32
    return %arg0, %c0_i32, %c0_i32_0 : i32, i32, i32
  }
}

module attributes {stable_mosaic.version = 11 : i64} {
  func.func @_conv_act_kernel(%arg0: i32, %arg1: memref<16x24xbf16, #tpu.memory_space<vmem>>, %arg2: memref<1x24x64xbf16, #tpu.memory_space<vmem>>, %arg3: memref<16x1xf32, #tpu.memory_space<vmem>>, %arg4: memref<1x1xf32, #tpu.memory_space<vmem>>, %arg5: memref<1x16x64xbf16, #tpu.memory_space<vmem>>) attributes {dimension_semantics = [#tpu.dimension_semantics<parallel>], iteration_bounds = array<i64: 2>, scalar_prefetch = 0 : i64, scratch_operands = 0 : i64, tpu.core_type = #tpu.core_type<tc>, window_params = [{pipeline_mode = #tpu.pipeline_mode<synchronous>, transform_indices = @transform_0, window_bounds = array<i64: 16, 24>}, {transform_indices = @transform_1, window_bounds = array<i64: 1, 24, 64>}, {pipeline_mode = #tpu.pipeline_mode<synchronous>, transform_indices = @transform_2, window_bounds = array<i64: 16, 1>}, {pipeline_mode = #tpu.pipeline_mode<synchronous>, transform_indices = @transform_3, window_bounds = array<i64: 1, 1>}, {transform_indices = @transform_4, window_bounds = array<i64: 1, 16, 64>}]} {
    %c0 = arith.constant 0 : index
    %c0_0 = arith.constant 0 : index
    %0 = vector.load %arg1[%c0, %c0_0] : memref<16x24xbf16, #tpu.memory_space<vmem>>, vector<16x24xbf16>
    %c0_1 = arith.constant 0 : index
    %c0_2 = arith.constant 0 : index
    %c0_3 = arith.constant 0 : index
    %1 = vector.load %arg2[%c0_1, %c0_2, %c0_3] : memref<1x24x64xbf16, #tpu.memory_space<vmem>>, vector<1x24x64xbf16>
    %2 = vector.shape_cast %1 : vector<1x24x64xbf16> to vector<24x64xbf16>
    %cst = arith.constant dense<0.000000e+00> : vector<16x64xf32>
    %3 = tpu.matmul %0, %2, %cst {dimension_numbers = #tpu.dot_dimension_numbers<[1], [0], [0], [1], [0, 0, 1, 1], [], []>} : vector<16x24xbf16>, vector<24x64xbf16>, vector<16x64xf32> -> vector<16x64xf32>
    %c0_4 = arith.constant 0 : index
    %c0_5 = arith.constant 0 : index
    %4 = vector.load %arg3[%c0_4, %c0_5] : memref<16x1xf32, #tpu.memory_space<vmem>>, vector<16x1xf32>
    %5 = vector.broadcast %4 : vector<16x1xf32> to vector<16x64xf32>
    %6 = arith.addf %3, %5 : vector<16x64xf32>
    %c0_6 = arith.constant 0 : index
    %c0_7 = arith.constant 0 : index
    %7 = vector.load %arg4[%c0_6, %c0_7] : memref<1x1xf32, #tpu.memory_space<vmem>>, vector<1x1xf32>
    %cst_8 = arith.constant 0.000000e+00 : f32
    %8 = vector.broadcast %cst_8 : f32 to vector<16x64xf32>
    %9 = arith.maximumf %6, %8 : vector<16x64xf32>
    %cst_9 = arith.constant 0.000000e+00 : f32
    %10 = vector.broadcast %cst_9 : f32 to vector<16x64xf32>
    %11 = arith.minimumf %6, %10 : vector<16x64xf32>
    %12 = vector.broadcast %7 : vector<1x1xf32> to vector<16x64xf32>
    %13 = arith.mulf %12, %11 : vector<16x64xf32>
    %14 = arith.addf %9, %13 : vector<16x64xf32>
    %15 = arith.truncf %14 : vector<16x64xf32> to vector<16x64xbf16>
    %c0_10 = arith.constant 0 : index
    %c0_11 = arith.constant 0 : index
    %c0_12 = arith.constant 0 : index
    %16 = vector.load %arg5[%c0_10, %c0_11, %c0_12] : memref<1x16x64xbf16, #tpu.memory_space<vmem>>, vector<1x16x64xbf16>
    %17 = vector.shape_cast %16 : vector<1x16x64xbf16> to vector<16x64xbf16>
    %18 = vector.shape_cast %15 : vector<16x64xbf16> to vector<1x16x64xbf16>
    tpu.vector_store %arg5[%c0_10, %c0_11, %c0_12], %18 {strides = array<i32>} : memref<1x16x64xbf16, #tpu.memory_space<vmem>>, vector<1x16x64xbf16>,
    return
  }
  func.func @transform_0(%arg0: i32) -> (i32, i32) {
    %c0_i32 = arith.constant 0 : i32
    %c0_i32_0 = arith.constant 0 : i32
    %c0_i32_1 = arith.constant 0 : i32
    return %c0_i32, %c0_i32_0 : i32, i32
  }
  func.func @transform_1(%arg0: i32) -> (i32, i32, i32) {
    %c0_i32 = arith.constant 0 : i32
    %c0_i32_0 = arith.constant 0 : i32
    %c0_i32_1 = arith.constant 0 : i32
    return %arg0, %c0_i32, %c0_i32_0 : i32, i32, i32
  }
  func.func @transform_2(%arg0: i32) -> (i32, i32) {
    %c0_i32 = arith.constant 0 : i32
    %c0_i32_0 = arith.constant 0 : i32
    %c0_i32_1 = arith.constant 0 : i32
    return %c0_i32, %c0_i32_0 : i32, i32
  }
  func.func @transform_3(%arg0: i32) -> (i32, i32) {
    %c0_i32 = arith.constant 0 : i32
    %c0_i32_0 = arith.constant 0 : i32
    %c0_i32_1 = arith.constant 0 : i32
    return %c0_i32, %c0_i32_0 : i32, i32
  }
  func.func @transform_4(%arg0: i32) -> (i32, i32, i32) {
    %c0_i32 = arith.constant 0 : i32
    %c0_i32_0 = arith.constant 0 : i32
    %c0_i32_1 = arith.constant 0 : i32
    return %arg0, %c0_i32, %c0_i32_0 : i32, i32, i32
  }
}

module attributes {stable_mosaic.version = 11 : i64} {
  func.func @_conv_gn_act_kernel(%arg0: i32, %arg1: memref<16x96xbf16, #tpu.memory_space<vmem>>, %arg2: memref<1x96x64xbf16, #tpu.memory_space<vmem>>, %arg3: memref<16x1xf32, #tpu.memory_space<vmem>>, %arg4: memref<16x1xf32, #tpu.memory_space<vmem>>, %arg5: memref<16x1xf32, #tpu.memory_space<vmem>>, %arg6: memref<1x1xf32, #tpu.memory_space<vmem>>, %arg7: memref<1x16x64xbf16, #tpu.memory_space<vmem>>) attributes {dimension_semantics = [#tpu.dimension_semantics<parallel>], iteration_bounds = array<i64: 2>, scalar_prefetch = 0 : i64, scratch_operands = 0 : i64, tpu.core_type = #tpu.core_type<tc>, window_params = [{pipeline_mode = #tpu.pipeline_mode<synchronous>, transform_indices = @transform_0, window_bounds = array<i64: 16, 96>}, {transform_indices = @transform_1, window_bounds = array<i64: 1, 96, 64>}, {pipeline_mode = #tpu.pipeline_mode<synchronous>, transform_indices = @transform_2, window_bounds = array<i64: 16, 1>}, {pipeline_mode = #tpu.pipeline_mode<synchronous>, transform_indices = @transform_3, window_bounds = array<i64: 16, 1>}, {pipeline_mode = #tpu.pipeline_mode<synchronous>, transform_indices = @transform_4, window_bounds = array<i64: 16, 1>}, {pipeline_mode = #tpu.pipeline_mode<synchronous>, transform_indices = @transform_5, window_bounds = array<i64: 1, 1>}, {transform_indices = @transform_6, window_bounds = array<i64: 1, 16, 64>}]} {
    %c0 = arith.constant 0 : index
    %c0_0 = arith.constant 0 : index
    %0 = vector.load %arg1[%c0, %c0_0] : memref<16x96xbf16, #tpu.memory_space<vmem>>, vector<16x96xbf16>
    %c0_1 = arith.constant 0 : index
    %c0_2 = arith.constant 0 : index
    %c0_3 = arith.constant 0 : index
    %1 = vector.load %arg2[%c0_1, %c0_2, %c0_3] : memref<1x96x64xbf16, #tpu.memory_space<vmem>>, vector<1x96x64xbf16>
    %2 = vector.shape_cast %1 : vector<1x96x64xbf16> to vector<96x64xbf16>
    %cst = arith.constant dense<0.000000e+00> : vector<16x64xf32>
    %3 = tpu.matmul %0, %2, %cst {dimension_numbers = #tpu.dot_dimension_numbers<[1], [0], [0], [1], [0, 0, 1, 1], [], []>} : vector<16x96xbf16>, vector<96x64xbf16>, vector<16x64xf32> -> vector<16x64xf32>
    %c0_4 = arith.constant 0 : index
    %c0_5 = arith.constant 0 : index
    %4 = vector.load %arg3[%c0_4, %c0_5] : memref<16x1xf32, #tpu.memory_space<vmem>>, vector<16x1xf32>
    %5 = vector.broadcast %4 : vector<16x1xf32> to vector<16x64xf32>
    %6 = arith.addf %3, %5 : vector<16x64xf32>
    %7 = vector.shape_cast %6 : vector<16x64xf32> to vector<1x16x64xf32>
    %cst_6 = arith.constant dense<0.000000e+00> : vector<1xf32>
    %8 = vector.multi_reduction <add>, %7, %cst_6 [1, 2] : vector<1x16x64xf32> to vector<1xf32>
    %9 = vector.shape_cast %8 : vector<1xf32> to vector<1x1x1xf32>
    %10 = vector.extract %9[0, 0, 0] : f32 from vector<1x1x1xf32>
    %cst_7 = arith.constant 1.024000e+03 : f32
    %11 = arith.divf %10, %cst_7 : f32
    %12 = vector.broadcast %11 : f32 to vector<16x64xf32>
    %13 = arith.subf %6, %12 : vector<16x64xf32>
    %14 = vector.broadcast %11 : f32 to vector<16x64xf32>
    %15 = arith.subf %6, %14 : vector<16x64xf32>
    %16 = arith.mulf %13, %15 : vector<16x64xf32>
    %17 = vector.shape_cast %16 : vector<16x64xf32> to vector<1x16x64xf32>
    %cst_8 = arith.constant dense<0.000000e+00> : vector<1xf32>
    %18 = vector.multi_reduction <add>, %17, %cst_8 [1, 2] : vector<1x16x64xf32> to vector<1xf32>
    %19 = vector.shape_cast %18 : vector<1xf32> to vector<1x1x1xf32>
    %20 = vector.extract %19[0, 0, 0] : f32 from vector<1x1x1xf32>
    %cst_9 = arith.constant 1.024000e+03 : f32
    %21 = arith.divf %20, %cst_9 : f32
    %22 = vector.broadcast %11 : f32 to vector<16x64xf32>
    %23 = arith.subf %6, %22 : vector<16x64xf32>
    %cst_10 = arith.constant 9.99999993E-9 : f32
    %24 = arith.addf %21, %cst_10 : f32
    %25 = math.rsqrt %24 : f32
    %26 = vector.broadcast %25 : f32 to vector<16x64xf32>
    %27 = arith.mulf %23, %26 : vector<16x64xf32>
    %c0_11 = arith.constant 0 : index
    %c0_12 = arith.constant 0 : index
    %28 = vector.load %arg4[%c0_11, %c0_12] : memref<16x1xf32, #tpu.memory_space<vmem>>, vector<16x1xf32>
    %29 = vector.broadcast %28 : vector<16x1xf32> to vector<16x64xf32>
    %30 = arith.mulf %27, %29 : vector<16x64xf32>
    %c0_13 = arith.constant 0 : index
    %c0_14 = arith.constant 0 : index
    %31 = vector.load %arg5[%c0_13, %c0_14] : memref<16x1xf32, #tpu.memory_space<vmem>>, vector<16x1xf32>
    %32 = vector.broadcast %31 : vector<16x1xf32> to vector<16x64xf32>
    %33 = arith.addf %30, %32 : vector<16x64xf32>
    %c0_15 = arith.constant 0 : index
    %c0_16 = arith.constant 0 : index
    %34 = vector.load %arg6[%c0_15, %c0_16] : memref<1x1xf32, #tpu.memory_space<vmem>>, vector<1x1xf32>
    %cst_17 = arith.constant 0.000000e+00 : f32
    %35 = vector.broadcast %cst_17 : f32 to vector<16x64xf32>
    %36 = arith.maximumf %33, %35 : vector<16x64xf32>
    %cst_18 = arith.constant 0.000000e+00 : f32
    %37 = vector.broadcast %cst_18 : f32 to vector<16x64xf32>
    %38 = arith.minimumf %33, %37 : vector<16x64xf32>
    %39 = vector.broadcast %34 : vector<1x1xf32> to vector<16x64xf32>
    %40 = arith.mulf %39, %38 : vector<16x64xf32>
    %41 = arith.addf %36, %40 : vector<16x64xf32>
    %42 = arith.truncf %41 : vector<16x64xf32> to vector<16x64xbf16>
    %c0_19 = arith.constant 0 : index
    %c0_20 = arith.constant 0 : index
    %c0_21 = arith.constant 0 : index
    %43 = vector.load %arg7[%c0_19, %c0_20, %c0_21] : memref<1x16x64xbf16, #tpu.memory_space<vmem>>, vector<1x16x64xbf16>
    %44 = vector.shape_cast %43 : vector<1x16x64xbf16> to vector<16x64xbf16>
    %45 = vector.shape_cast %42 : vector<16x64xbf16> to vector<1x16x64xbf16>
    tpu.vector_store %arg7[%c0_19, %c0_20, %c0_21], %45 {strides = array<i32>} : memref<1x16x64xbf16, #tpu.memory_space<vmem>>, vector<1x16x64xbf16>,
    return
  }
  func.func @transform_0(%arg0: i32) -> (i32, i32) {
    %c0_i32 = arith.constant 0 : i32
    %c0_i32_0 = arith.constant 0 : i32
    %c0_i32_1 = arith.constant 0 : i32
    return %c0_i32, %c0_i32_0 : i32, i32
  }
  func.func @transform_1(%arg0: i32) -> (i32, i32, i32) {
    %c0_i32 = arith.constant 0 : i32
    %c0_i32_0 = arith.constant 0 : i32
    %c0_i32_1 = arith.constant 0 : i32
    return %arg0, %c0_i32, %c0_i32_0 : i32, i32, i32
  }
  func.func @transform_2(%arg0: i32) -> (i32, i32) {
    %c0_i32 = arith.constant 0 : i32
    %c0_i32_0 = arith.constant 0 : i32
    %c0_i32_1 = arith.constant 0 : i32
    return %c0_i32, %c0_i32_0 : i32, i32
  }
  func.func @transform_3(%arg0: i32) -> (i32, i32) {
    %c0_i32 = arith.constant 0 : i32
    %c0_i32_0 = arith.constant 0 : i32
    %c0_i32_1 = arith.constant 0 : i32
    return %c0_i32, %c0_i32_0 : i32, i32
  }
  func.func @transform_4(%arg0: i32) -> (i32, i32) {
    %c0_i32 = arith.constant 0 : i32
    %c0_i32_0 = arith.constant 0 : i32
    %c0_i32_1 = arith.constant 0 : i32
    return %c0_i32, %c0_i32_0 : i32, i32
  }
  func.func @transform_5(%arg0: i32) -> (i32, i32) {
    %c0_i32 = arith.constant 0 : i32
    %c0_i32_0 = arith.constant 0 : i32
    %c0_i32_1 = arith.constant 0 : i32
    return %c0_i32, %c0_i32_0 : i32, i32
  }
  func.func @transform_6(%arg0: i32) -> (i32, i32, i32) {
    %c0_i32 = arith.constant 0 : i32
    %c0_i32_0 = arith.constant 0 : i32
    %c0_i32_1 = arith.constant 0 : i32
    return %arg0, %c0_i32, %c0_i32_0 : i32, i32, i32
  }
}

module attributes {stable_mosaic.version = 11 : i64} {
  func.func @_conv_act_kernel(%arg0: i32, %arg1: memref<16x24xbf16, #tpu.memory_space<vmem>>, %arg2: memref<1x24x128xbf16, #tpu.memory_space<vmem>>, %arg3: memref<16x1xf32, #tpu.memory_space<vmem>>, %arg4: memref<1x1xf32, #tpu.memory_space<vmem>>, %arg5: memref<1x16x128xbf16, #tpu.memory_space<vmem>>) attributes {dimension_semantics = [#tpu.dimension_semantics<parallel>], iteration_bounds = array<i64: 2>, scalar_prefetch = 0 : i64, scratch_operands = 0 : i64, tpu.core_type = #tpu.core_type<tc>, window_params = [{pipeline_mode = #tpu.pipeline_mode<synchronous>, transform_indices = @transform_0, window_bounds = array<i64: 16, 24>}, {transform_indices = @transform_1, window_bounds = array<i64: 1, 24, 128>}, {pipeline_mode = #tpu.pipeline_mode<synchronous>, transform_indices = @transform_2, window_bounds = array<i64: 16, 1>}, {pipeline_mode = #tpu.pipeline_mode<synchronous>, transform_indices = @transform_3, window_bounds = array<i64: 1, 1>}, {transform_indices = @transform_4, window_bounds = array<i64: 1, 16, 128>}]} {
    %c0 = arith.constant 0 : index
    %c0_0 = arith.constant 0 : index
    %0 = vector.load %arg1[%c0, %c0_0] : memref<16x24xbf16, #tpu.memory_space<vmem>>, vector<16x24xbf16>
    %c0_1 = arith.constant 0 : index
    %c0_2 = arith.constant 0 : index
    %c0_3 = arith.constant 0 : index
    %1 = vector.load %arg2[%c0_1, %c0_2, %c0_3] : memref<1x24x128xbf16, #tpu.memory_space<vmem>>, vector<1x24x128xbf16>
    %2 = vector.shape_cast %1 : vector<1x24x128xbf16> to vector<24x128xbf16>
    %cst = arith.constant dense<0.000000e+00> : vector<16x128xf32>
    %3 = tpu.matmul %0, %2, %cst {dimension_numbers = #tpu.dot_dimension_numbers<[1], [0], [0], [1], [0, 0, 1, 1], [], []>} : vector<16x24xbf16>, vector<24x128xbf16>, vector<16x128xf32> -> vector<16x128xf32>
    %c0_4 = arith.constant 0 : index
    %c0_5 = arith.constant 0 : index
    %4 = vector.load %arg3[%c0_4, %c0_5] : memref<16x1xf32, #tpu.memory_space<vmem>>, vector<16x1xf32>
    %5 = vector.broadcast %4 : vector<16x1xf32> to vector<16x128xf32>
    %6 = arith.addf %3, %5 : vector<16x128xf32>
    %c0_6 = arith.constant 0 : index
    %c0_7 = arith.constant 0 : index
    %7 = vector.load %arg4[%c0_6, %c0_7] : memref<1x1xf32, #tpu.memory_space<vmem>>, vector<1x1xf32>
    %cst_8 = arith.constant 0.000000e+00 : f32
    %8 = vector.broadcast %cst_8 : f32 to vector<16x128xf32>
    %9 = arith.maximumf %6, %8 : vector<16x128xf32>
    %cst_9 = arith.constant 0.000000e+00 : f32
    %10 = vector.broadcast %cst_9 : f32 to vector<16x128xf32>
    %11 = arith.minimumf %6, %10 : vector<16x128xf32>
    %12 = vector.broadcast %7 : vector<1x1xf32> to vector<16x128xf32>
    %13 = arith.mulf %12, %11 : vector<16x128xf32>
    %14 = arith.addf %9, %13 : vector<16x128xf32>
    %15 = arith.truncf %14 : vector<16x128xf32> to vector<16x128xbf16>
    %c0_10 = arith.constant 0 : index
    %c0_11 = arith.constant 0 : index
    %c0_12 = arith.constant 0 : index
    %16 = vector.load %arg5[%c0_10, %c0_11, %c0_12] : memref<1x16x128xbf16, #tpu.memory_space<vmem>>, vector<1x16x128xbf16>
    %17 = vector.shape_cast %16 : vector<1x16x128xbf16> to vector<16x128xbf16>
    %18 = vector.shape_cast %15 : vector<16x128xbf16> to vector<1x16x128xbf16>
    tpu.vector_store %arg5[%c0_10, %c0_11, %c0_12], %18 {strides = array<i32>} : memref<1x16x128xbf16, #tpu.memory_space<vmem>>, vector<1x16x128xbf16>,
    return
  }
  func.func @transform_0(%arg0: i32) -> (i32, i32) {
    %c0_i32 = arith.constant 0 : i32
    %c0_i32_0 = arith.constant 0 : i32
    %c0_i32_1 = arith.constant 0 : i32
    return %c0_i32, %c0_i32_0 : i32, i32
  }
  func.func @transform_1(%arg0: i32) -> (i32, i32, i32) {
    %c0_i32 = arith.constant 0 : i32
    %c0_i32_0 = arith.constant 0 : i32
    %c0_i32_1 = arith.constant 0 : i32
    return %arg0, %c0_i32, %c0_i32_0 : i32, i32, i32
  }
  func.func @transform_2(%arg0: i32) -> (i32, i32) {
    %c0_i32 = arith.constant 0 : i32
    %c0_i32_0 = arith.constant 0 : i32
    %c0_i32_1 = arith.constant 0 : i32
    return %c0_i32, %c0_i32_0 : i32, i32
  }
  func.func @transform_3(%arg0: i32) -> (i32, i32) {
    %c0_i32 = arith.constant 0 : i32
    %c0_i32_0 = arith.constant 0 : i32
    %c0_i32_1 = arith.constant 0 : i32
    return %c0_i32, %c0_i32_0 : i32, i32
  }
  func.func @transform_4(%arg0: i32) -> (i32, i32, i32) {
    %c0_i32 = arith.constant 0 : i32
    %c0_i32_0 = arith.constant 0 : i32
    %c0_i32_1 = arith.constant 0 : i32
    return %arg0, %c0_i32, %c0_i32_0 : i32, i32, i32
  }
}

module attributes {stable_mosaic.version = 11 : i64} {
  func.func @_conv_gn_act_kernel(%arg0: i32, %arg1: memref<16x96xbf16, #tpu.memory_space<vmem>>, %arg2: memref<1x96x128xbf16, #tpu.memory_space<vmem>>, %arg3: memref<16x1xf32, #tpu.memory_space<vmem>>, %arg4: memref<16x1xf32, #tpu.memory_space<vmem>>, %arg5: memref<16x1xf32, #tpu.memory_space<vmem>>, %arg6: memref<1x1xf32, #tpu.memory_space<vmem>>, %arg7: memref<1x16x128xbf16, #tpu.memory_space<vmem>>) attributes {dimension_semantics = [#tpu.dimension_semantics<parallel>], iteration_bounds = array<i64: 2>, scalar_prefetch = 0 : i64, scratch_operands = 0 : i64, tpu.core_type = #tpu.core_type<tc>, window_params = [{pipeline_mode = #tpu.pipeline_mode<synchronous>, transform_indices = @transform_0, window_bounds = array<i64: 16, 96>}, {transform_indices = @transform_1, window_bounds = array<i64: 1, 96, 128>}, {pipeline_mode = #tpu.pipeline_mode<synchronous>, transform_indices = @transform_2, window_bounds = array<i64: 16, 1>}, {pipeline_mode = #tpu.pipeline_mode<synchronous>, transform_indices = @transform_3, window_bounds = array<i64: 16, 1>}, {pipeline_mode = #tpu.pipeline_mode<synchronous>, transform_indices = @transform_4, window_bounds = array<i64: 16, 1>}, {pipeline_mode = #tpu.pipeline_mode<synchronous>, transform_indices = @transform_5, window_bounds = array<i64: 1, 1>}, {transform_indices = @transform_6, window_bounds = array<i64: 1, 16, 128>}]} {
    %c0 = arith.constant 0 : index
    %c0_0 = arith.constant 0 : index
    %0 = vector.load %arg1[%c0, %c0_0] : memref<16x96xbf16, #tpu.memory_space<vmem>>, vector<16x96xbf16>
    %c0_1 = arith.constant 0 : index
    %c0_2 = arith.constant 0 : index
    %c0_3 = arith.constant 0 : index
    %1 = vector.load %arg2[%c0_1, %c0_2, %c0_3] : memref<1x96x128xbf16, #tpu.memory_space<vmem>>, vector<1x96x128xbf16>
    %2 = vector.shape_cast %1 : vector<1x96x128xbf16> to vector<96x128xbf16>
    %cst = arith.constant dense<0.000000e+00> : vector<16x128xf32>
    %3 = tpu.matmul %0, %2, %cst {dimension_numbers = #tpu.dot_dimension_numbers<[1], [0], [0], [1], [0, 0, 1, 1], [], []>} : vector<16x96xbf16>, vector<96x128xbf16>, vector<16x128xf32> -> vector<16x128xf32>
    %c0_4 = arith.constant 0 : index
    %c0_5 = arith.constant 0 : index
    %4 = vector.load %arg3[%c0_4, %c0_5] : memref<16x1xf32, #tpu.memory_space<vmem>>, vector<16x1xf32>
    %5 = vector.broadcast %4 : vector<16x1xf32> to vector<16x128xf32>
    %6 = arith.addf %3, %5 : vector<16x128xf32>
    %7 = vector.shape_cast %6 : vector<16x128xf32> to vector<1x16x128xf32>
    %cst_6 = arith.constant dense<0.000000e+00> : vector<1xf32>
    %8 = vector.multi_reduction <add>, %7, %cst_6 [1, 2] : vector<1x16x128xf32> to vector<1xf32>
    %9 = vector.shape_cast %8 : vector<1xf32> to vector<1x1x1xf32>
    %10 = vector.extract %9[0, 0, 0] : f32 from vector<1x1x1xf32>
    %cst_7 = arith.constant 2.048000e+03 : f32
    %11 = arith.divf %10, %cst_7 : f32
    %12 = vector.broadcast %11 : f32 to vector<16x128xf32>
    %13 = arith.subf %6, %12 : vector<16x128xf32>
    %14 = vector.broadcast %11 : f32 to vector<16x128xf32>
    %15 = arith.subf %6, %14 : vector<16x128xf32>
    %16 = arith.mulf %13, %15 : vector<16x128xf32>
    %17 = vector.shape_cast %16 : vector<16x128xf32> to vector<1x16x128xf32>
    %cst_8 = arith.constant dense<0.000000e+00> : vector<1xf32>
    %18 = vector.multi_reduction <add>, %17, %cst_8 [1, 2] : vector<1x16x128xf32> to vector<1xf32>
    %19 = vector.shape_cast %18 : vector<1xf32> to vector<1x1x1xf32>
    %20 = vector.extract %19[0, 0, 0] : f32 from vector<1x1x1xf32>
    %cst_9 = arith.constant 2.048000e+03 : f32
    %21 = arith.divf %20, %cst_9 : f32
    %22 = vector.broadcast %11 : f32 to vector<16x128xf32>
    %23 = arith.subf %6, %22 : vector<16x128xf32>
    %cst_10 = arith.constant 9.99999993E-9 : f32
    %24 = arith.addf %21, %cst_10 : f32
    %25 = math.rsqrt %24 : f32
    %26 = vector.broadcast %25 : f32 to vector<16x128xf32>
    %27 = arith.mulf %23, %26 : vector<16x128xf32>
    %c0_11 = arith.constant 0 : index
    %c0_12 = arith.constant 0 : index
    %28 = vector.load %arg4[%c0_11, %c0_12] : memref<16x1xf32, #tpu.memory_space<vmem>>, vector<16x1xf32>
    %29 = vector.broadcast %28 : vector<16x1xf32> to vector<16x128xf32>
    %30 = arith.mulf %27, %29 : vector<16x128xf32>
    %c0_13 = arith.constant 0 : index
    %c0_14 = arith.constant 0 : index
    %31 = vector.load %arg5[%c0_13, %c0_14] : memref<16x1xf32, #tpu.memory_space<vmem>>, vector<16x1xf32>
    %32 = vector.broadcast %31 : vector<16x1xf32> to vector<16x128xf32>
    %33 = arith.addf %30, %32 : vector<16x128xf32>
    %c0_15 = arith.constant 0 : index
    %c0_16 = arith.constant 0 : index
    %34 = vector.load %arg6[%c0_15, %c0_16] : memref<1x1xf32, #tpu.memory_space<vmem>>, vector<1x1xf32>
    %cst_17 = arith.constant 0.000000e+00 : f32
    %35 = vector.broadcast %cst_17 : f32 to vector<16x128xf32>
    %36 = arith.maximumf %33, %35 : vector<16x128xf32>
    %cst_18 = arith.constant 0.000000e+00 : f32
    %37 = vector.broadcast %cst_18 : f32 to vector<16x128xf32>
    %38 = arith.minimumf %33, %37 : vector<16x128xf32>
    %39 = vector.broadcast %34 : vector<1x1xf32> to vector<16x128xf32>
    %40 = arith.mulf %39, %38 : vector<16x128xf32>
    %41 = arith.addf %36, %40 : vector<16x128xf32>
    %42 = arith.truncf %41 : vector<16x128xf32> to vector<16x128xbf16>
    %c0_19 = arith.constant 0 : index
    %c0_20 = arith.constant 0 : index
    %c0_21 = arith.constant 0 : index
    %43 = vector.load %arg7[%c0_19, %c0_20, %c0_21] : memref<1x16x128xbf16, #tpu.memory_space<vmem>>, vector<1x16x128xbf16>
    %44 = vector.shape_cast %43 : vector<1x16x128xbf16> to vector<16x128xbf16>
    %45 = vector.shape_cast %42 : vector<16x128xbf16> to vector<1x16x128xbf16>
    tpu.vector_store %arg7[%c0_19, %c0_20, %c0_21], %45 {strides = array<i32>} : memref<1x16x128xbf16, #tpu.memory_space<vmem>>, vector<1x16x128xbf16>,
    return
  }
  func.func @transform_0(%arg0: i32) -> (i32, i32) {
    %c0_i32 = arith.constant 0 : i32
    %c0_i32_0 = arith.constant 0 : i32
    %c0_i32_1 = arith.constant 0 : i32
    return %c0_i32, %c0_i32_0 : i32, i32
  }
  func.func @transform_1(%arg0: i32) -> (i32, i32, i32) {
    %c0_i32 = arith.constant 0 : i32
    %c0_i32_0 = arith.constant 0 : i32
    %c0_i32_1 = arith.constant 0 : i32
    return %arg0, %c0_i32, %c0_i32_0 : i32, i32, i32
  }
  func.func @transform_2(%arg0: i32) -> (i32, i32) {
    %c0_i32 = arith.constant 0 : i32
    %c0_i32_0 = arith.constant 0 : i32
    %c0_i32_1 = arith.constant 0 : i32
    return %c0_i32, %c0_i32_0 : i32, i32
  }
  func.func @transform_3(%arg0: i32) -> (i32, i32) {
    %c0_i32 = arith.constant 0 : i32
    %c0_i32_0 = arith.constant 0 : i32
    %c0_i32_1 = arith.constant 0 : i32
    return %c0_i32, %c0_i32_0 : i32, i32
  }
  func.func @transform_4(%arg0: i32) -> (i32, i32) {
    %c0_i32 = arith.constant 0 : i32
    %c0_i32_0 = arith.constant 0 : i32
    %c0_i32_1 = arith.constant 0 : i32
    return %c0_i32, %c0_i32_0 : i32, i32
  }
  func.func @transform_5(%arg0: i32) -> (i32, i32) {
    %c0_i32 = arith.constant 0 : i32
    %c0_i32_0 = arith.constant 0 : i32
    %c0_i32_1 = arith.constant 0 : i32
    return %c0_i32, %c0_i32_0 : i32, i32
  }
  func.func @transform_6(%arg0: i32) -> (i32, i32, i32) {
    %c0_i32 = arith.constant 0 : i32
    %c0_i32_0 = arith.constant 0 : i32
    %c0_i32_1 = arith.constant 0 : i32
    return %arg0, %c0_i32, %c0_i32_0 : i32, i32, i32
  }
}

module attributes {stable_mosaic.version = 11 : i64} {
  func.func @_conv_act_kernel(%arg0: i32, %arg1: memref<16x24xbf16, #tpu.memory_space<vmem>>, %arg2: memref<1x24x256xbf16, #tpu.memory_space<vmem>>, %arg3: memref<16x1xf32, #tpu.memory_space<vmem>>, %arg4: memref<1x1xf32, #tpu.memory_space<vmem>>, %arg5: memref<1x16x256xbf16, #tpu.memory_space<vmem>>) attributes {dimension_semantics = [#tpu.dimension_semantics<parallel>], iteration_bounds = array<i64: 2>, scalar_prefetch = 0 : i64, scratch_operands = 0 : i64, tpu.core_type = #tpu.core_type<tc>, window_params = [{pipeline_mode = #tpu.pipeline_mode<synchronous>, transform_indices = @transform_0, window_bounds = array<i64: 16, 24>}, {transform_indices = @transform_1, window_bounds = array<i64: 1, 24, 256>}, {pipeline_mode = #tpu.pipeline_mode<synchronous>, transform_indices = @transform_2, window_bounds = array<i64: 16, 1>}, {pipeline_mode = #tpu.pipeline_mode<synchronous>, transform_indices = @transform_3, window_bounds = array<i64: 1, 1>}, {transform_indices = @transform_4, window_bounds = array<i64: 1, 16, 256>}]} {
    %c0 = arith.constant 0 : index
    %c0_0 = arith.constant 0 : index
    %0 = vector.load %arg1[%c0, %c0_0] : memref<16x24xbf16, #tpu.memory_space<vmem>>, vector<16x24xbf16>
    %c0_1 = arith.constant 0 : index
    %c0_2 = arith.constant 0 : index
    %c0_3 = arith.constant 0 : index
    %1 = vector.load %arg2[%c0_1, %c0_2, %c0_3] : memref<1x24x256xbf16, #tpu.memory_space<vmem>>, vector<1x24x256xbf16>
    %2 = vector.shape_cast %1 : vector<1x24x256xbf16> to vector<24x256xbf16>
    %cst = arith.constant dense<0.000000e+00> : vector<16x256xf32>
    %3 = tpu.matmul %0, %2, %cst {dimension_numbers = #tpu.dot_dimension_numbers<[1], [0], [0], [1], [0, 0, 1, 1], [], []>} : vector<16x24xbf16>, vector<24x256xbf16>, vector<16x256xf32> -> vector<16x256xf32>
    %c0_4 = arith.constant 0 : index
    %c0_5 = arith.constant 0 : index
    %4 = vector.load %arg3[%c0_4, %c0_5] : memref<16x1xf32, #tpu.memory_space<vmem>>, vector<16x1xf32>
    %5 = vector.broadcast %4 : vector<16x1xf32> to vector<16x256xf32>
    %6 = arith.addf %3, %5 : vector<16x256xf32>
    %c0_6 = arith.constant 0 : index
    %c0_7 = arith.constant 0 : index
    %7 = vector.load %arg4[%c0_6, %c0_7] : memref<1x1xf32, #tpu.memory_space<vmem>>, vector<1x1xf32>
    %cst_8 = arith.constant 0.000000e+00 : f32
    %8 = vector.broadcast %cst_8 : f32 to vector<16x256xf32>
    %9 = arith.maximumf %6, %8 : vector<16x256xf32>
    %cst_9 = arith.constant 0.000000e+00 : f32
    %10 = vector.broadcast %cst_9 : f32 to vector<16x256xf32>
    %11 = arith.minimumf %6, %10 : vector<16x256xf32>
    %12 = vector.broadcast %7 : vector<1x1xf32> to vector<16x256xf32>
    %13 = arith.mulf %12, %11 : vector<16x256xf32>
    %14 = arith.addf %9, %13 : vector<16x256xf32>
    %15 = arith.truncf %14 : vector<16x256xf32> to vector<16x256xbf16>
    %c0_10 = arith.constant 0 : index
    %c0_11 = arith.constant 0 : index
    %c0_12 = arith.constant 0 : index
    %16 = vector.load %arg5[%c0_10, %c0_11, %c0_12] : memref<1x16x256xbf16, #tpu.memory_space<vmem>>, vector<1x16x256xbf16>
    %17 = vector.shape_cast %16 : vector<1x16x256xbf16> to vector<16x256xbf16>
    %18 = vector.shape_cast %15 : vector<16x256xbf16> to vector<1x16x256xbf16>
    tpu.vector_store %arg5[%c0_10, %c0_11, %c0_12], %18 {strides = array<i32>} : memref<1x16x256xbf16, #tpu.memory_space<vmem>>, vector<1x16x256xbf16>,
    return
  }
  func.func @transform_0(%arg0: i32) -> (i32, i32) {
    %c0_i32 = arith.constant 0 : i32
    %c0_i32_0 = arith.constant 0 : i32
    %c0_i32_1 = arith.constant 0 : i32
    return %c0_i32, %c0_i32_0 : i32, i32
  }
  func.func @transform_1(%arg0: i32) -> (i32, i32, i32) {
    %c0_i32 = arith.constant 0 : i32
    %c0_i32_0 = arith.constant 0 : i32
    %c0_i32_1 = arith.constant 0 : i32
    return %arg0, %c0_i32, %c0_i32_0 : i32, i32, i32
  }
  func.func @transform_2(%arg0: i32) -> (i32, i32) {
    %c0_i32 = arith.constant 0 : i32
    %c0_i32_0 = arith.constant 0 : i32
    %c0_i32_1 = arith.constant 0 : i32
    return %c0_i32, %c0_i32_0 : i32, i32
  }
  func.func @transform_3(%arg0: i32) -> (i32, i32) {
    %c0_i32 = arith.constant 0 : i32
    %c0_i32_0 = arith.constant 0 : i32
    %c0_i32_1 = arith.constant 0 : i32
    return %c0_i32, %c0_i32_0 : i32, i32
  }
  func.func @transform_4(%arg0: i32) -> (i32, i32, i32) {
    %c0_i32 = arith.constant 0 : i32
    %c0_i32_0 = arith.constant 0 : i32
    %c0_i32_1 = arith.constant 0 : i32
    return %arg0, %c0_i32, %c0_i32_0 : i32, i32, i32
  }
}

module attributes {stable_mosaic.version = 11 : i64} {
  func.func @_conv_gn_act_kernel(%arg0: i32, %arg1: memref<8x96xbf16, #tpu.memory_space<vmem>>, %arg2: memref<1x96x256xbf16, #tpu.memory_space<vmem>>, %arg3: memref<8x1xf32, #tpu.memory_space<vmem>>, %arg4: memref<8x1xf32, #tpu.memory_space<vmem>>, %arg5: memref<8x1xf32, #tpu.memory_space<vmem>>, %arg6: memref<1x1xf32, #tpu.memory_space<vmem>>, %arg7: memref<1x8x256xbf16, #tpu.memory_space<vmem>>) attributes {dimension_semantics = [#tpu.dimension_semantics<parallel>], iteration_bounds = array<i64: 2>, scalar_prefetch = 0 : i64, scratch_operands = 0 : i64, tpu.core_type = #tpu.core_type<tc>, window_params = [{pipeline_mode = #tpu.pipeline_mode<synchronous>, transform_indices = @transform_0, window_bounds = array<i64: 8, 96>}, {transform_indices = @transform_1, window_bounds = array<i64: 1, 96, 256>}, {pipeline_mode = #tpu.pipeline_mode<synchronous>, transform_indices = @transform_2, window_bounds = array<i64: 8, 1>}, {pipeline_mode = #tpu.pipeline_mode<synchronous>, transform_indices = @transform_3, window_bounds = array<i64: 8, 1>}, {pipeline_mode = #tpu.pipeline_mode<synchronous>, transform_indices = @transform_4, window_bounds = array<i64: 8, 1>}, {pipeline_mode = #tpu.pipeline_mode<synchronous>, transform_indices = @transform_5, window_bounds = array<i64: 1, 1>}, {transform_indices = @transform_6, window_bounds = array<i64: 1, 8, 256>}]} {
    %c0 = arith.constant 0 : index
    %c0_0 = arith.constant 0 : index
    %0 = vector.load %arg1[%c0, %c0_0] : memref<8x96xbf16, #tpu.memory_space<vmem>>, vector<8x96xbf16>
    %c0_1 = arith.constant 0 : index
    %c0_2 = arith.constant 0 : index
    %c0_3 = arith.constant 0 : index
    %1 = vector.load %arg2[%c0_1, %c0_2, %c0_3] : memref<1x96x256xbf16, #tpu.memory_space<vmem>>, vector<1x96x256xbf16>
    %2 = vector.shape_cast %1 : vector<1x96x256xbf16> to vector<96x256xbf16>
    %cst = arith.constant dense<0.000000e+00> : vector<8x256xf32>
    %3 = tpu.matmul %0, %2, %cst {dimension_numbers = #tpu.dot_dimension_numbers<[1], [0], [0], [1], [0, 0, 1, 1], [], []>} : vector<8x96xbf16>, vector<96x256xbf16>, vector<8x256xf32> -> vector<8x256xf32>
    %c0_4 = arith.constant 0 : index
    %c0_5 = arith.constant 0 : index
    %4 = vector.load %arg3[%c0_4, %c0_5] : memref<8x1xf32, #tpu.memory_space<vmem>>, vector<8x1xf32>
    %5 = vector.broadcast %4 : vector<8x1xf32> to vector<8x256xf32>
    %6 = arith.addf %3, %5 : vector<8x256xf32>
    %7 = vector.shape_cast %6 : vector<8x256xf32> to vector<1x8x256xf32>
    %cst_6 = arith.constant dense<0.000000e+00> : vector<1xf32>
    %8 = vector.multi_reduction <add>, %7, %cst_6 [1, 2] : vector<1x8x256xf32> to vector<1xf32>
    %9 = vector.shape_cast %8 : vector<1xf32> to vector<1x1x1xf32>
    %10 = vector.extract %9[0, 0, 0] : f32 from vector<1x1x1xf32>
    %cst_7 = arith.constant 2.048000e+03 : f32
    %11 = arith.divf %10, %cst_7 : f32
    %12 = vector.broadcast %11 : f32 to vector<8x256xf32>
    %13 = arith.subf %6, %12 : vector<8x256xf32>
    %14 = vector.broadcast %11 : f32 to vector<8x256xf32>
    %15 = arith.subf %6, %14 : vector<8x256xf32>
    %16 = arith.mulf %13, %15 : vector<8x256xf32>
    %17 = vector.shape_cast %16 : vector<8x256xf32> to vector<1x8x256xf32>
    %cst_8 = arith.constant dense<0.000000e+00> : vector<1xf32>
    %18 = vector.multi_reduction <add>, %17, %cst_8 [1, 2] : vector<1x8x256xf32> to vector<1xf32>
    %19 = vector.shape_cast %18 : vector<1xf32> to vector<1x1x1xf32>
    %20 = vector.extract %19[0, 0, 0] : f32 from vector<1x1x1xf32>
    %cst_9 = arith.constant 2.048000e+03 : f32
    %21 = arith.divf %20, %cst_9 : f32
    %22 = vector.broadcast %11 : f32 to vector<8x256xf32>
    %23 = arith.subf %6, %22 : vector<8x256xf32>
    %cst_10 = arith.constant 9.99999993E-9 : f32
    %24 = arith.addf %21, %cst_10 : f32
    %25 = math.rsqrt %24 : f32
    %26 = vector.broadcast %25 : f32 to vector<8x256xf32>
    %27 = arith.mulf %23, %26 : vector<8x256xf32>
    %c0_11 = arith.constant 0 : index
    %c0_12 = arith.constant 0 : index
    %28 = vector.load %arg4[%c0_11, %c0_12] : memref<8x1xf32, #tpu.memory_space<vmem>>, vector<8x1xf32>
    %29 = vector.broadcast %28 : vector<8x1xf32> to vector<8x256xf32>
    %30 = arith.mulf %27, %29 : vector<8x256xf32>
    %c0_13 = arith.constant 0 : index
    %c0_14 = arith.constant 0 : index
    %31 = vector.load %arg5[%c0_13, %c0_14] : memref<8x1xf32, #tpu.memory_space<vmem>>, vector<8x1xf32>
    %32 = vector.broadcast %31 : vector<8x1xf32> to vector<8x256xf32>
    %33 = arith.addf %30, %32 : vector<8x256xf32>
    %c0_15 = arith.constant 0 : index
    %c0_16 = arith.constant 0 : index
    %34 = vector.load %arg6[%c0_15, %c0_16] : memref<1x1xf32, #tpu.memory_space<vmem>>, vector<1x1xf32>
    %cst_17 = arith.constant 0.000000e+00 : f32
    %35 = vector.broadcast %cst_17 : f32 to vector<8x256xf32>
    %36 = arith.maximumf %33, %35 : vector<8x256xf32>
    %cst_18 = arith.constant 0.000000e+00 : f32
    %37 = vector.broadcast %cst_18 : f32 to vector<8x256xf32>
    %38 = arith.minimumf %33, %37 : vector<8x256xf32>
    %39 = vector.broadcast %34 : vector<1x1xf32> to vector<8x256xf32>
    %40 = arith.mulf %39, %38 : vector<8x256xf32>
    %41 = arith.addf %36, %40 : vector<8x256xf32>
    %42 = arith.truncf %41 : vector<8x256xf32> to vector<8x256xbf16>
    %c0_19 = arith.constant 0 : index
    %c0_20 = arith.constant 0 : index
    %c0_21 = arith.constant 0 : index
    %43 = vector.load %arg7[%c0_19, %c0_20, %c0_21] : memref<1x8x256xbf16, #tpu.memory_space<vmem>>, vector<1x8x256xbf16>
    %44 = vector.shape_cast %43 : vector<1x8x256xbf16> to vector<8x256xbf16>
    %45 = vector.shape_cast %42 : vector<8x256xbf16> to vector<1x8x256xbf16>
    tpu.vector_store %arg7[%c0_19, %c0_20, %c0_21], %45 {strides = array<i32>} : memref<1x8x256xbf16, #tpu.memory_space<vmem>>, vector<1x8x256xbf16>,
    return
  }
  func.func @transform_0(%arg0: i32) -> (i32, i32) {
    %c0_i32 = arith.constant 0 : i32
    %c0_i32_0 = arith.constant 0 : i32
    %c0_i32_1 = arith.constant 0 : i32
    return %c0_i32, %c0_i32_0 : i32, i32
  }
  func.func @transform_1(%arg0: i32) -> (i32, i32, i32) {
    %c0_i32 = arith.constant 0 : i32
    %c0_i32_0 = arith.constant 0 : i32
    %c0_i32_1 = arith.constant 0 : i32
    return %arg0, %c0_i32, %c0_i32_0 : i32, i32, i32
  }
  func.func @transform_2(%arg0: i32) -> (i32, i32) {
    %c0_i32 = arith.constant 0 : i32
    %c0_i32_0 = arith.constant 0 : i32
    %c0_i32_1 = arith.constant 0 : i32
    return %c0_i32, %c0_i32_0 : i32, i32
  }
  func.func @transform_3(%arg0: i32) -> (i32, i32) {
    %c0_i32 = arith.constant 0 : i32
    %c0_i32_0 = arith.constant 0 : i32
    %c0_i32_1 = arith.constant 0 : i32
    return %c0_i32, %c0_i32_0 : i32, i32
  }
  func.func @transform_4(%arg0: i32) -> (i32, i32) {
    %c0_i32 = arith.constant 0 : i32
    %c0_i32_0 = arith.constant 0 : i32
    %c0_i32_1 = arith.constant 0 : i32
    return %c0_i32, %c0_i32_0 : i32, i32
  }
  func.func @transform_5(%arg0: i32) -> (i32, i32) {
    %c0_i32 = arith.constant 0 : i32
    %c0_i32_0 = arith.constant 0 : i32
    %c0_i32_1 = arith.constant 0 : i32
    return %c0_i32, %c0_i32_0 : i32, i32
  }
  func.func @transform_6(%arg0: i32) -> (i32, i32, i32) {
    %c0_i32 = arith.constant 0 : i32
    %c0_i32_0 = arith.constant 0 : i32
    %c0_i32_1 = arith.constant 0 : i32
    return %arg0, %c0_i32, %c0_i32_0 : i32, i32, i32
  }
}

</mosaic_0001>

<bundles_post_ra>
// kernel: msfed4_forward.19
= control target key start
LH: loop header
LB: loop body
LE: loop exit
PB: predicated region body
PF: predicated region fallthrough
CT: control target
= control target key end

     0   :  { %s638_s0 = inlined_call_operand.hbm [shape: bf16[4,8], index: 0, kind: input, shape index: {}]   ;;  %s639_s1 = inlined_call_operand.vmem [shape: bf16[2,8,512], index: 1, kind: input, shape index: {}]   ;;  %s640_s2 = inlined_call_operand.vmem [shape: f32[4,1], index: 2, kind: input, shape index: {}]   ;;  %s641_s3 = inlined_call_operand.<no memory space> [shape: f32[1,1], index: 3, kind: input, shape index: {}]   ;;  %s642_s4 = inlined_call_operand.vmem [shape: bf16[2,4,512], index: 4, kind: output, shape index: {}]  }
   0x1   :  { %v9_v0 = vstv %s641_s3 }
   0x2   :  { %10 = vst [vmem:[#allocation2] sm:$0x1] %v9_v0 }
   0x3   :  { %11 = vsyncpa [#allocation4], 0  ;;  %s575_s17 = smov 0  }
   0x4 LB: > { %s581_s18 = sadd.s32 4294967295, %s542_s17   ;;  %p454_p0 = scmp.ge.s32.totalorder %s542_s17, 1  ;;  %s542_s17 = sphi %s575_s17, %s17_s17  }
   0x5   : > { %p137_p1 = scmp.lt.s32.totalorder %s542_s17, 3  ;;  %p643_p3 = scmp.eq.s32.totalorder %s581_s18, 0 }
   0x6   : > { %s544_s19 = smov [#allocation3]   ;;  %s504_s24 = scalar_lea.hbm %s638_s0, 32 }
   0x7   : > { %p585_p2 = pnand %p454_p0, %p137_p1  ;;  %s150_s20 = sshll.u32 %s544_s19, 4  ;;  %s151_s20 = int_to_ptr.vmem [resolvable:$true] %s150_s20 }
   0x8   : > { %p505_p6 = scmp.ne.s32.totalorder %s638_s0, %s504_s24  ;;  %p511_p10 = scmp.lt.u32.totalorder %s504_s24, %s638_s0 }
   0x9   : > { %s645_s3 = scalar_select %p585_p2, 1, 0 }
   0xa   : > { %p482_p4 = pneg %p585_p2 }
   0xc   : > { %p594_p5 = pnand %p643_p3, %p482_p4 }
   0xe   : > { %p506_p7 = pneg %p594_p5 }
  0x10   : > { %p507_p8 = pnand %p506_p7, %p505_p6 }
  0x12   : > { %p508_p9 = pneg %p507_p8 }
  0x14   : > { %p513_p11 = pnand %p511_p10, %p508_p9 }
  0x16   : > { %516 = shalt.err (!%p513_p11)
}
  0x17   : > { %s517_s29 = scalar_lea.vmem %s151_s20, 32  ;;  %p525_p1 = scmp.lt.s32.totalorder %s151_s20, %s151_s20 }
  0x18   : > { %p518_p12 = scmp.ne.s32.totalorder %s151_s20, %s517_s29  ;;  %p526_p4 = scmp.lt.s32.totalorder %s517_s29, %s517_s29 }
  0x1a   : > { %p520_p13 = pnand %p518_p12, %p506_p7  ;;  %p527_p3 = por %p526_p4, %p525_p1 }
  0x1c   : > { %p521_p0 = pneg %p520_p13 }
  0x1e   : > { %p528_p2 = pnand %p527_p3, %p521_p0 }
  0x20   : > { %531 = shalt.err (!%p528_p2)
}
  0x21   : > { %485 = dma.hbm_to_vmem [thread:$0]  (!%p594_p5), %s638_s0, 32, %s151_s20, [#allocation4]  }
  0x22   : > { %p647_p6 = scmp.ne.s32.totalorder %s645_s3, 0 }
  0x23   : > { %p648_p8 = scmp.eq.s32.totalorder (!%p647_p6), %s581_s18, 0 }
  0x24   : > { %177 = sbr.rel (%p647_p6) target bundleno = 284 (0x11c), region = 36 }
  0x2b   : > { %537 = dma.done.wait (%p648_p8), [#allocation4], 32   ;;  %p649_p7 = pmov %p648_p8 }
  0x2c   : > { %p203_p9 = scmp.lt.s32.totalorder %s581_s18, 1  ;;  %v545_v1 = vmov 0   ;;  %vm237_vm0 = vcmask 1043456   ;;  %v217_v8 = vld [vmem:[%s640_s2] sm:$0xf]  ;;  %vm233_vm1 = vcmask 64512   ;;  %v371_v18 = vlaneseq }
  0x2d   : > { %539 = vsyncadd (%p649_p7), [#allocation4], 4294967264  ;;  %282 = vmatprep.mubr.bf16.mxu0 %v545_v1  ;;  %323 = vmatprep.mubr.bf16.mxu1 %v545_v1  ;;  %v471_v11 = vld [vmem:[#allocation2] ss:$0 sm:$0xff]  ;;  %v214_v12 = vld [vmem:[#allocation3] sm:$0x3] }
  0x2e   : > { %s651_s18 = smov (!%p203_p9, %s581_s18), 1  ;;  %499 = vset.pattern.permute.xlu0 %v545_v1  ;;  %v546_v16 = vmov 1983009808   ;;  %v372_v34 = vshrl.u32 %v371_v18, 7 }
  0x2f   : > { %s476_s6 = sshll.u32 %s651_s18, 4  ;;  %220 = vperm.xlu0 %499, %v217_v8   ;;  %v369_v17 = vunpack.c.l.s4 %v546_v16  ;;  %s477_s12 = sshll.u32 %s651_s18, 3 }
  0x30   : > { %s207_s9 = scalar_lea.vmem %s639_s1, %s476_s6  ;;  %s212_s15 = scalar_lea.vmem %s642_s4, %s477_s12 }
  0x31   : > { %v215_v2 = vld [vmem:[%s207_s9] sm:$0xff]  ;;  %v216_v3 = vld [vmem:[%s207_s9 + $0x8] sm:$0xff]  ;;  %v370_v33 = vunpack.c.0.s8 %v369_v17 }
  0x32   : > { %v464_v4 = vcombine.high %v215_v2, %v215_v2  ;;  %v466_v5 = vcombine.high %v216_v3, %v216_v3  ;;  %v463_v6 = vcombine.low %v215_v2, %v215_v2  ;;  %v465_v7 = vcombine.low %v216_v3, %v216_v3 }
  0x33   : > { %347 = vperm.xlu0 %499, %v471_v11   ;;  %v373_v47 = vsub.s32 %v370_v33, %v372_v34 }
  0x34   : > { %467 = vmatprep.subr.msk.bf16.mxu0 %vm237_vm0, %v464_v4  ;;  %469 = vmatprep.subr.msk.bf16.mxu1 %vm237_vm0, %v466_v5  ;;  %v239_v9 = vsel %vm237_vm0, %v463_v6, 0  ;;  %v245_v10 = vsel %vm237_vm0, %v465_v7, 0 }
  0x35   : > { %251 = vmatpush1.bf16.msra.mxu0 %v239_v9  ;;  %292 = vmatpush1.bf16.msra.mxu1 %v245_v10 }
  0x38   : > { %468 = vmatmul.mubr.msk.bf16.vlgmr.msra.gmra.mrb[0].mxu0 %vm233_vm1, %v214_v12  ;;  %470 = vmatmul.mubr.msk.bf16.vlgmr.msra.gmra.mrb[0].mxu1 %vm233_vm1, %v214_v12 }
  0xae   : > { %v221_v13 = vpop.permute.xlu0 %220 }
  0xb2   : > { %v348_v31 = vpop.permute.xlu0 %347 }
 0x10b   : > { %v284_v14 = vpop.f32.mrb[0].mxu0  ;;  %v325_v15 = vpop.f32.mrb[0].mxu1 }
 0x10c   : > { %v285_v19 = vadd.f32 %v284_v14, %v221_v13  ;;  %v326_v20 = vadd.f32 %v325_v15, %v221_v13  ;;  %v286_v21 = vpop.f32.mrb[1].mxu0  ;;  %v327_v22 = vpop.f32.mrb[1].mxu1 }
 0x10d   : > { %v287_v23 = vadd.f32 %v286_v21, %v221_v13  ;;  %v328_v24 = vadd.f32 %v327_v22, %v221_v13  ;;  %v288_v25 = vpop.f32.mrb[2].mxu0  ;;  %v329_v26 = vpop.f32.mrb[2].mxu1 }
 0x10e   : > { %v337_v27 = vmin.f32 %v285_v19, 0.0  ;;  %v339_v28 = vmin.f32 %v326_v20, 0.0  ;;  %v289_v29 = vpop.f32.mrb[3].mxu0  ;;  %v330_v30 = vpop.f32.mrb[3].mxu1  ;;  %v333_v36 = vmax.f32 %v285_v19, 0.0  ;;  %v335_v37 = vmax.f32 %v326_v20, 0.0 }
 0x10f   : > { %v338_v32 = vmin.f32 %v287_v23, 0.0  ;;  %v340_v35 = vmin.f32 %v328_v24, 0.0  ;;  %v334_v40 = vmax.f32 %v287_v23, 0.0  ;;  %v336_v42 = vmax.f32 %v328_v24, 0.0 }
 0x110   : > { %v350_v38 = vmul.f32 %v348_v31, %v337_v27  ;;  %v352_v39 = vmul.f32 %v348_v31, %v339_v28 }
 0x111   : > { %v351_v41 = vmul.f32 %v348_v31, %v338_v32  ;;  %v353_v43 = vmul.f32 %v348_v31, %v340_v35 }
 0x112   : > { %v354_v44 = vadd.f32 %v350_v38, %v333_v36  ;;  %v356_v45 = vadd.f32 %v352_v39, %v335_v37 }
 0x113   : > { %v355_v46 = vadd.f32 %v351_v41, %v334_v40  ;;  %v357_v48 = vadd.f32 %v353_v43, %v336_v42 }
 0x115   : > { %v472_v49 = vpack.c.bf16 %v355_v46, %v354_v44  ;;  %v473_v50 = vpack.c.bf16 %v357_v48, %v356_v45 }
 0x117   : > { %v374_v51 = vrot.slane %v472_v49, %v373_v47  ;;  %v381_v52 = vrot.slane %v473_v50, %v373_v47 }
 0x119   : > { %v382_v53 = vcombine.low %v374_v51, %v381_v52 }
 0x11b   : > { %384 = vst [vmem:[%s212_s15] sm:$0xff] %v382_v53 }
 0x11c PF: > { %s17_s17 = sadd.s32 1, %s542_s17  }
 0x11d   : > { %p14_p2 = scmp.ge.s32.totalorder %s17_s17, 4  }
 0x11f   :  { %16 = sbr.rel (!%p14_p2) target bundleno = 4 (0x4), region = 71 }
 0x126   :  { %406 = vsyncpa [#allocation4], 1 }
 0x127   :  { %408 = vsyncpa [#allocation4 + $0x1], 1 }

// kernel: msfed4_forward.18
= control target key start
LH: loop header
LB: loop body
LE: loop exit
PB: predicated region body
PF: predicated region fallthrough
CT: control target
= control target key end

     0   :  { %s658_s23 = smov 0   ;;  %s703_s0 = inlined_call_operand.vmem [shape: bf16[4,2], index: 0, kind: input, shape index: {}]   ;;  %s704_s1 = inlined_call_operand.vmem [shape: bf16[2,2,512], index: 1, kind: input, shape index: {}]   ;;  %s705_s2 = inlined_call_operand.vmem [shape: f32[4,1], index: 2, kind: input, shape index: {}]   ;;  %s706_s3 = inlined_call_operand.vmem [shape: f32[4,1], index: 3, kind: input, shape index: {}]   ;;  %s707_s4 = inlined_call_operand.vmem [shape: f32[4,1], index: 4, kind: input, shape index: {}]   ;;  %s708_s5 = inlined_call_operand.<no memory space> [shape: f32[1,1], index: 5, kind: input, shape index: {}]   ;;  %s709_s6 = inlined_call_operand.vmem [shape: bf16[2,4,512], index: 6, kind: output, shape index: {}]  }
   0x1   :  { %v11_v0 = vstv %s708_s5 }
   0x2   :  { %12 = vst [vmem:[#allocation2] sm:$0x1] %v11_v0 }
   0x3 LB: > { %s569_s24 = sadd.s32 4294967295, %s615_s23   ;;  %p573_p0 = scmp.ge.s32.totalorder %s615_s23, 1  ;;  %s615_s23 = sphi %s658_s23, %s18_s23  }
   0x4   : > { %p213_p1 = scmp.lt.s32.totalorder %s615_s23, 3 }
   0x6   : > { %p214_p2 = pnand %p573_p0, %p213_p1 }
   0x7   : > { %p242_p3 = scmp.lt.s32.totalorder (!%p214_p2), %s569_s24, 1  ;;  %v272_v1 = vlaneseq (!%p214_p2)  ;;  %v617_v2 = vmov (!%p214_p2), 1966171168   ;;  %v254_v4 = vld [vmem:[%s705_s2] sm:$0xf] (!%p214_p2)  ;;  %v618_v6 = vmov (!%p214_p2), 0  }
   0x8   : > { %217 = sbr.rel (%p214_p2) target bundleno = 757 (0x2f5), region = 44  ;;  %v270_v3 = vunpack.c.l.s4 (!%p214_p2), %v617_v2  ;;  %334 = vmatprep.mubr.bf16.mxu0 (!%p214_p2), %v618_v6  ;;  %375 = vmatprep.mubr.bf16.mxu1 (!%p214_p2), %v618_v6  ;;  %vm289_vm0 = vcmask (!%p214_p2), 1040384   ;;  %v252_v17 = vld [vmem:[%s703_s0] sm:$0x3] (!%p214_p2)  ;;  %vm285_vm1 = vcmask (!%p214_p2), 15360   ;;  %vm384_vm2 = vcmask (!%p214_p2), 1043456  }
   0x9   : > { %v671_v5 = vshrl.u32 (!%p214_p2), %v272_v1, 7  ;;  %605 = vset.pattern.permute.xlu0 (!%p214_p2), %v618_v6  ;;  %606 = vset.pattern.permute.xlu1 (!%p214_p2), %v618_v6  ;;  %v441_v61 = vld [vmem:[%s706_s3] sm:$0xf] (!%p214_p2) }
   0xa   : > { %v271_v7 = vunpack.c.0.s8 (!%p214_p2), %v270_v3  ;;  %257 = vperm.xlu0 (!%p214_p2), %605, %v254_v4   ;;  %v451_v62 = vld [vmem:[%s707_s4] sm:$0xf] (!%p214_p2) }
   0xb   : > { %v582_v63 = vld [vmem:[#allocation2] ss:$0 sm:$0xff] (!%p214_p2) }
   0xc   : > { %v274_v8 = vsub.s32 (!%p214_p2), %v271_v7, %v671_v5 }
   0xf   : > { %s711_s24 = smov (!%p242_p3, %s569_s24), 1 }
  0x10   : > { %s574_s26 = sshll.u32 %s711_s24, 2  ;;  %s587_s18 = sshll.u32 %s711_s24, 3 }
  0x11   : > { %s245_s29 = scalar_lea.vmem %s704_s1, %s574_s26  ;;  %s250_s21 = scalar_lea.vmem %s709_s6, %s587_s18 }
  0x12   : > { %v577_v9 = vld.sshfl [vmem:[%s245_s29] sm:$0x33 pattern:$0x75316420] }
  0x13   : > { %v268_v10 = vcombine.high %v577_v9, %v577_v9  ;;  %v275_v11 = vrot.slane %v577_v9, %v274_v8 }
  0x15   : > { %v282_v12 = vrot.slane %v268_v10, %v274_v8  ;;  %v291_v13 = vsel %vm289_vm0, %v275_v11, 0  ;;  %v283_v14 = vcombine.high %v275_v11, %v275_v11 }
  0x17   : > { %578 = vmatprep.subr.msk.bf16.mxu0 %vm289_vm0, %v282_v12  ;;  %v284_v15 = vcombine.high %v282_v12, %v282_v12  ;;  %v297_v16 = vsel %vm289_vm0, %v283_v14, 0 }
  0x18   : > { %303 = vmatpush1.bf16.msra.mxu0 %v291_v13 }
  0x19   : > { %580 = vmatprep.subr.msk.bf16.mxu1 %vm289_vm0, %v284_v15 }
  0x1a   : > { %344 = vmatpush1.bf16.msra.mxu1 %v297_v16  ;;  %v619_v16 = vmov 1983009808  }
  0x1b   : > { %579 = vmatmul.mubr.msk.bf16.vlgmr.msra.gmra.mrb[0].mxu0 %vm285_vm1, %v252_v17 }
  0x1d   : > { %581 = vmatmul.mubr.msk.bf16.vlgmr.msra.gmra.mrb[0].mxu1 %vm285_vm1, %v252_v17  ;;  %v498_v17 = vunpack.c.l.s4 %v619_v16 }
  0x89   : > { %v258_v18 = vpop.permute.xlu0 %257 }
  0xee   : > { %v336_v19 = vpop.f32.mrb[0].mxu0 }
  0xef   : > { %v337_v20 = vadd.f32 %v336_v19, %v258_v18  ;;  %v338_v21 = vpop.f32.mrb[1].mxu0 }
  0xf0   : > { %v339_v22 = vadd.f32 %v338_v21, %v258_v18  ;;  %v340_v23 = vpop.f32.mrb[2].mxu0  ;;  %v377_v24 = vpop.f32.mrb[0].mxu1 }
  0xf1   : > { %v385_v25 = vsel %vm384_vm2, %v337_v20, 0.0  ;;  %v378_v26 = vadd.f32 %v377_v24, %v258_v18  ;;  %v341_v27 = vpop.f32.mrb[3].mxu0  ;;  %v379_v28 = vpop.f32.mrb[1].mxu1 }
  0xf2   : > { %v386_v29 = vsel %vm384_vm2, %v339_v22, 0.0  ;;  %v380_v30 = vadd.f32 %v379_v28, %v258_v18  ;;  %v381_v31 = vpop.f32.mrb[2].mxu1  ;;  %v499_v27 = vunpack.c.0.s8 %v498_v17 }
  0xf3   : > { %v387_v32 = vadd.f32 %v386_v29, %v385_v25  ;;  %v388_v33 = vsel %vm384_vm2, %v378_v26, 0.0  ;;  %v382_v34 = vpop.f32.mrb[3].mxu1 }
  0xf4   : > { %v390_v36 = vsel %vm384_vm2, %v380_v30, 0.0 }
  0xf5   : > { %v389_v35 = vadd.f32 %v388_v33, %v387_v32 }
  0xf7   : > { %v391_v37 = vadd.f32 %v390_v36, %v389_v35 }
  0xf9   : > { %392 = vadd.xlane.f32.xlu0 %v391_v37 }
 0x186   : > { %v393_v38 = vpop.xlane.xlu0 %392 }
 0x187   : > { %v394_v39 = vrot.slane %v393_v38, 4 }
 0x189   : > { %v395_v40 = vadd.f32 %v394_v39, %v393_v38 }
 0x18b   : > { %v396_v41 = vrot.slane %v395_v40, 2 }
 0x18d   : > { %v397_v42 = vadd.f32 %v396_v41, %v395_v40  ;;  %v502_v41 = vsub.s32 %v499_v27, %v671_v5 }
 0x18f   : > { %v398_v43 = vrot.slane %v397_v42, 1 }
 0x191   : > { %v399_v44 = vadd.f32 %v398_v43, %v397_v42 }
 0x193   : > { %588 = vpush %v399_v44 }
 0x1c4   : > { %s589_s8 = spop %588 }
 0x1c5   : > { %s403_s9 = smul.f32 0.00048828125, %s589_s8 }
 0x1c7   : > { %v404_v45 = vstv %s403_s9 }
 0x1c8   : > { %v405_v46 = vsub.f32 %v337_v20, %v404_v45  ;;  %v406_v47 = vsub.f32 %v339_v22, %v404_v45  ;;  %v407_v48 = vsub.f32 %v378_v26, %v404_v45  ;;  %v408_v49 = vsub.f32 %v380_v30, %v404_v45 }
 0x1ca   : > { %v409_v50 = vmul.f32 %v405_v46, %v405_v46  ;;  %v410_v51 = vmul.f32 %v406_v47, %v406_v47  ;;  %v411_v52 = vmul.f32 %v407_v48, %v407_v48  ;;  %v412_v53 = vmul.f32 %v408_v49, %v408_v49 }
 0x1cc   : > { %v413_v54 = vsel %vm384_vm2, %v409_v50, 0.0  ;;  %v414_v55 = vsel %vm384_vm2, %v410_v51, 0.0  ;;  %v416_v57 = vsel %vm384_vm2, %v411_v52, 0.0  ;;  %v418_v59 = vsel %vm384_vm2, %v412_v53, 0.0 }
 0x1cd   : > { %v415_v56 = vadd.f32 %v414_v55, %v413_v54 }
 0x1cf   : > { %v417_v58 = vadd.f32 %v416_v57, %v415_v56 }
 0x1d1   : > { %v419_v60 = vadd.f32 %v418_v59, %v417_v58 }
 0x1d3   : > { %420 = vadd.xlane.f32.xlu1 %v419_v60 }
 0x1e4   : > { %444 = vperm.xlu1 %606, %v441_v61  }
 0x1e8   : > { %454 = vperm.xlu1 %606, %v451_v62  }
 0x1ec   : > { %476 = vperm.xlu1 %606, %v582_v63  }
 0x260   : > { %v421_v0 = vpop.xlane.xlu1 %420 }
 0x261   : > { %v422_v1 = vrot.slane %v421_v0, 4 }
 0x263   : > { %v423_v2 = vadd.f32 %v422_v1, %v421_v0 }
 0x264   : > { %v445_v10 = vpop.permute.xlu1 %444 }
 0x265   : > { %v424_v3 = vrot.slane %v423_v2, 2 }
 0x267   : > { %v425_v4 = vadd.f32 %v424_v3, %v423_v2 }
 0x268   : > { %v455_v18 = vpop.permute.xlu1 %454 }
 0x269   : > { %v426_v6 = vrot.slane %v425_v4, 1 }
 0x26b   : > { %v427_v7 = vadd.f32 %v426_v6, %v425_v4 }
 0x26c   : > { %v477_v36 = vpop.permute.xlu1 %476 }
 0x26d   : > { %590 = vpush %v427_v7 }
 0x29e   : > { %s591_s14 = spop %590 }
 0x29f   : > { %s431_s15 = smul.f32 0.00048828125, %s591_s14 }
 0x2a1   : > { %s432_s16 = sadd.f32 1e-08, %s431_s15 }
 0x2a3   : > { %v433_v8 = vstv %s432_s16 }
 0x2a4   : > { %607 = vrsqrt.f32 %v433_v8 }
 0x2ae   : > { %v608_v9 = vpop.eup %607 }
 0x2af   : > { %592 = vpush %v608_v9 }
 0x2e0   : > { %s593_s17 = spop %592 }
 0x2e1   : > { %v436_v11 = vstv %s593_s17 }
 0x2e2   : > { %v437_v12 = vmul.f32 %v436_v11, %v405_v46  ;;  %v438_v13 = vmul.f32 %v436_v11, %v406_v47  ;;  %v439_v14 = vmul.f32 %v436_v11, %v407_v48  ;;  %v440_v15 = vmul.f32 %v436_v11, %v408_v49 }
 0x2e4   : > { %v447_v19 = vmul.f32 %v445_v10, %v437_v12  ;;  %v448_v20 = vmul.f32 %v445_v10, %v438_v13  ;;  %v449_v21 = vmul.f32 %v445_v10, %v439_v14  ;;  %v450_v22 = vmul.f32 %v445_v10, %v440_v15 }
 0x2e6   : > { %v457_v23 = vadd.f32 %v455_v18, %v447_v19  ;;  %v458_v24 = vadd.f32 %v455_v18, %v448_v20  ;;  %v459_v25 = vadd.f32 %v455_v18, %v449_v21  ;;  %v460_v26 = vadd.f32 %v455_v18, %v450_v22 }
 0x2e8   : > { %v466_v28 = vmin.f32 %v457_v23, 0.0  ;;  %v467_v29 = vmin.f32 %v458_v24, 0.0  ;;  %v468_v30 = vmin.f32 %v459_v25, 0.0  ;;  %v469_v31 = vmin.f32 %v460_v26, 0.0 }
 0x2e9   : > { %v462_v32 = vmax.f32 %v457_v23, 0.0  ;;  %v463_v33 = vmax.f32 %v458_v24, 0.0  ;;  %v464_v34 = vmax.f32 %v459_v25, 0.0  ;;  %v465_v35 = vmax.f32 %v460_v26, 0.0 }
 0x2ea   : > { %v479_v37 = vmul.f32 %v477_v36, %v466_v28  ;;  %v480_v38 = vmul.f32 %v477_v36, %v467_v29  ;;  %v481_v39 = vmul.f32 %v477_v36, %v468_v30  ;;  %v482_v40 = vmul.f32 %v477_v36, %v469_v31 }
 0x2ec   : > { %v483_v42 = vadd.f32 %v479_v37, %v462_v32  ;;  %v484_v43 = vadd.f32 %v480_v38, %v463_v33  ;;  %v485_v44 = vadd.f32 %v481_v39, %v464_v34  ;;  %v486_v45 = vadd.f32 %v482_v40, %v465_v35 }
 0x2ee   : > { %v583_v46 = vpack.c.bf16 %v484_v43, %v483_v42  ;;  %v584_v47 = vpack.c.bf16 %v486_v45, %v485_v44 }
 0x2f0   : > { %v503_v48 = vrot.slane %v583_v46, %v502_v41  ;;  %v510_v49 = vrot.slane %v584_v47, %v502_v41 }
 0x2f2   : > { %v511_v50 = vcombine.low %v503_v48, %v510_v49 }
 0x2f4   : > { %513 = vst [vmem:[%s250_s21] sm:$0xff] %v511_v50 }
 0x2f5 PF: > { %s18_s23 = sadd.s32 1, %s615_s23  }
 0x2f6   : > { %p15_p4 = scmp.ge.s32.totalorder %s18_s23, 4  }
 0x2f8   :  { %17 = sbr.rel (!%p15_p4) target bundleno = 3 (0x3), region = 74 }

// kernel: msfed4_forward.20
= control target key start
LH: loop header
LB: loop body
LE: loop exit
PB: predicated region body
PF: predicated region fallthrough
CT: control target
= control target key end

     0   :  { %s560_s23 = smov 0   ;;  %s593_s0 = inlined_call_operand.vmem [shape: bf16[8,24], index: 0, kind: input, shape index: {}]   ;;  %s594_s1 = inlined_call_operand.vmem [shape: bf16[2,24,256], index: 1, kind: input, shape index: {}]   ;;  %s595_s2 = inlined_call_operand.vmem [shape: f32[8,1], index: 2, kind: input, shape index: {}]   ;;  %s596_s3 = inlined_call_operand.vmem [shape: f32[8,1], index: 3, kind: input, shape index: {}]   ;;  %s597_s4 = inlined_call_operand.vmem [shape: f32[8,1], index: 4, kind: input, shape index: {}]   ;;  %s598_s5 = inlined_call_operand.<no memory space> [shape: f32[1,1], index: 5, kind: input, shape index: {}]   ;;  %s599_s6 = inlined_call_operand.vmem [shape: bf16[2,8,256], index: 6, kind: output, shape index: {}]  }
   0x1   :  { %v11_v0 = vstv %s598_s5 }
   0x2   :  { %12 = vst [vmem:[#allocation2] sm:$0x1] %v11_v0 }
   0x3 LB: > { %s468_s24 = sadd.s32 4294967295, %s519_s23   ;;  %p472_p0 = scmp.ge.s32.totalorder %s519_s23, 1  ;;  %s519_s23 = sphi %s560_s23, %s18_s23  }
   0x4   : > { %p214_p1 = scmp.lt.s32.totalorder %s519_s23, 3 }
   0x6   : > { %p215_p2 = pnand %p472_p0, %p214_p1 }
   0x7   : > { %p244_p3 = scmp.lt.s32.totalorder (!%p215_p2), %s468_s24, 1  ;;  %v521_v1 = vmov (!%p215_p2), 0   ;;  %v259_v2 = vld [vmem:[%s595_s2] sm:$0xff] (!%p215_p2)  ;;  %vm284_vm0 = vcmask (!%p215_p2), 1043456   ;;  %vm280_vm1 = vcmask (!%p215_p2), 195584  }
   0x8   : > { %218 = sbr.rel (%p215_p2) target bundleno = 744 (0x2e8), region = 44  ;;  %323 = vmatprep.mubr.bf16.mxu0 (!%p215_p2), %v521_v1  ;;  %504 = vset.pattern.permute.xlu0 (!%p215_p2), %v521_v1  ;;  %v255_v9 = vld [vmem:[%s593_s0] sm:$0xf] (!%p215_p2) }
   0x9   : > { %262 = vperm.xlu0 (!%p215_p2), %504, %v259_v2   ;;  %505 = vset.pattern.permute.xlu1 (!%p215_p2), %v521_v1  ;;  %v370_v31 = vld [vmem:[%s596_s3] sm:$0xff] (!%p215_p2) }
   0xa   : > { %v378_v32 = vld [vmem:[%s597_s4] sm:$0xff] (!%p215_p2) }
   0xb   : > { %v482_v33 = vld [vmem:[#allocation2] ss:$0 sm:$0xff] (!%p215_p2) }
   0xf   : > { %s601_s24 = smov (!%p244_p3, %s468_s24), 1 }
  0x10   : > { %s488_s26 = smul.u32 24, %s601_s24  ;;  %s486_s18 = sshll.u32 %s601_s24, 3 }
  0x11   : > { %s253_s21 = scalar_lea.vmem %s599_s6, %s486_s18 }
  0x12   : > { %s248_s29 = scalar_lea.vmem %s594_s1, %s488_s26 }
  0x13   : > { %v258_v3 = vld [vmem:[%s248_s29 + $0x10] sm:$0xff]  ;;  %v506_v4 = vld [vmem:[%s248_s29 + $0x4] ss:$8 sps:$4 sm:$0xff]   ;;  %v509_v6 = vld [vmem:[%s248_s29] ss:$8 sps:$4 sm:$0xff]  }
  0x14   : > { %v479_v5 = vcombine.high %v258_v3, %v258_v3  ;;  %v478_v7 = vcombine.low %v258_v3, %v258_v3  ;;  %291 = vmatprep.subr.bf16.mxu0 %v506_v4 }
  0x15   : > { %292 = vmatpush1.bf16.msra.mxu0 %v509_v6 }
  0x16   : > { %480 = vmatprep.subr.msk.bf16.mxu0 %vm284_vm0, %v479_v5  ;;  %v286_v8 = vsel %vm284_vm0, %v478_v7, 0 }
  0x19   : > { %294 = vmatpush1.bf16.msra.mxu0 %v286_v8 }
  0x1c   : > { %481 = vmatmul.mubr.msk.bf16.vlgmr.msra.gmra.mrb[0].mxu0 %vm280_vm1, %v255_v9 }
  0x88   : > { %v263_v10 = vpop.permute.xlu0 %262 }
  0xef   : > { %v325_v11 = vpop.f32.mrb[0].mxu0 }
  0xf0   : > { %v326_v12 = vadd.f32 %v325_v11, %v263_v10  ;;  %v327_v13 = vpop.f32.mrb[1].mxu0 }
  0xf1   : > { %v328_v14 = vadd.f32 %v327_v13, %v263_v10  ;;  %v329_v15 = vpop.f32.mrb[2].mxu0 }
  0xf2   : > { %v330_v16 = vpop.f32.mrb[3].mxu0 }
  0xf3   : > { %v332_v17 = vadd.f32 %v328_v14, %v326_v12 }
  0xf5   : > { %333 = vadd.xlane.f32.xlu0 %v332_v17 }
 0x182   : > { %v334_v18 = vpop.xlane.xlu0 %333 }
 0x183   : > { %v335_v19 = vrot.slane %v334_v18, 4 }
 0x185   : > { %v336_v20 = vadd.f32 %v335_v19, %v334_v18 }
 0x187   : > { %v337_v21 = vrot.slane %v336_v20, 2 }
 0x189   : > { %v338_v22 = vadd.f32 %v337_v21, %v336_v20 }
 0x18b   : > { %v339_v23 = vrot.slane %v338_v22, 1 }
 0x18d   : > { %v340_v24 = vadd.f32 %v339_v23, %v338_v22 }
 0x18f   : > { %489 = vpush %v340_v24 }
 0x1c0   : > { %s490_s8 = spop %489 }
 0x1c1   : > { %s344_s9 = smul.f32 0.00048828125, %s490_s8 }
 0x1c3   : > { %v345_v25 = vstv %s344_s9 }
 0x1c4   : > { %v346_v26 = vsub.f32 %v326_v12, %v345_v25  ;;  %v347_v27 = vsub.f32 %v328_v14, %v345_v25 }
 0x1c6   : > { %v348_v28 = vmul.f32 %v346_v26, %v346_v26  ;;  %v349_v29 = vmul.f32 %v347_v27, %v347_v27 }
 0x1c8   : > { %v350_v30 = vadd.f32 %v349_v29, %v348_v28 }
 0x1ca   : > { %351 = vadd.xlane.f32.xlu1 %v350_v30 }
 0x1db   : > { %373 = vperm.xlu1 %505, %v370_v31  }
 0x1df   : > { %381 = vperm.xlu1 %505, %v378_v32  }
 0x1e3   : > { %397 = vperm.xlu1 %505, %v482_v33  }
 0x257   : > { %v352_v34 = vpop.xlane.xlu1 %351 }
 0x258   : > { %v353_v35 = vrot.slane %v352_v34, 4 }
 0x25a   : > { %v354_v36 = vadd.f32 %v353_v35, %v352_v34 }
 0x25b   : > { %v374_v43 = vpop.permute.xlu1 %373 }
 0x25c   : > { %v355_v37 = vrot.slane %v354_v36, 2 }
 0x25e   : > { %v356_v38 = vadd.f32 %v355_v37, %v354_v36 }
 0x25f   : > { %v382_v47 = vpop.permute.xlu1 %381 }
 0x260   : > { %v357_v39 = vrot.slane %v356_v38, 1 }
 0x262   : > { %v358_v40 = vadd.f32 %v357_v39, %v356_v38 }
 0x263   : > { %v398_v54 = vpop.permute.xlu1 %397 }
 0x264   : > { %491 = vpush %v358_v40 }
 0x295   : > { %s492_s14 = spop %491 }
 0x296   : > { %s362_s15 = smul.f32 0.00048828125, %s492_s14 }
 0x298   : > { %s363_s16 = sadd.f32 1e-08, %s362_s15 }
 0x29a   : > { %v364_v41 = vstv %s363_s16 }
 0x29b   : > { %511 = vrsqrt.f32 %v364_v41 }
 0x2a5   : > { %v512_v42 = vpop.eup %511 }
 0x2a6   : > { %493 = vpush %v512_v42 }
 0x2d7   : > { %s494_s17 = spop %493 }
 0x2d8   : > { %v367_v44 = vstv %s494_s17 }
 0x2d9   : > { %v368_v45 = vmul.f32 %v367_v44, %v346_v26  ;;  %v369_v46 = vmul.f32 %v367_v44, %v347_v27 }
 0x2db   : > { %v376_v48 = vmul.f32 %v374_v43, %v368_v45  ;;  %v377_v49 = vmul.f32 %v374_v43, %v369_v46 }
 0x2dd   : > { %v384_v50 = vadd.f32 %v382_v47, %v376_v48  ;;  %v385_v51 = vadd.f32 %v382_v47, %v377_v49 }
 0x2df   : > { %v389_v52 = vmin.f32 %v384_v50, 0.0  ;;  %v390_v53 = vmin.f32 %v385_v51, 0.0  ;;  %v387_v55 = vmax.f32 %v384_v50, 0.0  ;;  %v388_v56 = vmax.f32 %v385_v51, 0.0 }
 0x2e1   : > { %v400_v57 = vmul.f32 %v398_v54, %v389_v52  ;;  %v401_v58 = vmul.f32 %v398_v54, %v390_v53 }
 0x2e3   : > { %v402_v59 = vadd.f32 %v400_v57, %v387_v55  ;;  %v403_v60 = vadd.f32 %v401_v58, %v388_v56 }
 0x2e5   : > { %v487_v61 = vpack.c.bf16 %v403_v60, %v402_v59 }
 0x2e7   : > { %412 = vst [vmem:[%s253_s21] sm:$0xff] %v487_v61 }
 0x2e8 PF: > { %s18_s23 = sadd.s32 1, %s519_s23  }
 0x2e9   : > { %p15_p4 = scmp.ge.s32.totalorder %s18_s23, 4  }
 0x2eb   :  { %17 = sbr.rel (!%p15_p4) target bundleno = 3 (0x3), region = 74 }

// kernel: msfed4_forward.21
= control target key start
LH: loop header
LB: loop body
LE: loop exit
PB: predicated region body
PF: predicated region fallthrough
CT: control target
= control target key end

     0   :  { %s416_s17 = smov 0   ;;  %s443_s0 = inlined_call_operand.vmem [shape: bf16[8,16], index: 0, kind: input, shape index: {}]   ;;  %s444_s1 = inlined_call_operand.vmem [shape: bf16[2,16,256], index: 1, kind: input, shape index: {}]   ;;  %s445_s2 = inlined_call_operand.vmem [shape: f32[8,1], index: 2, kind: input, shape index: {}]   ;;  %s446_s3 = inlined_call_operand.<no memory space> [shape: f32[1,1], index: 3, kind: input, shape index: {}]   ;;  %s447_s4 = inlined_call_operand.vmem [shape: bf16[2,8,256], index: 4, kind: output, shape index: {}]  }
   0x1   :  { %v9_v0 = vstv %s446_s3 }
   0x2   :  { %10 = vst [vmem:[#allocation2] sm:$0x1] %v9_v0 }
   0x3 LB: > { %s347_s18 = sadd.s32 4294967295, %s385_s17   ;;  %p351_p0 = scmp.ge.s32.totalorder %s385_s17, 1  ;;  %s385_s17 = sphi %s416_s17, %s16_s17  }
   0x4   : > { %p164_p1 = scmp.lt.s32.totalorder %s385_s17, 3 }
   0x6   : > { %p165_p2 = pnand %p351_p0, %p164_p1 }
   0x7   : > { %p190_p3 = scmp.lt.s32.totalorder (!%p165_p2), %s347_s18, 1  ;;  %v204_v1 = vld [vmem:[%s445_s2] sm:$0xff] (!%p165_p2)  ;;  %v387_v2 = vmov (!%p165_p2), 0   ;;  %vm220_vm0 = vcmask (!%p165_p2), 130048  }
   0x8   : > { %168 = sbr.rel (%p165_p2) target bundleno = 247 (0xf7), region = 36  ;;  %256 = vmatprep.mubr.bf16.mxu0 (!%p165_p2), %v387_v2  ;;  %375 = vset.pattern.permute.xlu0 (!%p165_p2), %v387_v2  ;;  %v201_v6 = vld [vmem:[%s443_s0] sm:$0xf] (!%p165_p2) }
   0x9   : > { %207 = vperm.xlu0 (!%p165_p2), %375, %v204_v1   ;;  %v359_v3 = vld [vmem:[#allocation2] ss:$0 sm:$0xff] (!%p165_p2) }
   0xd   : > { %276 = vperm.xlu0 (!%p165_p2), %375, %v359_v3  }
   0xf   : > { %s449_s18 = smov (!%p190_p3, %s347_s18), 1 }
  0x10   : > { %s363_s3 = sshll.u32 %s449_s18, 4  ;;  %s364_s26 = sshll.u32 %s449_s18, 3 }
  0x11   : > { %s194_s23 = scalar_lea.vmem %s444_s1, %s363_s3  ;;  %s199_s29 = scalar_lea.vmem %s447_s4, %s364_s26 }
  0x12   : > { %v376_v4 = vld [vmem:[%s194_s23 + $0x4] ss:$8 sps:$4 sm:$0xff]   ;;  %v378_v5 = vld [vmem:[%s194_s23] ss:$8 sps:$4 sm:$0xff]  }
  0x13   : > { %224 = vmatprep.subr.bf16.mxu0 %v376_v4 }
  0x14   : > { %225 = vmatpush1.bf16.msra.mxu0 %v378_v5 }
  0x17   : > { %358 = vmatmul.mubr.msk.bf16.vlgmr.msra.gmra.mrb[0].mxu0 %vm220_vm0, %v201_v6 }
  0x88   : > { %v208_v7 = vpop.permute.xlu0 %207 }
  0x8c   : > { %v277_v15 = vpop.permute.xlu0 %276 }
  0xea   : > { %v258_v8 = vpop.f32.mrb[0].mxu0 }
  0xeb   : > { %v259_v9 = vadd.f32 %v258_v8, %v208_v7  ;;  %v260_v10 = vpop.f32.mrb[1].mxu0 }
  0xec   : > { %v261_v11 = vadd.f32 %v260_v10, %v208_v7  ;;  %v262_v12 = vpop.f32.mrb[2].mxu0 }
  0xed   : > { %v268_v13 = vmin.f32 %v259_v9, 0.0  ;;  %v263_v14 = vpop.f32.mrb[3].mxu0  ;;  %v266_v17 = vmax.f32 %v259_v9, 0.0 }
  0xee   : > { %v269_v16 = vmin.f32 %v261_v11, 0.0  ;;  %v267_v19 = vmax.f32 %v261_v11, 0.0 }
  0xef   : > { %v279_v18 = vmul.f32 %v277_v15, %v268_v13 }
  0xf0   : > { %v280_v20 = vmul.f32 %v277_v15, %v269_v16 }
  0xf1   : > { %v281_v21 = vadd.f32 %v279_v18, %v266_v17 }
  0xf2   : > { %v282_v22 = vadd.f32 %v280_v20, %v267_v19 }
  0xf4   : > { %v365_v23 = vpack.c.bf16 %v282_v22, %v281_v21 }
  0xf6   : > { %291 = vst [vmem:[%s199_s29] sm:$0xff] %v365_v23 }
  0xf7 PF: > { %s16_s17 = sadd.s32 1, %s385_s17  }
  0xf8   : > { %p13_p4 = scmp.ge.s32.totalorder %s16_s17, 4  }
  0xfa   :  { %15 = sbr.rel (!%p13_p4) target bundleno = 3 (0x3), region = 66 }

// kernel: msfed4_forward.22
= control target key start
LH: loop header
LB: loop body
LE: loop exit
PB: predicated region body
PF: predicated region fallthrough
CT: control target
= control target key end

     0   :  { %s546_s23 = smov 0   ;;  %s579_s0 = inlined_call_operand.vmem [shape: bf16[8,48], index: 0, kind: input, shape index: {}]   ;;  %s580_s1 = inlined_call_operand.vmem [shape: bf16[2,48,128], index: 1, kind: input, shape index: {}]   ;;  %s581_s2 = inlined_call_operand.vmem [shape: f32[8,1], index: 2, kind: input, shape index: {}]   ;;  %s582_s3 = inlined_call_operand.vmem [shape: f32[8,1], index: 3, kind: input, shape index: {}]   ;;  %s583_s4 = inlined_call_operand.vmem [shape: f32[8,1], index: 4, kind: input, shape index: {}]   ;;  %s584_s5 = inlined_call_operand.<no memory space> [shape: f32[1,1], index: 5, kind: input, shape index: {}]   ;;  %s585_s6 = inlined_call_operand.vmem [shape: bf16[2,8,128], index: 6, kind: output, shape index: {}]  }
   0x1   :  { %v11_v0 = vstv %s584_s5 }
   0x2   :  { %12 = vst [vmem:[#allocation2] sm:$0x1] %v11_v0 }
   0x3 LB: > { %s444_s24 = sadd.s32 4294967295, %s503_s23   ;;  %p448_p0 = scmp.ge.s32.totalorder %s503_s23, 1  ;;  %s503_s23 = sphi %s546_s23, %s18_s23  }
   0x4   : > { %p214_p1 = scmp.lt.s32.totalorder %s503_s23, 3 }
   0x6   : > { %p215_p2 = pnand %p448_p0, %p214_p1 }
   0x7   : > { %p243_p3 = scmp.lt.s32.totalorder (!%p215_p2), %s444_s24, 1  ;;  %v505_v1 = vmov (!%p215_p2), 0.0   ;;  %vm506_vm0 = vmmov (!%p215_p2), 0   ;;  %v260_v2 = vld [vmem:[%s581_s2] sm:$0xff] (!%p215_p2)  ;;  %v507_v3 = vmov (!%p215_p2), 0   ;;  %vm284_vm1 = vcmask (!%p215_p2), 392192  }
   0x8   : > { %218 = sbr.rel (%p215_p2) target bundleno = 742 (0x2e6), region = 44  ;;  %462 = vmatprep.subr.bf16.mxu0 (!%p215_p2), %v505_v1  ;;  %468 = vmatprep.mubr.msk.bf16.mxu0 (!%p215_p2), %vm506_vm0, %v505_v1  ;;  %v253_v7 = vld [vmem:[%s579_s0] sm:$0xf] (!%p215_p2) }
   0x9   : > { %490 = vset.pattern.permute.xlu0 (!%p215_p2), %v507_v3  ;;  %491 = vset.pattern.permute.xlu1 (!%p215_p2), %v507_v3  ;;  %v361_v24 = vld [vmem:[%s582_s3] sm:$0xff] (!%p215_p2) }
   0xa   : > { %263 = vperm.xlu0 (!%p215_p2), %490, %v260_v2   ;;  %v368_v25 = vld [vmem:[%s583_s4] sm:$0xff] (!%p215_p2) }
   0xb   : > { %v455_v26 = vld [vmem:[#allocation2] ss:$0 sm:$0xff] (!%p215_p2) }
   0xf   : > { %s587_s24 = smov (!%p243_p3, %s444_s24), 1 }
  0x10   : > { %s472_s26 = smul.u32 24, %s587_s24  ;;  %s450_s18 = sshll.u32 %s587_s24, 2 }
  0x11   : > { %s251_s21 = scalar_lea.vmem %s585_s6, %s450_s18 }
  0x12   : > { %s247_s29 = scalar_lea.vmem %s580_s1, %s472_s26 }
  0x13   : > { %v492_v4 = vld [vmem:[%s247_s29] sm:$0xff]   ;;  %v493_v5 = vld [vmem:[%s247_s29 + $0x8] sm:$0xff]   ;;  %v494_v6 = vld [vmem:[%s247_s29 + $0x10] sm:$0xff]  }
  0x14   : > { %463 = vmatpush3.bf16.msra.mxu0 %v492_v4 }
  0x15   : > { %464 = vmatprep.subr.bf16.mxu0 %v505_v1 }
  0x18   : > { %465 = vmatpush3.bf16.msra.mxu0 %v493_v5 }
  0x19   : > { %466 = vmatprep.subr.bf16.mxu0 %v505_v1 }
  0x1c   : > { %467 = vmatpush3.bf16.msra.mxu0 %v494_v6 }
  0x1f   : > { %469 = vmatmul.mubr.msk.bf16.vlgmr.msra.gmra.mrb[0].mxu0 %vm284_vm1, %v253_v7 }
  0x89   : > { %v264_v8 = vpop.permute.xlu0 %263 }
  0xf2   : > { %v322_v9 = vpop.f32.mrb[0].mxu0 }
  0xf3   : > { %v323_v10 = vadd.f32 %v322_v9, %v264_v8  ;;  %v470_v11 = vpop.f32.mrb[1].mxu0 }
  0xf4   : > { %v325_v12 = vpop.f32.mrb[2].mxu0 }
  0xf5   : > { %328 = vadd.xlane.f32.xlu0 %v323_v10  ;;  %v471_v13 = vpop.f32.mrb[3].mxu0 }
 0x182   : > { %v329_v14 = vpop.xlane.xlu0 %328 }
 0x183   : > { %v330_v15 = vrot.slane %v329_v14, 4 }
 0x185   : > { %v331_v16 = vadd.f32 %v330_v15, %v329_v14 }
 0x187   : > { %v332_v17 = vrot.slane %v331_v16, 2 }
 0x189   : > { %v333_v18 = vadd.f32 %v332_v17, %v331_v16 }
 0x18b   : > { %v334_v19 = vrot.slane %v333_v18, 1 }
 0x18d   : > { %v335_v20 = vadd.f32 %v334_v19, %v333_v18 }
 0x18f   : > { %473 = vpush %v335_v20 }
 0x1c0   : > { %s474_s8 = spop %473 }
 0x1c1   : > { %s339_s9 = smul.f32 0.0009765625, %s474_s8 }
 0x1c3   : > { %v340_v21 = vstv %s339_s9 }
 0x1c4   : > { %v341_v22 = vsub.f32 %v323_v10, %v340_v21 }
 0x1c6   : > { %v342_v23 = vmul.f32 %v341_v22, %v341_v22 }
 0x1c8   : > { %343 = vadd.xlane.f32.xlu1 %v342_v23 }
 0x1d9   : > { %364 = vperm.xlu1 %491, %v361_v24  }
 0x1dd   : > { %371 = vperm.xlu1 %491, %v368_v25  }
 0x1e1   : > { %384 = vperm.xlu1 %491, %v455_v26  }
 0x255   : > { %v344_v27 = vpop.xlane.xlu1 %343 }
 0x256   : > { %v345_v28 = vrot.slane %v344_v27, 4 }
 0x258   : > { %v346_v29 = vadd.f32 %v345_v28, %v344_v27 }
 0x259   : > { %v365_v36 = vpop.permute.xlu1 %364 }
 0x25a   : > { %v347_v30 = vrot.slane %v346_v29, 2 }
 0x25c   : > { %v348_v31 = vadd.f32 %v347_v30, %v346_v29 }
 0x25d   : > { %v372_v39 = vpop.permute.xlu1 %371 }
 0x25e   : > { %v349_v32 = vrot.slane %v348_v31, 1 }
 0x260   : > { %v350_v33 = vadd.f32 %v349_v32, %v348_v31 }
 0x261   : > { %v385_v43 = vpop.permute.xlu1 %384 }
 0x262   : > { %475 = vpush %v350_v33 }
 0x293   : > { %s476_s14 = spop %475 }
 0x294   : > { %s354_s15 = smul.f32 0.0009765625, %s476_s14 }
 0x296   : > { %s355_s16 = sadd.f32 1e-08, %s354_s15 }
 0x298   : > { %v356_v34 = vstv %s355_s16 }
 0x299   : > { %495 = vrsqrt.f32 %v356_v34 }
 0x2a3   : > { %v496_v35 = vpop.eup %495 }
 0x2a4   : > { %477 = vpush %v496_v35 }
 0x2d5   : > { %s478_s17 = spop %477 }
 0x2d6   : > { %v359_v37 = vstv %s478_s17 }
 0x2d7   : > { %v360_v38 = vmul.f32 %v359_v37, %v341_v22 }
 0x2d9   : > { %v367_v40 = vmul.f32 %v365_v36, %v360_v38 }
 0x2db   : > { %v374_v41 = vadd.f32 %v372_v39, %v367_v40 }
 0x2dd   : > { %v377_v42 = vmin.f32 %v374_v41, 0.0  ;;  %v376_v44 = vmax.f32 %v374_v41, 0.0 }
 0x2df   : > { %v387_v45 = vmul.f32 %v385_v43, %v377_v42 }
 0x2e1   : > { %v388_v46 = vadd.f32 %v387_v45, %v376_v44 }
 0x2e3   : > { %v389_v47 = vpack.c.bf16 %v388_v46, %v388_v46 }
 0x2e5   : > { %390 = vst [vmem:[%s251_s21] sm:$0xf] %v389_v47 }
 0x2e6 PF: > { %s18_s23 = sadd.s32 1, %s503_s23  }
 0x2e7   : > { %p15_p4 = scmp.ge.s32.totalorder %s18_s23, 4  }
 0x2e9   :  { %17 = sbr.rel (!%p15_p4) target bundleno = 3 (0x3), region = 74 }

// kernel: msfed4_forward.23
= control target key start
LH: loop header
LB: loop body
LE: loop exit
PB: predicated region body
PF: predicated region fallthrough
CT: control target
= control target key end

     0   :  { %s401_s17 = smov 0   ;;  %s424_s0 = inlined_call_operand.vmem [shape: bf16[8,16], index: 0, kind: input, shape index: {}]   ;;  %s425_s1 = inlined_call_operand.vmem [shape: bf16[2,16,128], index: 1, kind: input, shape index: {}]   ;;  %s426_s2 = inlined_call_operand.vmem [shape: f32[8,1], index: 2, kind: input, shape index: {}]   ;;  %s427_s3 = inlined_call_operand.<no memory space> [shape: f32[1,1], index: 3, kind: input, shape index: {}]   ;;  %s428_s4 = inlined_call_operand.vmem [shape: bf16[2,8,128], index: 4, kind: output, shape index: {}]  }
   0x1   :  { %v9_v0 = vstv %s427_s3 }
   0x2   :  { %10 = vst [vmem:[#allocation2] sm:$0x1] %v9_v0 }
   0x3 LB: > { %s327_s18 = sadd.s32 4294967295, %s368_s17   ;;  %p331_p0 = scmp.ge.s32.totalorder %s368_s17, 1  ;;  %s368_s17 = sphi %s401_s17, %s16_s17  }
   0x4   : > { %p164_p1 = scmp.lt.s32.totalorder %s368_s17, 3 }
   0x6   : > { %p165_p2 = pnand %p331_p0, %p164_p1 }
   0x7   : > { %p189_p3 = scmp.lt.s32.totalorder (!%p165_p2), %s327_s18, 1  ;;  %v370_v1 = vmov (!%p165_p2), 0.0   ;;  %vm371_vm0 = vmmov (!%p165_p2), 0   ;;  %v202_v2 = vld [vmem:[%s426_s2] sm:$0xff] (!%p165_p2)  ;;  %v372_v3 = vmov (!%p165_p2), 0   ;;  %vm214_vm1 = vcmask (!%p165_p2), 130048  }
   0x8   : > { %168 = sbr.rel (%p165_p2) target bundleno = 245 (0xf5), region = 36  ;;  %343 = vmatprep.subr.bf16.mxu0 (!%p165_p2), %v370_v1  ;;  %345 = vmatprep.mubr.msk.bf16.mxu0 (!%p165_p2), %vm371_vm0, %v370_v1  ;;  %v199_v6 = vld [vmem:[%s424_s0] sm:$0xf] (!%p165_p2) }
   0x9   : > { %360 = vset.pattern.permute.xlu0 (!%p165_p2), %v372_v3  ;;  %v337_v4 = vld [vmem:[#allocation2] ss:$0 sm:$0xff] (!%p165_p2) }
   0xa   : > { %205 = vperm.xlu0 (!%p165_p2), %360, %v202_v2  }
   0xe   : > { %267 = vperm.xlu0 (!%p165_p2), %360, %v337_v4  }
   0xf   : > { %s430_s18 = smov (!%p189_p3, %s327_s18), 1 }
  0x10   : > { %s340_s20 = sshll.u32 %s430_s18, 3  ;;  %s334_s26 = sshll.u32 %s430_s18, 2 }
  0x11   : > { %s193_s23 = scalar_lea.vmem %s425_s1, %s340_s20  ;;  %s197_s29 = scalar_lea.vmem %s428_s4, %s334_s26 }
  0x12   : > { %v361_v5 = vld [vmem:[%s193_s23] sm:$0xff]  }
  0x13   : > { %344 = vmatpush3.bf16.msra.mxu0 %v361_v5 }
  0x16   : > { %346 = vmatmul.mubr.msk.bf16.vlgmr.msra.gmra.mrb[0].mxu0 %vm214_vm1, %v199_v6 }
  0x89   : > { %v206_v7 = vpop.permute.xlu0 %205 }
  0x8d   : > { %v268_v14 = vpop.permute.xlu0 %267 }
  0xe9   : > { %v252_v8 = vpop.f32.mrb[0].mxu0 }
  0xea   : > { %v253_v9 = vadd.f32 %v252_v8, %v206_v7  ;;  %v347_v10 = vpop.f32.mrb[1].mxu0 }
  0xeb   : > { %v255_v11 = vpop.f32.mrb[2].mxu0 }
  0xec   : > { %v260_v12 = vmin.f32 %v253_v9, 0.0  ;;  %v348_v13 = vpop.f32.mrb[3].mxu0  ;;  %v259_v15 = vmax.f32 %v253_v9, 0.0 }
  0xee   : > { %v270_v16 = vmul.f32 %v268_v14, %v260_v12 }
  0xf0   : > { %v271_v17 = vadd.f32 %v270_v16, %v259_v15 }
  0xf2   : > { %v272_v18 = vpack.c.bf16 %v271_v17, %v271_v17 }
  0xf4   : > { %273 = vst [vmem:[%s197_s29] sm:$0xf] %v272_v18 }
  0xf5 PF: > { %s16_s17 = sadd.s32 1, %s368_s17  }
  0xf6   : > { %p13_p4 = scmp.ge.s32.totalorder %s16_s17, 4  }
  0xf8   :  { %15 = sbr.rel (!%p13_p4) target bundleno = 3 (0x3), region = 66 }

// kernel: msfed4_forward.24
= control target key start
LH: loop header
LB: loop body
LE: loop exit
PB: predicated region body
PF: predicated region fallthrough
CT: control target
= control target key end

     0   :  { %s550_s23 = smov 0   ;;  %s585_s0 = inlined_call_operand.vmem [shape: bf16[8,48], index: 0, kind: input, shape index: {}]   ;;  %s586_s1 = inlined_call_operand.vmem [shape: bf16[2,48,64], index: 1, kind: input, shape index: {}]   ;;  %s587_s2 = inlined_call_operand.vmem [shape: f32[8,1], index: 2, kind: input, shape index: {}]   ;;  %s588_s3 = inlined_call_operand.vmem [shape: f32[8,1], index: 3, kind: input, shape index: {}]   ;;  %s589_s4 = inlined_call_operand.vmem [shape: f32[8,1], index: 4, kind: input, shape index: {}]   ;;  %s590_s5 = inlined_call_operand.<no memory space> [shape: f32[1,1], index: 5, kind: input, shape index: {}]   ;;  %s591_s6 = inlined_call_operand.vmem [shape: bf16[2,8,64], index: 6, kind: output, shape index: {}]  }
   0x1   :  { %v11_v0 = vstv %s590_s5 }
   0x2   :  { %12 = vst [vmem:[#allocation2] sm:$0x1] %v11_v0 }
   0x3 LB: > { %s448_s24 = sadd.s32 4294967295, %s507_s23   ;;  %p452_p0 = scmp.ge.s32.totalorder %s507_s23, 1  ;;  %s507_s23 = sphi %s550_s23, %s18_s23  }
   0x4   : > { %p214_p1 = scmp.lt.s32.totalorder %s507_s23, 3 }
   0x6   : > { %p215_p2 = pnand %p452_p0, %p214_p1 }
   0x7   : > { %p243_p3 = scmp.lt.s32.totalorder (!%p215_p2), %s448_s24, 1  ;;  %v509_v1 = vmov (!%p215_p2), 0.0   ;;  %vm510_vm0 = vmmov (!%p215_p2), 0   ;;  %v260_v2 = vld [vmem:[%s587_s2] sm:$0xff] (!%p215_p2)  ;;  %v511_v3 = vmov (!%p215_p2), 0   ;;  %vm284_vm1 = vcmask (!%p215_p2), 392192  }
   0x8   : > { %218 = sbr.rel (%p215_p2) target bundleno = 744 (0x2e8), region = 44  ;;  %466 = vmatprep.subr.bf16.mxu0 (!%p215_p2), %v509_v1  ;;  %472 = vmatprep.mubr.msk.bf16.mxu0 (!%p215_p2), %vm510_vm0, %v509_v1  ;;  %v253_v7 = vld [vmem:[%s585_s0] sm:$0xf] (!%p215_p2)  ;;  %vm328_vm2 = vcmask (!%p215_p2), 523264   ;;  %vm393_vm3 = vcmask (!%p215_p2), 519168  }
   0x9   : > { %494 = vset.pattern.permute.xlu0 (!%p215_p2), %v511_v3  ;;  %495 = vset.pattern.permute.xlu1 (!%p215_p2), %v511_v3  ;;  %v364_v26 = vld [vmem:[%s588_s3] sm:$0xff] (!%p215_p2) }
   0xa   : > { %263 = vperm.xlu0 (!%p215_p2), %494, %v260_v2   ;;  %v371_v27 = vld [vmem:[%s589_s4] sm:$0xff] (!%p215_p2) }
   0xb   : > { %v459_v28 = vld [vmem:[#allocation2] ss:$0 sm:$0xff] (!%p215_p2) }
   0xf   : > { %s593_s24 = smov (!%p243_p3, %s448_s24), 1 }
  0x10   : > { %s476_s26 = smul.u32 24, %s593_s24  ;;  %s454_s18 = sshll.u32 %s593_s24, 2 }
  0x11   : > { %s251_s21 = scalar_lea.vmem %s591_s6, %s454_s18 }
  0x12   : > { %s247_s29 = scalar_lea.vmem %s586_s1, %s476_s26 }
  0x13   : > { %v496_v4 = vld [vmem:[%s247_s29] sm:$0xff]   ;;  %v497_v5 = vld [vmem:[%s247_s29 + $0x8] sm:$0xff]   ;;  %v498_v6 = vld [vmem:[%s247_s29 + $0x10] sm:$0xff]  }
  0x14   : > { %467 = vmatpush3.bf16.msra.mxu0 %v496_v4 }
  0x15   : > { %468 = vmatprep.subr.bf16.mxu0 %v509_v1 }
  0x18   : > { %469 = vmatpush3.bf16.msra.mxu0 %v497_v5 }
  0x19   : > { %470 = vmatprep.subr.bf16.mxu0 %v509_v1 }
  0x1c   : > { %471 = vmatpush3.bf16.msra.mxu0 %v498_v6 }
  0x1f   : > { %473 = vmatmul.mubr.msk.bf16.vlgmr.msra.gmra.mrb[0].mxu0 %vm284_vm1, %v253_v7 }
  0x89   : > { %v264_v8 = vpop.permute.xlu0 %263 }
  0xf2   : > { %v322_v9 = vpop.f32.mrb[0].mxu0 }
  0xf3   : > { %v323_v10 = vadd.f32 %v322_v9, %v264_v8  ;;  %v474_v11 = vpop.f32.mrb[1].mxu0 }
  0xf4   : > { %v325_v12 = vpop.f32.mrb[2].mxu0 }
  0xf5   : > { %v475_v13 = vpop.f32.mrb[3].mxu0  ;;  %v329_v14 = vsel %vm328_vm2, %v323_v10, 0.0 }
  0xf6   : > { %330 = vadd.xlane.f32.xlu0 %v329_v14 }
 0x183   : > { %v331_v15 = vpop.xlane.xlu0 %330 }
 0x184   : > { %v332_v16 = vrot.slane %v331_v15, 4 }
 0x186   : > { %v333_v17 = vadd.f32 %v332_v16, %v331_v15 }
 0x188   : > { %v334_v18 = vrot.slane %v333_v17, 2 }
 0x18a   : > { %v335_v19 = vadd.f32 %v334_v18, %v333_v17 }
 0x18c   : > { %v336_v20 = vrot.slane %v335_v19, 1 }
 0x18e   : > { %v337_v21 = vadd.f32 %v336_v20, %v335_v19 }
 0x190   : > { %477 = vpush %v337_v21 }
 0x1c1   : > { %s478_s8 = spop %477 }
 0x1c2   : > { %s341_s9 = smul.f32 0.001953125, %s478_s8 }
 0x1c4   : > { %v342_v22 = vstv %s341_s9 }
 0x1c5   : > { %v343_v23 = vsub.f32 %v323_v10, %v342_v22 }
 0x1c7   : > { %v344_v24 = vmul.f32 %v343_v23, %v343_v23 }
 0x1c9   : > { %v345_v25 = vsel %vm328_vm2, %v344_v24, 0.0 }
 0x1ca   : > { %346 = vadd.xlane.f32.xlu1 %v345_v25 }
 0x1db   : > { %367 = vperm.xlu1 %495, %v364_v26  }
 0x1df   : > { %374 = vperm.xlu1 %495, %v371_v27  }
 0x1e3   : > { %387 = vperm.xlu1 %495, %v459_v28  }
 0x257   : > { %v347_v29 = vpop.xlane.xlu1 %346 }
 0x258   : > { %v348_v30 = vrot.slane %v347_v29, 4 }
 0x25a   : > { %v349_v31 = vadd.f32 %v348_v30, %v347_v29 }
 0x25b   : > { %v368_v38 = vpop.permute.xlu1 %367 }
 0x25c   : > { %v350_v32 = vrot.slane %v349_v31, 2 }
 0x25e   : > { %v351_v33 = vadd.f32 %v350_v32, %v349_v31 }
 0x25f   : > { %v375_v41 = vpop.permute.xlu1 %374 }
 0x260   : > { %v352_v34 = vrot.slane %v351_v33, 1 }
 0x262   : > { %v353_v35 = vadd.f32 %v352_v34, %v351_v33 }
 0x263   : > { %v388_v45 = vpop.permute.xlu1 %387 }
 0x264   : > { %479 = vpush %v353_v35 }
 0x295   : > { %s480_s14 = spop %479 }
 0x296   : > { %s357_s15 = smul.f32 0.001953125, %s480_s14 }
 0x298   : > { %s358_s16 = sadd.f32 1e-08, %s357_s15 }
 0x29a   : > { %v359_v36 = vstv %s358_s16 }
 0x29b   : > { %499 = vrsqrt.f32 %v359_v36 }
 0x2a5   : > { %v500_v37 = vpop.eup %499 }
 0x2a6   : > { %481 = vpush %v500_v37 }
 0x2d7   : > { %s482_s17 = spop %481 }
 0x2d8   : > { %v362_v39 = vstv %s482_s17 }
 0x2d9   : > { %v363_v40 = vmul.f32 %v362_v39, %v343_v23 }
 0x2db   : > { %v370_v42 = vmul.f32 %v368_v38, %v363_v40 }
 0x2dd   : > { %v377_v43 = vadd.f32 %v375_v41, %v370_v42 }
 0x2df   : > { %v380_v44 = vmin.f32 %v377_v43, 0.0  ;;  %v379_v46 = vmax.f32 %v377_v43, 0.0 }
 0x2e1   : > { %v390_v47 = vmul.f32 %v388_v45, %v380_v44 }
 0x2e3   : > { %v391_v48 = vadd.f32 %v390_v47, %v379_v46 }
 0x2e5   : > { %v392_v49 = vpack.c.bf16 %v391_v48, %v391_v48 }
 0x2e7   : > { %394 = vst.msk [vmem:[%s251_s21] sm:$0xf] %vm393_vm3, %v392_v49 }
 0x2e8 PF: > { %s18_s23 = sadd.s32 1, %s507_s23  }
 0x2e9   : > { %p15_p4 = scmp.ge.s32.totalorder %s18_s23, 4  }
 0x2eb   :  { %17 = sbr.rel (!%p15_p4) target bundleno = 3 (0x3), region = 74 }

// kernel: msfed4_forward.25
= control target key start
LH: loop header
LB: loop body
LE: loop exit
PB: predicated region body
PF: predicated region fallthrough
CT: control target
= control target key end

     0   :  { %s402_s17 = smov 0   ;;  %s425_s0 = inlined_call_operand.vmem [shape: bf16[8,16], index: 0, kind: input, shape index: {}]   ;;  %s426_s1 = inlined_call_operand.vmem [shape: bf16[2,16,64], index: 1, kind: input, shape index: {}]   ;;  %s427_s2 = inlined_call_operand.vmem [shape: f32[8,1], index: 2, kind: input, shape index: {}]   ;;  %s428_s3 = inlined_call_operand.<no memory space> [shape: f32[1,1], index: 3, kind: input, shape index: {}]   ;;  %s429_s4 = inlined_call_operand.vmem [shape: bf16[2,8,64], index: 4, kind: output, shape index: {}]  }
   0x1   :  { %v9_v0 = vstv %s428_s3 }
   0x2   :  { %10 = vst [vmem:[#allocation2] sm:$0x1] %v9_v0 }
   0x3 LB: > { %s328_s18 = sadd.s32 4294967295, %s369_s17   ;;  %p332_p0 = scmp.ge.s32.totalorder %s369_s17, 1  ;;  %s369_s17 = sphi %s402_s17, %s16_s17  }
   0x4   : > { %p164_p1 = scmp.lt.s32.totalorder %s369_s17, 3 }
   0x6   : > { %p165_p2 = pnand %p332_p0, %p164_p1 }
   0x7   : > { %p189_p3 = scmp.lt.s32.totalorder (!%p165_p2), %s328_s18, 1  ;;  %v371_v1 = vmov (!%p165_p2), 0.0   ;;  %vm372_vm0 = vmmov (!%p165_p2), 0   ;;  %v202_v2 = vld [vmem:[%s427_s2] sm:$0xff] (!%p165_p2)  ;;  %v373_v3 = vmov (!%p165_p2), 0   ;;  %vm214_vm1 = vcmask (!%p165_p2), 130048  }
   0x8   : > { %168 = sbr.rel (%p165_p2) target bundleno = 245 (0xf5), region = 36  ;;  %344 = vmatprep.subr.bf16.mxu0 (!%p165_p2), %v371_v1  ;;  %346 = vmatprep.mubr.msk.bf16.mxu0 (!%p165_p2), %vm372_vm0, %v371_v1  ;;  %v199_v6 = vld [vmem:[%s425_s0] sm:$0xf] (!%p165_p2)  ;;  %vm273_vm2 = vcmask (!%p165_p2), 519168  }
   0x9   : > { %361 = vset.pattern.permute.xlu0 (!%p165_p2), %v373_v3  ;;  %v338_v4 = vld [vmem:[#allocation2] ss:$0 sm:$0xff] (!%p165_p2) }
   0xa   : > { %205 = vperm.xlu0 (!%p165_p2), %361, %v202_v2  }
   0xe   : > { %267 = vperm.xlu0 (!%p165_p2), %361, %v338_v4  }
   0xf   : > { %s431_s18 = smov (!%p189_p3, %s328_s18), 1 }
  0x10   : > { %s341_s20 = sshll.u32 %s431_s18, 3  ;;  %s335_s26 = sshll.u32 %s431_s18, 2 }
  0x11   : > { %s193_s23 = scalar_lea.vmem %s426_s1, %s341_s20  ;;  %s197_s29 = scalar_lea.vmem %s429_s4, %s335_s26 }
  0x12   : > { %v362_v5 = vld [vmem:[%s193_s23] sm:$0xff]  }
  0x13   : > { %345 = vmatpush3.bf16.msra.mxu0 %v362_v5 }
  0x16   : > { %347 = vmatmul.mubr.msk.bf16.vlgmr.msra.gmra.mrb[0].mxu0 %vm214_vm1, %v199_v6 }
  0x89   : > { %v206_v7 = vpop.permute.xlu0 %205 }
  0x8d   : > { %v268_v14 = vpop.permute.xlu0 %267 }
  0xe9   : > { %v252_v8 = vpop.f32.mrb[0].mxu0 }
  0xea   : > { %v253_v9 = vadd.f32 %v252_v8, %v206_v7  ;;  %v348_v10 = vpop.f32.mrb[1].mxu0 }
  0xeb   : > { %v255_v11 = vpop.f32.mrb[2].mxu0 }
  0xec   : > { %v260_v12 = vmin.f32 %v253_v9, 0.0  ;;  %v349_v13 = vpop.f32.mrb[3].mxu0  ;;  %v259_v15 = vmax.f32 %v253_v9, 0.0 }
  0xee   : > { %v270_v16 = vmul.f32 %v268_v14, %v260_v12 }
  0xf0   : > { %v271_v17 = vadd.f32 %v270_v16, %v259_v15 }
  0xf2   : > { %v272_v18 = vpack.c.bf16 %v271_v17, %v271_v17 }
  0xf4   : > { %274 = vst.msk [vmem:[%s197_s29] sm:$0xf] %vm273_vm2, %v272_v18 }
  0xf5 PF: > { %s16_s17 = sadd.s32 1, %s369_s17  }
  0xf6   : > { %p13_p4 = scmp.ge.s32.totalorder %s16_s17, 4  }
  0xf8   :  { %15 = sbr.rel (!%p13_p4) target bundleno = 3 (0x3), region = 66 }

// kernel: msfed4_forward.26
= control target key start
LH: loop header
LB: loop body
LE: loop exit
PB: predicated region body
PF: predicated region fallthrough
CT: control target
= control target key end

     0   :  { %s550_s23 = smov 0   ;;  %s585_s0 = inlined_call_operand.vmem [shape: bf16[8,48], index: 0, kind: input, shape index: {}]   ;;  %s586_s1 = inlined_call_operand.vmem [shape: bf16[2,48,32], index: 1, kind: input, shape index: {}]   ;;  %s587_s2 = inlined_call_operand.vmem [shape: f32[8,1], index: 2, kind: input, shape index: {}]   ;;  %s588_s3 = inlined_call_operand.vmem [shape: f32[8,1], index: 3, kind: input, shape index: {}]   ;;  %s589_s4 = inlined_call_operand.vmem [shape: f32[8,1], index: 4, kind: input, shape index: {}]   ;;  %s590_s5 = inlined_call_operand.<no memory space> [shape: f32[1,1], index: 5, kind: input, shape index: {}]   ;;  %s591_s6 = inlined_call_operand.vmem [shape: bf16[2,8,32], index: 6, kind: output, shape index: {}]  }
   0x1   :  { %v11_v0 = vstv %s590_s5 }
   0x2   :  { %12 = vst [vmem:[#allocation2] sm:$0x1] %v11_v0 }
   0x3 LB: > { %s448_s24 = sadd.s32 4294967295, %s507_s23   ;;  %p452_p0 = scmp.ge.s32.totalorder %s507_s23, 1  ;;  %s507_s23 = sphi %s550_s23, %s18_s23  }
   0x4   : > { %p214_p1 = scmp.lt.s32.totalorder %s507_s23, 3 }
   0x6   : > { %p215_p2 = pnand %p452_p0, %p214_p1 }
   0x7   : > { %p243_p3 = scmp.lt.s32.totalorder (!%p215_p2), %s448_s24, 1  ;;  %v509_v1 = vmov (!%p215_p2), 0.0   ;;  %vm510_vm0 = vmmov (!%p215_p2), 0   ;;  %v260_v2 = vld [vmem:[%s587_s2] sm:$0xff] (!%p215_p2)  ;;  %v511_v3 = vmov (!%p215_p2), 0   ;;  %vm284_vm1 = vcmask (!%p215_p2), 392192  }
   0x8   : > { %218 = sbr.rel (%p215_p2) target bundleno = 744 (0x2e8), region = 44  ;;  %466 = vmatprep.subr.bf16.mxu0 (!%p215_p2), %v509_v1  ;;  %472 = vmatprep.mubr.msk.bf16.mxu0 (!%p215_p2), %vm510_vm0, %v509_v1  ;;  %v253_v7 = vld [vmem:[%s585_s0] sm:$0xf] (!%p215_p2)  ;;  %vm328_vm2 = vcmask (!%p215_p2), 261120   ;;  %vm393_vm3 = vcmask (!%p215_p2), 257024  }
   0x9   : > { %494 = vset.pattern.permute.xlu0 (!%p215_p2), %v511_v3  ;;  %495 = vset.pattern.permute.xlu1 (!%p215_p2), %v511_v3  ;;  %v364_v26 = vld [vmem:[%s588_s3] sm:$0xff] (!%p215_p2) }
   0xa   : > { %263 = vperm.xlu0 (!%p215_p2), %494, %v260_v2   ;;  %v371_v27 = vld [vmem:[%s589_s4] sm:$0xff] (!%p215_p2) }
   0xb   : > { %v459_v28 = vld [vmem:[#allocation2] ss:$0 sm:$0xff] (!%p215_p2) }
   0xf   : > { %s593_s24 = smov (!%p243_p3, %s448_s24), 1 }
  0x10   : > { %s476_s26 = smul.u32 24, %s593_s24  ;;  %s454_s18 = sshll.u32 %s593_s24, 2 }
  0x11   : > { %s251_s21 = scalar_lea.vmem %s591_s6, %s454_s18 }
  0x12   : > { %s247_s29 = scalar_lea.vmem %s586_s1, %s476_s26 }
  0x13   : > { %v496_v4 = vld [vmem:[%s247_s29] sm:$0xff]   ;;  %v497_v5 = vld [vmem:[%s247_s29 + $0x8] sm:$0xff]   ;;  %v498_v6 = vld [vmem:[%s247_s29 + $0x10] sm:$0xff]  }
  0x14   : > { %467 = vmatpush3.bf16.msra.mxu0 %v496_v4 }
  0x15   : > { %468 = vmatprep.subr.bf16.mxu0 %v509_v1 }
  0x18   : > { %469 = vmatpush3.bf16.msra.mxu0 %v497_v5 }
  0x19   : > { %470 = vmatprep.subr.bf16.mxu0 %v509_v1 }
  0x1c   : > { %471 = vmatpush3.bf16.msra.mxu0 %v498_v6 }
  0x1f   : > { %473 = vmatmul.mubr.msk.bf16.vlgmr.msra.gmra.mrb[0].mxu0 %vm284_vm1, %v253_v7 }
  0x89   : > { %v264_v8 = vpop.permute.xlu0 %263 }
  0xf2   : > { %v322_v9 = vpop.f32.mrb[0].mxu0 }
  0xf3   : > { %v323_v10 = vadd.f32 %v322_v9, %v264_v8  ;;  %v474_v11 = vpop.f32.mrb[1].mxu0 }
  0xf4   : > { %v325_v12 = vpop.f32.mrb[2].mxu0 }
  0xf5   : > { %v475_v13 = vpop.f32.mrb[3].mxu0  ;;  %v329_v14 = vsel %vm328_vm2, %v323_v10, 0.0 }
  0xf6   : > { %330 = vadd.xlane.f32.xlu0 %v329_v14 }
 0x183   : > { %v331_v15 = vpop.xlane.xlu0 %330 }
 0x184   : > { %v332_v16 = vrot.slane %v331_v15, 4 }
 0x186   : > { %v333_v17 = vadd.f32 %v332_v16, %v331_v15 }
 0x188   : > { %v334_v18 = vrot.slane %v333_v17, 2 }
 0x18a   : > { %v335_v19 = vadd.f32 %v334_v18, %v333_v17 }
 0x18c   : > { %v336_v20 = vrot.slane %v335_v19, 1 }
 0x18e   : > { %v337_v21 = vadd.f32 %v336_v20, %v335_v19 }
 0x190   : > { %477 = vpush %v337_v21 }
 0x1c1   : > { %s478_s8 = spop %477 }
 0x1c2   : > { %s341_s9 = smul.f32 0.00390625, %s478_s8 }
 0x1c4   : > { %v342_v22 = vstv %s341_s9 }
 0x1c5   : > { %v343_v23 = vsub.f32 %v323_v10, %v342_v22 }
 0x1c7   : > { %v344_v24 = vmul.f32 %v343_v23, %v343_v23 }
 0x1c9   : > { %v345_v25 = vsel %vm328_vm2, %v344_v24, 0.0 }
 0x1ca   : > { %346 = vadd.xlane.f32.xlu1 %v345_v25 }
 0x1db   : > { %367 = vperm.xlu1 %495, %v364_v26  }
 0x1df   : > { %374 = vperm.xlu1 %495, %v371_v27  }
 0x1e3   : > { %387 = vperm.xlu1 %495, %v459_v28  }
 0x257   : > { %v347_v29 = vpop.xlane.xlu1 %346 }
 0x258   : > { %v348_v30 = vrot.slane %v347_v29, 4 }
 0x25a   : > { %v349_v31 = vadd.f32 %v348_v30, %v347_v29 }
 0x25b   : > { %v368_v38 = vpop.permute.xlu1 %367 }
 0x25c   : > { %v350_v32 = vrot.slane %v349_v31, 2 }
 0x25e   : > { %v351_v33 = vadd.f32 %v350_v32, %v349_v31 }
 0x25f   : > { %v375_v41 = vpop.permute.xlu1 %374 }
 0x260   : > { %v352_v34 = vrot.slane %v351_v33, 1 }
 0x262   : > { %v353_v35 = vadd.f32 %v352_v34, %v351_v33 }
 0x263   : > { %v388_v45 = vpop.permute.xlu1 %387 }
 0x264   : > { %479 = vpush %v353_v35 }
 0x295   : > { %s480_s14 = spop %479 }
 0x296   : > { %s357_s15 = smul.f32 0.00390625, %s480_s14 }
 0x298   : > { %s358_s16 = sadd.f32 1e-08, %s357_s15 }
 0x29a   : > { %v359_v36 = vstv %s358_s16 }
 0x29b   : > { %499 = vrsqrt.f32 %v359_v36 }
 0x2a5   : > { %v500_v37 = vpop.eup %499 }
 0x2a6   : > { %481 = vpush %v500_v37 }
 0x2d7   : > { %s482_s17 = spop %481 }
 0x2d8   : > { %v362_v39 = vstv %s482_s17 }
 0x2d9   : > { %v363_v40 = vmul.f32 %v362_v39, %v343_v23 }
 0x2db   : > { %v370_v42 = vmul.f32 %v368_v38, %v363_v40 }
 0x2dd   : > { %v377_v43 = vadd.f32 %v375_v41, %v370_v42 }
 0x2df   : > { %v380_v44 = vmin.f32 %v377_v43, 0.0  ;;  %v379_v46 = vmax.f32 %v377_v43, 0.0 }
 0x2e1   : > { %v390_v47 = vmul.f32 %v388_v45, %v380_v44 }
 0x2e3   : > { %v391_v48 = vadd.f32 %v390_v47, %v379_v46 }
 0x2e5   : > { %v392_v49 = vpack.c.bf16 %v391_v48, %v391_v48 }
 0x2e7   : > { %394 = vst.msk [vmem:[%s251_s21] sm:$0xf] %vm393_vm3, %v392_v49 }
 0x2e8 PF: > { %s18_s23 = sadd.s32 1, %s507_s23  }
 0x2e9   : > { %p15_p4 = scmp.ge.s32.totalorder %s18_s23, 4  }
 0x2eb   :  { %17 = sbr.rel (!%p15_p4) target bundleno = 3 (0x3), region = 74 }

// kernel: msfed4_forward.28
= control target key start
LH: loop header
LB: loop body
LE: loop exit
PB: predicated region body
PF: predicated region fallthrough
CT: control target
= control target key end

     0   :  { %s452_s17 = smov 0   ;;  %s482_s0 = inlined_call_operand.vmem [shape: bf16[16,24], index: 0, kind: input, shape index: {}]   ;;  %s483_s1 = inlined_call_operand.vmem [shape: bf16[2,24,32], index: 1, kind: input, shape index: {}]   ;;  %s484_s2 = inlined_call_operand.vmem [shape: f32[16,1], index: 2, kind: input, shape index: {}]   ;;  %s485_s3 = inlined_call_operand.<no memory space> [shape: f32[1,1], index: 3, kind: input, shape index: {}]   ;;  %s486_s4 = inlined_call_operand.vmem [shape: bf16[2,16,32], index: 4, kind: output, shape index: {}]  }
   0x1   :  { %v9_v0 = vstv %s485_s3 }
   0x2   :  { %10 = vst [vmem:[#allocation2] sm:$0x1] %v9_v0 }
   0x3 LB: > { %s365_s18 = sadd.s32 4294967295, %s419_s17   ;;  %p369_p0 = scmp.ge.s32.totalorder %s419_s17, 1  ;;  %s419_s17 = sphi %s452_s17, %s16_s17  }
   0x4   : > { %p164_p1 = scmp.lt.s32.totalorder %s419_s17, 3 }
   0x6   : > { %p165_p2 = pnand %p369_p0, %p164_p1 }
   0x7   : > { %p190_p3 = scmp.lt.s32.totalorder (!%p165_p2), %s365_s18, 1  ;;  %v421_v1 = vmov (!%p165_p2), 0.0   ;;  %vm422_vm0 = vmmov (!%p165_p2), 0   ;;  %v206_v2 = vld [vmem:[%s484_s2] sm:$0xff] (!%p165_p2)  ;;  %v423_v3 = vmov (!%p165_p2), 0   ;;  %v207_v5 = vld [vmem:[%s484_s2 + $0x8] sm:$0xff] (!%p165_p2) }
   0x8   : > { %168 = sbr.rel (%p165_p2) target bundleno = 252 (0xfc), region = 36  ;;  %388 = vmatprep.subr.bf16.mxu0 (!%p165_p2), %v421_v1  ;;  %392 = vmatprep.mubr.msk.bf16.mxu0 (!%p165_p2), %vm422_vm0, %v421_v1  ;;  %vm236_vm1 = vcmask (!%p165_p2), 1043456   ;;  %v412_v9 = vld [vmem:[%s482_s0] sm:$0xff] (!%p165_p2)   ;;  %vm232_vm2 = vcmask (!%p165_p2), 195584   ;;  %vm307_vm3 = vcmask (!%p165_p2), 257024  }
   0x9   : > { %408 = vset.pattern.permute.xlu0 (!%p165_p2), %v423_v3  ;;  %409 = vset.pattern.permute.xlu1 (!%p165_p2), %v423_v3  ;;  %v377_v4 = vld [vmem:[#allocation2] ss:$0 sm:$0xff] (!%p165_p2) }
   0xa   : > { %210 = vperm.xlu0 (!%p165_p2), %408, %v206_v2   ;;  %292 = vperm.xlu1 (!%p165_p2), %409, %v377_v4  }
   0xe   : > { %215 = vperm.xlu0 (!%p165_p2), %408, %v207_v5  }
   0xf   : > { %s488_s18 = smov (!%p190_p3, %s365_s18), 1 }
  0x10   : > { %s396_s20 = smul.u32 12, %s488_s18  ;;  %s382_s28 = sshll.u32 %s488_s18, 3 }
  0x11   : > { %s199_s5 = scalar_lea.vmem %s486_s4, %s382_s28 }
  0x12   : > { %s194_s25 = scalar_lea.vmem %s483_s1, %s396_s20 }
  0x13   : > { %v410_v6 = vld [vmem:[%s194_s25] sm:$0xff]   ;;  %v411_v7 = vld [vmem:[%s194_s25 + $0x8] ss:$0 sps:$4 sm:$0xff]  }
  0x14   : > { %389 = vmatpush3.bf16.msra.mxu0 %v410_v6  ;;  %v238_v8 = vsel %vm236_vm1, %v411_v7, 0 }
  0x15   : > { %390 = vmatprep.subr.bf16.mxu0 %v421_v1 }
  0x18   : > { %391 = vmatpush3.bf16.msra.mxu0 %v238_v8 }
  0x1b   : > { %393 = vmatmul.mubr.msk.bf16.vlgmr.msra.gmra.mrb[0].mxu0 %vm232_vm2, %v412_v9 }
  0x89   : > { %v211_v10 = vpop.permute.xlu0 %210  ;;  %v293_v14 = vpop.permute.xlu1 %292 }
  0x8d   : > { %v216_v15 = vpop.permute.xlu0 %215 }
  0xee   : > { %v274_v11 = vpop.f32.mrb[0].mxu0 }
  0xef   : > { %v275_v12 = vadd.f32 %v274_v11, %v211_v10  ;;  %v394_v13 = vpop.f32.mrb[1].mxu0 }
  0xf0   : > { %v277_v16 = vpop.f32.mrb[2].mxu0 }
  0xf1   : > { %v278_v17 = vadd.f32 %v277_v16, %v216_v15  ;;  %v395_v18 = vpop.f32.mrb[3].mxu0  ;;  %v284_v19 = vmin.f32 %v275_v12, 0.0  ;;  %v282_v20 = vmax.f32 %v275_v12, 0.0 }
  0xf3   : > { %v285_v21 = vmin.f32 %v278_v17, 0.0  ;;  %v295_v22 = vmul.f32 %v293_v14, %v284_v19  ;;  %v283_v23 = vmax.f32 %v278_v17, 0.0 }
  0xf5   : > { %v296_v24 = vmul.f32 %v293_v14, %v285_v21  ;;  %v297_v25 = vadd.f32 %v295_v22, %v282_v20 }
  0xf7   : > { %v298_v26 = vadd.f32 %v296_v24, %v283_v23  ;;  %v383_v27 = vpack.c.bf16 %v297_v25, %v297_v25 }
  0xf9   : > { %v384_v28 = vpack.c.bf16 %v298_v26, %v298_v26  ;;  %308 = vst.msk [vmem:[%s199_s5] sm:$0xf] %vm307_vm3, %v383_v27 }
  0xfb   : > { %309 = vst.msk [vmem:[%s199_s5 + $0x4] sm:$0xf] %vm307_vm3, %v384_v28 }
  0xfc PF: > { %s16_s17 = sadd.s32 1, %s419_s17  }
  0xfd   : > { %p13_p4 = scmp.ge.s32.totalorder %s16_s17, 4  }
  0xff   :  { %15 = sbr.rel (!%p13_p4) target bundleno = 3 (0x3), region = 66 }

// kernel: msfed4_forward.29
= control target key start
LH: loop header
LB: loop body
LE: loop exit
PB: predicated region body
PF: predicated region fallthrough
CT: control target
= control target key end

     0   :  { %s647_s23 = smov 0   ;;  %s693_s0 = inlined_call_operand.vmem [shape: bf16[16,96], index: 0, kind: input, shape index: {}]   ;;  %s694_s1 = inlined_call_operand.vmem [shape: bf16[2,96,32], index: 1, kind: input, shape index: {}]   ;;  %s695_s2 = inlined_call_operand.vmem [shape: f32[16,1], index: 2, kind: input, shape index: {}]   ;;  %s696_s3 = inlined_call_operand.vmem [shape: f32[16,1], index: 3, kind: input, shape index: {}]   ;;  %s697_s4 = inlined_call_operand.vmem [shape: f32[16,1], index: 4, kind: input, shape index: {}]   ;;  %s698_s5 = inlined_call_operand.<no memory space> [shape: f32[1,1], index: 5, kind: input, shape index: {}]   ;;  %s699_s6 = inlined_call_operand.vmem [shape: bf16[2,16,32], index: 6, kind: output, shape index: {}]  }
   0x1   :  { %v11_v0 = vstv %s698_s5 }
   0x2   :  { %12 = vst [vmem:[#allocation2] sm:$0x1] %v11_v0 }
   0x3 LB: > { %s522_s24 = sadd.s32 4294967295, %s604_s23   ;;  %p526_p0 = scmp.ge.s32.totalorder %s604_s23, 1  ;;  %s604_s23 = sphi %s647_s23, %s18_s23  }
   0x4   : > { %p214_p1 = scmp.lt.s32.totalorder %s604_s23, 3 }
   0x6   : > { %p215_p2 = pnand %p526_p0, %p214_p1 }
   0x7   : > { %p244_p3 = scmp.lt.s32.totalorder (!%p215_p2), %s522_s24, 1  ;;  %v606_v1 = vmov (!%p215_p2), 0.0   ;;  %vm607_vm0 = vmmov (!%p215_p2), 0   ;;  %v269_v2 = vld [vmem:[%s695_s2] sm:$0xff] (!%p215_p2)  ;;  %v608_v3 = vmov (!%p215_p2), 0   ;;  %v270_v4 = vld [vmem:[%s695_s2 + $0x8] sm:$0xff] (!%p215_p2) }
   0x8   : > { %218 = sbr.rel (%p215_p2) target bundleno = 762 (0x2fa), region = 44  ;;  %553 = vmatprep.subr.bf16.mxu0 (!%p215_p2), %v606_v1  ;;  %565 = vmatprep.mubr.msk.bf16.mxu0 (!%p215_p2), %vm607_vm0, %v606_v1  ;;  %v410_v6 = vld [vmem:[%s696_s3] sm:$0xff] (!%p215_p2)  ;;  %v425_v10 = vld [vmem:[%s697_s4 + $0x8] sm:$0xff] (!%p215_p2)  ;;  %vm322_vm1 = vcmask (!%p215_p2), 785408   ;;  %vm367_vm2 = vcmask (!%p215_p2), 261120   ;;  %vm464_vm3 = vcmask (!%p215_p2), 257024  }
   0x9   : > { %587 = vset.pattern.permute.xlu0 (!%p215_p2), %v608_v3  ;;  %588 = vset.pattern.permute.xlu1 (!%p215_p2), %v608_v3  ;;  %v424_v8 = vld [vmem:[%s697_s4] sm:$0xff] (!%p215_p2)  ;;  %v411_v42 = vld [vmem:[%s696_s3 + $0x8] sm:$0xff] (!%p215_p2) }
   0xa   : > { %273 = vperm.xlu0 (!%p215_p2), %587, %v269_v2   ;;  %v538_v12 = vld [vmem:[#allocation2] ss:$0 sm:$0xff] (!%p215_p2) }
   0xb   : > { %v595_v15 = vld [vmem:[%s693_s0] sm:$0xff] (!%p215_p2)  }
   0xe   : > { %278 = vperm.xlu0 (!%p215_p2), %587, %v270_v4  }
   0xf   : > { %s701_s24 = smov (!%p244_p3, %s522_s24), 1 }
  0x10   : > { %s569_s26 = smul.u32 48, %s701_s24  ;;  %s543_s25 = sshll.u32 %s701_s24, 3 }
  0x11   : > { %s253_s28 = scalar_lea.vmem %s699_s6, %s543_s25 }
  0x12   : > { %s248_s7 = scalar_lea.vmem %s694_s1, %s569_s26  ;;  %414 = vperm.xlu0 %587, %v410_v6  }
  0x13   : > { %v589_v5 = vld [vmem:[%s248_s7] sm:$0xff]   ;;  %v590_v7 = vld [vmem:[%s248_s7 + $0x8] sm:$0xff]   ;;  %v591_v9 = vld [vmem:[%s248_s7 + $0x10] sm:$0xff]  }
  0x14   : > { %554 = vmatpush3.bf16.msra.mxu0 %v589_v5  ;;  %v592_v11 = vld [vmem:[%s248_s7 + $0x18] sm:$0xff]   ;;  %v593_v13 = vld [vmem:[%s248_s7 + $0x20] sm:$0xff]   ;;  %v594_v14 = vld [vmem:[%s248_s7 + $0x28] sm:$0xff]  }
  0x15   : > { %555 = vmatprep.subr.bf16.mxu0 %v606_v1 }
  0x16   : > { %428 = vperm.xlu0 %587, %v424_v8  }
  0x18   : > { %556 = vmatpush3.bf16.msra.mxu0 %v590_v7 }
  0x19   : > { %557 = vmatprep.subr.bf16.mxu0 %v606_v1 }
  0x1a   : > { %433 = vperm.xlu0 %587, %v425_v10  }
  0x1c   : > { %558 = vmatpush3.bf16.msra.mxu0 %v591_v9 }
  0x1d   : > { %559 = vmatprep.subr.bf16.mxu0 %v606_v1 }
  0x1e   : > { %449 = vperm.xlu0 %587, %v538_v12  }
  0x20   : > { %560 = vmatpush3.bf16.msra.mxu0 %v592_v11 }
  0x21   : > { %561 = vmatprep.subr.bf16.mxu0 %v606_v1 }
  0x24   : > { %562 = vmatpush3.bf16.msra.mxu0 %v593_v13 }
  0x25   : > { %563 = vmatprep.subr.bf16.mxu0 %v606_v1 }
  0x28   : > { %564 = vmatpush3.bf16.msra.mxu0 %v594_v14 }
  0x2b   : > { %566 = vmatmul.mubr.msk.bf16.vlgmr.msra.gmra.mrb[0].mxu0 %vm322_vm1, %v595_v15 }
  0x89   : > { %v274_v16 = vpop.permute.xlu0 %273 }
  0x8d   : > { %v279_v20 = vpop.permute.xlu0 %278 }
  0x91   : > { %v415_v52 = vpop.permute.xlu0 %414 }
  0x95   : > { %v429_v53 = vpop.permute.xlu0 %428 }
  0x99   : > { %v434_v58 = vpop.permute.xlu0 %433 }
  0x9d   : > { %v450_v1 = vpop.permute.xlu0 %449 }
  0xfe   : > { %v360_v17 = vpop.f32.mrb[0].mxu0 }
  0xff   : > { %v361_v18 = vadd.f32 %v360_v17, %v274_v16  ;;  %v567_v19 = vpop.f32.mrb[1].mxu0 }
 0x100   : > { %v363_v21 = vpop.f32.mrb[2].mxu0 }
 0x101   : > { %v364_v22 = vadd.f32 %v363_v21, %v279_v20  ;;  %v568_v23 = vpop.f32.mrb[3].mxu0  ;;  %v368_v24 = vsel %vm367_vm2, %v361_v18, 0.0 }
 0x103   : > { %v369_v25 = vsel %vm367_vm2, %v364_v22, 0.0 }
 0x104   : > { %v370_v26 = vadd.f32 %v369_v25, %v368_v24 }
 0x106   : > { %371 = vadd.xlane.f32.xlu1 %v370_v26 }
 0x193   : > { %v372_v27 = vpop.xlane.xlu1 %371 }
 0x194   : > { %v373_v28 = vrot.slane %v372_v27, 4 }
 0x196   : > { %v374_v29 = vadd.f32 %v373_v28, %v372_v27 }
 0x198   : > { %v375_v30 = vrot.slane %v374_v29, 2 }
 0x19a   : > { %v376_v31 = vadd.f32 %v375_v30, %v374_v29 }
 0x19c   : > { %v377_v32 = vrot.slane %v376_v31, 1 }
 0x19e   : > { %v378_v33 = vadd.f32 %v377_v32, %v376_v31 }
 0x1a0   : > { %570 = vpush %v378_v33 }
 0x1d1   : > { %s571_s16 = spop %570 }
 0x1d2   : > { %s382_s17 = smul.f32 0.001953125, %s571_s16 }
 0x1d4   : > { %v383_v34 = vstv %s382_s17 }
 0x1d5   : > { %v384_v35 = vsub.f32 %v361_v18, %v383_v34  ;;  %v385_v36 = vsub.f32 %v364_v22, %v383_v34 }
 0x1d7   : > { %v386_v37 = vmul.f32 %v384_v35, %v384_v35  ;;  %v387_v38 = vmul.f32 %v385_v36, %v385_v36 }
 0x1d9   : > { %v388_v39 = vsel %vm367_vm2, %v386_v37, 0.0  ;;  %v389_v40 = vsel %vm367_vm2, %v387_v38, 0.0 }
 0x1da   : > { %v390_v41 = vadd.f32 %v389_v40, %v388_v39 }
 0x1dc   : > { %391 = vadd.xlane.f32.xlu1 %v390_v41 }
 0x1ed   : > { %419 = vperm.xlu1 %588, %v411_v42  }
 0x269   : > { %v392_v43 = vpop.xlane.xlu1 %391 }
 0x26a   : > { %v393_v44 = vrot.slane %v392_v43, 4 }
 0x26c   : > { %v394_v45 = vadd.f32 %v393_v44, %v392_v43 }
 0x26d   : > { %v420_v55 = vpop.permute.xlu1 %419 }
 0x26e   : > { %v395_v46 = vrot.slane %v394_v45, 2 }
 0x270   : > { %v396_v47 = vadd.f32 %v395_v46, %v394_v45 }
 0x272   : > { %v397_v48 = vrot.slane %v396_v47, 1 }
 0x274   : > { %v398_v49 = vadd.f32 %v397_v48, %v396_v47 }
 0x276   : > { %572 = vpush %v398_v49 }
 0x2a7   : > { %s573_s20 = spop %572 }
 0x2a8   : > { %s402_s21 = smul.f32 0.001953125, %s573_s20 }
 0x2aa   : > { %s403_s22 = sadd.f32 1e-08, %s402_s21 }
 0x2ac   : > { %v404_v50 = vstv %s403_s22 }
 0x2ad   : > { %596 = vrsqrt.f32 %v404_v50 }
 0x2b7   : > { %v597_v51 = vpop.eup %596 }
 0x2b8   : > { %574 = vpush %v597_v51 }
 0x2e9   : > { %s575_s5 = spop %574 }
 0x2ea   : > { %v407_v54 = vstv %s575_s5 }
 0x2eb   : > { %v408_v56 = vmul.f32 %v407_v54, %v384_v35  ;;  %v409_v57 = vmul.f32 %v407_v54, %v385_v36 }
 0x2ed   : > { %v422_v59 = vmul.f32 %v415_v52, %v408_v56  ;;  %v423_v60 = vmul.f32 %v420_v55, %v409_v57 }
 0x2ef   : > { %v436_v61 = vadd.f32 %v429_v53, %v422_v59  ;;  %v437_v62 = vadd.f32 %v434_v58, %v423_v60 }
 0x2f1   : > { %v441_v63 = vmin.f32 %v436_v61, 0.0  ;;  %v442_v0 = vmin.f32 %v437_v62, 0.0  ;;  %v439_v2 = vmax.f32 %v436_v61, 0.0  ;;  %v440_v4 = vmax.f32 %v437_v62, 0.0 }
 0x2f3   : > { %v452_v3 = vmul.f32 %v450_v1, %v441_v63  ;;  %v453_v5 = vmul.f32 %v450_v1, %v442_v0 }
 0x2f5   : > { %v454_v6 = vadd.f32 %v452_v3, %v439_v2  ;;  %v455_v7 = vadd.f32 %v453_v5, %v440_v4 }
 0x2f7   : > { %v544_v8 = vpack.c.bf16 %v454_v6, %v454_v6  ;;  %v545_v9 = vpack.c.bf16 %v455_v7, %v455_v7 }
 0x2f9   : > { %465 = vst.msk [vmem:[%s253_s28] sm:$0xf] %vm464_vm3, %v544_v8  ;;  %466 = vst.msk [vmem:[%s253_s28 + $0x4] sm:$0xf] %vm464_vm3, %v545_v9 }
 0x2fa PF: > { %s18_s23 = sadd.s32 1, %s604_s23  }
 0x2fb   : > { %p15_p4 = scmp.ge.s32.totalorder %s18_s23, 4  }
 0x2fd   :  { %17 = sbr.rel (!%p15_p4) target bundleno = 3 (0x3), region = 74 }

// kernel: msfed4_forward.30
= control target key start
LH: loop header
LB: loop body
LE: loop exit
PB: predicated region body
PF: predicated region fallthrough
CT: control target
= control target key end

     0   :  { %s452_s17 = smov 0   ;;  %s482_s0 = inlined_call_operand.vmem [shape: bf16[16,24], index: 0, kind: input, shape index: {}]   ;;  %s483_s1 = inlined_call_operand.vmem [shape: bf16[2,24,64], index: 1, kind: input, shape index: {}]   ;;  %s484_s2 = inlined_call_operand.vmem [shape: f32[16,1], index: 2, kind: input, shape index: {}]   ;;  %s485_s3 = inlined_call_operand.<no memory space> [shape: f32[1,1], index: 3, kind: input, shape index: {}]   ;;  %s486_s4 = inlined_call_operand.vmem [shape: bf16[2,16,64], index: 4, kind: output, shape index: {}]  }
   0x1   :  { %v9_v0 = vstv %s485_s3 }
   0x2   :  { %10 = vst [vmem:[#allocation2] sm:$0x1] %v9_v0 }
   0x3 LB: > { %s365_s18 = sadd.s32 4294967295, %s419_s17   ;;  %p369_p0 = scmp.ge.s32.totalorder %s419_s17, 1  ;;  %s419_s17 = sphi %s452_s17, %s16_s17  }
   0x4   : > { %p164_p1 = scmp.lt.s32.totalorder %s419_s17, 3 }
   0x6   : > { %p165_p2 = pnand %p369_p0, %p164_p1 }
   0x7   : > { %p190_p3 = scmp.lt.s32.totalorder (!%p165_p2), %s365_s18, 1  ;;  %v421_v1 = vmov (!%p165_p2), 0.0   ;;  %vm422_vm0 = vmmov (!%p165_p2), 0   ;;  %v206_v2 = vld [vmem:[%s484_s2] sm:$0xff] (!%p165_p2)  ;;  %v423_v3 = vmov (!%p165_p2), 0   ;;  %v207_v5 = vld [vmem:[%s484_s2 + $0x8] sm:$0xff] (!%p165_p2) }
   0x8   : > { %168 = sbr.rel (%p165_p2) target bundleno = 252 (0xfc), region = 36  ;;  %388 = vmatprep.subr.bf16.mxu0 (!%p165_p2), %v421_v1  ;;  %392 = vmatprep.mubr.msk.bf16.mxu0 (!%p165_p2), %vm422_vm0, %v421_v1  ;;  %vm236_vm1 = vcmask (!%p165_p2), 1043456   ;;  %v412_v9 = vld [vmem:[%s482_s0] sm:$0xff] (!%p165_p2)   ;;  %vm232_vm2 = vcmask (!%p165_p2), 195584   ;;  %vm307_vm3 = vcmask (!%p165_p2), 519168  }
   0x9   : > { %408 = vset.pattern.permute.xlu0 (!%p165_p2), %v423_v3  ;;  %409 = vset.pattern.permute.xlu1 (!%p165_p2), %v423_v3  ;;  %v377_v4 = vld [vmem:[#allocation2] ss:$0 sm:$0xff] (!%p165_p2) }
   0xa   : > { %210 = vperm.xlu0 (!%p165_p2), %408, %v206_v2   ;;  %292 = vperm.xlu1 (!%p165_p2), %409, %v377_v4  }
   0xe   : > { %215 = vperm.xlu0 (!%p165_p2), %408, %v207_v5  }
   0xf   : > { %s488_s18 = smov (!%p190_p3, %s365_s18), 1 }
  0x10   : > { %s396_s20 = smul.u32 12, %s488_s18  ;;  %s382_s28 = sshll.u32 %s488_s18, 3 }
  0x11   : > { %s199_s5 = scalar_lea.vmem %s486_s4, %s382_s28 }
  0x12   : > { %s194_s25 = scalar_lea.vmem %s483_s1, %s396_s20 }
  0x13   : > { %v410_v6 = vld [vmem:[%s194_s25] sm:$0xff]   ;;  %v411_v7 = vld [vmem:[%s194_s25 + $0x8] ss:$0 sps:$4 sm:$0xff]  }
  0x14   : > { %389 = vmatpush3.bf16.msra.mxu0 %v410_v6  ;;  %v238_v8 = vsel %vm236_vm1, %v411_v7, 0 }
  0x15   : > { %390 = vmatprep.subr.bf16.mxu0 %v421_v1 }
  0x18   : > { %391 = vmatpush3.bf16.msra.mxu0 %v238_v8 }
  0x1b   : > { %393 = vmatmul.mubr.msk.bf16.vlgmr.msra.gmra.mrb[0].mxu0 %vm232_vm2, %v412_v9 }
  0x89   : > { %v211_v10 = vpop.permute.xlu0 %210  ;;  %v293_v14 = vpop.permute.xlu1 %292 }
  0x8d   : > { %v216_v15 = vpop.permute.xlu0 %215 }
  0xee   : > { %v274_v11 = vpop.f32.mrb[0].mxu0 }
  0xef   : > { %v275_v12 = vadd.f32 %v274_v11, %v211_v10  ;;  %v394_v13 = vpop.f32.mrb[1].mxu0 }
  0xf0   : > { %v277_v16 = vpop.f32.mrb[2].mxu0 }
  0xf1   : > { %v278_v17 = vadd.f32 %v277_v16, %v216_v15  ;;  %v395_v18 = vpop.f32.mrb[3].mxu0  ;;  %v284_v19 = vmin.f32 %v275_v12, 0.0  ;;  %v282_v20 = vmax.f32 %v275_v12, 0.0 }
  0xf3   : > { %v285_v21 = vmin.f32 %v278_v17, 0.0  ;;  %v295_v22 = vmul.f32 %v293_v14, %v284_v19  ;;  %v283_v23 = vmax.f32 %v278_v17, 0.0 }
  0xf5   : > { %v296_v24 = vmul.f32 %v293_v14, %v285_v21  ;;  %v297_v25 = vadd.f32 %v295_v22, %v282_v20 }
  0xf7   : > { %v298_v26 = vadd.f32 %v296_v24, %v283_v23  ;;  %v383_v27 = vpack.c.bf16 %v297_v25, %v297_v25 }
  0xf9   : > { %v384_v28 = vpack.c.bf16 %v298_v26, %v298_v26  ;;  %308 = vst.msk [vmem:[%s199_s5] sm:$0xf] %vm307_vm3, %v383_v27 }
  0xfb   : > { %309 = vst.msk [vmem:[%s199_s5 + $0x4] sm:$0xf] %vm307_vm3, %v384_v28 }
  0xfc PF: > { %s16_s17 = sadd.s32 1, %s419_s17  }
  0xfd   : > { %p13_p4 = scmp.ge.s32.totalorder %s16_s17, 4  }
  0xff   :  { %15 = sbr.rel (!%p13_p4) target bundleno = 3 (0x3), region = 66 }

// kernel: msfed4_forward.31
= control target key start
LH: loop header
LB: loop body
LE: loop exit
PB: predicated region body
PF: predicated region fallthrough
CT: control target
= control target key end

     0   :  { %s647_s23 = smov 0   ;;  %s693_s0 = inlined_call_operand.vmem [shape: bf16[16,96], index: 0, kind: input, shape index: {}]   ;;  %s694_s1 = inlined_call_operand.vmem [shape: bf16[2,96,64], index: 1, kind: input, shape index: {}]   ;;  %s695_s2 = inlined_call_operand.vmem [shape: f32[16,1], index: 2, kind: input, shape index: {}]   ;;  %s696_s3 = inlined_call_operand.vmem [shape: f32[16,1], index: 3, kind: input, shape index: {}]   ;;  %s697_s4 = inlined_call_operand.vmem [shape: f32[16,1], index: 4, kind: input, shape index: {}]   ;;  %s698_s5 = inlined_call_operand.<no memory space> [shape: f32[1,1], index: 5, kind: input, shape index: {}]   ;;  %s699_s6 = inlined_call_operand.vmem [shape: bf16[2,16,64], index: 6, kind: output, shape index: {}]  }
   0x1   :  { %v11_v0 = vstv %s698_s5 }
   0x2   :  { %12 = vst [vmem:[#allocation2] sm:$0x1] %v11_v0 }
   0x3 LB: > { %s522_s24 = sadd.s32 4294967295, %s604_s23   ;;  %p526_p0 = scmp.ge.s32.totalorder %s604_s23, 1  ;;  %s604_s23 = sphi %s647_s23, %s18_s23  }
   0x4   : > { %p214_p1 = scmp.lt.s32.totalorder %s604_s23, 3 }
   0x6   : > { %p215_p2 = pnand %p526_p0, %p214_p1 }
   0x7   : > { %p244_p3 = scmp.lt.s32.totalorder (!%p215_p2), %s522_s24, 1  ;;  %v606_v1 = vmov (!%p215_p2), 0.0   ;;  %vm607_vm0 = vmmov (!%p215_p2), 0   ;;  %v269_v2 = vld [vmem:[%s695_s2] sm:$0xff] (!%p215_p2)  ;;  %v608_v3 = vmov (!%p215_p2), 0   ;;  %v270_v4 = vld [vmem:[%s695_s2 + $0x8] sm:$0xff] (!%p215_p2) }
   0x8   : > { %218 = sbr.rel (%p215_p2) target bundleno = 762 (0x2fa), region = 44  ;;  %553 = vmatprep.subr.bf16.mxu0 (!%p215_p2), %v606_v1  ;;  %565 = vmatprep.mubr.msk.bf16.mxu0 (!%p215_p2), %vm607_vm0, %v606_v1  ;;  %v410_v6 = vld [vmem:[%s696_s3] sm:$0xff] (!%p215_p2)  ;;  %v425_v10 = vld [vmem:[%s697_s4 + $0x8] sm:$0xff] (!%p215_p2)  ;;  %vm322_vm1 = vcmask (!%p215_p2), 785408   ;;  %vm367_vm2 = vcmask (!%p215_p2), 523264   ;;  %vm464_vm3 = vcmask (!%p215_p2), 519168  }
   0x9   : > { %587 = vset.pattern.permute.xlu0 (!%p215_p2), %v608_v3  ;;  %588 = vset.pattern.permute.xlu1 (!%p215_p2), %v608_v3  ;;  %v424_v8 = vld [vmem:[%s697_s4] sm:$0xff] (!%p215_p2)  ;;  %v411_v42 = vld [vmem:[%s696_s3 + $0x8] sm:$0xff] (!%p215_p2) }
   0xa   : > { %273 = vperm.xlu0 (!%p215_p2), %587, %v269_v2   ;;  %v538_v12 = vld [vmem:[#allocation2] ss:$0 sm:$0xff] (!%p215_p2) }
   0xb   : > { %v595_v15 = vld [vmem:[%s693_s0] sm:$0xff] (!%p215_p2)  }
   0xe   : > { %278 = vperm.xlu0 (!%p215_p2), %587, %v270_v4  }
   0xf   : > { %s701_s24 = smov (!%p244_p3, %s522_s24), 1 }
  0x10   : > { %s569_s26 = smul.u32 48, %s701_s24  ;;  %s543_s25 = sshll.u32 %s701_s24, 3 }
  0x11   : > { %s253_s28 = scalar_lea.vmem %s699_s6, %s543_s25 }
  0x12   : > { %s248_s7 = scalar_lea.vmem %s694_s1, %s569_s26  ;;  %414 = vperm.xlu0 %587, %v410_v6  }
  0x13   : > { %v589_v5 = vld [vmem:[%s248_s7] sm:$0xff]   ;;  %v590_v7 = vld [vmem:[%s248_s7 + $0x8] sm:$0xff]   ;;  %v591_v9 = vld [vmem:[%s248_s7 + $0x10] sm:$0xff]  }
  0x14   : > { %554 = vmatpush3.bf16.msra.mxu0 %v589_v5  ;;  %v592_v11 = vld [vmem:[%s248_s7 + $0x18] sm:$0xff]   ;;  %v593_v13 = vld [vmem:[%s248_s7 + $0x20] sm:$0xff]   ;;  %v594_v14 = vld [vmem:[%s248_s7 + $0x28] sm:$0xff]  }
  0x15   : > { %555 = vmatprep.subr.bf16.mxu0 %v606_v1 }
  0x16   : > { %428 = vperm.xlu0 %587, %v424_v8  }
  0x18   : > { %556 = vmatpush3.bf16.msra.mxu0 %v590_v7 }
  0x19   : > { %557 = vmatprep.subr.bf16.mxu0 %v606_v1 }
  0x1a   : > { %433 = vperm.xlu0 %587, %v425_v10  }
  0x1c   : > { %558 = vmatpush3.bf16.msra.mxu0 %v591_v9 }
  0x1d   : > { %559 = vmatprep.subr.bf16.mxu0 %v606_v1 }
  0x1e   : > { %449 = vperm.xlu0 %587, %v538_v12  }
  0x20   : > { %560 = vmatpush3.bf16.msra.mxu0 %v592_v11 }
  0x21   : > { %561 = vmatprep.subr.bf16.mxu0 %v606_v1 }
  0x24   : > { %562 = vmatpush3.bf16.msra.mxu0 %v593_v13 }
  0x25   : > { %563 = vmatprep.subr.bf16.mxu0 %v606_v1 }
  0x28   : > { %564 = vmatpush3.bf16.msra.mxu0 %v594_v14 }
  0x2b   : > { %566 = vmatmul.mubr.msk.bf16.vlgmr.msra.gmra.mrb[0].mxu0 %vm322_vm1, %v595_v15 }
  0x89   : > { %v274_v16 = vpop.permute.xlu0 %273 }
  0x8d   : > { %v279_v20 = vpop.permute.xlu0 %278 }
  0x91   : > { %v415_v52 = vpop.permute.xlu0 %414 }
  0x95   : > { %v429_v53 = vpop.permute.xlu0 %428 }
  0x99   : > { %v434_v58 = vpop.permute.xlu0 %433 }
  0x9d   : > { %v450_v1 = vpop.permute.xlu0 %449 }
  0xfe   : > { %v360_v17 = vpop.f32.mrb[0].mxu0 }
  0xff   : > { %v361_v18 = vadd.f32 %v360_v17, %v274_v16  ;;  %v567_v19 = vpop.f32.mrb[1].mxu0 }
 0x100   : > { %v363_v21 = vpop.f32.mrb[2].mxu0 }
 0x101   : > { %v364_v22 = vadd.f32 %v363_v21, %v279_v20  ;;  %v568_v23 = vpop.f32.mrb[3].mxu0  ;;  %v368_v24 = vsel %vm367_vm2, %v361_v18, 0.0 }
 0x103   : > { %v369_v25 = vsel %vm367_vm2, %v364_v22, 0.0 }
 0x104   : > { %v370_v26 = vadd.f32 %v369_v25, %v368_v24 }
 0x106   : > { %371 = vadd.xlane.f32.xlu1 %v370_v26 }
 0x193   : > { %v372_v27 = vpop.xlane.xlu1 %371 }
 0x194   : > { %v373_v28 = vrot.slane %v372_v27, 4 }
 0x196   : > { %v374_v29 = vadd.f32 %v373_v28, %v372_v27 }
 0x198   : > { %v375_v30 = vrot.slane %v374_v29, 2 }
 0x19a   : > { %v376_v31 = vadd.f32 %v375_v30, %v374_v29 }
 0x19c   : > { %v377_v32 = vrot.slane %v376_v31, 1 }
 0x19e   : > { %v378_v33 = vadd.f32 %v377_v32, %v376_v31 }
 0x1a0   : > { %570 = vpush %v378_v33 }
 0x1d1   : > { %s571_s16 = spop %570 }
 0x1d2   : > { %s382_s17 = smul.f32 0.0009765625, %s571_s16 }
 0x1d4   : > { %v383_v34 = vstv %s382_s17 }
 0x1d5   : > { %v384_v35 = vsub.f32 %v361_v18, %v383_v34  ;;  %v385_v36 = vsub.f32 %v364_v22, %v383_v34 }
 0x1d7   : > { %v386_v37 = vmul.f32 %v384_v35, %v384_v35  ;;  %v387_v38 = vmul.f32 %v385_v36, %v385_v36 }
 0x1d9   : > { %v388_v39 = vsel %vm367_vm2, %v386_v37, 0.0  ;;  %v389_v40 = vsel %vm367_vm2, %v387_v38, 0.0 }
 0x1da   : > { %v390_v41 = vadd.f32 %v389_v40, %v388_v39 }
 0x1dc   : > { %391 = vadd.xlane.f32.xlu1 %v390_v41 }
 0x1ed   : > { %419 = vperm.xlu1 %588, %v411_v42  }
 0x269   : > { %v392_v43 = vpop.xlane.xlu1 %391 }
 0x26a   : > { %v393_v44 = vrot.slane %v392_v43, 4 }
 0x26c   : > { %v394_v45 = vadd.f32 %v393_v44, %v392_v43 }
 0x26d   : > { %v420_v55 = vpop.permute.xlu1 %419 }
 0x26e   : > { %v395_v46 = vrot.slane %v394_v45, 2 }
 0x270   : > { %v396_v47 = vadd.f32 %v395_v46, %v394_v45 }
 0x272   : > { %v397_v48 = vrot.slane %v396_v47, 1 }
 0x274   : > { %v398_v49 = vadd.f32 %v397_v48, %v396_v47 }
 0x276   : > { %572 = vpush %v398_v49 }
 0x2a7   : > { %s573_s20 = spop %572 }
 0x2a8   : > { %s402_s21 = smul.f32 0.0009765625, %s573_s20 }
 0x2aa   : > { %s403_s22 = sadd.f32 1e-08, %s402_s21 }
 0x2ac   : > { %v404_v50 = vstv %s403_s22 }
 0x2ad   : > { %596 = vrsqrt.f32 %v404_v50 }
 0x2b7   : > { %v597_v51 = vpop.eup %596 }
 0x2b8   : > { %574 = vpush %v597_v51 }
 0x2e9   : > { %s575_s5 = spop %574 }
 0x2ea   : > { %v407_v54 = vstv %s575_s5 }
 0x2eb   : > { %v408_v56 = vmul.f32 %v407_v54, %v384_v35  ;;  %v409_v57 = vmul.f32 %v407_v54, %v385_v36 }
 0x2ed   : > { %v422_v59 = vmul.f32 %v415_v52, %v408_v56  ;;  %v423_v60 = vmul.f32 %v420_v55, %v409_v57 }
 0x2ef   : > { %v436_v61 = vadd.f32 %v429_v53, %v422_v59  ;;  %v437_v62 = vadd.f32 %v434_v58, %v423_v60 }
 0x2f1   : > { %v441_v63 = vmin.f32 %v436_v61, 0.0  ;;  %v442_v0 = vmin.f32 %v437_v62, 0.0  ;;  %v439_v2 = vmax.f32 %v436_v61, 0.0  ;;  %v440_v4 = vmax.f32 %v437_v62, 0.0 }
 0x2f3   : > { %v452_v3 = vmul.f32 %v450_v1, %v441_v63  ;;  %v453_v5 = vmul.f32 %v450_v1, %v442_v0 }
 0x2f5   : > { %v454_v6 = vadd.f32 %v452_v3, %v439_v2  ;;  %v455_v7 = vadd.f32 %v453_v5, %v440_v4 }
 0x2f7   : > { %v544_v8 = vpack.c.bf16 %v454_v6, %v454_v6  ;;  %v545_v9 = vpack.c.bf16 %v455_v7, %v455_v7 }
 0x2f9   : > { %465 = vst.msk [vmem:[%s253_s28] sm:$0xf] %vm464_vm3, %v544_v8  ;;  %466 = vst.msk [vmem:[%s253_s28 + $0x4] sm:$0xf] %vm464_vm3, %v545_v9 }
 0x2fa PF: > { %s18_s23 = sadd.s32 1, %s604_s23  }
 0x2fb   : > { %p15_p4 = scmp.ge.s32.totalorder %s18_s23, 4  }
 0x2fd   :  { %17 = sbr.rel (!%p15_p4) target bundleno = 3 (0x3), region = 74 }

// kernel: msfed4_forward.27
= control target key start
LH: loop header
LB: loop body
LE: loop exit
PB: predicated region body
PF: predicated region fallthrough
CT: control target
= control target key end

     0   :  { %s12840_s29 = smov 0   ;;  %s14505_s0 = inlined_call_operand.vmem [shape: bf16[2,8,32], index: 0, kind: input, shape index: {}]   ;;  %s14506_s1 = inlined_call_operand.vmem [shape: f32[42,32,32], index: 1, kind: input, shape index: {}]   ;;  %s14507_s2 = inlined_call_operand.vmem [shape: f32[6,4,8], index: 2, kind: input, shape index: {}]   ;;  %s14508_s3 = inlined_call_operand.vmem [shape: f32[4,1], index: 3, kind: input, shape index: {}]   ;;  %s14509_s4 = inlined_call_operand.vmem [shape: f32[42,4,32], index: 4, kind: input, shape index: {}]   ;;  %s14510_s5 = inlined_call_operand.vmem [shape: f32[7,4,1], index: 5, kind: input, shape index: {}]   ;;  %s14511_s6 = inlined_call_operand.vmem [shape: f32[7,4,4], index: 6, kind: input, shape index: {}]   ;;  %s14512_s7 = inlined_call_operand.vmem [shape: f32[7,4,1], index: 7, kind: input, shape index: {}]   ;;  %s14513_s8 = inlined_call_operand.vmem [shape: f32[7,4,1], index: 8, kind: input, shape index: {}]   ;;  %s14514_s9 = inlined_call_operand.vmem [shape: f32[7,4,1], index: 9, kind: input, shape index: {}]   ;;  %s14515_s10 = inlined_call_operand.vmem [shape: f32[7,1,1], index: 10, kind: input, shape index: {}]   ;;  %s14516_s11 = inlined_call_operand.vmem [shape: f32[6,8,4], index: 11, kind: input, shape index: {}]   ;;  %s14517_s12 = inlined_call_operand.vmem [shape: f32[8,1], index: 12, kind: input, shape index: {}]   ;;  %s14518_s13 = inlined_call_operand.vmem [shape: f32[2,1,1], index: 13, kind: input, shape index: {}]   ;;  %s14519_s14 = inlined_call_operand.vmem [shape: bf16[2,8,32], index: 14, kind: output, shape index: {}]  }
   0x1 LB: > { %s10000_s30 = sadd.s32 4294967295, %s12759_s29   ;;  %p10004_p0 = scmp.ge.s32.totalorder %s12759_s29, 1  ;;  %s12759_s29 = sphi %s12840_s29, %s24_s29  }
   0x2   : > { %p411_p1 = scmp.lt.s32.totalorder %s12759_s29, 3 }
   0x4   : > { %p412_p2 = pnand %p10004_p0, %p411_p1 }
   0x5   : > { %p455_p3 = scmp.lt.s32.totalorder (!%p412_p2), %s10000_s30, 1  ;;  %v12761_v0 = vmov (!%p412_p2), 0.0   ;;  %vm12762_vm0 = vmmov (!%p412_p2), 0   ;;  %v10010_v1 = vld [vmem:[%s14506_s1 + $0x20] sm:$0xff] (!%p412_p2)  ;;  %v10011_v2 = vld [vmem:[%s14506_s1 + $0x28] sm:$0xff] (!%p412_p2)  ;;  %vm471_vm1 = vcmask (!%p412_p2), 64512  }
   0x6   : > { %415 = sbr.rel (%p412_p2) target bundleno = 11552 (0x2d20), region = 76  ;;  %10956 = vmatprep.subr.mxu0 (!%p412_p2), %v12761_v0  ;;  %10961 = vmatprep.subr.mxu1 (!%p412_p2), %v12761_v0  ;;  %v545_v3 = vld [vmem:[%s14506_s1] sm:$0xff] (!%p412_p2)  ;;  %v546_v4 = vld [vmem:[%s14506_s1 + $0x8] sm:$0xff] (!%p412_p2)  ;;  %v12882_v9 = vpack.c.bf16 (!%p412_p2), %v10011_v2, %v10010_v1  ;;  %v10012_v11 = vld [vmem:[%s14506_s1 + $0x30] sm:$0xff] (!%p412_p2)  ;;  %v12763_v15 = vmov (!%p412_p2), 0.0|0.0   ;;  %vm465_vm2 = vcmask (!%p412_p2), 261120  }
   0x7   : > { %10958 = vmatprep.mubr.msk.f32.mxu0 (!%p412_p2), %vm12762_vm0, %v12761_v0  ;;  %10963 = vmatprep.mubr.msk.f32.mxu1 (!%p412_p2), %vm12762_vm0, %v12761_v0  ;;  %v470_v7 = vld [vmem:[%s14507_s2] sm:$0xf] (!%p412_p2)  ;;  %v10008_v8 = vld [vmem:[%s14507_s2 + $0x4] sm:$0xf] (!%p412_p2)  ;;  %v12884_v10 = vpack.c.bf16 (!%p412_p2), %v546_v4, %v545_v3  ;;  %v10013_v12 = vld [vmem:[%s14506_s1 + $0x38] sm:$0xff] (!%p412_p2)  ;;  %466 = vst.msk [vmem:[#allocation2] sm:$0xff] (!%p412_p2), %vm465_vm2, %v12761_v0 }
   0x8   : > { %v547_v13 = vld [vmem:[%s14506_s1 + $0x10] sm:$0xff] (!%p412_p2)  ;;  %v548_v14 = vld [vmem:[%s14506_s1 + $0x18] sm:$0xff] (!%p412_p2)  ;;  %v12906_v16 = vpack.c.bf16 (!%p412_p2), %v10013_v12, %v10012_v11  ;;  %467 = vst.msk [vmem:[#allocation2 + $0x8] sm:$0xff] (!%p412_p2), %vm465_vm2, %v12761_v0  ;;  %468 = vst.msk [vmem:[#allocation2 + $0x10] sm:$0xff] (!%p412_p2), %vm465_vm2, %v12761_v0  ;;  %v12764_v60 = vmov (!%p412_p2), 0   ;;  %vm1412_vm3 = vcmask (!%p412_p2), 257024  }
   0x9   : > { %v12908_v17 = vpack.c.bf16 (!%p412_p2), %v548_v14, %v547_v13  ;;  %469 = vst.msk [vmem:[#allocation2 + $0x18] sm:$0xff] (!%p412_p2), %vm465_vm2, %v12761_v0  ;;  %v10018_v18 = vld [vmem:[%s14506_s1 + $0x40] sm:$0xff] (!%p412_p2)  ;;  %v10019_v19 = vld [vmem:[%s14506_s1 + $0x48] sm:$0xff] (!%p412_p2)  ;;  %v10020_v27 = vld [vmem:[%s14506_s1 + $0x50] sm:$0xff] (!%p412_p2)  ;;  %12737 = vset.pattern.permute.xlu0 (!%p412_p2), %v12764_v60  ;;  %12738 = vset.pattern.permute.xlu1 (!%p412_p2), %v12764_v60  ;;  %vm2351_vm4 = vcmask (!%p412_p2), 1043456   ;;  %vm2347_vm5 = vcmask (!%p412_p2), 31744  }
   0xa   : > { %v12934_v20 = vpack.c.bf16 (!%p412_p2), %v10019_v19, %v10018_v18  ;;  %v10016_v25 = vld [vmem:[%s14507_s2 + $0x8] sm:$0xf] (!%p412_p2)  ;;  %v10023_v26 = vld [vmem:[%s14507_s2 + $0xc] sm:$0xf] (!%p412_p2)  ;;  %v10021_v28 = vld [vmem:[%s14506_s1 + $0x58] sm:$0xff] (!%p412_p2) }
   0xb   : > { %v10025_v29 = vld [vmem:[%s14506_s1 + $0x60] sm:$0xff] (!%p412_p2)  ;;  %v12969_v30 = vpack.c.bf16 (!%p412_p2), %v10021_v28, %v10020_v27  ;;  %v10026_v31 = vld [vmem:[%s14506_s1 + $0x68] sm:$0xff] (!%p412_p2)  ;;  %v10027_v33 = vld [vmem:[%s14506_s1 + $0x70] sm:$0xff] (!%p412_p2) }
   0xc   : > { %v12974_v32 = vpack.c.bf16 (!%p412_p2), %v10026_v31, %v10025_v29  ;;  %v10028_v34 = vld [vmem:[%s14506_s1 + $0x78] sm:$0xff] (!%p412_p2)  ;;  %v10032_v42 = vld [vmem:[%s14506_s1 + $0x80] sm:$0xff] (!%p412_p2)  ;;  %v10033_v43 = vld [vmem:[%s14506_s1 + $0x88] sm:$0xff] (!%p412_p2) }
   0xd   : > { %s14521_s30 = smov (!%p455_p3, %s10000_s30), 1  ;;  %v12986_v35 = vpack.c.bf16 %v10028_v34, %v10027_v33  ;;  %v10030_v45 = vld [vmem:[%s14507_s2 + $0x10] sm:$0xf]  ;;  %v13004_v46 = vpack.c.bf16 %v10033_v43, %v10032_v42  ;;  %v10037_v49 = vld [vmem:[%s14507_s2 + $0x14] sm:$0xf]  ;;  %v10035_v51 = vld [vmem:[%s14506_s1 + $0x98] sm:$0xff] }
   0xe   : > { %s10005_s15 = sshll.u32 %s14521_s30, 2  ;;  %v10034_v50 = vld [vmem:[%s14506_s1 + $0x90] sm:$0xff]  ;;  %v10039_v52 = vld [vmem:[%s14506_s1 + $0xa0] sm:$0xff]  ;;  %v10040_v54 = vld [vmem:[%s14506_s1 + $0xa8] sm:$0xff] }
   0xf   : > { %s458_s20 = scalar_lea.vmem %s14505_s0, %s10005_s15  ;;  %v13031_v53 = vpack.c.bf16 %v10035_v51, %v10034_v50  ;;  %v13036_v55 = vpack.c.bf16 %v10040_v54, %v10039_v52  ;;  %v10041_v56 = vld [vmem:[%s14506_s1 + $0xb0] sm:$0xff]  ;;  %v10042_v57 = vld [vmem:[%s14506_s1 + $0xb8] sm:$0xff]  ;;  %v1391_v59 = vld [vmem:[%s14508_s3] sm:$0xf] }
  0x10   : > { %v463_v5 = vld [vmem:[%s458_s20] sm:$0xf]  ;;  %v13048_v58 = vpack.c.bf16 %v10042_v57, %v10041_v56  ;;  %1394 = vperm.xlu0 %12737, %v1391_v59   ;;  %v13065_v28 = vld [vmem:[#allocation2 + $0x8] sm:$0xff]  ;;  %v1416_v31 = vld [vmem:[#allocation2 + $0x10] sm:$0xff] }
  0x11   : > { %v12874_v6 = vunpack.c.l.bf16 %v463_v5  ;;  %v10044_v61 = vld [vmem:[%s14518_s13] ss:$0 sm:$0xff]  ;;  %v1417_v33 = vld [vmem:[#allocation2 + $0x18] sm:$0xff] }
  0x12   : > { %v2341_v42 = vld [vmem:[%s14512_s7] sm:$0xf] }
  0x13   : > { %10957 = vmatpush3.msra.mxu0 %v12874_v6  ;;  %10962 = vmatpush3.msra.mxu1 %v12874_v6 }
  0x14   : > { %10959 = vmatmul.mubr.msk.f32.vlgmr.msra.gmra.mrb[0].mxu0 %vm471_vm1, %v470_v7  ;;  %10964 = vmatmul.mubr.msk.f32.vlgmr.msra.gmra.mrb[0].mxu1 %vm471_vm1, %v10008_v8 }
  0x15   : > { %12107 = vmatprep.subr.bf16.mxu0 %v12763_v15  ;;  %12113 = vmatprep.subr.bf16.mxu1 %v12763_v15 }
  0x16   : > { %12109 = vmatpush3.bf16.msra.mxu0 %v12882_v9  ;;  %12115 = vmatpush3.bf16.msra.mxu1 %v12884_v10 }
  0x17   : > { %12110 = vmatprep.subr.bf16.mxu0 %v12763_v15  ;;  %12116 = vmatprep.subr.bf16.mxu1 %v12763_v15 }
  0x18   : > { %10974 = vmatprep.mubr.msk.f32.mxu0 %vm12762_vm0, %v12761_v0  ;;  %10985 = vmatprep.mubr.msk.f32.mxu1 %vm12762_vm0, %v12761_v0 }
  0x19   : > { %1407 = vperm.xlu0 %12737, %v10044_v61  }
  0x1a   : > { %12112 = vmatpush3.bf16.msra.mxu0 %v12906_v16  ;;  %12118 = vmatpush3.bf16.msra.mxu1 %v12908_v17 }
  0x1b   : > { %10988 = vmatprep.subr.mxu0 %v12761_v0  ;;  %12119 = vmatprep.subr.bf16.mxu1 %v12763_v15 }
  0x8f   : > { %v1395_v14 = vpop.permute.xlu0 %1394 }
  0xe7   : > { %v541_v21 = vpop.f32.mrb[0].mxu0  ;;  %v620_v22 = vpop.f32.mrb[0].mxu1 }
  0xe8   : > { %v10965_v23 = vpop.f32.mrb[1].mxu1  ;;  %10975 = vmatmul.mubr.msk.f32.vlgmr.msra.gmra.mrb[2].mxu0 %vm465_vm2, %v620_v22  ;;  %10986 = vmatmul.mubr.msk.f32.vlgmr.msra.gmra.mrb[2].mxu1 %vm465_vm2, %v541_v21  ;;  %v10960_v24 = vpop.f32.mrb[1].mxu0 }
  0xe9   : > { %10989 = vmatpush3.msra.mxu0 %v12874_v6  ;;  %10990 = vmatprep.mubr.msk.f32.mxu0 %vm12762_vm0, %v12761_v0  ;;  %v1408_v24 = vpop.permute.xlu0 %1407 }
  0xea   : > { %11004 = vmatprep.subr.mxu0 %v12761_v0  ;;  %12121 = vmatpush3.bf16.msra.mxu1 %v12934_v20 }
  0xeb   : > { %12122 = vmatprep.subr.bf16.mxu1 %v12763_v15  ;;  %11001 = vmatprep.mubr.msk.f32.mxu1 %vm12762_vm0, %v12761_v0 }
  0xec   : > { %10991 = vmatmul.mubr.msk.f32.vlgmr.msra.gmra.mrb[4].mxu0 %vm471_vm1, %v10016_v25 }
  0xed   : > { %11005 = vmatpush3.msra.mxu0 %v12874_v6  ;;  %11006 = vmatprep.mubr.msk.f32.mxu0 %vm12762_vm0, %v12761_v0 }
  0xee   : > { %12125 = vmatprep.subr.bf16.mxu0 %v12763_v15  ;;  %12124 = vmatpush3.bf16.msra.mxu1 %v12969_v30 }
  0xef   : > { %11020 = vmatprep.subr.mxu1 %v12761_v0 }
  0xf0   : > { %11007 = vmatmul.mubr.msk.f32.vlgmr.msra.gmra.mrb[6].mxu0 %vm471_vm1, %v10023_v26 }
  0xf1   : > { %11017 = vmatprep.mubr.msk.f32.mxu0 %vm12762_vm0, %v12761_v0  ;;  %12127 = vmatpush3.bf16.msra.mxu0 %v12974_v32 }
  0xf2   : > { %12128 = vmatprep.subr.bf16.mxu0 %v12763_v15 }
  0xf5   : > { %12130 = vmatpush3.bf16.msra.mxu0 %v12986_v35 }
  0xf6   : > { %11036 = vmatprep.subr.mxu0 %v12761_v0 }
 0x1bb   : > { %v698_v36 = vpop.f32.mrb[2].mxu0  ;;  %v771_v37 = vpop.f32.mrb[2].mxu1 }
 0x1bc   : > { %v772_v38 = vadd.f32 %v771_v37, %v698_v36  ;;  %v10976_v39 = vpop.f32.mrb[3].mxu0  ;;  %v10987_v40 = vpop.f32.mrb[3].mxu1  ;;  %v13068_v36 = vpack.c.bf16 %v1417_v33, %v1416_v31  ;;  %v1418_v37 = vld [vmem:[%s14509_s4] sm:$0xf] }
 0x1bf   : > { %v846_v41 = vpop.f32.mrb[4].mxu0 }
 0x1c0   : > { %v10992_v44 = vpop.f32.mrb[5].mxu0  ;;  %11002 = vmatmul.mubr.msk.f32.vlgmr.msra.gmra.mrb[4].mxu1 %vm465_vm2, %v846_v41  ;;  %v2333_v41 = vld [vmem:[%s14510_s5] sm:$0xf] }
 0x1c1   : > { %11021 = vmatpush3.msra.mxu1 %v12874_v6  ;;  %11022 = vmatprep.mubr.msk.f32.mxu1 %vm12762_vm0, %v12761_v0 }
 0x1c2   : > { %12131 = vmatprep.subr.bf16.mxu1 %v12763_v15  ;;  %2336 = vperm.xlu1 %12738, %v2333_v41  }
 0x1c3   : > { %v1000_v47 = vpop.f32.mrb[6].mxu0 }
 0x1c4   : > { %v11008_v48 = vpop.f32.mrb[7].mxu0  ;;  %11018 = vmatmul.mubr.msk.f32.vlgmr.msra.gmra.mrb[8].mxu0 %vm465_vm2, %v1000_v47  ;;  %11023 = vmatmul.mubr.msk.f32.vlgmr.msra.gmra.mrb[6].mxu1 %vm471_vm1, %v10030_v45 }
 0x1c5   : > { %11037 = vmatpush3.msra.mxu0 %v12874_v6  ;;  %11038 = vmatprep.mubr.msk.f32.mxu0 %vm12762_vm0, %v12761_v0 }
 0x1c6   : > { %12133 = vmatpush3.bf16.msra.mxu1 %v13004_v46  ;;  %12137 = vmatprep.subr.bf16.mxu0 %v12763_v15 }
 0x1c7   : > { %12134 = vmatprep.subr.bf16.mxu1 %v12763_v15  ;;  %11033 = vmatprep.mubr.msk.f32.mxu1 %vm12762_vm0, %v12761_v0 }
 0x1c8   : > { %11039 = vmatmul.mubr.msk.f32.vlgmr.msra.gmra.mrb[10].mxu0 %vm471_vm1, %v10037_v49  ;;  %2344 = vperm.xlu1 %12738, %v2341_v42  }
 0x1c9   : > { %11049 = vmatprep.mubr.msk.f32.mxu0 %vm12762_vm0, %v12761_v0  ;;  %12139 = vmatpush3.bf16.msra.mxu0 %v13036_v55 }
 0x1ca   : > { %12136 = vmatpush3.bf16.msra.mxu1 %v13031_v53  ;;  %12140 = vmatprep.subr.bf16.mxu0 %v12763_v15 }
 0x1cb   : > { %12143 = vmatprep.subr.bf16.mxu1 %v12763_v15 }
 0x1cd   : > { %12142 = vmatpush3.bf16.msra.mxu0 %v13048_v58 }
 0x1ce   : > { %12149 = vmatprep.subr.bf16.mxu0 %v12763_v15 }
 0x293   : > { %v924_v62 = vpop.f32.mrb[4].mxu1 }
 0x294   : > { %v928_v63 = vadd.f32 %v924_v62, %v772_v38  ;;  %v11003_v1 = vpop.f32.mrb[5].mxu1  ;;  %v10046_v38 = vld [vmem:[%s14509_s4 + $0x4] sm:$0xf] }
 0x297   : > { %v1078_v2 = vpop.f32.mrb[8].mxu0  ;;  %v1154_v3 = vpop.f32.mrb[6].mxu1 }
 0x298   : > { %v1082_v4 = vadd.f32 %v1078_v2, %v928_v63  ;;  %v11019_v5 = vpop.f32.mrb[9].mxu0  ;;  %11034 = vmatmul.mubr.msk.f32.vlgmr.msra.gmra.mrb[8].mxu1 %vm465_vm2, %v1154_v3  ;;  %v11024_v6 = vpop.f32.mrb[7].mxu1 }
 0x299   : > { %11060 = vmatprep.mubr.msk.f32.mxu1 %vm12762_vm0, %v12761_v0  ;;  %v2337_v3 = vpop.permute.xlu1 %2336  ;;  %v2340_v5 = vld [vmem:[%s14511_s6] sm:$0xf] }
 0x29b   : > { %v1308_v7 = vpop.f32.mrb[10].mxu0 }
 0x29c   : > { %v11040_v8 = vpop.f32.mrb[11].mxu0  ;;  %11050 = vmatmul.mubr.msk.f32.vlgmr.msra.gmra.mrb[12].mxu0 %vm465_vm2, %v1308_v7 }
 0x29d   : > { %11071 = vmatprep.mubr.msk.f32.mxu0 %vm12762_vm0, %v12761_v0  ;;  %v2345_v6 = vpop.permute.xlu1 %2344 }
 0x36b   : > { %v1232_v11 = vpop.f32.mrb[8].mxu1 }
 0x36c   : > { %v1236_v12 = vadd.f32 %v1232_v11, %v1082_v4  ;;  %v11035_v13 = vpop.f32.mrb[9].mxu1 }
 0x36d   : > { %v2460_v13 = vld [vmem:[%s14513_s8] sm:$0xf] }
 0x36f   : > { %v1386_v18 = vpop.f32.mrb[12].mxu0 }
 0x370   : > { %v1390_v19 = vadd.f32 %v1386_v18, %v1236_v12  ;;  %v11051_v21 = vpop.f32.mrb[13].mxu0  ;;  %v10129_v18 = vld [vmem:[%s14512_s7 + $0x4] sm:$0xf] }
 0x372   : > { %v1397_v22 = vadd.f32 %v1395_v14, %v1390_v19  ;;  %v10084_v14 = vld [vmem:[%s14515_s10] ss:$0 sm:$0xff] }
 0x374   : > { %v1400_v23 = vmin.f32 %v1397_v22, 0.0  ;;  %v1399_v25 = vmax.f32 %v1397_v22, 0.0 }
 0x376   : > { %v1410_v26 = vmul.f32 %v1408_v24, %v1400_v23 }
 0x378   : > { %v1411_v27 = vadd.f32 %v1410_v26, %v1399_v25 }
 0x37a   : > { %1413 = vst.msk [vmem:[#allocation2] sm:$0xf] %vm1412_vm3, %v1411_v27 }
 0x381   : > { %v1414_v29 = vld [vmem:[#allocation2] sm:$0xff] }
 0x382   : > { %v12144_v34 = vpack.c.bf16 %v13065_v28, %v1414_v29 }
 0x384   : > { %12145 = vmatpush3.bf16.msra.mxu1 %v12144_v34  ;;  %12151 = vmatpush3.bf16.msra.mxu0 %v12144_v34 }
 0x385   : > { %12146 = vmatprep.subr.bf16.mxu1 %v12763_v15  ;;  %12152 = vmatprep.subr.bf16.mxu0 %v12763_v15 }
 0x388   : > { %12148 = vmatpush3.bf16.msra.mxu1 %v13068_v36  ;;  %12154 = vmatpush3.bf16.msra.mxu0 %v13068_v36 }
 0x389   : > { %12155 = vmatprep.subr.bf16.mxu1 %v12763_v15  ;;  %12161 = vmatprep.subr.bf16.mxu0 %v12763_v15 }
 0x38b   : > { %11061 = vmatmul.mubr.msk.f32.vlgmr.msra.gmra.mrb[10].mxu1 %vm465_vm2, %v1418_v37  ;;  %11072 = vmatmul.mubr.msk.f32.vlgmr.msra.gmra.mrb[14].mxu0 %vm465_vm2, %v10046_v38  ;;  %v10127_v37 = vld [vmem:[%s14510_s5 + $0x4] sm:$0xf] }
 0x38c   : > { %12157 = vmatpush3.bf16.msra.mxu1 %v12882_v9  ;;  %12163 = vmatpush3.bf16.msra.mxu0 %v12884_v10 }
 0x38d   : > { %12158 = vmatprep.subr.bf16.mxu1 %v12763_v15  ;;  %12164 = vmatprep.subr.bf16.mxu0 %v12763_v15 }
 0x38e   : > { %11082 = vmatprep.mubr.msk.f32.mxu1 %vm12762_vm0, %v12761_v0  ;;  %11093 = vmatprep.mubr.msk.f32.mxu0 %vm12762_vm0, %v12761_v0 }
 0x390   : > { %12160 = vmatpush3.bf16.msra.mxu1 %v12906_v16  ;;  %12166 = vmatpush3.bf16.msra.mxu0 %v12908_v17  ;;  %v10054_v16 = vld [vmem:[%s14509_s4 + $0x8] sm:$0xf]  ;;  %v10061_v17 = vld [vmem:[%s14509_s4 + $0xc] sm:$0xf] }
 0x391   : > { %12167 = vmatprep.subr.bf16.mxu1 %v12763_v15  ;;  %12173 = vmatprep.subr.bf16.mxu0 %v12763_v15 }
 0x45e   : > { %v1488_v9 = vpop.f32.mrb[10].mxu1  ;;  %v1567_v10 = vpop.f32.mrb[14].mxu0 }
 0x45f   : > { %v11073_v39 = vpop.f32.mrb[15].mxu0  ;;  %11083 = vmatmul.mubr.msk.f32.vlgmr.msra.gmra.mrb[12].mxu1 %vm465_vm2, %v1567_v10  ;;  %11094 = vmatmul.mubr.msk.f32.vlgmr.msra.gmra.mrb[16].mxu0 %vm465_vm2, %v1488_v9  ;;  %v11062_v40 = vpop.f32.mrb[11].mxu1 }
 0x460   : > { %12169 = vmatpush3.bf16.msra.mxu1 %v12144_v34  ;;  %11104 = vmatprep.mubr.msk.f32.mxu1 %vm12762_vm0, %v12761_v0 }
 0x461   : > { %12170 = vmatprep.subr.bf16.mxu1 %v12763_v15  ;;  %12175 = vmatpush3.bf16.msra.mxu0 %v12934_v20  ;;  %v10068_v20 = vld [vmem:[%s14509_s4 + $0x10] sm:$0xf] }
 0x462   : > { %12176 = vmatprep.subr.bf16.mxu0 %v12763_v15  ;;  %11115 = vmatprep.mubr.msk.f32.mxu0 %vm12762_vm0, %v12761_v0 }
 0x464   : > { %12172 = vmatpush3.bf16.msra.mxu1 %v13068_v36 }
 0x465   : > { %12179 = vmatprep.subr.bf16.mxu1 %v12763_v15  ;;  %12178 = vmatpush3.bf16.msra.mxu0 %v12969_v30  ;;  %v10075_v30 = vld [vmem:[%s14509_s4 + $0x14] sm:$0xf] }
 0x466   : > { %12185 = vmatprep.subr.bf16.mxu0 %v12763_v15 }
 0x467   : > { %11105 = vmatmul.mubr.msk.f32.vlgmr.msra.gmra.mrb[14].mxu1 %vm465_vm2, %v10054_v16 }
 0x468   : > { %12181 = vmatpush3.bf16.msra.mxu1 %v12144_v34  ;;  %11126 = vmatprep.mubr.msk.f32.mxu1 %vm12762_vm0, %v12761_v0 }
 0x469   : > { %12182 = vmatprep.subr.bf16.mxu1 %v12763_v15 }
 0x46c   : > { %12184 = vmatpush3.bf16.msra.mxu1 %v13068_v36 }
 0x46d   : > { %12191 = vmatprep.subr.bf16.mxu1 %v12763_v15 }
 0x46f   : > { %11127 = vmatmul.mubr.msk.f32.vlgmr.msra.gmra.mrb[16].mxu1 %vm465_vm2, %v10061_v17 }
 0x470   : > { %12193 = vmatpush3.bf16.msra.mxu1 %v12144_v34  ;;  %11148 = vmatprep.mubr.msk.f32.mxu1 %vm12762_vm0, %v12761_v0 }
 0x471   : > { %12194 = vmatprep.subr.bf16.mxu1 %v12763_v15 }
 0x474   : > { %12196 = vmatpush3.bf16.msra.mxu1 %v13068_v36 }
 0x475   : > { %12203 = vmatprep.subr.bf16.mxu1 %v12763_v15 }
 0x477   : > { %11149 = vmatmul.mubr.msk.f32.vlgmr.msra.gmra.mrb[18].mxu1 %vm465_vm2, %v10068_v20 }
 0x478   : > { %12205 = vmatpush3.bf16.msra.mxu1 %v12144_v34  ;;  %11170 = vmatprep.mubr.msk.f32.mxu1 %vm12762_vm0, %v12761_v0  ;;  %v2467_v34 = vld [vmem:[%s14514_s9] sm:$0xf] }
 0x479   : > { %12206 = vmatprep.subr.bf16.mxu1 %v12763_v15 }
 0x47c   : > { %12208 = vmatpush3.bf16.msra.mxu1 %v13068_v36 }
 0x47d   : > { %11184 = vmatprep.subr.mxu1 %v12761_v0 }
 0x47f   : > { %11171 = vmatmul.mubr.msk.f32.vlgmr.msra.gmra.mrb[20].mxu1 %vm465_vm2, %v10075_v30 }
 0x480   : > { %11186 = vmatprep.mubr.msk.f32.mxu1 %vm12762_vm0, %v12761_v0 }
 0x532   : > { %v1644_v43 = vpop.f32.mrb[12].mxu1  ;;  %v1717_v44 = vpop.f32.mrb[16].mxu0 }
 0x533   : > { %v1718_v45 = vadd.f32 %v1717_v44, %v1644_v43  ;;  %v11084_v47 = vpop.f32.mrb[13].mxu1  ;;  %v11095_v48 = vpop.f32.mrb[17].mxu0 }
 0x53a   : > { %v1792_v49 = vpop.f32.mrb[14].mxu1 }
 0x53b   : > { %v11106_v50 = vpop.f32.mrb[15].mxu1  ;;  %11116 = vmatmul.mubr.msk.f32.vlgmr.msra.gmra.mrb[18].mxu0 %vm465_vm2, %v1792_v49 }
 0x53c   : > { %12187 = vmatpush3.bf16.msra.mxu0 %v12974_v32  ;;  %11137 = vmatprep.mubr.msk.f32.mxu0 %vm12762_vm0, %v12761_v0 }
 0x53d   : > { %12188 = vmatprep.subr.bf16.mxu0 %v12763_v15 }
 0x540   : > { %12190 = vmatpush3.bf16.msra.mxu0 %v12986_v35 }
 0x541   : > { %12197 = vmatprep.subr.bf16.mxu0 %v12763_v15 }
 0x542   : > { %v1945_v51 = vpop.f32.mrb[16].mxu1 }
 0x543   : > { %v11128_v52 = vpop.f32.mrb[17].mxu1  ;;  %11138 = vmatmul.mubr.msk.f32.vlgmr.msra.gmra.mrb[20].mxu0 %vm465_vm2, %v1945_v51 }
 0x544   : > { %12199 = vmatpush3.bf16.msra.mxu0 %v13004_v46  ;;  %11159 = vmatprep.mubr.msk.f32.mxu0 %vm12762_vm0, %v12761_v0 }
 0x545   : > { %12200 = vmatprep.subr.bf16.mxu0 %v12763_v15 }
 0x548   : > { %12202 = vmatpush3.bf16.msra.mxu0 %v13031_v53 }
 0x549   : > { %12209 = vmatprep.subr.bf16.mxu0 %v12763_v15 }
 0x54a   : > { %v2098_v32 = vpop.f32.mrb[18].mxu1 }
 0x54b   : > { %v11150_v54 = vpop.f32.mrb[19].mxu1  ;;  %11160 = vmatmul.mubr.msk.f32.vlgmr.msra.gmra.mrb[22].mxu0 %vm465_vm2, %v2098_v32 }
 0x54c   : > { %12211 = vmatpush3.bf16.msra.mxu0 %v13036_v55  ;;  %11181 = vmatprep.mubr.msk.f32.mxu0 %vm12762_vm0, %v12761_v0 }
 0x54d   : > { %12212 = vmatprep.subr.bf16.mxu0 %v12763_v15 }
 0x550   : > { %12214 = vmatpush3.bf16.msra.mxu0 %v13048_v58 }
 0x551   : > { %12221 = vmatprep.subr.bf16.mxu0 %v12763_v15 }
 0x552   : > { %v2251_v35 = vpop.f32.mrb[20].mxu1 }
 0x553   : > { %v11172_v46 = vpop.f32.mrb[21].mxu1  ;;  %11182 = vmatmul.mubr.msk.f32.vlgmr.msra.gmra.mrb[24].mxu0 %vm465_vm2, %v2251_v35  ;;  %v10093_v35 = vld [vmem:[%s14506_s1 + $0xe0] sm:$0xff] }
 0x554   : > { %11208 = vmatprep.mubr.msk.f32.mxu0 %vm12762_vm0, %v12761_v0  ;;  %v10094_v46 = vld [vmem:[%s14506_s1 + $0xe8] sm:$0xff] }
 0x60e   : > { %v1869_v53 = vpop.f32.mrb[18].mxu0 }
 0x60f   : > { %v1873_v56 = vadd.f32 %v1869_v53, %v1718_v45  ;;  %v11117_v57 = vpop.f32.mrb[19].mxu0  ;;  %v10088_v53 = vld [vmem:[%s14506_s1 + $0xc8] sm:$0xff] }
 0x610   : > { %v10091_v57 = vld [vmem:[%s14509_s4 + $0x1c] sm:$0xf] }
 0x616   : > { %v2022_v55 = vpop.f32.mrb[20].mxu0 }
 0x617   : > { %v2026_v59 = vadd.f32 %v2022_v55, %v1873_v56  ;;  %v11139_v60 = vpop.f32.mrb[21].mxu0  ;;  %v10085_v56 = vld [vmem:[%s14509_s4 + $0x18] sm:$0xf]  ;;  %v12228_v55 = vpack.c.bf16 %v10094_v46, %v10093_v35 }
 0x618   : > { %v10095_v60 = vld [vmem:[%s14506_s1 + $0xf0] sm:$0xff] }
 0x61e   : > { %v2175_v61 = vpop.f32.mrb[22].mxu0 }
 0x61f   : > { %v2179_v62 = vadd.f32 %v2175_v61, %v2026_v59  ;;  %v11161_v63 = vpop.f32.mrb[23].mxu0  ;;  %v10096_v61 = vld [vmem:[%s14506_s1 + $0xf8] sm:$0xff] }
 0x620   : > { %v10090_v63 = vld [vmem:[%s14506_s1 + $0xd8] sm:$0xff] }
 0x626   : > { %v2328_v1 = vpop.f32.mrb[24].mxu0 }
 0x627   : > { %v2332_v58 = vadd.f32 %v2328_v1, %v2179_v62  ;;  %v11183_v2 = vpop.f32.mrb[25].mxu0  ;;  %v10089_v62 = vld [vmem:[%s14506_s1 + $0xd0] sm:$0xff]  ;;  %v12231_v1 = vpack.c.bf16 %v10096_v61, %v10095_v60 }
 0x629   : > { %v2339_v4 = vadd.f32 %v2337_v3, %v2332_v58  ;;  %v12237_v58 = vpack.c.bf16 %v10090_v63, %v10089_v62 }
 0x62b   : > { %11185 = vmatpush3.msk.msra.mxu1 %vm2351_vm4, %v2339_v4 }
 0x62c   : > { %11187 = vmatmul.mubr.msk.f32.vlgmr.msra.gmra.mrb[22].mxu1 %vm2347_vm5, %v2340_v5  ;;  %12215 = vmatprep.subr.bf16.mxu1 %v12763_v15 }
 0x62d   : > { %11197 = vmatprep.mubr.msk.f32.mxu1 %vm12762_vm0, %v12761_v0 }
 0x6ff   : > { %v2421_v7 = vpop.f32.mrb[22].mxu1 }
 0x700   : > { %v2422_v8 = vadd.f32 %v2421_v7, %v2345_v6  ;;  %v11188_v11 = vpop.f32.mrb[23].mxu1  ;;  %v10099_v6 = vld [vmem:[%s14509_s4 + $0x20] sm:$0xf]  ;;  %v10106_v7 = vld [vmem:[%s14509_s4 + $0x24] sm:$0xf] }
 0x701   : > { %v10120_v11 = vld [vmem:[%s14509_s4 + $0x2c] sm:$0xf] }
 0x702   : > { %v2425_v12 = vsel %vm1412_vm3, %v2422_v8, 0.0 }
 0x703   : > { %2426 = vadd.xlane.f32.xlu0 %v2425_v12  ;;  %v10101_v12 = vld [vmem:[%s14506_s1 + $0x100] sm:$0xff] }
 0x719   : > { %2463 = vperm.xlu0 %12737, %v2460_v13   ;;  %v10102_v13 = vld [vmem:[%s14506_s1 + $0x108] sm:$0xff] }
 0x71d   : > { %2483 = vperm.xlu0 %12737, %v10084_v14   ;;  %v12246_v14 = vpack.c.bf16 %v10102_v13, %v10101_v12 }
 0x721   : > { %3429 = vperm.xlu0 %12737, %v10129_v18   ;;  %v10103_v18 = vld [vmem:[%s14506_s1 + $0x110] sm:$0xff] }
 0x790   : > { %v2427_v19 = vpop.xlane.xlu0 %2426 }
 0x791   : > { %v2428_v21 = vrot.slane %v2427_v19, 4 }
 0x793   : > { %v2429_v22 = vadd.f32 %v2428_v21, %v2427_v19  ;;  %v10104_v19 = vld [vmem:[%s14506_s1 + $0x118] sm:$0xff] }
 0x794   : > { %v12249_v21 = vpack.c.bf16 %v10104_v19, %v10103_v18 }
 0x795   : > { %v2430_v23 = vrot.slane %v2429_v22, 2 }
 0x797   : > { %v2431_v24 = vadd.f32 %v2430_v23, %v2429_v22 }
 0x798   : > { %v2464_v43 = vpop.permute.xlu0 %2463 }
 0x799   : > { %v2432_v25 = vrot.slane %v2431_v24, 1 }
 0x79b   : > { %v2433_v26 = vadd.f32 %v2432_v25, %v2431_v24 }
 0x79c   : > { %v2484_v49 = vpop.permute.xlu0 %2483 }
 0x79d   : > { %12683 = vpush %v2433_v26 }
 0x7ce   : > { %s12684_s16 = spop %12683 }
 0x7cf   : > { %s2437_s17 = smul.f32 0.0078125, %s12684_s16 }
 0x7d1   : > { %v2438_v27 = vstv %s2437_s17 }
 0x7d2   : > { %v2439_v29 = vsub.f32 %v2422_v8, %v2438_v27  ;;  %v10113_v8 = vld [vmem:[%s14509_s4 + $0x28] sm:$0xf]  ;;  %v10108_v27 = vld [vmem:[%s14506_s1 + $0x120] sm:$0xff] }
 0x7d4   : > { %v2440_v31 = vmul.f32 %v2439_v29, %v2439_v29 }
 0x7d6   : > { %v2441_v33 = vsel %vm1412_vm3, %v2440_v31, 0.0 }
 0x7d7   : > { %2442 = vadd.xlane.f32.xlu1 %v2441_v33  ;;  %v10110_v33 = vld [vmem:[%s14506_s1 + $0x130] sm:$0xff] }
 0x7e8   : > { %2470 = vperm.xlu1 %12738, %v2467_v34   ;;  %v10111_v34 = vld [vmem:[%s14506_s1 + $0x138] sm:$0xff] }
 0x7ec   : > { %3419 = vperm.xlu1 %12738, %v10127_v37  }
 0x864   : > { %v2443_v38 = vpop.xlane.xlu1 %2442 }
 0x865   : > { %v2444_v9 = vrot.slane %v2443_v38, 4 }
 0x867   : > { %v2445_v10 = vadd.f32 %v2444_v9, %v2443_v38  ;;  %v12261_v9 = vpack.c.bf16 %v10111_v34, %v10110_v33 }
 0x868   : > { %v2471_v45 = vpop.permute.xlu1 %2470 }
 0x869   : > { %v2446_v39 = vrot.slane %v2445_v10, 2 }
 0x86b   : > { %v2447_v40 = vadd.f32 %v2446_v39, %v2445_v10  ;;  %v10115_v10 = vld [vmem:[%s14506_s1 + $0x140] sm:$0xff]  ;;  %v10116_v39 = vld [vmem:[%s14506_s1 + $0x148] sm:$0xff] }
 0x86c   : > { %v3420_v63 = vpop.permute.xlu1 %3419 }
 0x86d   : > { %v2448_v16 = vrot.slane %v2447_v40, 1 }
 0x86f   : > { %v2449_v17 = vadd.f32 %v2448_v16, %v2447_v40  ;;  %v12270_v40 = vpack.c.bf16 %v10116_v39, %v10115_v10  ;;  %v10117_v16 = vld [vmem:[%s14506_s1 + $0x150] sm:$0xff] }
 0x871   : > { %12685 = vpush %v2449_v17  ;;  %v10118_v17 = vld [vmem:[%s14506_s1 + $0x158] sm:$0xff] }
 0x8a2   : > { %s12686_s22 = spop %12685 }
 0x8a3   : > { %s2453_s23 = smul.f32 0.0078125, %s12686_s22 }
 0x8a5   : > { %s2454_s24 = sadd.f32 1e-08, %s2453_s23 }
 0x8a7   : > { %v2455_v20 = vstv %s2454_s24 }
 0x8a8   : > { %12739 = vrsqrt.f32 %v2455_v20 }
 0x8b2   : > { %v12740_v30 = vpop.eup %12739 }
 0x8b3   : > { %12687 = vpush %v12740_v30 }
 0x8e4   : > { %s12688_s25 = spop %12687 }
 0x8e5   : > { %v2458_v41 = vstv %s12688_s25 }
 0x8e6   : > { %v2459_v42 = vmul.f32 %v2458_v41, %v2439_v29  ;;  %v10109_v29 = vld [vmem:[%s14506_s1 + $0x128] sm:$0xff]  ;;  %v12273_v41 = vpack.c.bf16 %v10118_v17, %v10117_v16 }
 0x8e7   : > { %v12258_v31 = vpack.c.bf16 %v10109_v29, %v10108_v27  ;;  %v10132_v27 = vld [vmem:[%s14513_s8 + $0x4] sm:$0xf]  ;;  %v10178_v29 = vld [vmem:[%s14510_s5 + $0x8] sm:$0xf] }
 0x8e8   : > { %v2466_v44 = vmul.f32 %v2464_v43, %v2459_v42  ;;  %v10122_v42 = vld [vmem:[%s14506_s1 + $0x160] sm:$0xff]  ;;  %v10123_v43 = vld [vmem:[%s14506_s1 + $0x168] sm:$0xff] }
 0x8ea   : > { %v2473_v47 = vadd.f32 %v2471_v45, %v2466_v44  ;;  %v12282_v44 = vpack.c.bf16 %v10123_v43, %v10122_v42  ;;  %v10124_v45 = vld [vmem:[%s14506_s1 + $0x170] sm:$0xff] }
 0x8ec   : > { %v2476_v48 = vmin.f32 %v2473_v47, 0.0  ;;  %v2475_v50 = vmax.f32 %v2473_v47, 0.0  ;;  %v10125_v47 = vld [vmem:[%s14506_s1 + $0x178] sm:$0xff] }
 0x8ee   : > { %v2486_v51 = vmul.f32 %v2484_v49, %v2476_v48 }
 0x8f0   : > { %v2487_v52 = vadd.f32 %v2486_v51, %v2475_v50  ;;  %v12285_v50 = vpack.c.bf16 %v10125_v47, %v10124_v45 }
 0x8f2   : > { %2488 = vst.msk [vmem:[#allocation2 + $0x4] sm:$0xf] %vm1412_vm3, %v2487_v52 }
 0x8f9   : > { %v13198_v32 = vld [vmem:[#allocation2] sm:$0xff] }
 0x8fa   : > { %v13202_v54 = vpack.c.bf16 %v13065_v28, %v13198_v32  ;;  %v10087_v28 = vld [vmem:[%s14506_s1 + $0xc0] sm:$0xff] }
 0x8fb   : > { %v12234_v59 = vpack.c.bf16 %v10088_v53, %v10087_v28 }
 0x8fc   : > { %12217 = vmatpush3.bf16.msra.mxu1 %v13202_v54  ;;  %12223 = vmatpush3.bf16.msra.mxu0 %v13202_v54 }
 0x8fd   : > { %12218 = vmatprep.subr.bf16.mxu1 %v12763_v15  ;;  %12224 = vmatprep.subr.bf16.mxu0 %v12763_v15 }
 0x900   : > { %12220 = vmatpush3.bf16.msra.mxu1 %v13068_v36  ;;  %12226 = vmatpush3.bf16.msra.mxu0 %v13068_v36 }
 0x901   : > { %12227 = vmatprep.subr.bf16.mxu1 %v12763_v15  ;;  %12233 = vmatprep.subr.bf16.mxu0 %v12763_v15 }
 0x903   : > { %11198 = vmatmul.mubr.msk.f32.vlgmr.msra.gmra.mrb[24].mxu1 %vm465_vm2, %v10085_v56  ;;  %11209 = vmatmul.mubr.msk.f32.vlgmr.msra.gmra.mrb[26].mxu0 %vm465_vm2, %v10091_v57 }
 0x904   : > { %12229 = vmatpush3.bf16.msra.mxu1 %v12228_v55  ;;  %12235 = vmatpush3.bf16.msra.mxu0 %v12234_v59 }
 0x905   : > { %12230 = vmatprep.subr.bf16.mxu1 %v12763_v15  ;;  %12236 = vmatprep.subr.bf16.mxu0 %v12763_v15 }
 0x906   : > { %11219 = vmatprep.mubr.msk.f32.mxu1 %vm12762_vm0, %v12761_v0  ;;  %11230 = vmatprep.mubr.msk.f32.mxu0 %vm12762_vm0, %v12761_v0 }
 0x908   : > { %12232 = vmatpush3.bf16.msra.mxu1 %v12231_v1  ;;  %12238 = vmatpush3.bf16.msra.mxu0 %v12237_v58  ;;  %v10128_v58 = vld [vmem:[%s14511_s6 + $0x4] sm:$0xf] }
 0x909   : > { %12239 = vmatprep.subr.bf16.mxu1 %v12763_v15  ;;  %12245 = vmatprep.subr.bf16.mxu0 %v12763_v15 }
 0x9d6   : > { %v2564_v2 = vpop.f32.mrb[24].mxu1  ;;  %v2644_v3 = vpop.f32.mrb[26].mxu0 }
 0x9d7   : > { %v11210_v4 = vpop.f32.mrb[27].mxu0  ;;  %11220 = vmatmul.mubr.msk.f32.vlgmr.msra.gmra.mrb[26].mxu1 %vm465_vm2, %v2644_v3  ;;  %11231 = vmatmul.mubr.msk.f32.vlgmr.msra.gmra.mrb[28].mxu0 %vm465_vm2, %v2564_v2  ;;  %v11199_v5 = vpop.f32.mrb[25].mxu1 }
 0x9d8   : > { %12241 = vmatpush3.bf16.msra.mxu1 %v13202_v54  ;;  %11241 = vmatprep.mubr.msk.f32.mxu1 %vm12762_vm0, %v12761_v0  ;;  %v3430_v2 = vpop.permute.xlu0 %3429 }
 0x9d9   : > { %12242 = vmatprep.subr.bf16.mxu1 %v12763_v15  ;;  %11252 = vmatprep.mubr.msk.f32.mxu0 %vm12762_vm0, %v12761_v0 }
 0x9da   : > { %12247 = vmatpush3.bf16.msra.mxu0 %v12246_v14 }
 0x9db   : > { %12248 = vmatprep.subr.bf16.mxu0 %v12763_v15 }
 0x9dc   : > { %12244 = vmatpush3.bf16.msra.mxu1 %v13068_v36 }
 0x9dd   : > { %12251 = vmatprep.subr.bf16.mxu1 %v12763_v15 }
 0x9de   : > { %12250 = vmatpush3.bf16.msra.mxu0 %v12249_v21 }
 0x9df   : > { %11242 = vmatmul.mubr.msk.f32.vlgmr.msra.gmra.mrb[28].mxu1 %vm465_vm2, %v10099_v6  ;;  %12257 = vmatprep.subr.bf16.mxu0 %v12763_v15 }
 0x9e0   : > { %12253 = vmatpush3.bf16.msra.mxu1 %v13202_v54  ;;  %11263 = vmatprep.mubr.msk.f32.mxu1 %vm12762_vm0, %v12761_v0 }
 0x9e1   : > { %12254 = vmatprep.subr.bf16.mxu1 %v12763_v15 }
 0x9e4   : > { %12256 = vmatpush3.bf16.msra.mxu1 %v13068_v36 }
 0x9e5   : > { %12263 = vmatprep.subr.bf16.mxu1 %v12763_v15 }
 0x9e7   : > { %11264 = vmatmul.mubr.msk.f32.vlgmr.msra.gmra.mrb[30].mxu1 %vm465_vm2, %v10106_v7  ;;  %v10133_v7 = vld [vmem:[%s14514_s9 + $0x4] sm:$0xf] }
 0x9e8   : > { %12265 = vmatpush3.bf16.msra.mxu1 %v13202_v54  ;;  %11285 = vmatprep.mubr.msk.f32.mxu1 %vm12762_vm0, %v12761_v0 }
 0x9e9   : > { %12266 = vmatprep.subr.bf16.mxu1 %v12763_v15 }
 0x9ec   : > { %12268 = vmatpush3.bf16.msra.mxu1 %v13068_v36 }
 0x9ed   : > { %12275 = vmatprep.subr.bf16.mxu1 %v12763_v15 }
 0x9ef   : > { %11286 = vmatmul.mubr.msk.f32.vlgmr.msra.gmra.mrb[32].mxu1 %vm465_vm2, %v10113_v8  ;;  %v10135_v8 = vld [vmem:[%s14515_s10 + $0x1] ss:$0 sm:$0xff] }
 0x9f0   : > { %12277 = vmatpush3.bf16.msra.mxu1 %v13202_v54  ;;  %11307 = vmatprep.mubr.msk.f32.mxu1 %vm12762_vm0, %v12761_v0 }
 0x9f1   : > { %12278 = vmatprep.subr.bf16.mxu1 %v12763_v15 }
 0x9f4   : > { %12280 = vmatpush3.bf16.msra.mxu1 %v13068_v36 }
 0x9f5   : > { %11321 = vmatprep.subr.mxu1 %v12761_v0 }
 0x9f7   : > { %11308 = vmatmul.mubr.msk.f32.vlgmr.msra.gmra.mrb[34].mxu1 %vm465_vm2, %v10120_v11  ;;  %v10180_v11 = vld [vmem:[%s14512_s7 + $0x8] sm:$0xf] }
 0x9f8   : > { %11323 = vmatprep.mubr.msk.f32.mxu1 %vm12762_vm0, %v12761_v0 }
 0xaaa   : > { %v2722_v22 = vpop.f32.mrb[26].mxu1  ;;  %v2795_v23 = vpop.f32.mrb[28].mxu0 }
 0xaab   : > { %v2796_v24 = vadd.f32 %v2795_v23, %v2722_v22  ;;  %v11221_v25 = vpop.f32.mrb[27].mxu1  ;;  %v11232_v26 = vpop.f32.mrb[29].mxu0 }
 0xab2   : > { %v2870_v37 = vpop.f32.mrb[28].mxu1 }
 0xab3   : > { %v11243_v38 = vpop.f32.mrb[29].mxu1  ;;  %11253 = vmatmul.mubr.msk.f32.vlgmr.msra.gmra.mrb[30].mxu0 %vm465_vm2, %v2870_v37 }
 0xab4   : > { %12259 = vmatpush3.bf16.msra.mxu0 %v12258_v31  ;;  %11274 = vmatprep.mubr.msk.f32.mxu0 %vm12762_vm0, %v12761_v0 }
 0xab5   : > { %12260 = vmatprep.subr.bf16.mxu0 %v12763_v15 }
 0xab8   : > { %12262 = vmatpush3.bf16.msra.mxu0 %v12261_v9 }
 0xab9   : > { %12269 = vmatprep.subr.bf16.mxu0 %v12763_v15 }
 0xaba   : > { %v3024_v20 = vpop.f32.mrb[30].mxu1 }
 0xabb   : > { %v11265_v30 = vpop.f32.mrb[31].mxu1  ;;  %11275 = vmatmul.mubr.msk.f32.vlgmr.msra.gmra.mrb[32].mxu0 %vm465_vm2, %v3024_v20 }
 0xabc   : > { %12271 = vmatpush3.bf16.msra.mxu0 %v12270_v40  ;;  %11296 = vmatprep.mubr.msk.f32.mxu0 %vm12762_vm0, %v12761_v0 }
 0xabd   : > { %12272 = vmatprep.subr.bf16.mxu0 %v12763_v15 }
 0xac0   : > { %12274 = vmatpush3.bf16.msra.mxu0 %v12273_v41 }
 0xac1   : > { %12281 = vmatprep.subr.bf16.mxu0 %v12763_v15 }
 0xac2   : > { %v3178_v48 = vpop.f32.mrb[32].mxu1 }
 0xac3   : > { %v11287_v49 = vpop.f32.mrb[33].mxu1  ;;  %11297 = vmatmul.mubr.msk.f32.vlgmr.msra.gmra.mrb[34].mxu0 %vm465_vm2, %v3178_v48 }
 0xac4   : > { %12283 = vmatpush3.bf16.msra.mxu0 %v12282_v44  ;;  %11318 = vmatprep.mubr.msk.f32.mxu0 %vm12762_vm0, %v12761_v0 }
 0xac5   : > { %12284 = vmatprep.subr.bf16.mxu0 %v12763_v15 }
 0xac8   : > { %12286 = vmatpush3.bf16.msra.mxu0 %v12285_v50 }
 0xac9   : > { %12287 = vmatprep.subr.bf16.mxu0 %v12763_v15 }
 0xaca   : > { %v3332_v51 = vpop.f32.mrb[34].mxu1 }
 0xacb   : > { %v11309_v52 = vpop.f32.mrb[35].mxu1  ;;  %11319 = vmatmul.mubr.msk.f32.vlgmr.msra.gmra.mrb[36].mxu0 %vm465_vm2, %v3332_v51  ;;  %v10144_v51 = vld [vmem:[%s14506_s1 + $0x1a0] sm:$0xff] }
 0xacc   : > { %11334 = vmatprep.mubr.msk.f32.mxu0 %vm12762_vm0, %v12761_v0  ;;  %v10145_v52 = vld [vmem:[%s14506_s1 + $0x1a8] sm:$0xff] }
 0xb86   : > { %v2948_v54 = vpop.f32.mrb[30].mxu0 }
 0xb87   : > { %v2952_v35 = vadd.f32 %v2948_v54, %v2796_v24  ;;  %v11254_v46 = vpop.f32.mrb[31].mxu0  ;;  %v10138_v54 = vld [vmem:[%s14506_s1 + $0x180] sm:$0xff] }
 0xb88   : > { %v10136_v46 = vld [vmem:[%s14509_s4 + $0x30] sm:$0xf] }
 0xb8e   : > { %v3102_v28 = vpop.f32.mrb[32].mxu0 }
 0xb8f   : > { %v3106_v53 = vadd.f32 %v3102_v28, %v2952_v35  ;;  %v11276_v56 = vpop.f32.mrb[33].mxu0  ;;  %v10139_v35 = vld [vmem:[%s14506_s1 + $0x188] sm:$0xff]  ;;  %v10142_v28 = vld [vmem:[%s14509_s4 + $0x34] sm:$0xf] }
 0xb90   : > { %v12306_v56 = vpack.c.bf16 %v10139_v35, %v10138_v54 }
 0xb96   : > { %v3256_v57 = vpop.f32.mrb[34].mxu0 }
 0xb97   : > { %v3260_v55 = vadd.f32 %v3256_v57, %v3106_v53  ;;  %v11298_v59 = vpop.f32.mrb[35].mxu0  ;;  %v12300_v53 = vpack.c.bf16 %v10145_v52, %v10144_v51  ;;  %v10146_v57 = vld [vmem:[%s14506_s1 + $0x1b0] sm:$0xff] }
 0xb98   : > { %v10140_v59 = vld [vmem:[%s14506_s1 + $0x190] sm:$0xff] }
 0xb9e   : > { %v3410_v60 = vpop.f32.mrb[36].mxu0 }
 0xb9f   : > { %v3414_v61 = vadd.f32 %v3410_v60, %v3260_v55  ;;  %v11320_v62 = vpop.f32.mrb[37].mxu0  ;;  %v10147_v55 = vld [vmem:[%s14506_s1 + $0x1b8] sm:$0xff] }
 0xba0   : > { %v10141_v60 = vld [vmem:[%s14506_s1 + $0x198] sm:$0xff] }
 0xba1   : > { %v3422_v1 = vadd.f32 %v3420_v63, %v3414_v61  ;;  %v12303_v61 = vpack.c.bf16 %v10147_v55, %v10146_v57  ;;  %v12309_v62 = vpack.c.bf16 %v10141_v60, %v10140_v59 }
 0xba3   : > { %11322 = vmatpush3.msk.msra.mxu1 %vm2351_vm4, %v3422_v1 }
 0xba4   : > { %11324 = vmatmul.mubr.msk.f32.vlgmr.msra.gmra.mrb[36].mxu1 %vm2347_vm5, %v10128_v58  ;;  %12293 = vmatprep.subr.bf16.mxu1 %v12763_v15 }
 0xba5   : > { %11345 = vmatprep.mubr.msk.f32.mxu1 %vm12762_vm0, %v12761_v0 }
 0xc77   : > { %v3504_v3 = vpop.f32.mrb[36].mxu1 }
 0xc78   : > { %v3505_v4 = vadd.f32 %v3504_v3, %v3430_v2  ;;  %v11325_v5 = vpop.f32.mrb[37].mxu1  ;;  %v10150_v3 = vld [vmem:[%s14509_s4 + $0x38] sm:$0xf] }
 0xc79   : > { %v10164_v5 = vld [vmem:[%s14509_s4 + $0x40] sm:$0xf] }
 0xc7a   : > { %v3508_v6 = vsel %vm1412_vm3, %v3505_v4, 0.0 }
 0xc7b   : > { %3509 = vadd.xlane.f32.xlu1 %v3508_v6  ;;  %v10171_v6 = vld [vmem:[%s14509_s4 + $0x44] sm:$0xf] }
 0xc8c   : > { %3555 = vperm.xlu1 %12738, %v10133_v7   ;;  %v10152_v7 = vld [vmem:[%s14506_s1 + $0x1c0] sm:$0xff] }
 0xc90   : > { %3569 = vperm.xlu1 %12738, %v10135_v8   ;;  %v10153_v8 = vld [vmem:[%s14506_s1 + $0x1c8] sm:$0xff] }
 0xc94   : > { %4515 = vperm.xlu1 %12738, %v10180_v11   ;;  %v10154_v11 = vld [vmem:[%s14506_s1 + $0x1d0] sm:$0xff] }
 0xd08   : > { %v3510_v12 = vpop.xlane.xlu1 %3509 }
 0xd09   : > { %v3511_v13 = vrot.slane %v3510_v12, 4 }
 0xd0b   : > { %v3512_v14 = vadd.f32 %v3511_v13, %v3510_v12  ;;  %v10155_v12 = vld [vmem:[%s14506_s1 + $0x1d8] sm:$0xff] }
 0xd0c   : > { %v3556_v20 = vpop.permute.xlu1 %3555  ;;  %v12321_v13 = vpack.c.bf16 %v10155_v12, %v10154_v11 }
 0xd0d   : > { %v3513_v18 = vrot.slane %v3512_v14, 2 }
 0xd0f   : > { %v3514_v19 = vadd.f32 %v3513_v18, %v3512_v14 }
 0xd10   : > { %v3570_v44 = vpop.permute.xlu1 %3569 }
 0xd11   : > { %v3515_v21 = vrot.slane %v3514_v19, 1 }
 0xd13   : > { %v3516_v22 = vadd.f32 %v3515_v21, %v3514_v19 }
 0xd15   : > { %12689 = vpush %v3516_v22 }
 0xd46   : > { %s12690_s16 = spop %12689 }
 0xd47   : > { %s3520_s17 = smul.f32 0.0078125, %s12690_s16 }
 0xd49   : > { %v3521_v23 = vstv %s3520_s17 }
 0xd4a   : > { %v3522_v24 = vsub.f32 %v3505_v4, %v3521_v23  ;;  %v10157_v4 = vld [vmem:[%s14509_s4 + $0x3c] sm:$0xf]  ;;  %v10159_v23 = vld [vmem:[%s14506_s1 + $0x1e0] sm:$0xff] }
 0xd4c   : > { %v3523_v25 = vmul.f32 %v3522_v24, %v3522_v24 }
 0xd4e   : > { %v3524_v26 = vsel %vm1412_vm3, %v3523_v25, 0.0 }
 0xd4f   : > { %3525 = vadd.xlane.f32.xlu0 %v3524_v26  ;;  %v10161_v26 = vld [vmem:[%s14506_s1 + $0x1f0] sm:$0xff] }
 0xd65   : > { %3547 = vperm.xlu0 %12737, %v10132_v27   ;;  %v10162_v27 = vld [vmem:[%s14506_s1 + $0x1f8] sm:$0xff] }
 0xd69   : > { %4505 = vperm.xlu0 %12737, %v10178_v29  }
 0xddc   : > { %v3526_v31 = vpop.xlane.xlu0 %3525 }
 0xddd   : > { %v3527_v33 = vrot.slane %v3526_v31, 4 }
 0xddf   : > { %v3528_v34 = vadd.f32 %v3527_v33, %v3526_v31  ;;  %v12333_v33 = vpack.c.bf16 %v10162_v27, %v10161_v26 }
 0xde1   : > { %v3529_v37 = vrot.slane %v3528_v34, 2 }
 0xde3   : > { %v3530_v38 = vadd.f32 %v3529_v37, %v3528_v34  ;;  %v10166_v34 = vld [vmem:[%s14506_s1 + $0x200] sm:$0xff]  ;;  %v10167_v37 = vld [vmem:[%s14506_s1 + $0x208] sm:$0xff] }
 0xde4   : > { %v3548_v30 = vpop.permute.xlu0 %3547 }
 0xde5   : > { %v3531_v9 = vrot.slane %v3530_v38, 1 }
 0xde7   : > { %v3532_v10 = vadd.f32 %v3531_v9, %v3530_v38  ;;  %v12342_v38 = vpack.c.bf16 %v10167_v37, %v10166_v34  ;;  %v10168_v9 = vld [vmem:[%s14506_s1 + $0x210] sm:$0xff] }
 0xde8   : > { %v4506_v59 = vpop.permute.xlu0 %4505 }
 0xde9   : > { %12691 = vpush %v3532_v10  ;;  %v10169_v10 = vld [vmem:[%s14506_s1 + $0x218] sm:$0xff] }
 0xe1a   : > { %s12692_s22 = spop %12691 }
 0xe1b   : > { %s3536_s23 = smul.f32 0.0078125, %s12692_s22 }
 0xe1d   : > { %s3537_s24 = sadd.f32 1e-08, %s3536_s23 }
 0xe1f   : > { %v3538_v39 = vstv %s3537_s24 }
 0xe20   : > { %12741 = vrsqrt.f32 %v3538_v39 }
 0xe2a   : > { %v12742_v40 = vpop.eup %12741 }
 0xe2b   : > { %12693 = vpush %v12742_v40 }
 0xe5c   : > { %s12694_s25 = spop %12693 }
 0xe5d   : > { %v3541_v16 = vstv %s12694_s25 }
 0xe5e   : > { %v3542_v17 = vmul.f32 %v3541_v16, %v3522_v24  ;;  %v10160_v24 = vld [vmem:[%s14506_s1 + $0x1e8] sm:$0xff]  ;;  %v12345_v16 = vpack.c.bf16 %v10169_v10, %v10168_v9 }
 0xe5f   : > { %v12330_v25 = vpack.c.bf16 %v10160_v24, %v10159_v23  ;;  %v10229_v23 = vld [vmem:[%s14510_s5 + $0xc] sm:$0xf] }
 0xe60   : > { %v3550_v41 = vmul.f32 %v3548_v30, %v3542_v17  ;;  %v10173_v17 = vld [vmem:[%s14506_s1 + $0x220] sm:$0xff] }
 0xe62   : > { %v3558_v42 = vadd.f32 %v3556_v20, %v3550_v41  ;;  %v10174_v20 = vld [vmem:[%s14506_s1 + $0x228] sm:$0xff]  ;;  %v10175_v41 = vld [vmem:[%s14506_s1 + $0x230] sm:$0xff] }
 0xe63   : > { %v12354_v30 = vpack.c.bf16 %v10174_v20, %v10173_v17 }
 0xe64   : > { %v3562_v43 = vmin.f32 %v3558_v42, 0.0  ;;  %v3561_v45 = vmax.f32 %v3558_v42, 0.0  ;;  %v10176_v42 = vld [vmem:[%s14506_s1 + $0x238] sm:$0xff] }
 0xe66   : > { %v3572_v47 = vmul.f32 %v3570_v44, %v3562_v43 }
 0xe68   : > { %v3573_v48 = vadd.f32 %v3572_v47, %v3561_v45  ;;  %v12357_v45 = vpack.c.bf16 %v10176_v42, %v10175_v41 }
 0xe6a   : > { %3574 = vst.msk [vmem:[#allocation2 + $0x8] sm:$0xf] %vm1412_vm3, %v3573_v48 }
 0xe71   : > { %v3576_v49 = vld [vmem:[#allocation2 + $0x8] sm:$0xff] }
 0xe72   : > { %v13393_v50 = vpack.c.bf16 %v3576_v49, %v13198_v32 }
 0xe74   : > { %12289 = vmatpush3.bf16.msra.mxu0 %v13393_v50  ;;  %12295 = vmatpush3.bf16.msra.mxu1 %v13393_v50 }
 0xe75   : > { %12290 = vmatprep.subr.bf16.mxu0 %v12763_v15  ;;  %12296 = vmatprep.subr.bf16.mxu1 %v12763_v15 }
 0xe78   : > { %12292 = vmatpush3.bf16.msra.mxu0 %v13068_v36  ;;  %12298 = vmatpush3.bf16.msra.mxu1 %v13068_v36 }
 0xe79   : > { %12299 = vmatprep.subr.bf16.mxu0 %v12763_v15  ;;  %12305 = vmatprep.subr.bf16.mxu1 %v12763_v15 }
 0xe7b   : > { %11335 = vmatmul.mubr.msk.f32.vlgmr.msra.gmra.mrb[38].mxu0 %vm465_vm2, %v10136_v46  ;;  %11346 = vmatmul.mubr.msk.f32.vlgmr.msra.gmra.mrb[38].mxu1 %vm465_vm2, %v10142_v28 }
 0xe7c   : > { %12301 = vmatpush3.bf16.msra.mxu0 %v12300_v53  ;;  %12307 = vmatpush3.bf16.msra.mxu1 %v12306_v56 }
 0xe7d   : > { %12302 = vmatprep.subr.bf16.mxu0 %v12763_v15  ;;  %12308 = vmatprep.subr.bf16.mxu1 %v12763_v15 }
 0xe7e   : > { %11356 = vmatprep.mubr.msk.f32.mxu0 %vm12762_vm0, %v12761_v0  ;;  %11367 = vmatprep.mubr.msk.f32.mxu1 %vm12762_vm0, %v12761_v0 }
 0xe80   : > { %12304 = vmatpush3.bf16.msra.mxu0 %v12303_v61  ;;  %12310 = vmatpush3.bf16.msra.mxu1 %v12309_v62  ;;  %v10179_v61 = vld [vmem:[%s14511_s6 + $0x8] sm:$0xf]  ;;  %v4516_v62 = vpop.permute.xlu1 %4515 }
 0xe81   : > { %12311 = vmatprep.subr.bf16.mxu0 %v12763_v15  ;;  %12317 = vmatprep.subr.bf16.mxu1 %v12763_v15 }
 0xf4e   : > { %v3650_v63 = vpop.f32.mrb[38].mxu0  ;;  %v3730_v1 = vpop.f32.mrb[38].mxu1 }
 0xf4f   : > { %v11347_v58 = vpop.f32.mrb[39].mxu1  ;;  %11357 = vmatmul.mubr.msk.f32.vlgmr.msra.gmra.mrb[40].mxu0 %vm465_vm2, %v3730_v1  ;;  %11368 = vmatmul.mubr.msk.f32.vlgmr.msra.gmra.mrb[40].mxu1 %vm465_vm2, %v3650_v63  ;;  %v11336_v2 = vpop.f32.mrb[39].mxu0 }
 0xf50   : > { %12313 = vmatpush3.bf16.msra.mxu0 %v13393_v50  ;;  %11378 = vmatprep.mubr.msk.f32.mxu0 %vm12762_vm0, %v12761_v0 }
 0xf51   : > { %12314 = vmatprep.subr.bf16.mxu0 %v12763_v15  ;;  %11389 = vmatprep.mubr.msk.f32.mxu1 %vm12762_vm0, %v12761_v0 }
 0xf54   : > { %12316 = vmatpush3.bf16.msra.mxu0 %v13068_v36 }
 0xf55   : > { %12323 = vmatprep.subr.bf16.mxu0 %v12763_v15 }
 0xf57   : > { %11379 = vmatmul.mubr.msk.f32.vlgmr.msra.gmra.mrb[42].mxu0 %vm465_vm2, %v10150_v3  ;;  %v10183_v3 = vld [vmem:[%s14513_s8 + $0x8] sm:$0xf] }
 0xf58   : > { %12325 = vmatpush3.bf16.msra.mxu0 %v13393_v50  ;;  %11400 = vmatprep.mubr.msk.f32.mxu0 %vm12762_vm0, %v12761_v0 }
 0xf59   : > { %12326 = vmatprep.subr.bf16.mxu0 %v12763_v15 }
 0xf5c   : > { %12328 = vmatpush3.bf16.msra.mxu0 %v13068_v36 }
 0xf5d   : > { %12335 = vmatprep.subr.bf16.mxu0 %v12763_v15 }
 0xf5f   : > { %11401 = vmatmul.mubr.msk.f32.vlgmr.msra.gmra.mrb[44].mxu0 %vm465_vm2, %v10157_v4  ;;  %v10186_v4 = vld [vmem:[%s14515_s10 + $0x2] ss:$0 sm:$0xff] }
 0xf60   : > { %12337 = vmatpush3.bf16.msra.mxu0 %v13393_v50  ;;  %11422 = vmatprep.mubr.msk.f32.mxu0 %vm12762_vm0, %v12761_v0 }
 0xf61   : > { %12338 = vmatprep.subr.bf16.mxu0 %v12763_v15 }
 0xf64   : > { %12340 = vmatpush3.bf16.msra.mxu0 %v13068_v36 }
 0xf65   : > { %12347 = vmatprep.subr.bf16.mxu0 %v12763_v15 }
 0xf67   : > { %11423 = vmatmul.mubr.msk.f32.vlgmr.msra.gmra.mrb[46].mxu0 %vm465_vm2, %v10164_v5  ;;  %v10231_v5 = vld [vmem:[%s14512_s7 + $0xc] sm:$0xf] }
 0xf68   : > { %12349 = vmatpush3.bf16.msra.mxu0 %v13393_v50  ;;  %11444 = vmatprep.mubr.msk.f32.mxu0 %vm12762_vm0, %v12761_v0 }
 0xf69   : > { %12350 = vmatprep.subr.bf16.mxu0 %v12763_v15 }
 0xf6c   : > { %12352 = vmatpush3.bf16.msra.mxu0 %v13068_v36  ;;  %v12318_v36 = vpack.c.bf16 %v10153_v8, %v10152_v7 }
 0xf6d   : > { %11458 = vmatprep.subr.mxu0 %v12761_v0 }
 0xf6e   : > { %12319 = vmatpush3.bf16.msra.mxu1 %v12318_v36 }
 0xf6f   : > { %11445 = vmatmul.mubr.msk.f32.vlgmr.msra.gmra.mrb[48].mxu0 %vm465_vm2, %v10171_v6  ;;  %12320 = vmatprep.subr.bf16.mxu1 %v12763_v15 }
 0xf70   : > { %11460 = vmatprep.mubr.msk.f32.mxu0 %vm12762_vm0, %v12761_v0 }
 0xf72   : > { %12322 = vmatpush3.bf16.msra.mxu1 %v12321_v13 }
 0xf73   : > { %12329 = vmatprep.subr.bf16.mxu1 %v12763_v15 }
0x1022   : > { %v3808_v14 = vpop.f32.mrb[40].mxu0  ;;  %v3881_v18 = vpop.f32.mrb[40].mxu1 }
0x1023   : > { %v3882_v19 = vadd.f32 %v3881_v18, %v3808_v14  ;;  %v11358_v21 = vpop.f32.mrb[41].mxu0  ;;  %v11369_v22 = vpop.f32.mrb[41].mxu1 }
0x1024   : > { %v10184_v22 = vld [vmem:[%s14514_s9 + $0x8] sm:$0xf] }
0x102a   : > { %v3956_v29 = vpop.f32.mrb[42].mxu0 }
0x102b   : > { %v11380_v31 = vpop.f32.mrb[43].mxu0  ;;  %11390 = vmatmul.mubr.msk.f32.vlgmr.msra.gmra.mrb[42].mxu1 %vm465_vm2, %v3956_v29 }
0x102c   : > { %12331 = vmatpush3.bf16.msra.mxu1 %v12330_v25  ;;  %11411 = vmatprep.mubr.msk.f32.mxu1 %vm12762_vm0, %v12761_v0 }
0x102d   : > { %12332 = vmatprep.subr.bf16.mxu1 %v12763_v15 }
0x1030   : > { %12334 = vmatpush3.bf16.msra.mxu1 %v12333_v33 }
0x1031   : > { %12341 = vmatprep.subr.bf16.mxu1 %v12763_v15 }
0x1032   : > { %v4110_v39 = vpop.f32.mrb[44].mxu0 }
0x1033   : > { %v11402_v40 = vpop.f32.mrb[45].mxu0  ;;  %11412 = vmatmul.mubr.msk.f32.vlgmr.msra.gmra.mrb[44].mxu1 %vm465_vm2, %v4110_v39 }
0x1034   : > { %12343 = vmatpush3.bf16.msra.mxu1 %v12342_v38  ;;  %11433 = vmatprep.mubr.msk.f32.mxu1 %vm12762_vm0, %v12761_v0 }
0x1035   : > { %12344 = vmatprep.subr.bf16.mxu1 %v12763_v15 }
0x1038   : > { %12346 = vmatpush3.bf16.msra.mxu1 %v12345_v16 }
0x1039   : > { %12353 = vmatprep.subr.bf16.mxu1 %v12763_v15 }
0x103a   : > { %v4264_v43 = vpop.f32.mrb[46].mxu0 }
0x103b   : > { %v11424_v44 = vpop.f32.mrb[47].mxu0  ;;  %11434 = vmatmul.mubr.msk.f32.vlgmr.msra.gmra.mrb[46].mxu1 %vm465_vm2, %v4264_v43 }
0x103c   : > { %12355 = vmatpush3.bf16.msra.mxu1 %v12354_v30  ;;  %11455 = vmatprep.mubr.msk.f32.mxu1 %vm12762_vm0, %v12761_v0  ;;  %v4663_v44 = vld [vmem:[#allocation2 + $0x10] sm:$0xff] }
0x103d   : > { %12356 = vmatprep.subr.bf16.mxu1 %v12763_v15 }
0x1040   : > { %12358 = vmatpush3.bf16.msra.mxu1 %v12357_v45  ;;  %v13585_v45 = vld [vmem:[#allocation2 + $0x18] sm:$0xff] }
0x1041   : > { %12359 = vmatprep.subr.bf16.mxu1 %v12763_v15 }
0x1042   : > { %v4418_v47 = vpop.f32.mrb[48].mxu0 }
0x1043   : > { %v11446_v48 = vpop.f32.mrb[49].mxu0  ;;  %11456 = vmatmul.mubr.msk.f32.vlgmr.msra.gmra.mrb[48].mxu1 %vm465_vm2, %v4418_v47 }
0x1044   : > { %11471 = vmatprep.mubr.msk.f32.mxu1 %vm12762_vm0, %v12761_v0  ;;  %v13594_v48 = vpack.c.bf16 %v13585_v45, %v4663_v44  ;;  %v13753_v44 = vld [vmem:[#allocation2] sm:$0xff] }
0x10fe   : > { %v4034_v49 = vpop.f32.mrb[42].mxu1 }
0x10ff   : > { %v4038_v50 = vadd.f32 %v4034_v49, %v3882_v19  ;;  %v11391_v51 = vpop.f32.mrb[43].mxu1  ;;  %v10195_v49 = vld [vmem:[%s14506_s1 + $0x260] sm:$0xff] }
0x1100   : > { %v10190_v51 = vld [vmem:[%s14506_s1 + $0x248] sm:$0xff] }
0x1106   : > { %v4188_v52 = vpop.f32.mrb[44].mxu1 }
0x1107   : > { %v4192_v54 = vadd.f32 %v4188_v52, %v4038_v50  ;;  %v11413_v35 = vpop.f32.mrb[45].mxu1  ;;  %v10189_v50 = vld [vmem:[%s14506_s1 + $0x240] sm:$0xff]  ;;  %v10187_v52 = vld [vmem:[%s14509_s4 + $0x48] sm:$0xf] }
0x110e   : > { %v4342_v46 = vpop.f32.mrb[46].mxu1 }
0x110f   : > { %v4346_v28 = vadd.f32 %v4342_v46, %v4192_v54  ;;  %v11435_v53 = vpop.f32.mrb[47].mxu1  ;;  %v10193_v54 = vld [vmem:[%s14509_s4 + $0x4c] sm:$0xf]  ;;  %v12378_v46 = vpack.c.bf16 %v10190_v51, %v10189_v50 }
0x1110   : > { %v10198_v53 = vld [vmem:[%s14506_s1 + $0x278] sm:$0xff] }
0x1116   : > { %v4496_v56 = vpop.f32.mrb[48].mxu1 }
0x1117   : > { %v4500_v57 = vadd.f32 %v4496_v56, %v4346_v28  ;;  %v11457_v55 = vpop.f32.mrb[49].mxu1  ;;  %v10197_v28 = vld [vmem:[%s14506_s1 + $0x270] sm:$0xff] }
0x1118   : > { %v10191_v56 = vld [vmem:[%s14506_s1 + $0x250] sm:$0xff]  ;;  %v12375_v55 = vpack.c.bf16 %v10198_v53, %v10197_v28 }
0x1119   : > { %v4508_v60 = vadd.f32 %v4506_v59, %v4500_v57  ;;  %v10192_v57 = vld [vmem:[%s14506_s1 + $0x258] sm:$0xff] }
0x111a   : > { %v12381_v59 = vpack.c.bf16 %v10192_v57, %v10191_v56 }
0x111b   : > { %11459 = vmatpush3.msk.msra.mxu0 %vm2351_vm4, %v4508_v60 }
0x111c   : > { %11461 = vmatmul.mubr.msk.f32.vlgmr.msra.gmra.mrb[50].mxu0 %vm2347_vm5, %v10179_v61  ;;  %12365 = vmatprep.subr.bf16.mxu0 %v12763_v15 }
0x111d   : > { %11482 = vmatprep.mubr.msk.f32.mxu0 %vm12762_vm0, %v12761_v0 }
0x11ef   : > { %v4590_v63 = vpop.f32.mrb[50].mxu0 }
0x11f0   : > { %v4591_v1 = vadd.f32 %v4590_v63, %v4516_v62  ;;  %v11462_v58 = vpop.f32.mrb[51].mxu0 }
0x11f1   : > { %v10208_v58 = vld [vmem:[%s14509_s4 + $0x54] sm:$0xf] }
0x11f2   : > { %v4594_v2 = vsel %vm1412_vm3, %v4591_v1, 0.0 }
0x11f3   : > { %4595 = vadd.xlane.f32.xlu0 %v4594_v2  ;;  %v10215_v2 = vld [vmem:[%s14509_s4 + $0x58] sm:$0xf] }
0x1209   : > { %4633 = vperm.xlu0 %12737, %v10183_v3   ;;  %v10222_v3 = vld [vmem:[%s14509_s4 + $0x5c] sm:$0xf] }
0x120d   : > { %4655 = vperm.xlu0 %12737, %v10186_v4   ;;  %v10203_v4 = vld [vmem:[%s14506_s1 + $0x280] sm:$0xff] }
0x1211   : > { %5601 = vperm.xlu0 %12737, %v10231_v5   ;;  %v10204_v5 = vld [vmem:[%s14506_s1 + $0x288] sm:$0xff] }
0x1280   : > { %v4596_v6 = vpop.xlane.xlu0 %4595 }
0x1281   : > { %v4597_v7 = vrot.slane %v4596_v6, 4 }
0x1283   : > { %v4598_v8 = vadd.f32 %v4597_v7, %v4596_v6  ;;  %v12390_v6 = vpack.c.bf16 %v10204_v5, %v10203_v4  ;;  %v10205_v7 = vld [vmem:[%s14506_s1 + $0x290] sm:$0xff] }
0x1284   : > { %v10282_v4 = vld [vmem:[%s14512_s7 + $0x10] sm:$0xf] }
0x1285   : > { %v4599_v36 = vrot.slane %v4598_v8, 2 }
0x1287   : > { %v4600_v11 = vadd.f32 %v4599_v36, %v4598_v8  ;;  %v10206_v8 = vld [vmem:[%s14506_s1 + $0x298] sm:$0xff] }
0x1288   : > { %v4634_v10 = vpop.permute.xlu0 %4633  ;;  %v12393_v36 = vpack.c.bf16 %v10206_v8, %v10205_v7 }
0x1289   : > { %v4601_v12 = vrot.slane %v4600_v11, 1 }
0x128b   : > { %v4602_v13 = vadd.f32 %v4601_v12, %v4600_v11 }
0x128c   : > { %v4656_v20 = vpop.permute.xlu0 %4655 }
0x128d   : > { %12695 = vpush %v4602_v13 }
0x12be   : > { %s12696_s16 = spop %12695 }
0x12bf   : > { %s4606_s17 = smul.f32 0.0078125, %s12696_s16 }
0x12c1   : > { %v4607_v14 = vstv %s4606_s17 }
0x12c2   : > { %v4608_v18 = vsub.f32 %v4591_v1, %v4607_v14  ;;  %v10201_v1 = vld [vmem:[%s14509_s4 + $0x50] sm:$0xf] }
0x12c4   : > { %v4609_v19 = vmul.f32 %v4608_v18, %v4608_v18 }
0x12c6   : > { %v4610_v21 = vsel %vm1412_vm3, %v4609_v19, 0.0  ;;  %v10210_v19 = vld [vmem:[%s14506_s1 + $0x2a0] sm:$0xff] }
0x12c7   : > { %4611 = vadd.xlane.f32.xlu1 %v4610_v21  ;;  %v10211_v21 = vld [vmem:[%s14506_s1 + $0x2a8] sm:$0xff] }
0x12d8   : > { %4641 = vperm.xlu1 %12738, %v10184_v22   ;;  %v12402_v22 = vpack.c.bf16 %v10211_v21, %v10210_v19  ;;  %v10234_v21 = vld [vmem:[%s14513_s8 + $0xc] sm:$0xf] }
0x12dc   : > { %5591 = vperm.xlu1 %12738, %v10229_v23   ;;  %v10212_v23 = vld [vmem:[%s14506_s1 + $0x2b0] sm:$0xff] }
0x1354   : > { %v4612_v24 = vpop.xlane.xlu1 %4611 }
0x1355   : > { %v4613_v25 = vrot.slane %v4612_v24, 4 }
0x1357   : > { %v4614_v26 = vadd.f32 %v4613_v25, %v4612_v24  ;;  %v10213_v24 = vld [vmem:[%s14506_s1 + $0x2b8] sm:$0xff] }
0x1358   : > { %v4642_v40 = vpop.permute.xlu1 %4641 }
0x1359   : > { %v4615_v27 = vrot.slane %v4614_v26, 2 }
0x135b   : > { %v4616_v29 = vadd.f32 %v4615_v27, %v4614_v26  ;;  %v12405_v27 = vpack.c.bf16 %v10213_v24, %v10212_v23 }
0x135d   : > { %v4617_v31 = vrot.slane %v4616_v29, 1 }
0x135f   : > { %v4618_v33 = vadd.f32 %v4617_v31, %v4616_v29  ;;  %v10217_v29 = vld [vmem:[%s14506_s1 + $0x2c0] sm:$0xff]  ;;  %v10218_v31 = vld [vmem:[%s14506_s1 + $0x2c8] sm:$0xff] }
0x1361   : > { %12697 = vpush %v4618_v33  ;;  %v12414_v33 = vpack.c.bf16 %v10218_v31, %v10217_v29 }
0x1392   : > { %s12698_s22 = spop %12697 }
0x1393   : > { %s4622_s23 = smul.f32 0.0078125, %s12698_s22 }
0x1395   : > { %s4623_s24 = sadd.f32 1e-08, %s4622_s23 }
0x1397   : > { %v4624_v34 = vstv %s4623_s24 }
0x1398   : > { %12743 = vrsqrt.f32 %v4624_v34  ;;  %v10219_v34 = vld [vmem:[%s14506_s1 + $0x2d0] sm:$0xff] }
0x13a2   : > { %v12744_v37 = vpop.eup %12743 }
0x13a3   : > { %12699 = vpush %v12744_v37  ;;  %v10220_v37 = vld [vmem:[%s14506_s1 + $0x2d8] sm:$0xff] }
0x13d4   : > { %s12700_s25 = spop %12699 }
0x13d5   : > { %v4627_v38 = vstv %s12700_s25 }
0x13d6   : > { %v4628_v9 = vmul.f32 %v4627_v38, %v4608_v18 }
0x13d8   : > { %v4636_v39 = vmul.f32 %v4634_v10, %v4628_v9  ;;  %v12417_v10 = vpack.c.bf16 %v10220_v37, %v10219_v34 }
0x13da   : > { %v4644_v16 = vadd.f32 %v4642_v40, %v4636_v39  ;;  %v10224_v39 = vld [vmem:[%s14506_s1 + $0x2e0] sm:$0xff]  ;;  %v10225_v40 = vld [vmem:[%s14506_s1 + $0x2e8] sm:$0xff] }
0x13dc   : > { %v4648_v17 = vmin.f32 %v4644_v16, 0.0  ;;  %v4647_v30 = vmax.f32 %v4644_v16, 0.0  ;;  %v12426_v16 = vpack.c.bf16 %v10225_v40, %v10224_v39 }
0x13de   : > { %v4658_v41 = vmul.f32 %v4656_v20, %v4648_v17  ;;  %v10226_v17 = vld [vmem:[%s14506_s1 + $0x2f0] sm:$0xff]  ;;  %v10227_v20 = vld [vmem:[%s14506_s1 + $0x2f8] sm:$0xff] }
0x13e0   : > { %v4659_v42 = vadd.f32 %v4658_v41, %v4647_v30 }
0x13e2   : > { %4660 = vst.msk [vmem:[#allocation2 + $0xc] sm:$0xf] %vm1412_vm3, %v4659_v42  ;;  %v12429_v42 = vpack.c.bf16 %v10227_v20, %v10226_v17 }
0x13e9   : > { %v13583_v43 = vld [vmem:[#allocation2 + $0x8] sm:$0xff] }
0x13ea   : > { %v13589_v47 = vpack.c.bf16 %v13583_v43, %v13198_v32  ;;  %v10196_v32 = vld [vmem:[%s14506_s1 + $0x268] sm:$0xff] }
0x13eb   : > { %v12372_v35 = vpack.c.bf16 %v10196_v32, %v10195_v49 }
0x13ec   : > { %12361 = vmatpush3.bf16.msra.mxu1 %v13589_v47  ;;  %12367 = vmatpush3.bf16.msra.mxu0 %v13589_v47 }
0x13ed   : > { %12362 = vmatprep.subr.bf16.mxu1 %v12763_v15  ;;  %12368 = vmatprep.subr.bf16.mxu0 %v12763_v15 }
0x13f0   : > { %12364 = vmatpush3.bf16.msra.mxu1 %v13594_v48  ;;  %12370 = vmatpush3.bf16.msra.mxu0 %v13594_v48 }
0x13f1   : > { %12371 = vmatprep.subr.bf16.mxu1 %v12763_v15  ;;  %12377 = vmatprep.subr.bf16.mxu0 %v12763_v15 }
0x13f3   : > { %11472 = vmatmul.mubr.msk.f32.vlgmr.msra.gmra.mrb[50].mxu1 %vm465_vm2, %v10187_v52  ;;  %11483 = vmatmul.mubr.msk.f32.vlgmr.msra.gmra.mrb[52].mxu0 %vm465_vm2, %v10193_v54 }
0x13f4   : > { %12373 = vmatpush3.bf16.msra.mxu1 %v12372_v35  ;;  %12379 = vmatpush3.bf16.msra.mxu0 %v12378_v46 }
0x13f5   : > { %12374 = vmatprep.subr.bf16.mxu1 %v12763_v15  ;;  %12380 = vmatprep.subr.bf16.mxu0 %v12763_v15 }
0x13f6   : > { %11493 = vmatprep.mubr.msk.f32.mxu1 %vm12762_vm0, %v12761_v0  ;;  %11504 = vmatprep.mubr.msk.f32.mxu0 %vm12762_vm0, %v12761_v0 }
0x13f8   : > { %12376 = vmatpush3.bf16.msra.mxu1 %v12375_v55  ;;  %12382 = vmatpush3.bf16.msra.mxu0 %v12381_v59  ;;  %v5592_v55 = vpop.permute.xlu1 %5591 }
0x13f9   : > { %12383 = vmatprep.subr.bf16.mxu1 %v12763_v15  ;;  %12389 = vmatprep.subr.bf16.mxu0 %v12763_v15 }
0x14c6   : > { %v4736_v60 = vpop.f32.mrb[50].mxu1  ;;  %v4816_v61 = vpop.f32.mrb[52].mxu0 }
0x14c7   : > { %v11484_v62 = vpop.f32.mrb[53].mxu0  ;;  %11494 = vmatmul.mubr.msk.f32.vlgmr.msra.gmra.mrb[52].mxu1 %vm465_vm2, %v4816_v61  ;;  %11505 = vmatmul.mubr.msk.f32.vlgmr.msra.gmra.mrb[54].mxu0 %vm465_vm2, %v4736_v60  ;;  %v11473_v63 = vpop.f32.mrb[51].mxu1  ;;  %v10230_v60 = vld [vmem:[%s14511_s6 + $0xc] sm:$0xf] }
0x14c8   : > { %12385 = vmatpush3.bf16.msra.mxu1 %v13589_v47  ;;  %11515 = vmatprep.mubr.msk.f32.mxu1 %vm12762_vm0, %v12761_v0  ;;  %v5602_v61 = vpop.permute.xlu0 %5601 }
0x14c9   : > { %12386 = vmatprep.subr.bf16.mxu1 %v12763_v15  ;;  %11526 = vmatprep.mubr.msk.f32.mxu0 %vm12762_vm0, %v12761_v0 }
0x14ca   : > { %12391 = vmatpush3.bf16.msra.mxu0 %v12390_v6 }
0x14cb   : > { %12392 = vmatprep.subr.bf16.mxu0 %v12763_v15 }
0x14cc   : > { %12388 = vmatpush3.bf16.msra.mxu1 %v13594_v48 }
0x14cd   : > { %12395 = vmatprep.subr.bf16.mxu1 %v12763_v15 }
0x14ce   : > { %12394 = vmatpush3.bf16.msra.mxu0 %v12393_v36 }
0x14cf   : > { %11516 = vmatmul.mubr.msk.f32.vlgmr.msra.gmra.mrb[54].mxu1 %vm465_vm2, %v10201_v1  ;;  %12401 = vmatprep.subr.bf16.mxu0 %v12763_v15 }
0x14d0   : > { %12397 = vmatpush3.bf16.msra.mxu1 %v13589_v47  ;;  %11537 = vmatprep.mubr.msk.f32.mxu1 %vm12762_vm0, %v12761_v0 }
0x14d1   : > { %12398 = vmatprep.subr.bf16.mxu1 %v12763_v15 }
0x14d4   : > { %12400 = vmatpush3.bf16.msra.mxu1 %v13594_v48 }
0x14d5   : > { %12407 = vmatprep.subr.bf16.mxu1 %v12763_v15 }
0x14d7   : > { %11538 = vmatmul.mubr.msk.f32.vlgmr.msra.gmra.mrb[56].mxu1 %vm465_vm2, %v10208_v58 }
0x14d8   : > { %12409 = vmatpush3.bf16.msra.mxu1 %v13589_v47  ;;  %11559 = vmatprep.mubr.msk.f32.mxu1 %vm12762_vm0, %v12761_v0 }
0x14d9   : > { %12410 = vmatprep.subr.bf16.mxu1 %v12763_v15 }
0x14dc   : > { %12412 = vmatpush3.bf16.msra.mxu1 %v13594_v48 }
0x14dd   : > { %12419 = vmatprep.subr.bf16.mxu1 %v12763_v15 }
0x14df   : > { %11560 = vmatmul.mubr.msk.f32.vlgmr.msra.gmra.mrb[58].mxu1 %vm465_vm2, %v10215_v2  ;;  %v10235_v2 = vld [vmem:[%s14514_s9 + $0xc] sm:$0xf] }
0x14e0   : > { %12421 = vmatpush3.bf16.msra.mxu1 %v13589_v47  ;;  %11581 = vmatprep.mubr.msk.f32.mxu1 %vm12762_vm0, %v12761_v0 }
0x14e1   : > { %12422 = vmatprep.subr.bf16.mxu1 %v12763_v15 }
0x14e4   : > { %12424 = vmatpush3.bf16.msra.mxu1 %v13594_v48  ;;  %v13757_v48 = vpack.c.bf16 %v13583_v43, %v13753_v44 }
0x14e5   : > { %11595 = vmatprep.subr.mxu1 %v12761_v0 }
0x14e7   : > { %11582 = vmatmul.mubr.msk.f32.vlgmr.msra.gmra.mrb[60].mxu1 %vm465_vm2, %v10222_v3  ;;  %v10237_v3 = vld [vmem:[%s14515_s10 + $0x3] ss:$0 sm:$0xff] }
0x14e8   : > { %11597 = vmatprep.mubr.msk.f32.mxu1 %vm12762_vm0, %v12761_v0 }
0x159a   : > { %v4894_v11 = vpop.f32.mrb[52].mxu1  ;;  %v4967_v12 = vpop.f32.mrb[54].mxu0 }
0x159b   : > { %v4968_v13 = vadd.f32 %v4967_v12, %v4894_v11  ;;  %v11495_v14 = vpop.f32.mrb[53].mxu1  ;;  %v11506_v18 = vpop.f32.mrb[55].mxu0 }
0x15a2   : > { %v5042_v25 = vpop.f32.mrb[54].mxu1 }
0x15a3   : > { %v11517_v26 = vpop.f32.mrb[55].mxu1  ;;  %11527 = vmatmul.mubr.msk.f32.vlgmr.msra.gmra.mrb[56].mxu0 %vm465_vm2, %v5042_v25 }
0x15a4   : > { %12403 = vmatpush3.bf16.msra.mxu0 %v12402_v22  ;;  %11548 = vmatprep.mubr.msk.f32.mxu0 %vm12762_vm0, %v12761_v0  ;;  %v10280_v22 = vld [vmem:[%s14510_s5 + $0x10] sm:$0xf] }
0x15a5   : > { %12404 = vmatprep.subr.bf16.mxu0 %v12763_v15 }
0x15a8   : > { %12406 = vmatpush3.bf16.msra.mxu0 %v12405_v27 }
0x15a9   : > { %12413 = vmatprep.subr.bf16.mxu0 %v12763_v15 }
0x15aa   : > { %v5196_v38 = vpop.f32.mrb[56].mxu1 }
0x15ab   : > { %v11539_v9 = vpop.f32.mrb[57].mxu1  ;;  %11549 = vmatmul.mubr.msk.f32.vlgmr.msra.gmra.mrb[58].mxu0 %vm465_vm2, %v5196_v38 }
0x15ac   : > { %12415 = vmatpush3.bf16.msra.mxu0 %v12414_v33  ;;  %11570 = vmatprep.mubr.msk.f32.mxu0 %vm12762_vm0, %v12761_v0 }
0x15ad   : > { %12416 = vmatprep.subr.bf16.mxu0 %v12763_v15 }
0x15b0   : > { %12418 = vmatpush3.bf16.msra.mxu0 %v12417_v10 }
0x15b1   : > { %12425 = vmatprep.subr.bf16.mxu0 %v12763_v15 }
0x15b2   : > { %v5350_v30 = vpop.f32.mrb[58].mxu1 }
0x15b3   : > { %v11561_v41 = vpop.f32.mrb[59].mxu1  ;;  %11571 = vmatmul.mubr.msk.f32.vlgmr.msra.gmra.mrb[60].mxu0 %vm465_vm2, %v5350_v30 }
0x15b4   : > { %12427 = vmatpush3.bf16.msra.mxu0 %v12426_v16  ;;  %11592 = vmatprep.mubr.msk.f32.mxu0 %vm12762_vm0, %v12761_v0 }
0x15b5   : > { %12428 = vmatprep.subr.bf16.mxu0 %v12763_v15 }
0x15b8   : > { %12430 = vmatpush3.bf16.msra.mxu0 %v12429_v42  ;;  %v10246_v42 = vld [vmem:[%s14506_s1 + $0x320] sm:$0xff] }
0x15b9   : > { %12431 = vmatprep.subr.bf16.mxu0 %v12763_v15 }
0x15ba   : > { %v5504_v47 = vpop.f32.mrb[60].mxu1 }
0x15bb   : > { %v11583_v49 = vpop.f32.mrb[61].mxu1  ;;  %11593 = vmatmul.mubr.msk.f32.vlgmr.msra.gmra.mrb[62].mxu0 %vm465_vm2, %v5504_v47  ;;  %v10247_v47 = vld [vmem:[%s14506_s1 + $0x328] sm:$0xff] }
0x15bc   : > { %12433 = vmatpush3.bf16.msra.mxu0 %v13757_v48  ;;  %11608 = vmatprep.mubr.msk.f32.mxu0 %vm12762_vm0, %v12761_v0 }
0x15bd   : > { %12434 = vmatprep.subr.bf16.mxu0 %v12763_v15 }
0x1676   : > { %v5120_v32 = vpop.f32.mrb[56].mxu0 }
0x1677   : > { %v5124_v50 = vadd.f32 %v5120_v32, %v4968_v13  ;;  %v11528_v51 = vpop.f32.mrb[57].mxu0  ;;  %v10240_v32 = vld [vmem:[%s14506_s1 + $0x300] sm:$0xff] }
0x167e   : > { %v5274_v52 = vpop.f32.mrb[58].mxu0 }
0x167f   : > { %v5278_v54 = vadd.f32 %v5274_v52, %v5124_v50  ;;  %v11550_v35 = vpop.f32.mrb[59].mxu0  ;;  %v10241_v50 = vld [vmem:[%s14506_s1 + $0x308] sm:$0xff]  ;;  %v10238_v52 = vld [vmem:[%s14509_s4 + $0x60] sm:$0xf] }
0x1680   : > { %v12444_v35 = vpack.c.bf16 %v10247_v47, %v10246_v42 }
0x1686   : > { %v5428_v46 = vpop.f32.mrb[60].mxu0 }
0x1687   : > { %v5432_v28 = vadd.f32 %v5428_v46, %v5278_v54  ;;  %v11572_v43 = vpop.f32.mrb[61].mxu0  ;;  %v10244_v54 = vld [vmem:[%s14509_s4 + $0x64] sm:$0xf]  ;;  %v12450_v46 = vpack.c.bf16 %v10241_v50, %v10240_v32 }
0x1688   : > { %v10249_v43 = vld [vmem:[%s14506_s1 + $0x338] sm:$0xff] }
0x168e   : > { %v5582_v53 = vpop.f32.mrb[62].mxu0 }
0x168f   : > { %v5586_v56 = vadd.f32 %v5582_v53, %v5432_v28  ;;  %v11594_v57 = vpop.f32.mrb[63].mxu0  ;;  %v10248_v28 = vld [vmem:[%s14506_s1 + $0x330] sm:$0xff] }
0x1690   : > { %v10242_v53 = vld [vmem:[%s14506_s1 + $0x310] sm:$0xff]  ;;  %v12447_v57 = vpack.c.bf16 %v10249_v43, %v10248_v28 }
0x1691   : > { %v5594_v59 = vadd.f32 %v5592_v55, %v5586_v56  ;;  %v10243_v56 = vld [vmem:[%s14506_s1 + $0x318] sm:$0xff] }
0x1692   : > { %v12453_v55 = vpack.c.bf16 %v10243_v56, %v10242_v53 }
0x1693   : > { %11596 = vmatpush3.msk.msra.mxu1 %vm2351_vm4, %v5594_v59 }
0x1694   : > { %11598 = vmatmul.mubr.msk.f32.vlgmr.msra.gmra.mrb[62].mxu1 %vm2347_vm5, %v10230_v60  ;;  %12437 = vmatprep.subr.bf16.mxu1 %v12763_v15 }
0x1695   : > { %12439 = vmatpush3.bf16.msra.mxu1 %v13757_v48  ;;  %11619 = vmatprep.mubr.msk.f32.mxu1 %vm12762_vm0, %v12761_v0 }
0x1696   : > { %12440 = vmatprep.subr.bf16.mxu1 %v12763_v15 }
0x1767   : > { %v5676_v62 = vpop.f32.mrb[62].mxu1 }
0x1768   : > { %v5677_v63 = vadd.f32 %v5676_v62, %v5602_v61  ;;  %v11599_v1 = vpop.f32.mrb[63].mxu1 }
0x1769   : > { %v10259_v1 = vld [vmem:[%s14509_s4 + $0x6c] sm:$0xf] }
0x176a   : > { %v5680_v58 = vsel %vm1412_vm3, %v5677_v63, 0.0 }
0x176b   : > { %5681 = vadd.xlane.f32.xlu1 %v5680_v58  ;;  %v10266_v58 = vld [vmem:[%s14509_s4 + $0x70] sm:$0xf] }
0x177c   : > { %5727 = vperm.xlu1 %12738, %v10235_v2   ;;  %v10273_v2 = vld [vmem:[%s14509_s4 + $0x74] sm:$0xf] }
0x1780   : > { %5741 = vperm.xlu1 %12738, %v10237_v3   ;;  %v10254_v3 = vld [vmem:[%s14506_s1 + $0x340] sm:$0xff] }
0x1784   : > { %6687 = vperm.xlu1 %12738, %v10282_v4   ;;  %v10255_v4 = vld [vmem:[%s14506_s1 + $0x348] sm:$0xff] }
0x17f8   : > { %v5682_v5 = vpop.xlane.xlu1 %5681 }
0x17f9   : > { %v5683_v6 = vrot.slane %v5682_v5, 4 }
0x17fb   : > { %v5684_v7 = vadd.f32 %v5683_v6, %v5682_v5  ;;  %v12462_v5 = vpack.c.bf16 %v10255_v4, %v10254_v3  ;;  %v10256_v6 = vld [vmem:[%s14506_s1 + $0x350] sm:$0xff] }
0x17fc   : > { %v5728_v9 = vpop.permute.xlu1 %5727  ;;  %v10333_v3 = vld [vmem:[%s14512_s7 + $0x14] sm:$0xf] }
0x17fd   : > { %v5685_v8 = vrot.slane %v5684_v7, 2 }
0x17ff   : > { %v5686_v36 = vadd.f32 %v5685_v8, %v5684_v7  ;;  %v10257_v7 = vld [vmem:[%s14506_s1 + $0x358] sm:$0xff] }
0x1800   : > { %v5742_v17 = vpop.permute.xlu1 %5741  ;;  %v12465_v8 = vpack.c.bf16 %v10257_v7, %v10256_v6 }
0x1801   : > { %v5687_v11 = vrot.slane %v5686_v36, 1 }
0x1803   : > { %v5688_v12 = vadd.f32 %v5687_v11, %v5686_v36 }
0x1805   : > { %12701 = vpush %v5688_v12 }
0x1836   : > { %s12702_s16 = spop %12701 }
0x1837   : > { %s5692_s17 = smul.f32 0.0078125, %s12702_s16 }
0x1839   : > { %v5693_v13 = vstv %s5692_s17 }
0x183a   : > { %v5694_v14 = vsub.f32 %v5677_v63, %v5693_v13  ;;  %v10252_v63 = vld [vmem:[%s14509_s4 + $0x68] sm:$0xf] }
0x183c   : > { %v5695_v18 = vmul.f32 %v5694_v14, %v5694_v14 }
0x183e   : > { %v5696_v19 = vsel %vm1412_vm3, %v5695_v18, 0.0  ;;  %v10261_v18 = vld [vmem:[%s14506_s1 + $0x360] sm:$0xff] }
0x183f   : > { %5697 = vadd.xlane.f32.xlu0 %v5696_v19  ;;  %v10262_v19 = vld [vmem:[%s14506_s1 + $0x368] sm:$0xff] }
0x1855   : > { %5719 = vperm.xlu0 %12737, %v10234_v21   ;;  %v12474_v21 = vpack.c.bf16 %v10262_v19, %v10261_v18  ;;  %v10286_v19 = vld [vmem:[%s14514_s9 + $0x10] sm:$0xf] }
0x1859   : > { %6677 = vperm.xlu0 %12737, %v10280_v22   ;;  %v10263_v22 = vld [vmem:[%s14506_s1 + $0x370] sm:$0xff] }
0x18cc   : > { %v5698_v23 = vpop.xlane.xlu0 %5697 }
0x18cd   : > { %v5699_v24 = vrot.slane %v5698_v23, 4 }
0x18cf   : > { %v5700_v25 = vadd.f32 %v5699_v24, %v5698_v23  ;;  %v10264_v23 = vld [vmem:[%s14506_s1 + $0x378] sm:$0xff] }
0x18d1   : > { %v5701_v26 = vrot.slane %v5700_v25, 2 }
0x18d3   : > { %v5702_v27 = vadd.f32 %v5701_v26, %v5700_v25  ;;  %v12477_v26 = vpack.c.bf16 %v10264_v23, %v10263_v22 }
0x18d4   : > { %v5720_v10 = vpop.permute.xlu0 %5719 }
0x18d5   : > { %v5703_v29 = vrot.slane %v5702_v27, 1 }
0x18d7   : > { %v5704_v31 = vadd.f32 %v5703_v29, %v5702_v27  ;;  %v10268_v27 = vld [vmem:[%s14506_s1 + $0x380] sm:$0xff]  ;;  %v10269_v29 = vld [vmem:[%s14506_s1 + $0x388] sm:$0xff] }
0x18d9   : > { %12703 = vpush %v5704_v31  ;;  %v12486_v31 = vpack.c.bf16 %v10269_v29, %v10268_v27 }
0x190a   : > { %s12704_s22 = spop %12703 }
0x190b   : > { %s5708_s23 = smul.f32 0.0078125, %s12704_s22 }
0x190d   : > { %s5709_s24 = sadd.f32 1e-08, %s5708_s23 }
0x190f   : > { %v5710_v33 = vstv %s5709_s24 }
0x1910   : > { %12745 = vrsqrt.f32 %v5710_v33  ;;  %v10270_v33 = vld [vmem:[%s14506_s1 + $0x390] sm:$0xff] }
0x191a   : > { %v12746_v34 = vpop.eup %12745 }
0x191b   : > { %12705 = vpush %v12746_v34  ;;  %v10271_v34 = vld [vmem:[%s14506_s1 + $0x398] sm:$0xff] }
0x194c   : > { %s12706_s25 = spop %12705 }
0x194d   : > { %v5713_v37 = vstv %s12706_s25 }
0x194e   : > { %v5714_v38 = vmul.f32 %v5713_v37, %v5694_v14 }
0x1950   : > { %v5722_v39 = vmul.f32 %v5720_v10, %v5714_v38  ;;  %v10275_v10 = vld [vmem:[%s14506_s1 + $0x3a0] sm:$0xff] }
0x1952   : > { %v5730_v40 = vadd.f32 %v5728_v9, %v5722_v39  ;;  %v12489_v9 = vpack.c.bf16 %v10271_v34, %v10270_v33  ;;  %v10276_v39 = vld [vmem:[%s14506_s1 + $0x3a8] sm:$0xff] }
0x1954   : > { %v5734_v16 = vmin.f32 %v5730_v40, 0.0  ;;  %v5733_v20 = vmax.f32 %v5730_v40, 0.0  ;;  %v12498_v40 = vpack.c.bf16 %v10276_v39, %v10275_v10 }
0x1956   : > { %v5744_v30 = vmul.f32 %v5742_v17, %v5734_v16  ;;  %v10277_v16 = vld [vmem:[%s14506_s1 + $0x3b0] sm:$0xff]  ;;  %v10278_v17 = vld [vmem:[%s14506_s1 + $0x3b8] sm:$0xff] }
0x1958   : > { %v5745_v41 = vadd.f32 %v5744_v30, %v5733_v20 }
0x195a   : > { %5746 = vst.msk [vmem:[#allocation2 + $0x10] sm:$0xf] %vm1412_vm3, %v5745_v41  ;;  %v12501_v41 = vpack.c.bf16 %v10278_v17, %v10277_v16 }
0x1961   : > { %v5749_v49 = vld [vmem:[#allocation2 + $0x10] sm:$0xff] }
0x1962   : > { %v12435_v51 = vpack.c.bf16 %v13585_v45, %v5749_v49 }
0x1964   : > { %12436 = vmatpush3.bf16.msra.mxu0 %v12435_v51  ;;  %12442 = vmatpush3.bf16.msra.mxu1 %v12435_v51 }
0x1965   : > { %12443 = vmatprep.subr.bf16.mxu0 %v12763_v15  ;;  %12449 = vmatprep.subr.bf16.mxu1 %v12763_v15 }
0x1967   : > { %11609 = vmatmul.mubr.msk.f32.vlgmr.msra.gmra.mrb[64].mxu0 %vm465_vm2, %v10238_v52  ;;  %11620 = vmatmul.mubr.msk.f32.vlgmr.msra.gmra.mrb[64].mxu1 %vm465_vm2, %v10244_v54 }
0x1968   : > { %12445 = vmatpush3.bf16.msra.mxu0 %v12444_v35  ;;  %12451 = vmatpush3.bf16.msra.mxu1 %v12450_v46 }
0x1969   : > { %12446 = vmatprep.subr.bf16.mxu0 %v12763_v15  ;;  %12452 = vmatprep.subr.bf16.mxu1 %v12763_v15 }
0x196a   : > { %11630 = vmatprep.mubr.msk.f32.mxu0 %vm12762_vm0, %v12761_v0  ;;  %11641 = vmatprep.mubr.msk.f32.mxu1 %vm12762_vm0, %v12761_v0 }
0x196c   : > { %12448 = vmatpush3.bf16.msra.mxu0 %v12447_v57  ;;  %12454 = vmatpush3.bf16.msra.mxu1 %v12453_v55  ;;  %v6678_v57 = vpop.permute.xlu0 %6677 }
0x196d   : > { %12455 = vmatprep.subr.bf16.mxu0 %v12763_v15  ;;  %12461 = vmatprep.subr.bf16.mxu1 %v12763_v15 }
0x1a3a   : > { %v5822_v59 = vpop.f32.mrb[64].mxu0  ;;  %v5902_v60 = vpop.f32.mrb[64].mxu1 }
0x1a3b   : > { %v11621_v61 = vpop.f32.mrb[65].mxu1  ;;  %11631 = vmatmul.mubr.msk.f32.vlgmr.msra.gmra.mrb[66].mxu0 %vm465_vm2, %v5902_v60  ;;  %11642 = vmatmul.mubr.msk.f32.vlgmr.msra.gmra.mrb[66].mxu1 %vm465_vm2, %v5822_v59  ;;  %v11610_v62 = vpop.f32.mrb[65].mxu0  ;;  %v10281_v59 = vld [vmem:[%s14511_s6 + $0x10] sm:$0xf] }
0x1a3c   : > { %12457 = vmatpush3.bf16.msra.mxu0 %v13757_v48  ;;  %11652 = vmatprep.mubr.msk.f32.mxu0 %vm12762_vm0, %v12761_v0  ;;  %v6688_v60 = vpop.permute.xlu1 %6687 }
0x1a3d   : > { %12458 = vmatprep.subr.bf16.mxu0 %v12763_v15  ;;  %11663 = vmatprep.mubr.msk.f32.mxu1 %vm12762_vm0, %v12761_v0 }
0x1a3e   : > { %12463 = vmatpush3.bf16.msra.mxu1 %v12462_v5 }
0x1a3f   : > { %12464 = vmatprep.subr.bf16.mxu1 %v12763_v15 }
0x1a40   : > { %12460 = vmatpush3.bf16.msra.mxu0 %v12435_v51 }
0x1a41   : > { %12467 = vmatprep.subr.bf16.mxu0 %v12763_v15 }
0x1a42   : > { %12466 = vmatpush3.bf16.msra.mxu1 %v12465_v8 }
0x1a43   : > { %11653 = vmatmul.mubr.msk.f32.vlgmr.msra.gmra.mrb[68].mxu0 %vm465_vm2, %v10252_v63  ;;  %12473 = vmatprep.subr.bf16.mxu1 %v12763_v15 }
0x1a44   : > { %12469 = vmatpush3.bf16.msra.mxu0 %v13757_v48  ;;  %11674 = vmatprep.mubr.msk.f32.mxu0 %vm12762_vm0, %v12761_v0 }
0x1a45   : > { %12470 = vmatprep.subr.bf16.mxu0 %v12763_v15 }
0x1a48   : > { %12472 = vmatpush3.bf16.msra.mxu0 %v12435_v51 }
0x1a49   : > { %12479 = vmatprep.subr.bf16.mxu0 %v12763_v15 }
0x1a4b   : > { %11675 = vmatmul.mubr.msk.f32.vlgmr.msra.gmra.mrb[70].mxu0 %vm465_vm2, %v10259_v1 }
0x1a4c   : > { %12481 = vmatpush3.bf16.msra.mxu0 %v13757_v48  ;;  %11696 = vmatprep.mubr.msk.f32.mxu0 %vm12762_vm0, %v12761_v0 }
0x1a4d   : > { %12482 = vmatprep.subr.bf16.mxu0 %v12763_v15 }
0x1a50   : > { %12484 = vmatpush3.bf16.msra.mxu0 %v12435_v51 }
0x1a51   : > { %12491 = vmatprep.subr.bf16.mxu0 %v12763_v15 }
0x1a53   : > { %11697 = vmatmul.mubr.msk.f32.vlgmr.msra.gmra.mrb[72].mxu0 %vm465_vm2, %v10266_v58  ;;  %v10285_v58 = vld [vmem:[%s14513_s8 + $0x10] sm:$0xf] }
0x1a54   : > { %12493 = vmatpush3.bf16.msra.mxu0 %v13757_v48  ;;  %11718 = vmatprep.mubr.msk.f32.mxu0 %vm12762_vm0, %v12761_v0 }
0x1a55   : > { %12494 = vmatprep.subr.bf16.mxu0 %v12763_v15 }
0x1a58   : > { %12496 = vmatpush3.bf16.msra.mxu0 %v12435_v51 }
0x1a59   : > { %11732 = vmatprep.subr.mxu0 %v12761_v0 }
0x1a5b   : > { %11719 = vmatmul.mubr.msk.f32.vlgmr.msra.gmra.mrb[74].mxu0 %vm465_vm2, %v10273_v2  ;;  %v10288_v2 = vld [vmem:[%s14515_s10 + $0x4] ss:$0 sm:$0xff] }
0x1a5c   : > { %11734 = vmatprep.mubr.msk.f32.mxu0 %vm12762_vm0, %v12761_v0 }
0x1b0e   : > { %v5980_v36 = vpop.f32.mrb[66].mxu0  ;;  %v6053_v11 = vpop.f32.mrb[66].mxu1 }
0x1b0f   : > { %v6054_v12 = vadd.f32 %v6053_v11, %v5980_v36  ;;  %v11632_v13 = vpop.f32.mrb[67].mxu0  ;;  %v11643_v14 = vpop.f32.mrb[67].mxu1 }
0x1b16   : > { %v6128_v24 = vpop.f32.mrb[68].mxu0 }
0x1b17   : > { %v11654_v25 = vpop.f32.mrb[69].mxu0  ;;  %11664 = vmatmul.mubr.msk.f32.vlgmr.msra.gmra.mrb[68].mxu1 %vm465_vm2, %v6128_v24 }
0x1b18   : > { %12475 = vmatpush3.bf16.msra.mxu1 %v12474_v21  ;;  %11685 = vmatprep.mubr.msk.f32.mxu1 %vm12762_vm0, %v12761_v0  ;;  %v10331_v21 = vld [vmem:[%s14510_s5 + $0x14] sm:$0xf] }
0x1b19   : > { %12476 = vmatprep.subr.bf16.mxu1 %v12763_v15 }
0x1b1c   : > { %12478 = vmatpush3.bf16.msra.mxu1 %v12477_v26 }
0x1b1d   : > { %12485 = vmatprep.subr.bf16.mxu1 %v12763_v15 }
0x1b1e   : > { %v6282_v37 = vpop.f32.mrb[70].mxu0 }
0x1b1f   : > { %v11676_v38 = vpop.f32.mrb[71].mxu0  ;;  %11686 = vmatmul.mubr.msk.f32.vlgmr.msra.gmra.mrb[70].mxu1 %vm465_vm2, %v6282_v37 }
0x1b20   : > { %12487 = vmatpush3.bf16.msra.mxu1 %v12486_v31  ;;  %11707 = vmatprep.mubr.msk.f32.mxu1 %vm12762_vm0, %v12761_v0 }
0x1b21   : > { %12488 = vmatprep.subr.bf16.mxu1 %v12763_v15 }
0x1b24   : > { %12490 = vmatpush3.bf16.msra.mxu1 %v12489_v9 }
0x1b25   : > { %12497 = vmatprep.subr.bf16.mxu1 %v12763_v15 }
0x1b26   : > { %v6436_v20 = vpop.f32.mrb[72].mxu0 }
0x1b27   : > { %v11698_v30 = vpop.f32.mrb[73].mxu0  ;;  %11708 = vmatmul.mubr.msk.f32.vlgmr.msra.gmra.mrb[72].mxu1 %vm465_vm2, %v6436_v20 }
0x1b28   : > { %12499 = vmatpush3.bf16.msra.mxu1 %v12498_v40  ;;  %11729 = vmatprep.mubr.msk.f32.mxu1 %vm12762_vm0, %v12761_v0 }
0x1b29   : > { %12500 = vmatprep.subr.bf16.mxu1 %v12763_v15 }
0x1b2c   : > { %12502 = vmatpush3.bf16.msra.mxu1 %v12501_v41  ;;  %v10297_v41 = vld [vmem:[%s14506_s1 + $0x3e0] sm:$0xff] }
0x1b2d   : > { %12503 = vmatprep.subr.bf16.mxu1 %v12763_v15 }
0x1b2e   : > { %v6590_v42 = vpop.f32.mrb[74].mxu0 }
0x1b2f   : > { %v11720_v47 = vpop.f32.mrb[75].mxu0  ;;  %11730 = vmatmul.mubr.msk.f32.vlgmr.msra.gmra.mrb[74].mxu1 %vm465_vm2, %v6590_v42  ;;  %v10298_v42 = vld [vmem:[%s14506_s1 + $0x3e8] sm:$0xff] }
0x1b30   : > { %12505 = vmatpush3.bf16.msra.mxu1 %v13757_v48  ;;  %11745 = vmatprep.mubr.msk.f32.mxu1 %vm12762_vm0, %v12761_v0 }
0x1b31   : > { %12506 = vmatprep.subr.bf16.mxu1 %v12763_v15 }
0x1bea   : > { %v6206_v49 = vpop.f32.mrb[68].mxu1 }
0x1beb   : > { %v6210_v32 = vadd.f32 %v6206_v49, %v6054_v12  ;;  %v11665_v50 = vpop.f32.mrb[69].mxu1  ;;  %v10291_v49 = vld [vmem:[%s14506_s1 + $0x3c0] sm:$0xff] }
0x1bf2   : > { %v6360_v51 = vpop.f32.mrb[70].mxu1 }
0x1bf3   : > { %v6364_v52 = vadd.f32 %v6360_v51, %v6210_v32  ;;  %v11687_v54 = vpop.f32.mrb[71].mxu1  ;;  %v10292_v32 = vld [vmem:[%s14506_s1 + $0x3c8] sm:$0xff]  ;;  %v10289_v51 = vld [vmem:[%s14509_s4 + $0x78] sm:$0xf] }
0x1bf4   : > { %v12516_v54 = vpack.c.bf16 %v10298_v42, %v10297_v41 }
0x1bfa   : > { %v6514_v35 = vpop.f32.mrb[72].mxu1 }
0x1bfb   : > { %v6518_v46 = vadd.f32 %v6514_v35, %v6364_v52  ;;  %v11709_v28 = vpop.f32.mrb[73].mxu1  ;;  %v10295_v52 = vld [vmem:[%s14509_s4 + $0x7c] sm:$0xf]  ;;  %v12522_v35 = vpack.c.bf16 %v10292_v32, %v10291_v49 }
0x1bfc   : > { %v10293_v28 = vld [vmem:[%s14506_s1 + $0x3d0] sm:$0xff] }
0x1c02   : > { %v6668_v43 = vpop.f32.mrb[74].mxu1 }
0x1c03   : > { %v6672_v53 = vadd.f32 %v6668_v43, %v6518_v46  ;;  %v11731_v56 = vpop.f32.mrb[75].mxu1  ;;  %v10299_v46 = vld [vmem:[%s14506_s1 + $0x3f0] sm:$0xff]  ;;  %v10294_v43 = vld [vmem:[%s14506_s1 + $0x3d8] sm:$0xff] }
0x1c04   : > { %v12525_v56 = vpack.c.bf16 %v10294_v43, %v10293_v28 }
0x1c05   : > { %v6680_v55 = vadd.f32 %v6678_v57, %v6672_v53 }
0x1c07   : > { %11733 = vmatpush3.msk.msra.mxu0 %vm2351_vm4, %v6680_v55 }
0x1c08   : > { %11735 = vmatmul.mubr.msk.f32.vlgmr.msra.gmra.mrb[76].mxu0 %vm2347_vm5, %v10281_v59  ;;  %12509 = vmatprep.subr.bf16.mxu0 %v12763_v15 }
0x1c09   : > { %12511 = vmatpush3.bf16.msra.mxu0 %v13757_v48  ;;  %11756 = vmatprep.mubr.msk.f32.mxu0 %vm12762_vm0, %v12761_v0 }
0x1c0a   : > { %12512 = vmatprep.subr.bf16.mxu0 %v12763_v15 }
0x1cdb   : > { %v6762_v61 = vpop.f32.mrb[76].mxu0 }
0x1cdc   : > { %v6763_v62 = vadd.f32 %v6762_v61, %v6688_v60  ;;  %v11736_v63 = vpop.f32.mrb[77].mxu0  ;;  %v10303_v61 = vld [vmem:[%s14509_s4 + $0x80] sm:$0xf] }
0x1cdd   : > { %v10317_v63 = vld [vmem:[%s14509_s4 + $0x88] sm:$0xf] }
0x1cde   : > { %v6766_v1 = vsel %vm1412_vm3, %v6763_v62, 0.0 }
0x1cdf   : > { %6767 = vadd.xlane.f32.xlu0 %v6766_v1  ;;  %v10324_v1 = vld [vmem:[%s14509_s4 + $0x8c] sm:$0xf] }
0x1cf5   : > { %6805 = vperm.xlu0 %12737, %v10285_v58   ;;  %v10306_v58 = vld [vmem:[%s14506_s1 + $0x408] sm:$0xff] }
0x1cf9   : > { %6827 = vperm.xlu0 %12737, %v10288_v2  }
0x1cfd   : > { %7773 = vperm.xlu0 %12737, %v10333_v3   ;;  %v10307_v3 = vld [vmem:[%s14506_s1 + $0x410] sm:$0xff] }
0x1d6c   : > { %v6768_v4 = vpop.xlane.xlu0 %6767 }
0x1d6d   : > { %v6769_v5 = vrot.slane %v6768_v4, 4 }
0x1d6f   : > { %v6770_v6 = vadd.f32 %v6769_v5, %v6768_v4  ;;  %v10308_v4 = vld [vmem:[%s14506_s1 + $0x418] sm:$0xff] }
0x1d70   : > { %v12537_v5 = vpack.c.bf16 %v10308_v4, %v10307_v3 }
0x1d71   : > { %v6771_v7 = vrot.slane %v6770_v6, 2 }
0x1d73   : > { %v6772_v8 = vadd.f32 %v6771_v7, %v6770_v6 }
0x1d74   : > { %v6806_v38 = vpop.permute.xlu0 %6805 }
0x1d75   : > { %v6773_v36 = vrot.slane %v6772_v8, 1 }
0x1d77   : > { %v6774_v11 = vadd.f32 %v6773_v36, %v6772_v8 }
0x1d78   : > { %v6828_v16 = vpop.permute.xlu0 %6827 }
0x1d79   : > { %12707 = vpush %v6774_v11 }
0x1daa   : > { %s12708_s16 = spop %12707 }
0x1dab   : > { %s6778_s17 = smul.f32 0.0078125, %s12708_s16 }
0x1dad   : > { %v6779_v12 = vstv %s6778_s17 }
0x1dae   : > { %v6780_v13 = vsub.f32 %v6763_v62, %v6779_v12  ;;  %v10310_v62 = vld [vmem:[%s14509_s4 + $0x84] sm:$0xf] }
0x1daf   : > { %v10312_v12 = vld [vmem:[%s14506_s1 + $0x420] sm:$0xff] }
0x1db0   : > { %v6781_v14 = vmul.f32 %v6780_v13, %v6780_v13 }
0x1db2   : > { %v6782_v18 = vsel %vm1412_vm3, %v6781_v14, 0.0 }
0x1db3   : > { %6783 = vadd.xlane.f32.xlu1 %v6782_v18  ;;  %v10314_v18 = vld [vmem:[%s14506_s1 + $0x430] sm:$0xff] }
0x1dc4   : > { %6813 = vperm.xlu1 %12738, %v10286_v19   ;;  %v10315_v19 = vld [vmem:[%s14506_s1 + $0x438] sm:$0xff] }
0x1dc8   : > { %7763 = vperm.xlu1 %12738, %v10331_v21  }
0x1e40   : > { %v6784_v22 = vpop.xlane.xlu1 %6783 }
0x1e41   : > { %v6785_v23 = vrot.slane %v6784_v22, 4 }
0x1e43   : > { %v6786_v24 = vadd.f32 %v6785_v23, %v6784_v22  ;;  %v12549_v23 = vpack.c.bf16 %v10315_v19, %v10314_v18 }
0x1e44   : > { %v6814_v10 = vpop.permute.xlu1 %6813 }
0x1e45   : > { %v6787_v25 = vrot.slane %v6786_v24, 2 }
0x1e47   : > { %v6788_v26 = vadd.f32 %v6787_v25, %v6786_v24  ;;  %v10319_v24 = vld [vmem:[%s14506_s1 + $0x440] sm:$0xff]  ;;  %v10320_v25 = vld [vmem:[%s14506_s1 + $0x448] sm:$0xff] }
0x1e49   : > { %v6789_v27 = vrot.slane %v6788_v26, 1 }
0x1e4b   : > { %v6790_v29 = vadd.f32 %v6789_v27, %v6788_v26  ;;  %v12558_v26 = vpack.c.bf16 %v10320_v25, %v10319_v24  ;;  %v10321_v27 = vld [vmem:[%s14506_s1 + $0x450] sm:$0xff] }
0x1e4d   : > { %12709 = vpush %v6790_v29  ;;  %v10322_v29 = vld [vmem:[%s14506_s1 + $0x458] sm:$0xff] }
0x1e7e   : > { %s12710_s22 = spop %12709 }
0x1e7f   : > { %s6794_s23 = smul.f32 0.0078125, %s12710_s22 }
0x1e81   : > { %s6795_s24 = sadd.f32 1e-08, %s6794_s23 }
0x1e83   : > { %v6796_v31 = vstv %s6795_s24 }
0x1e84   : > { %12747 = vrsqrt.f32 %v6796_v31 }
0x1e8e   : > { %v12748_v33 = vpop.eup %12747 }
0x1e8f   : > { %12711 = vpush %v12748_v33 }
0x1ec0   : > { %s12712_s25 = spop %12711 }
0x1ec1   : > { %v6799_v34 = vstv %s12712_s25 }
0x1ec2   : > { %v6800_v37 = vmul.f32 %v6799_v34, %v6780_v13  ;;  %v10313_v13 = vld [vmem:[%s14506_s1 + $0x428] sm:$0xff]  ;;  %v12561_v34 = vpack.c.bf16 %v10322_v29, %v10321_v27 }
0x1ec3   : > { %v12546_v14 = vpack.c.bf16 %v10313_v13, %v10312_v12  ;;  %v10336_v13 = vld [vmem:[%s14513_s8 + $0x14] sm:$0xf] }
0x1ec4   : > { %v6808_v9 = vmul.f32 %v6806_v38, %v6800_v37  ;;  %v10326_v37 = vld [vmem:[%s14506_s1 + $0x460] sm:$0xff]  ;;  %v10327_v38 = vld [vmem:[%s14506_s1 + $0x468] sm:$0xff] }
0x1ec6   : > { %v6816_v39 = vadd.f32 %v6814_v10, %v6808_v9  ;;  %v12570_v9 = vpack.c.bf16 %v10327_v38, %v10326_v37  ;;  %v10328_v10 = vld [vmem:[%s14506_s1 + $0x470] sm:$0xff] }
0x1ec8   : > { %v6820_v40 = vmin.f32 %v6816_v39, 0.0  ;;  %v6819_v17 = vmax.f32 %v6816_v39, 0.0  ;;  %v10329_v39 = vld [vmem:[%s14506_s1 + $0x478] sm:$0xff] }
0x1eca   : > { %v6830_v20 = vmul.f32 %v6828_v16, %v6820_v40 }
0x1ecc   : > { %v6831_v30 = vadd.f32 %v6830_v20, %v6819_v17  ;;  %v12573_v17 = vpack.c.bf16 %v10329_v39, %v10328_v10  ;;  %v7920_v20 = vld [vmem:[#allocation2 + $0x8] sm:$0xff] }
0x1ecd   : > { %v14129_v41 = vpack.c.bf16 %v7920_v20, %v13753_v44  ;;  %v10349_v20 = vld [vmem:[%s14506_s1 + $0x4a8] sm:$0xff] }
0x1ece   : > { %6832 = vst.msk [vmem:[#allocation2 + $0x14] sm:$0xf] %vm1412_vm3, %v6831_v30 }
0x1ed5   : > { %v13981_v47 = vld [vmem:[#allocation2 + $0x10] sm:$0xff] }
0x1ed6   : > { %v12507_v50 = vpack.c.bf16 %v13585_v45, %v13981_v47  ;;  %v10300_v45 = vld [vmem:[%s14506_s1 + $0x3f8] sm:$0xff] }
0x1ed7   : > { %v12519_v53 = vpack.c.bf16 %v10300_v45, %v10299_v46 }
0x1ed8   : > { %12508 = vmatpush3.bf16.msra.mxu1 %v12507_v50  ;;  %12514 = vmatpush3.bf16.msra.mxu0 %v12507_v50 }
0x1ed9   : > { %12515 = vmatprep.subr.bf16.mxu1 %v12763_v15  ;;  %12521 = vmatprep.subr.bf16.mxu0 %v12763_v15 }
0x1edb   : > { %11746 = vmatmul.mubr.msk.f32.vlgmr.msra.gmra.mrb[76].mxu1 %vm465_vm2, %v10289_v51  ;;  %11757 = vmatmul.mubr.msk.f32.vlgmr.msra.gmra.mrb[78].mxu0 %vm465_vm2, %v10295_v52 }
0x1edc   : > { %12517 = vmatpush3.bf16.msra.mxu1 %v12516_v54  ;;  %12523 = vmatpush3.bf16.msra.mxu0 %v12522_v35 }
0x1edd   : > { %12518 = vmatprep.subr.bf16.mxu1 %v12763_v15  ;;  %12524 = vmatprep.subr.bf16.mxu0 %v12763_v15 }
0x1ede   : > { %11767 = vmatprep.mubr.msk.f32.mxu1 %vm12762_vm0, %v12761_v0  ;;  %11778 = vmatprep.mubr.msk.f32.mxu0 %vm12762_vm0, %v12761_v0 }
0x1ee0   : > { %12520 = vmatpush3.bf16.msra.mxu1 %v12519_v53  ;;  %12526 = vmatpush3.bf16.msra.mxu0 %v12525_v56  ;;  %v7764_v53 = vpop.permute.xlu1 %7763 }
0x1ee1   : > { %12527 = vmatprep.subr.bf16.mxu1 %v12763_v15  ;;  %12533 = vmatprep.subr.bf16.mxu0 %v12763_v15 }
0x1fae   : > { %v6908_v57 = vpop.f32.mrb[76].mxu1  ;;  %v6988_v55 = vpop.f32.mrb[78].mxu0 }
0x1faf   : > { %v11758_v59 = vpop.f32.mrb[79].mxu0  ;;  %11768 = vmatmul.mubr.msk.f32.vlgmr.msra.gmra.mrb[78].mxu1 %vm465_vm2, %v6988_v55  ;;  %11779 = vmatmul.mubr.msk.f32.vlgmr.msra.gmra.mrb[80].mxu0 %vm465_vm2, %v6908_v57  ;;  %v11747_v60 = vpop.f32.mrb[77].mxu1  ;;  %v10332_v57 = vld [vmem:[%s14511_s6 + $0x14] sm:$0xf] }
0x1fb0   : > { %12529 = vmatpush3.bf16.msra.mxu1 %v13757_v48  ;;  %11789 = vmatprep.mubr.msk.f32.mxu1 %vm12762_vm0, %v12761_v0  ;;  %v7774_v55 = vpop.permute.xlu0 %7773 }
0x1fb1   : > { %12530 = vmatprep.subr.bf16.mxu1 %v12763_v15  ;;  %11800 = vmatprep.mubr.msk.f32.mxu0 %vm12762_vm0, %v12761_v0 }
0x1fb4   : > { %12532 = vmatpush3.bf16.msra.mxu1 %v12507_v50 }
0x1fb5   : > { %12539 = vmatprep.subr.bf16.mxu1 %v12763_v15 }
0x1fb7   : > { %11790 = vmatmul.mubr.msk.f32.vlgmr.msra.gmra.mrb[80].mxu1 %vm465_vm2, %v10303_v61 }
0x1fb8   : > { %12541 = vmatpush3.bf16.msra.mxu1 %v13757_v48  ;;  %11811 = vmatprep.mubr.msk.f32.mxu1 %vm12762_vm0, %v12761_v0 }
0x1fb9   : > { %12542 = vmatprep.subr.bf16.mxu1 %v12763_v15 }
0x1fbc   : > { %12544 = vmatpush3.bf16.msra.mxu1 %v12507_v50 }
0x1fbd   : > { %12551 = vmatprep.subr.bf16.mxu1 %v12763_v15 }
0x1fbf   : > { %11812 = vmatmul.mubr.msk.f32.vlgmr.msra.gmra.mrb[82].mxu1 %vm465_vm2, %v10310_v62 }
0x1fc0   : > { %12553 = vmatpush3.bf16.msra.mxu1 %v13757_v48  ;;  %11833 = vmatprep.mubr.msk.f32.mxu1 %vm12762_vm0, %v12761_v0 }
0x1fc1   : > { %12554 = vmatprep.subr.bf16.mxu1 %v12763_v15 }
0x1fc4   : > { %12556 = vmatpush3.bf16.msra.mxu1 %v12507_v50 }
0x1fc5   : > { %12563 = vmatprep.subr.bf16.mxu1 %v12763_v15 }
0x1fc7   : > { %11834 = vmatmul.mubr.msk.f32.vlgmr.msra.gmra.mrb[84].mxu1 %vm465_vm2, %v10317_v63  ;;  %v10337_v63 = vld [vmem:[%s14514_s9 + $0x14] sm:$0xf] }
0x1fc8   : > { %12565 = vmatpush3.bf16.msra.mxu1 %v13757_v48  ;;  %11855 = vmatprep.mubr.msk.f32.mxu1 %vm12762_vm0, %v12761_v0  ;;  %v10305_v48 = vld [vmem:[%s14506_s1 + $0x400] sm:$0xff] }
0x1fc9   : > { %12566 = vmatprep.subr.bf16.mxu1 %v12763_v15  ;;  %v12534_v2 = vpack.c.bf16 %v10306_v58, %v10305_v48  ;;  %v10384_v48 = vld [vmem:[%s14512_s7 + $0x18] sm:$0xf] }
0x1fcb   : > { %12535 = vmatpush3.bf16.msra.mxu0 %v12534_v2 }
0x1fcc   : > { %12568 = vmatpush3.bf16.msra.mxu1 %v12507_v50  ;;  %12536 = vmatprep.subr.bf16.mxu0 %v12763_v15 }
0x1fcd   : > { %11869 = vmatprep.subr.mxu1 %v12761_v0 }
0x1fcf   : > { %11856 = vmatmul.mubr.msk.f32.vlgmr.msra.gmra.mrb[86].mxu1 %vm465_vm2, %v10324_v1  ;;  %12538 = vmatpush3.bf16.msra.mxu0 %v12537_v5  ;;  %v10339_v1 = vld [vmem:[%s14515_s10 + $0x5] ss:$0 sm:$0xff] }
0x1fd0   : > { %11871 = vmatprep.mubr.msk.f32.mxu1 %vm12762_vm0, %v12761_v0  ;;  %12545 = vmatprep.subr.bf16.mxu0 %v12763_v15 }
0x2082   : > { %v7066_v6 = vpop.f32.mrb[78].mxu1  ;;  %v7139_v7 = vpop.f32.mrb[80].mxu0 }
0x2083   : > { %v7140_v8 = vadd.f32 %v7139_v7, %v7066_v6  ;;  %v11769_v36 = vpop.f32.mrb[79].mxu1  ;;  %v11780_v11 = vpop.f32.mrb[81].mxu0 }
0x208a   : > { %v7214_v21 = vpop.f32.mrb[80].mxu1 }
0x208b   : > { %v11791_v22 = vpop.f32.mrb[81].mxu1  ;;  %11801 = vmatmul.mubr.msk.f32.vlgmr.msra.gmra.mrb[82].mxu0 %vm465_vm2, %v7214_v21 }
0x208c   : > { %12547 = vmatpush3.bf16.msra.mxu0 %v12546_v14  ;;  %11822 = vmatprep.mubr.msk.f32.mxu0 %vm12762_vm0, %v12761_v0  ;;  %v10382_v14 = vld [vmem:[%s14510_s5 + $0x18] sm:$0xf] }
0x208d   : > { %12548 = vmatprep.subr.bf16.mxu0 %v12763_v15 }
0x2090   : > { %12550 = vmatpush3.bf16.msra.mxu0 %v12549_v23 }
0x2091   : > { %12557 = vmatprep.subr.bf16.mxu0 %v12763_v15 }
0x2092   : > { %v7368_v31 = vpop.f32.mrb[82].mxu1 }
0x2093   : > { %v11813_v33 = vpop.f32.mrb[83].mxu1  ;;  %11823 = vmatmul.mubr.msk.f32.vlgmr.msra.gmra.mrb[84].mxu0 %vm465_vm2, %v7368_v31 }
0x2094   : > { %12559 = vmatpush3.bf16.msra.mxu0 %v12558_v26  ;;  %11844 = vmatprep.mubr.msk.f32.mxu0 %vm12762_vm0, %v12761_v0 }
0x2095   : > { %12560 = vmatprep.subr.bf16.mxu0 %v12763_v15 }
0x2098   : > { %12562 = vmatpush3.bf16.msra.mxu0 %v12561_v34 }
0x2099   : > { %12569 = vmatprep.subr.bf16.mxu0 %v12763_v15 }
0x209a   : > { %v7522_v40 = vpop.f32.mrb[84].mxu1 }
0x209b   : > { %v11835_v16 = vpop.f32.mrb[85].mxu1  ;;  %11845 = vmatmul.mubr.msk.f32.vlgmr.msra.gmra.mrb[86].mxu0 %vm465_vm2, %v7522_v40 }
0x209c   : > { %12571 = vmatpush3.bf16.msra.mxu0 %v12570_v9  ;;  %11866 = vmatprep.mubr.msk.f32.mxu0 %vm12762_vm0, %v12761_v0 }
0x209d   : > { %12572 = vmatprep.subr.bf16.mxu0 %v12763_v15 }
0x20a0   : > { %12574 = vmatpush3.bf16.msra.mxu0 %v12573_v17  ;;  %v10348_v17 = vld [vmem:[%s14506_s1 + $0x4a0] sm:$0xff] }
0x20a1   : > { %12575 = vmatprep.subr.bf16.mxu0 %v12763_v15 }
0x20a2   : > { %v7676_v30 = vpop.f32.mrb[86].mxu1 }
0x20a3   : > { %v11857_v42 = vpop.f32.mrb[87].mxu1  ;;  %11867 = vmatmul.mubr.msk.f32.vlgmr.msra.gmra.mrb[88].mxu0 %vm465_vm2, %v7676_v30 }
0x20a4   : > { %12577 = vmatpush3.bf16.msra.mxu0 %v14129_v41  ;;  %11882 = vmatprep.mubr.msk.f32.mxu0 %vm12762_vm0, %v12761_v0  ;;  %v10342_v42 = vld [vmem:[%s14506_s1 + $0x480] sm:$0xff] }
0x20a5   : > { %12578 = vmatprep.subr.bf16.mxu0 %v12763_v15 }
0x215e   : > { %v7292_v49 = vpop.f32.mrb[82].mxu0 }
0x215f   : > { %v7296_v32 = vadd.f32 %v7292_v49, %v7140_v8  ;;  %v11802_v50 = vpop.f32.mrb[83].mxu0  ;;  %v10343_v49 = vld [vmem:[%s14506_s1 + $0x488] sm:$0xff] }
0x2160   : > { %v10340_v50 = vld [vmem:[%s14509_s4 + $0x90] sm:$0xf] }
0x2166   : > { %v7446_v51 = vpop.f32.mrb[84].mxu0 }
0x2167   : > { %v7450_v52 = vadd.f32 %v7446_v51, %v7296_v32  ;;  %v11824_v54 = vpop.f32.mrb[85].mxu0  ;;  %v10346_v51 = vld [vmem:[%s14509_s4 + $0x94] sm:$0xf] }
0x2168   : > { %v12594_v54 = vpack.c.bf16 %v10343_v49, %v10342_v42 }
0x216e   : > { %v7600_v35 = vpop.f32.mrb[86].mxu0 }
0x216f   : > { %v7604_v46 = vadd.f32 %v7600_v35, %v7450_v52  ;;  %v11846_v44 = vpop.f32.mrb[87].mxu0  ;;  %v12588_v52 = vpack.c.bf16 %v10349_v20, %v10348_v17  ;;  %v10350_v35 = vld [vmem:[%s14506_s1 + $0x4b0] sm:$0xff] }
0x2170   : > { %v10345_v44 = vld [vmem:[%s14506_s1 + $0x498] sm:$0xff] }
0x2176   : > { %v7754_v45 = vpop.f32.mrb[88].mxu0 }
0x2177   : > { %v7758_v28 = vadd.f32 %v7754_v45, %v7604_v46  ;;  %v11868_v43 = vpop.f32.mrb[89].mxu0  ;;  %v10344_v46 = vld [vmem:[%s14506_s1 + $0x490] sm:$0xff] }
0x2179   : > { %v7766_v56 = vadd.f32 %v7764_v53, %v7758_v28  ;;  %v12597_v28 = vpack.c.bf16 %v10345_v44, %v10344_v46  ;;  %v10383_v44 = vld [vmem:[%s14511_s6 + $0x18] sm:$0xf] }
0x217b   : > { %11870 = vmatpush3.msk.msra.mxu1 %vm2351_vm4, %v7766_v56 }
0x217c   : > { %11872 = vmatmul.mubr.msk.f32.vlgmr.msra.gmra.mrb[88].mxu1 %vm2347_vm5, %v10332_v57  ;;  %12581 = vmatprep.subr.bf16.mxu1 %v12763_v15 }
0x217d   : > { %12583 = vmatpush3.bf16.msra.mxu1 %v14129_v41  ;;  %11893 = vmatprep.mubr.msk.f32.mxu1 %vm12762_vm0, %v12761_v0 }
0x217e   : > { %12584 = vmatprep.subr.bf16.mxu1 %v12763_v15 }
0x224f   : > { %v7848_v59 = vpop.f32.mrb[88].mxu1 }
0x2250   : > { %v7849_v60 = vadd.f32 %v7848_v59, %v7774_v55  ;;  %v11873_v61 = vpop.f32.mrb[89].mxu1  ;;  %v10354_v55 = vld [vmem:[%s14509_s4 + $0x98] sm:$0xf]  ;;  %v10361_v59 = vld [vmem:[%s14509_s4 + $0x9c] sm:$0xf] }
0x2251   : > { %v10375_v61 = vld [vmem:[%s14509_s4 + $0xa4] sm:$0xf] }
0x2252   : > { %v7852_v62 = vsel %vm1412_vm3, %v7849_v60, 0.0 }
0x2253   : > { %7853 = vadd.xlane.f32.xlu1 %v7852_v62  ;;  %v10357_v62 = vld [vmem:[%s14506_s1 + $0x4c8] sm:$0xff] }
0x2264   : > { %7899 = vperm.xlu1 %12738, %v10337_v63  }
0x2268   : > { %7913 = vperm.xlu1 %12738, %v10339_v1   ;;  %v10358_v1 = vld [vmem:[%s14506_s1 + $0x4d0] sm:$0xff] }
0x226c   : > { %8859 = vperm.xlu1 %12738, %v10384_v48   ;;  %v10359_v48 = vld [vmem:[%s14506_s1 + $0x4d8] sm:$0xff] }
0x22e0   : > { %v7854_v58 = vpop.xlane.xlu1 %7853 }
0x22e1   : > { %v7855_v2 = vrot.slane %v7854_v58, 4 }
0x22e3   : > { %v7856_v3 = vadd.f32 %v7855_v2, %v7854_v58  ;;  %v12609_v58 = vpack.c.bf16 %v10359_v48, %v10358_v1 }
0x22e4   : > { %v7900_v33 = vpop.permute.xlu1 %7899 }
0x22e5   : > { %v7857_v4 = vrot.slane %v7856_v3, 2 }
0x22e7   : > { %v7858_v5 = vadd.f32 %v7857_v4, %v7856_v3 }
0x22e8   : > { %v7914_v10 = vpop.permute.xlu1 %7913 }
0x22e9   : > { %v7859_v6 = vrot.slane %v7858_v5, 1 }
0x22eb   : > { %v7860_v7 = vadd.f32 %v7859_v6, %v7858_v5 }
0x22ed   : > { %12713 = vpush %v7860_v7  ;;  %v10363_v7 = vld [vmem:[%s14506_s1 + $0x4e0] sm:$0xff] }
0x231e   : > { %s12714_s16 = spop %12713 }
0x231f   : > { %s7864_s17 = smul.f32 0.0078125, %s12714_s16 }
0x2321   : > { %v7865_v8 = vstv %s7864_s17 }
0x2322   : > { %v7866_v36 = vsub.f32 %v7849_v60, %v7865_v8  ;;  %v10368_v60 = vld [vmem:[%s14509_s4 + $0xa0] sm:$0xf]  ;;  %v10364_v8 = vld [vmem:[%s14506_s1 + $0x4e8] sm:$0xff] }
0x2324   : > { %v7867_v11 = vmul.f32 %v7866_v36, %v7866_v36 }
0x2326   : > { %v7868_v12 = vsel %vm1412_vm3, %v7867_v11, 0.0  ;;  %v10365_v11 = vld [vmem:[%s14506_s1 + $0x4f0] sm:$0xff] }
0x2327   : > { %7869 = vadd.xlane.f32.xlu0 %v7868_v12  ;;  %v10366_v12 = vld [vmem:[%s14506_s1 + $0x4f8] sm:$0xff] }
0x233d   : > { %7891 = vperm.xlu0 %12737, %v10336_v13  }
0x2341   : > { %8849 = vperm.xlu0 %12737, %v10382_v14  }
0x23b4   : > { %v7870_v18 = vpop.xlane.xlu0 %7869 }
0x23b5   : > { %v7871_v19 = vrot.slane %v7870_v18, 4 }
0x23b7   : > { %v7872_v21 = vadd.f32 %v7871_v19, %v7870_v18  ;;  %v12621_v18 = vpack.c.bf16 %v10366_v12, %v10365_v11  ;;  %v10370_v19 = vld [vmem:[%s14506_s1 + $0x500] sm:$0xff] }
0x23b9   : > { %v7873_v22 = vrot.slane %v7872_v21, 2 }
0x23bb   : > { %v7874_v23 = vadd.f32 %v7873_v22, %v7872_v21  ;;  %v10371_v21 = vld [vmem:[%s14506_s1 + $0x508] sm:$0xff] }
0x23bc   : > { %v7892_v34 = vpop.permute.xlu0 %7891  ;;  %v12630_v22 = vpack.c.bf16 %v10371_v21, %v10370_v19 }
0x23bd   : > { %v7875_v24 = vrot.slane %v7874_v23, 1 }
0x23bf   : > { %v7876_v25 = vadd.f32 %v7875_v24, %v7874_v23  ;;  %v10372_v23 = vld [vmem:[%s14506_s1 + $0x510] sm:$0xff]  ;;  %v10373_v24 = vld [vmem:[%s14506_s1 + $0x518] sm:$0xff] }
0x23c1   : > { %12715 = vpush %v7876_v25 }
0x23f2   : > { %s12716_s22 = spop %12715 }
0x23f3   : > { %s7880_s23 = smul.f32 0.0078125, %s12716_s22 }
0x23f5   : > { %s7881_s24 = sadd.f32 1e-08, %s7880_s23 }
0x23f7   : > { %v7882_v26 = vstv %s7881_s24 }
0x23f8   : > { %12749 = vrsqrt.f32 %v7882_v26 }
0x2402   : > { %v12750_v27 = vpop.eup %12749 }
0x2403   : > { %12717 = vpush %v12750_v27  ;;  %v12633_v27 = vpack.c.bf16 %v10373_v24, %v10372_v23 }
0x2434   : > { %s12718_s25 = spop %12717 }
0x2435   : > { %v7885_v29 = vstv %s12718_s25 }
0x2436   : > { %v7886_v31 = vmul.f32 %v7885_v29, %v7866_v36  ;;  %v12618_v36 = vpack.c.bf16 %v10364_v8, %v10363_v7  ;;  %v10377_v29 = vld [vmem:[%s14506_s1 + $0x520] sm:$0xff] }
0x2438   : > { %v7894_v37 = vmul.f32 %v7892_v34, %v7886_v31  ;;  %v10378_v31 = vld [vmem:[%s14506_s1 + $0x528] sm:$0xff]  ;;  %v10379_v34 = vld [vmem:[%s14506_s1 + $0x530] sm:$0xff] }
0x243a   : > { %v7902_v38 = vadd.f32 %v7900_v33, %v7894_v37  ;;  %v12642_v33 = vpack.c.bf16 %v10378_v31, %v10377_v29  ;;  %v10380_v37 = vld [vmem:[%s14506_s1 + $0x538] sm:$0xff]  ;;  %v10396_v31 = vld [vmem:[%s14506_s1 + $0x20] sm:$0xff] }
0x243c   : > { %v7906_v9 = vmin.f32 %v7902_v38, 0.0  ;;  %v7905_v39 = vmax.f32 %v7902_v38, 0.0 }
0x243e   : > { %v7916_v40 = vmul.f32 %v7914_v10, %v7906_v9  ;;  %v12645_v10 = vpack.c.bf16 %v10380_v37, %v10379_v34  ;;  %v10397_v37 = vld [vmem:[%s14506_s1 + $0x28] sm:$0xff] }
0x2440   : > { %v7917_v16 = vadd.f32 %v7916_v40, %v7905_v39 }
0x2442   : > { %7918 = vst.msk [vmem:[#allocation2 + $0x18] sm:$0xf] %vm1412_vm3, %v7917_v16 }
0x2449   : > { %v7922_v30 = vld [vmem:[#allocation2 + $0x18] sm:$0xff] }
0x244a   : > { %v12579_v32 = vpack.c.bf16 %v7922_v30, %v13981_v47  ;;  %v10351_v47 = vld [vmem:[%s14506_s1 + $0x4b8] sm:$0xff] }
0x244b   : > { %v12591_v45 = vpack.c.bf16 %v10351_v47, %v10350_v35  ;;  %v8850_v47 = vpop.permute.xlu0 %8849 }
0x244c   : > { %12580 = vmatpush3.bf16.msra.mxu0 %v12579_v32  ;;  %12586 = vmatpush3.bf16.msra.mxu1 %v12579_v32 }
0x244d   : > { %12587 = vmatprep.subr.bf16.mxu0 %v12763_v15  ;;  %12593 = vmatprep.subr.bf16.mxu1 %v12763_v15 }
0x244f   : > { %11883 = vmatmul.mubr.msk.f32.vlgmr.msra.gmra.mrb[90].mxu0 %vm465_vm2, %v10340_v50  ;;  %11894 = vmatmul.mubr.msk.f32.vlgmr.msra.gmra.mrb[90].mxu1 %vm465_vm2, %v10346_v51 }
0x2450   : > { %12589 = vmatpush3.bf16.msra.mxu0 %v12588_v52  ;;  %12595 = vmatpush3.bf16.msra.mxu1 %v12594_v54 }
0x2451   : > { %12590 = vmatprep.subr.bf16.mxu0 %v12763_v15  ;;  %12596 = vmatprep.subr.bf16.mxu1 %v12763_v15 }
0x2452   : > { %11904 = vmatprep.mubr.msk.f32.mxu0 %vm12762_vm0, %v12761_v0  ;;  %11915 = vmatprep.mubr.msk.f32.mxu1 %vm12762_vm0, %v12761_v0 }
0x2454   : > { %12592 = vmatpush3.bf16.msra.mxu0 %v12591_v45  ;;  %12598 = vmatpush3.bf16.msra.mxu1 %v12597_v28  ;;  %v8860_v45 = vpop.permute.xlu1 %8859 }
0x2455   : > { %12599 = vmatprep.subr.bf16.mxu0 %v12763_v15  ;;  %12605 = vmatprep.subr.bf16.mxu1 %v12763_v15 }
0x2522   : > { %v7994_v43 = vpop.f32.mrb[90].mxu0  ;;  %v8074_v53 = vpop.f32.mrb[90].mxu1 }
0x2523   : > { %v11895_v56 = vpop.f32.mrb[91].mxu1  ;;  %11905 = vmatmul.mubr.msk.f32.vlgmr.msra.gmra.mrb[92].mxu0 %vm465_vm2, %v8074_v53  ;;  %11916 = vmatmul.mubr.msk.f32.vlgmr.msra.gmra.mrb[92].mxu1 %vm465_vm2, %v7994_v43  ;;  %v11884_v57 = vpop.f32.mrb[91].mxu0 }
0x2524   : > { %12601 = vmatpush3.bf16.msra.mxu0 %v14129_v41  ;;  %11926 = vmatprep.mubr.msk.f32.mxu0 %vm12762_vm0, %v12761_v0  ;;  %v10387_v57 = vld [vmem:[%s14513_s8 + $0x18] sm:$0xf] }
0x2525   : > { %12602 = vmatprep.subr.bf16.mxu0 %v12763_v15  ;;  %11937 = vmatprep.mubr.msk.f32.mxu1 %vm12762_vm0, %v12761_v0 }
0x2528   : > { %12604 = vmatpush3.bf16.msra.mxu0 %v12579_v32 }
0x2529   : > { %12611 = vmatprep.subr.bf16.mxu0 %v12763_v15 }
0x252b   : > { %11927 = vmatmul.mubr.msk.f32.vlgmr.msra.gmra.mrb[94].mxu0 %vm465_vm2, %v10354_v55  ;;  %v10390_v55 = vld [vmem:[%s14515_s10 + $0x6] ss:$0 sm:$0xff] }
0x252c   : > { %12613 = vmatpush3.bf16.msra.mxu0 %v14129_v41  ;;  %11948 = vmatprep.mubr.msk.f32.mxu0 %vm12762_vm0, %v12761_v0 }
0x252d   : > { %12614 = vmatprep.subr.bf16.mxu0 %v12763_v15 }
0x2530   : > { %12616 = vmatpush3.bf16.msra.mxu0 %v12579_v32 }
0x2531   : > { %12623 = vmatprep.subr.bf16.mxu0 %v12763_v15 }
0x2533   : > { %11949 = vmatmul.mubr.msk.f32.vlgmr.msra.gmra.mrb[96].mxu0 %vm465_vm2, %v10361_v59  ;;  %v10435_v59 = vld [vmem:[%s14518_s13 + $0x1] ss:$0 sm:$0xff] }
0x2534   : > { %12625 = vmatpush3.bf16.msra.mxu0 %v14129_v41  ;;  %11970 = vmatprep.mubr.msk.f32.mxu0 %vm12762_vm0, %v12761_v0 }
0x2535   : > { %12626 = vmatprep.subr.bf16.mxu0 %v12763_v15 }
0x2538   : > { %12628 = vmatpush3.bf16.msra.mxu0 %v12579_v32 }
0x2539   : > { %12635 = vmatprep.subr.bf16.mxu0 %v12763_v15 }
0x253b   : > { %11971 = vmatmul.mubr.msk.f32.vlgmr.msra.gmra.mrb[98].mxu0 %vm465_vm2, %v10368_v60 }
0x253c   : > { %12637 = vmatpush3.bf16.msra.mxu0 %v14129_v41  ;;  %11992 = vmatprep.mubr.msk.f32.mxu0 %vm12762_vm0, %v12761_v0  ;;  %v10356_v41 = vld [vmem:[%s14506_s1 + $0x4c0] sm:$0xff] }
0x253d   : > { %12638 = vmatprep.subr.bf16.mxu0 %v12763_v15  ;;  %v12606_v63 = vpack.c.bf16 %v10357_v62, %v10356_v41 }
0x253f   : > { %12607 = vmatpush3.bf16.msra.mxu1 %v12606_v63 }
0x2540   : > { %12640 = vmatpush3.bf16.msra.mxu0 %v12579_v32  ;;  %12608 = vmatprep.subr.bf16.mxu1 %v12763_v15 }
0x2541   : > { %12006 = vmatprep.subr.mxu0 %v12761_v0 }
0x2543   : > { %11993 = vmatmul.mubr.msk.f32.vlgmr.msra.gmra.mrb[100].mxu0 %vm465_vm2, %v10375_v61  ;;  %12610 = vmatpush3.bf16.msra.mxu1 %v12609_v58 }
0x2544   : > { %12008 = vmatprep.mubr.msk.f32.mxu0 %vm12762_vm0, %v12761_v0  ;;  %12617 = vmatprep.subr.bf16.mxu1 %v12763_v15 }
0x25f6   : > { %v8152_v2 = vpop.f32.mrb[92].mxu0  ;;  %v8225_v3 = vpop.f32.mrb[92].mxu1 }
0x25f7   : > { %v8226_v4 = vadd.f32 %v8225_v3, %v8152_v2  ;;  %v11906_v5 = vpop.f32.mrb[93].mxu0  ;;  %v11917_v6 = vpop.f32.mrb[93].mxu1 }
0x25f8   : > { %v10388_v5 = vld [vmem:[%s14514_s9 + $0x18] sm:$0xf]  ;;  %v9923_v6 = vld [vmem:[%s14517_s12] sm:$0xff] }
0x25fe   : > { %v8300_v13 = vpop.f32.mrb[94].mxu0 }
0x25ff   : > { %v11928_v14 = vpop.f32.mrb[95].mxu0  ;;  %11938 = vmatmul.mubr.msk.f32.vlgmr.msra.gmra.mrb[94].mxu1 %vm465_vm2, %v8300_v13 }
0x2600   : > { %12619 = vmatpush3.bf16.msra.mxu1 %v12618_v36  ;;  %11959 = vmatprep.mubr.msk.f32.mxu1 %vm12762_vm0, %v12761_v0 }
0x2601   : > { %12620 = vmatprep.subr.bf16.mxu1 %v12763_v15 }
0x2604   : > { %12622 = vmatpush3.bf16.msra.mxu1 %v12621_v18 }
0x2605   : > { %12629 = vmatprep.subr.bf16.mxu1 %v12763_v15 }
0x2606   : > { %v8454_v25 = vpop.f32.mrb[96].mxu0 }
0x2607   : > { %v11950_v26 = vpop.f32.mrb[97].mxu0  ;;  %11960 = vmatmul.mubr.msk.f32.vlgmr.msra.gmra.mrb[96].mxu1 %vm465_vm2, %v8454_v25 }
0x2608   : > { %12631 = vmatpush3.bf16.msra.mxu1 %v12630_v22  ;;  %11981 = vmatprep.mubr.msk.f32.mxu1 %vm12762_vm0, %v12761_v0 }
0x2609   : > { %12632 = vmatprep.subr.bf16.mxu1 %v12763_v15 }
0x260c   : > { %12634 = vmatpush3.bf16.msra.mxu1 %v12633_v27 }
0x260d   : > { %12641 = vmatprep.subr.bf16.mxu1 %v12763_v15 }
0x260e   : > { %v8608_v38 = vpop.f32.mrb[98].mxu0 }
0x260f   : > { %v11972_v9 = vpop.f32.mrb[99].mxu0  ;;  %11982 = vmatmul.mubr.msk.f32.vlgmr.msra.gmra.mrb[98].mxu1 %vm465_vm2, %v8608_v38  ;;  %v9082_v38 = vld [vmem:[%s14506_s1] sm:$0xff] }
0x2610   : > { %12643 = vmatpush3.bf16.msra.mxu1 %v12642_v33  ;;  %12003 = vmatprep.mubr.msk.f32.mxu1 %vm12762_vm0, %v12761_v0  ;;  %v9083_v9 = vld [vmem:[%s14506_s1 + $0x8] sm:$0xff] }
0x2611   : > { %12644 = vmatprep.subr.bf16.mxu1 %v12763_v15 }
0x2614   : > { %12646 = vmatpush3.bf16.msra.mxu1 %v12645_v10 }
0x2615   : > { %12011 = vmatprep.subr.mxu1 %v12761_v0 }
0x2616   : > { %v8762_v39 = vpop.f32.mrb[100].mxu0 }
0x2617   : > { %v11994_v40 = vpop.f32.mrb[101].mxu0  ;;  %12004 = vmatmul.mubr.msk.f32.vlgmr.msra.gmra.mrb[100].mxu1 %vm465_vm2, %v8762_v39  ;;  %v10393_v39 = vld [vmem:[%s14516_s11 + $0x8] sm:$0xff] }
0x2618   : > { %12013 = vmatprep.mubr.msk.f32.mxu1 %vm12762_vm0, %v12761_v0  ;;  %v9005_v40 = vld [vmem:[%s14516_s11] sm:$0xff] }
0x26d2   : > { %v8378_v16 = vpop.f32.mrb[94].mxu1 }
0x26d3   : > { %v8382_v17 = vadd.f32 %v8378_v16, %v8226_v4  ;;  %v11939_v20 = vpop.f32.mrb[95].mxu1  ;;  %v12648_v16 = vpack.c.bf16 %v10397_v37, %v10396_v31 }
0x26d4   : > { %v10398_v20 = vld [vmem:[%s14506_s1 + $0x30] sm:$0xff] }
0x26da   : > { %v8532_v30 = vpop.f32.mrb[96].mxu1 }
0x26db   : > { %v8536_v42 = vadd.f32 %v8532_v30, %v8382_v17  ;;  %v11961_v49 = vpop.f32.mrb[97].mxu1  ;;  %v12654_v17 = vpack.c.bf16 %v9083_v9, %v9082_v38  ;;  %v10399_v30 = vld [vmem:[%s14506_s1 + $0x38] sm:$0xff] }
0x26dc   : > { %v9084_v49 = vld [vmem:[%s14506_s1 + $0x10] sm:$0xff] }
0x26e2   : > { %v8686_v32 = vpop.f32.mrb[98].mxu1 }
0x26e3   : > { %v8690_v50 = vadd.f32 %v8686_v32, %v8536_v42  ;;  %v11983_v51 = vpop.f32.mrb[99].mxu1  ;;  %v12651_v42 = vpack.c.bf16 %v10399_v30, %v10398_v20  ;;  %v9085_v32 = vld [vmem:[%s14506_s1 + $0x18] sm:$0xff] }
0x26e4   : > { %v10405_v51 = vld [vmem:[%s14506_s1 + $0x40] sm:$0xff] }
0x26ea   : > { %v8840_v52 = vpop.f32.mrb[100].mxu1 }
0x26eb   : > { %v8844_v54 = vadd.f32 %v8840_v52, %v8690_v50  ;;  %v12005_v35 = vpop.f32.mrb[101].mxu1  ;;  %v12657_v50 = vpack.c.bf16 %v9085_v32, %v9084_v49  ;;  %v10406_v52 = vld [vmem:[%s14506_s1 + $0x48] sm:$0xff] }
0x26ed   : > { %v8852_v46 = vadd.f32 %v8850_v47, %v8844_v54  ;;  %v12660_v54 = vpack.c.bf16 %v10406_v52, %v10405_v51 }
0x26ef   : > { %12007 = vmatpush3.msk.msra.mxu0 %vm2351_vm4, %v8852_v46  ;;  %v10407_v46 = vld [vmem:[%s14506_s1 + $0x50] sm:$0xff] }
0x26f0   : > { %12009 = vmatmul.mubr.msk.f32.vlgmr.msra.gmra.mrb[102].mxu0 %vm2347_vm5, %v10383_v44  ;;  %12016 = vmatprep.subr.mxu0 %v12761_v0  ;;  %v10408_v44 = vld [vmem:[%s14506_s1 + $0x58] sm:$0xff] }
0x26f1   : > { %12018 = vmatprep.mubr.msk.f32.mxu0 %vm12762_vm0, %v12761_v0 }
0x27c3   : > { %v8934_v28 = vpop.f32.mrb[102].mxu0 }
0x27c4   : > { %v8935_v43 = vadd.f32 %v8934_v28, %v8860_v45  ;;  %v12010_v53 = vpop.f32.mrb[103].mxu0 }
0x27c5   : > { %v12663_v53 = vpack.c.bf16 %v10408_v44, %v10407_v46 }
0x27c6   : > { %v8938_v56 = vsel %vm1412_vm3, %v8935_v43, 0.0 }
0x27c7   : > { %8939 = vadd.xlane.f32.xlu0 %v8938_v56  ;;  %v10413_v56 = vld [vmem:[%s14506_s1 + $0x60] sm:$0xff] }
0x27dd   : > { %8977 = vperm.xlu0 %12737, %v10387_v57   ;;  %v10414_v57 = vld [vmem:[%s14506_s1 + $0x68] sm:$0xff] }
0x27e1   : > { %8999 = vperm.xlu0 %12737, %v10390_v55   ;;  %v10410_v55 = vld [vmem:[%s14516_s11 + $0x18] sm:$0xff] }
0x27e5   : > { %9940 = vperm.xlu0 %12737, %v10435_v59   ;;  %v12666_v59 = vpack.c.bf16 %v10414_v57, %v10413_v56 }
0x2854   : > { %v8940_v60 = vpop.xlane.xlu0 %8939 }
0x2855   : > { %v8941_v61 = vrot.slane %v8940_v60, 4 }
0x2857   : > { %v8942_v41 = vadd.f32 %v8941_v61, %v8940_v60  ;;  %v10415_v60 = vld [vmem:[%s14506_s1 + $0x70] sm:$0xff]  ;;  %v10416_v61 = vld [vmem:[%s14506_s1 + $0x78] sm:$0xff] }
0x2859   : > { %v8943_v62 = vrot.slane %v8942_v41, 2 }
0x285b   : > { %v8944_v63 = vadd.f32 %v8943_v62, %v8942_v41  ;;  %v12669_v41 = vpack.c.bf16 %v10416_v61, %v10415_v60 }
0x285c   : > { %v8978_v23 = vpop.permute.xlu0 %8977 }
0x285d   : > { %v8945_v1 = vrot.slane %v8944_v63, 1 }
0x285f   : > { %v8946_v48 = vadd.f32 %v8945_v1, %v8944_v63 }
0x2860   : > { %v9000_v29 = vpop.permute.xlu0 %8999 }
0x2861   : > { %12719 = vpush %v8946_v48 }
0x2892   : > { %s12720_s16 = spop %12719 }
0x2893   : > { %s8950_s17 = smul.f32 0.0078125, %s12720_s16 }
0x2895   : > { %v8951_v58 = vstv %s8950_s17 }
0x2896   : > { %v8952_v2 = vsub.f32 %v8935_v43, %v8951_v58  ;;  %v10402_v43 = vld [vmem:[%s14516_s11 + $0x10] sm:$0xff] }
0x2898   : > { %v8953_v3 = vmul.f32 %v8952_v2, %v8952_v2 }
0x289a   : > { %v8954_v4 = vsel %vm1412_vm3, %v8953_v3, 0.0  ;;  %v10421_v3 = vld [vmem:[%s14506_s1 + $0x80] sm:$0xff] }
0x289b   : > { %8955 = vadd.xlane.f32.xlu1 %v8954_v4  ;;  %v10422_v4 = vld [vmem:[%s14506_s1 + $0x88] sm:$0xff] }
0x28ac   : > { %8985 = vperm.xlu1 %12738, %v10388_v5  }
0x28b0   : > { %9926 = vperm.xlu1 %12738, %v9923_v6   ;;  %v10418_v6 = vld [vmem:[%s14516_s11 + $0x20] sm:$0xff] }
0x2928   : > { %v8956_v7 = vpop.xlane.xlu1 %8955 }
0x2929   : > { %v8957_v8 = vrot.slane %v8956_v7, 4 }
0x292b   : > { %v8958_v36 = vadd.f32 %v8957_v8, %v8956_v7  ;;  %v12672_v7 = vpack.c.bf16 %v10422_v4, %v10421_v3 }
0x292c   : > { %v8986_v25 = vpop.permute.xlu1 %8985 }
0x292d   : > { %v8959_v11 = vrot.slane %v8958_v36, 2 }
0x292f   : > { %v8960_v12 = vadd.f32 %v8959_v11, %v8958_v36  ;;  %v10426_v11 = vld [vmem:[%s14516_s11 + $0x28] sm:$0xff] }
0x2931   : > { %v8961_v13 = vrot.slane %v8960_v12, 1 }
0x2933   : > { %v8962_v14 = vadd.f32 %v8961_v13, %v8960_v12  ;;  %v10423_v12 = vld [vmem:[%s14506_s1 + $0x90] sm:$0xff]  ;;  %v10424_v13 = vld [vmem:[%s14506_s1 + $0x98] sm:$0xff] }
0x2935   : > { %12721 = vpush %v8962_v14  ;;  %v10429_v14 = vld [vmem:[%s14506_s1 + $0xa0] sm:$0xff] }
0x2966   : > { %s12722_s22 = spop %12721 }
0x2967   : > { %s8966_s23 = smul.f32 0.0078125, %s12722_s22 }
0x2969   : > { %s8967_s24 = sadd.f32 1e-08, %s8966_s23  ;;  %s462_s23 = scalar_lea.vmem %s14519_s14, %s10005_s15 }
0x296b   : > { %v8968_v18 = vstv %s8967_s24 }
0x296c   : > { %12751 = vrsqrt.f32 %v8968_v18  ;;  %v12675_v18 = vpack.c.bf16 %v10424_v13, %v10423_v12 }
0x2976   : > { %v12752_v19 = vpop.eup %12751 }
0x2977   : > { %12723 = vpush %v12752_v19  ;;  %v10430_v19 = vld [vmem:[%s14506_s1 + $0xa8] sm:$0xff] }
0x29a8   : > { %s12724_s25 = spop %12723 }
0x29a9   : > { %v8971_v21 = vstv %s12724_s25 }
0x29aa   : > { %v8972_v22 = vmul.f32 %v8971_v21, %v8952_v2  ;;  %v12678_v21 = vpack.c.bf16 %v10430_v19, %v10429_v14 }
0x29ac   : > { %v8980_v24 = vmul.f32 %v8978_v23, %v8972_v22  ;;  %v10432_v22 = vld [vmem:[%s14506_s1 + $0xb8] sm:$0xff] }
0x29ae   : > { %v8988_v26 = vadd.f32 %v8986_v25, %v8980_v24 }
0x29b0   : > { %v8992_v27 = vmin.f32 %v8988_v26, 0.0  ;;  %v8991_v33 = vmax.f32 %v8988_v26, 0.0 }
0x29b2   : > { %v9002_v34 = vmul.f32 %v9000_v29, %v8992_v27 }
0x29b4   : > { %v14354_v10 = vadd.f32 %v9002_v34, %v8991_v33 }
0x29b6   : > { %9004 = vst.msk [vmem:[#allocation2 + $0x1c] sm:$0xf] %vm1412_vm3, %v14354_v10  ;;  %12012 = vmatpush3.msk.msra.mxu1 %vm2351_vm4, %v14354_v10  ;;  %12017 = vmatpush3.msk.msra.mxu0 %vm2351_vm4, %v14354_v10 }
0x29b7   : > { %12019 = vmatmul.mubr.msk.f32.vlgmr.msra.gmra.mrb[104].mxu0 %vm2347_vm5, %v10393_v39  ;;  %12014 = vmatmul.mubr.msk.f32.vlgmr.msra.gmra.mrb[102].mxu1 %vm2347_vm5, %v9005_v40 }
0x29b8   : > { %12647 = vmatprep.subr.bf16.mxu1 %v12763_v15  ;;  %12653 = vmatprep.subr.bf16.mxu0 %v12763_v15 }
0x29b9   : > { %12649 = vmatpush3.bf16.msra.mxu1 %v12648_v16  ;;  %12655 = vmatpush3.bf16.msra.mxu0 %v12654_v17  ;;  %v9927_v17 = vpop.permute.xlu1 %9926 }
0x29ba   : > { %12650 = vmatprep.subr.bf16.mxu1 %v12763_v15  ;;  %12029 = vmatprep.mubr.msk.f32.mxu1 %vm12762_vm0, %v12761_v0 }
0x29bb   : > { %12656 = vmatprep.subr.bf16.mxu0 %v12763_v15  ;;  %12040 = vmatprep.mubr.msk.f32.mxu0 %vm12762_vm0, %v12761_v0 }
0x29bd   : > { %12652 = vmatpush3.bf16.msra.mxu1 %v12651_v42  ;;  %12658 = vmatpush3.bf16.msra.mxu0 %v12657_v50  ;;  %v9941_v42 = vpop.permute.xlu0 %9940 }
0x29be   : > { %12043 = vmatprep.subr.mxu1 %v12761_v0  ;;  %12659 = vmatprep.subr.bf16.mxu0 %v12763_v15 }
0x2a8a   : > { %v9157_v35 = vpop.f32.mrb[104].mxu0  ;;  %v9078_v47 = vpop.f32.mrb[102].mxu1 }
0x2a8b   : > { %12030 = vmatmul.mubr.msk.f32.vlgmr.msra.gmra.mrb[104].mxu1 %vm465_vm2, %v9157_v35  ;;  %v12020_v45 = vpop.f32.mrb[105].mxu0  ;;  %12041 = vmatmul.mubr.msk.f32.vlgmr.msra.gmra.mrb[106].mxu0 %vm465_vm2, %v9078_v47  ;;  %v12015_v28 = vpop.f32.mrb[103].mxu1 }
0x2a8c   : > { %12044 = vmatpush3.msk.msra.mxu1 %vm2351_vm4, %v14354_v10  ;;  %12045 = vmatprep.mubr.msk.f32.mxu1 %vm12762_vm0, %v12761_v0 }
0x2a8d   : > { %12059 = vmatprep.subr.mxu1 %v12761_v0  ;;  %12661 = vmatpush3.bf16.msra.mxu0 %v12660_v54 }
0x2a8e   : > { %12662 = vmatprep.subr.bf16.mxu0 %v12763_v15  ;;  %12056 = vmatprep.mubr.msk.f32.mxu0 %vm12762_vm0, %v12761_v0 }
0x2a8f   : > { %12046 = vmatmul.mubr.msk.f32.vlgmr.msra.gmra.mrb[106].mxu1 %vm2347_vm5, %v10402_v43 }
0x2a90   : > { %12060 = vmatpush3.msk.msra.mxu1 %vm2351_vm4, %v14354_v10  ;;  %12061 = vmatprep.mubr.msk.f32.mxu1 %vm12762_vm0, %v12761_v0 }
0x2a91   : > { %12665 = vmatprep.subr.bf16.mxu1 %v12763_v15  ;;  %12664 = vmatpush3.bf16.msra.mxu0 %v12663_v53 }
0x2a92   : > { %12075 = vmatprep.subr.mxu0 %v12761_v0 }
0x2a93   : > { %12062 = vmatmul.mubr.msk.f32.vlgmr.msra.gmra.mrb[108].mxu1 %vm2347_vm5, %v10410_v55 }
0x2a94   : > { %12667 = vmatpush3.bf16.msra.mxu1 %v12666_v59  ;;  %12072 = vmatprep.mubr.msk.f32.mxu1 %vm12762_vm0, %v12761_v0 }
0x2a95   : > { %12668 = vmatprep.subr.bf16.mxu1 %v12763_v15 }
0x2a98   : > { %12670 = vmatpush3.bf16.msra.mxu1 %v12669_v41 }
0x2a99   : > { %12091 = vmatprep.subr.mxu1 %v12761_v0 }
0x2b5e   : > { %v9234_v62 = vpop.f32.mrb[104].mxu1  ;;  %v9307_v63 = vpop.f32.mrb[106].mxu0 }
0x2b5f   : > { %v12031_v1 = vpop.f32.mrb[105].mxu1  ;;  %v9308_v48 = vadd.f32 %v9307_v63, %v9234_v62  ;;  %v12042_v58 = vpop.f32.mrb[107].mxu0 }
0x2b62   : > { %v9382_v2 = vpop.f32.mrb[106].mxu1 }
0x2b63   : > { %12057 = vmatmul.mubr.msk.f32.vlgmr.msra.gmra.mrb[108].mxu0 %vm465_vm2, %v9382_v2  ;;  %v12047_v5 = vpop.f32.mrb[107].mxu1 }
0x2b64   : > { %12076 = vmatpush3.msk.msra.mxu0 %vm2351_vm4, %v14354_v10  ;;  %12077 = vmatprep.mubr.msk.f32.mxu0 %vm12762_vm0, %v12761_v0 }
0x2b65   : > { %12671 = vmatprep.subr.bf16.mxu0 %v12763_v15 }
0x2b66   : > { %v9535_v8 = vpop.f32.mrb[108].mxu1 }
0x2b67   : > { %12073 = vmatmul.mubr.msk.f32.vlgmr.msra.gmra.mrb[110].mxu1 %vm465_vm2, %v9535_v8  ;;  %12078 = vmatmul.mubr.msk.f32.vlgmr.msra.gmra.mrb[110].mxu0 %vm2347_vm5, %v10418_v6  ;;  %v12063_v36 = vpop.f32.mrb[109].mxu1 }
0x2b68   : > { %12092 = vmatpush3.msk.msra.mxu1 %vm2351_vm4, %v14354_v10  ;;  %12093 = vmatprep.mubr.msk.f32.mxu1 %vm12762_vm0, %v12761_v0 }
0x2b69   : > { %12673 = vmatpush3.bf16.msra.mxu0 %v12672_v7  ;;  %12677 = vmatprep.subr.bf16.mxu1 %v12763_v15 }
0x2b6a   : > { %12674 = vmatprep.subr.bf16.mxu0 %v12763_v15  ;;  %12088 = vmatprep.mubr.msk.f32.mxu0 %vm12762_vm0, %v12761_v0 }
0x2b6b   : > { %12094 = vmatmul.mubr.msk.f32.vlgmr.msra.gmra.mrb[112].mxu1 %vm2347_vm5, %v10426_v11 }
0x2b6c   : > { %12104 = vmatprep.mubr.msk.f32.mxu1 %vm12762_vm0, %v12761_v0  ;;  %12679 = vmatpush3.bf16.msra.mxu1 %v12678_v21  ;;  %v10431_v0 = vld [vmem:[%s14506_s1 + $0xb0] sm:$0xff] }
0x2b6d   : > { %12676 = vmatpush3.bf16.msra.mxu0 %v12675_v18  ;;  %12680 = vmatprep.subr.bf16.mxu1 %v12763_v15  ;;  %v12681_v23 = vpack.c.bf16 %v10432_v22, %v10431_v0 }
0x2b70   : > { %12682 = vmatpush3.bf16.msra.mxu1 %v12681_v23 }
0x2c36   : > { %v9459_v24 = vpop.f32.mrb[108].mxu0 }
0x2c37   : > { %v9463_v25 = vadd.f32 %v9459_v24, %v9308_v48  ;;  %v12058_v26 = vpop.f32.mrb[109].mxu0 }
0x2c3a   : > { %v9612_v27 = vpop.f32.mrb[110].mxu1  ;;  %v9688_v29 = vpop.f32.mrb[110].mxu0 }
0x2c3b   : > { %v9616_v31 = vadd.f32 %v9612_v27, %v9463_v25  ;;  %12089 = vmatmul.mubr.msk.f32.vlgmr.msra.gmra.mrb[112].mxu0 %vm465_vm2, %v9688_v29  ;;  %v12074_v33 = vpop.f32.mrb[111].mxu1  ;;  %v12079_v34 = vpop.f32.mrb[111].mxu0 }
0x2c3e   : > { %v9841_v37 = vpop.f32.mrb[112].mxu1 }
0x2c3f   : > { %12105 = vmatmul.mubr.msk.f32.vlgmr.msra.gmra.mrb[114].mxu1 %vm465_vm2, %v9841_v37  ;;  %v12095_v38 = vpop.f32.mrb[113].mxu1 }
0x2d0e   : > { %v9765_v9 = vpop.f32.mrb[112].mxu0 }
0x2d0f   : > { %v9769_v10 = vadd.f32 %v9765_v9, %v9616_v31  ;;  %v12090_v15 = vpop.f32.mrb[113].mxu0 }
0x2d12   : > { %v9918_v39 = vpop.f32.mrb[114].mxu1 }
0x2d13   : > { %v9922_v40 = vadd.f32 %v9918_v39, %v9769_v10  ;;  %v12106_v16 = vpop.f32.mrb[115].mxu1 }
0x2d15   : > { %v9929_v20 = vadd.f32 %v9927_v17, %v9922_v40 }
0x2d17   : > { %v9933_v30 = vmin.f32 %v9929_v20, 0.0  ;;  %v9932_v49 = vmax.f32 %v9929_v20, 0.0 }
0x2d19   : > { %v9943_v32 = vmul.f32 %v9941_v42, %v9933_v30 }
0x2d1b   : > { %v9944_v50 = vadd.f32 %v9943_v32, %v9932_v49 }
0x2d1d   : > { %v9945_v51 = vpack.c.bf16 %v9944_v50, %v9944_v50 }
0x2d1f   : > { %9946 = vst.msk [vmem:[%s462_s23] sm:$0xf] %vm1412_vm3, %v9945_v51 }
0x2d20 PF: > { %s24_s29 = sadd.s32 1, %s12759_s29  }
0x2d21   : > { %p21_p4 = scmp.ge.s32.totalorder %s24_s29, 4  }
0x2d23   :  { %23 = sbr.rel (!%p21_p4) target bundleno = 1 (0x1), region = 235 }

// kernel: msfed4_forward.32
= control target key start
LH: loop header
LB: loop body
LE: loop exit
PB: predicated region body
PF: predicated region fallthrough
CT: control target
= control target key end

     0   :  { %s456_s17 = smov 0   ;;  %s486_s0 = inlined_call_operand.vmem [shape: bf16[16,24], index: 0, kind: input, shape index: {}]   ;;  %s487_s1 = inlined_call_operand.vmem [shape: bf16[2,24,128], index: 1, kind: input, shape index: {}]   ;;  %s488_s2 = inlined_call_operand.vmem [shape: f32[16,1], index: 2, kind: input, shape index: {}]   ;;  %s489_s3 = inlined_call_operand.<no memory space> [shape: f32[1,1], index: 3, kind: input, shape index: {}]   ;;  %s490_s4 = inlined_call_operand.vmem [shape: bf16[2,16,128], index: 4, kind: output, shape index: {}]  }
   0x1   :  { %v9_v0 = vstv %s489_s3 }
   0x2   :  { %10 = vst [vmem:[#allocation2] sm:$0x1] %v9_v0 }
   0x3 LB: > { %s364_s18 = sadd.s32 4294967295, %s423_s17   ;;  %p368_p0 = scmp.ge.s32.totalorder %s423_s17, 1  ;;  %s423_s17 = sphi %s456_s17, %s16_s17  }
   0x4   : > { %p164_p1 = scmp.lt.s32.totalorder %s423_s17, 3 }
   0x6   : > { %p165_p2 = pnand %p368_p0, %p164_p1 }
   0x7   : > { %p190_p3 = scmp.lt.s32.totalorder (!%p165_p2), %s364_s18, 1  ;;  %v425_v1 = vmov (!%p165_p2), 0.0   ;;  %vm426_vm0 = vmmov (!%p165_p2), 0   ;;  %v206_v2 = vld [vmem:[%s488_s2] sm:$0xff] (!%p165_p2)  ;;  %v427_v3 = vmov (!%p165_p2), 0   ;;  %v207_v5 = vld [vmem:[%s488_s2 + $0x8] sm:$0xff] (!%p165_p2) }
   0x8   : > { %168 = sbr.rel (%p165_p2) target bundleno = 252 (0xfc), region = 36  ;;  %392 = vmatprep.subr.bf16.mxu0 (!%p165_p2), %v425_v1  ;;  %396 = vmatprep.mubr.msk.bf16.mxu0 (!%p165_p2), %vm426_vm0, %v425_v1  ;;  %vm236_vm1 = vcmask (!%p165_p2), 1043456   ;;  %v416_v9 = vld [vmem:[%s486_s0] sm:$0xff] (!%p165_p2)   ;;  %vm232_vm2 = vcmask (!%p165_p2), 195584  }
   0x9   : > { %412 = vset.pattern.permute.xlu0 (!%p165_p2), %v427_v3  ;;  %413 = vset.pattern.permute.xlu1 (!%p165_p2), %v427_v3  ;;  %v376_v4 = vld [vmem:[#allocation2] ss:$0 sm:$0xff] (!%p165_p2) }
   0xa   : > { %210 = vperm.xlu0 (!%p165_p2), %412, %v206_v2   ;;  %292 = vperm.xlu1 (!%p165_p2), %413, %v376_v4  }
   0xe   : > { %215 = vperm.xlu0 (!%p165_p2), %412, %v207_v5  }
   0xf   : > { %s492_s18 = smov (!%p190_p3, %s364_s18), 1 }
  0x10   : > { %s400_s20 = smul.u32 12, %s492_s18  ;;  %s381_s28 = sshll.u32 %s492_s18, 3 }
  0x11   : > { %s199_s5 = scalar_lea.vmem %s490_s4, %s381_s28 }
  0x12   : > { %s194_s25 = scalar_lea.vmem %s487_s1, %s400_s20 }
  0x13   : > { %v414_v6 = vld [vmem:[%s194_s25] sm:$0xff]   ;;  %v415_v7 = vld [vmem:[%s194_s25 + $0x8] ss:$0 sps:$4 sm:$0xff]  }
  0x14   : > { %393 = vmatpush3.bf16.msra.mxu0 %v414_v6  ;;  %v238_v8 = vsel %vm236_vm1, %v415_v7, 0 }
  0x15   : > { %394 = vmatprep.subr.bf16.mxu0 %v425_v1 }
  0x18   : > { %395 = vmatpush3.bf16.msra.mxu0 %v238_v8 }
  0x1b   : > { %397 = vmatmul.mubr.msk.bf16.vlgmr.msra.gmra.mrb[0].mxu0 %vm232_vm2, %v416_v9 }
  0x89   : > { %v211_v10 = vpop.permute.xlu0 %210  ;;  %v293_v14 = vpop.permute.xlu1 %292 }
  0x8d   : > { %v216_v15 = vpop.permute.xlu0 %215 }
  0xee   : > { %v274_v11 = vpop.f32.mrb[0].mxu0 }
  0xef   : > { %v275_v12 = vadd.f32 %v274_v11, %v211_v10  ;;  %v398_v13 = vpop.f32.mrb[1].mxu0 }
  0xf0   : > { %v277_v16 = vpop.f32.mrb[2].mxu0 }
  0xf1   : > { %v278_v17 = vadd.f32 %v277_v16, %v216_v15  ;;  %v399_v18 = vpop.f32.mrb[3].mxu0  ;;  %v284_v19 = vmin.f32 %v275_v12, 0.0  ;;  %v282_v22 = vmax.f32 %v275_v12, 0.0 }
  0xf3   : > { %v285_v20 = vmin.f32 %v278_v17, 0.0  ;;  %v295_v21 = vmul.f32 %v293_v14, %v284_v19  ;;  %v283_v23 = vmax.f32 %v278_v17, 0.0 }
  0xf5   : > { %v296_v24 = vmul.f32 %v293_v14, %v285_v20  ;;  %v297_v25 = vadd.f32 %v295_v21, %v282_v22 }
  0xf7   : > { %v298_v26 = vadd.f32 %v296_v24, %v283_v23 }
  0xf9   : > { %v387_v27 = vpack.c.bf16 %v298_v26, %v297_v25 }
  0xfb   : > { %388 = vst [vmem:[%s199_s5] sm:$0xff] %v387_v27  }
  0xfc PF: > { %s16_s17 = sadd.s32 1, %s423_s17  }
  0xfd   : > { %p13_p4 = scmp.ge.s32.totalorder %s16_s17, 4  }
  0xff   :  { %15 = sbr.rel (!%p13_p4) target bundleno = 3 (0x3), region = 66 }

// kernel: msfed4_forward.33
= control target key start
LH: loop header
LB: loop body
LE: loop exit
PB: predicated region body
PF: predicated region fallthrough
CT: control target
= control target key end

     0   :  { %s646_s23 = smov 0   ;;  %s688_s0 = inlined_call_operand.vmem [shape: bf16[16,96], index: 0, kind: input, shape index: {}]   ;;  %s689_s1 = inlined_call_operand.vmem [shape: bf16[2,96,128], index: 1, kind: input, shape index: {}]   ;;  %s690_s2 = inlined_call_operand.vmem [shape: f32[16,1], index: 2, kind: input, shape index: {}]   ;;  %s691_s3 = inlined_call_operand.vmem [shape: f32[16,1], index: 3, kind: input, shape index: {}]   ;;  %s692_s4 = inlined_call_operand.vmem [shape: f32[16,1], index: 4, kind: input, shape index: {}]   ;;  %s693_s5 = inlined_call_operand.<no memory space> [shape: f32[1,1], index: 5, kind: input, shape index: {}]   ;;  %s694_s6 = inlined_call_operand.vmem [shape: bf16[2,16,128], index: 6, kind: output, shape index: {}]  }
   0x1   :  { %v11_v0 = vstv %s693_s5 }
   0x2   :  { %12 = vst [vmem:[#allocation2] sm:$0x1] %v11_v0 }
   0x3 LB: > { %s516_s24 = sadd.s32 4294967295, %s603_s23   ;;  %p520_p0 = scmp.ge.s32.totalorder %s603_s23, 1  ;;  %s603_s23 = sphi %s646_s23, %s18_s23  }
   0x4   : > { %p214_p1 = scmp.lt.s32.totalorder %s603_s23, 3 }
   0x6   : > { %p215_p2 = pnand %p520_p0, %p214_p1 }
   0x7   : > { %p244_p3 = scmp.lt.s32.totalorder (!%p215_p2), %s516_s24, 1  ;;  %v605_v1 = vmov (!%p215_p2), 0.0   ;;  %vm606_vm0 = vmmov (!%p215_p2), 0   ;;  %v269_v2 = vld [vmem:[%s690_s2] sm:$0xff] (!%p215_p2)  ;;  %v607_v3 = vmov (!%p215_p2), 0   ;;  %v270_v4 = vld [vmem:[%s690_s2 + $0x8] sm:$0xff] (!%p215_p2) }
   0x8   : > { %218 = sbr.rel (%p215_p2) target bundleno = 760 (0x2f8), region = 44  ;;  %552 = vmatprep.subr.bf16.mxu0 (!%p215_p2), %v605_v1  ;;  %564 = vmatprep.mubr.msk.bf16.mxu0 (!%p215_p2), %vm606_vm0, %v605_v1  ;;  %v405_v6 = vld [vmem:[%s691_s3] sm:$0xff] (!%p215_p2)  ;;  %v420_v10 = vld [vmem:[%s692_s4 + $0x8] sm:$0xff] (!%p215_p2)  ;;  %vm322_vm1 = vcmask (!%p215_p2), 785408  }
   0x9   : > { %586 = vset.pattern.permute.xlu0 (!%p215_p2), %v607_v3  ;;  %587 = vset.pattern.permute.xlu1 (!%p215_p2), %v607_v3  ;;  %v419_v8 = vld [vmem:[%s692_s4] sm:$0xff] (!%p215_p2)  ;;  %v406_v38 = vld [vmem:[%s691_s3 + $0x8] sm:$0xff] (!%p215_p2) }
   0xa   : > { %273 = vperm.xlu0 (!%p215_p2), %586, %v269_v2   ;;  %v532_v12 = vld [vmem:[#allocation2] ss:$0 sm:$0xff] (!%p215_p2) }
   0xb   : > { %v594_v15 = vld [vmem:[%s688_s0] sm:$0xff] (!%p215_p2)  }
   0xe   : > { %278 = vperm.xlu0 (!%p215_p2), %586, %v270_v4  }
   0xf   : > { %s696_s24 = smov (!%p244_p3, %s516_s24), 1 }
  0x10   : > { %s568_s26 = smul.u32 48, %s696_s24  ;;  %s537_s25 = sshll.u32 %s696_s24, 3 }
  0x11   : > { %s253_s28 = scalar_lea.vmem %s694_s6, %s537_s25 }
  0x12   : > { %s248_s7 = scalar_lea.vmem %s689_s1, %s568_s26  ;;  %409 = vperm.xlu0 %586, %v405_v6  }
  0x13   : > { %v588_v5 = vld [vmem:[%s248_s7] sm:$0xff]   ;;  %v589_v7 = vld [vmem:[%s248_s7 + $0x8] sm:$0xff]   ;;  %v590_v9 = vld [vmem:[%s248_s7 + $0x10] sm:$0xff]  }
  0x14   : > { %553 = vmatpush3.bf16.msra.mxu0 %v588_v5  ;;  %v591_v11 = vld [vmem:[%s248_s7 + $0x18] sm:$0xff]   ;;  %v592_v13 = vld [vmem:[%s248_s7 + $0x20] sm:$0xff]   ;;  %v593_v14 = vld [vmem:[%s248_s7 + $0x28] sm:$0xff]  }
  0x15   : > { %554 = vmatprep.subr.bf16.mxu0 %v605_v1 }
  0x16   : > { %423 = vperm.xlu0 %586, %v419_v8  }
  0x18   : > { %555 = vmatpush3.bf16.msra.mxu0 %v589_v7 }
  0x19   : > { %556 = vmatprep.subr.bf16.mxu0 %v605_v1 }
  0x1a   : > { %428 = vperm.xlu0 %586, %v420_v10  }
  0x1c   : > { %557 = vmatpush3.bf16.msra.mxu0 %v590_v9 }
  0x1d   : > { %558 = vmatprep.subr.bf16.mxu0 %v605_v1 }
  0x1e   : > { %444 = vperm.xlu0 %586, %v532_v12  }
  0x20   : > { %559 = vmatpush3.bf16.msra.mxu0 %v591_v11 }
  0x21   : > { %560 = vmatprep.subr.bf16.mxu0 %v605_v1 }
  0x24   : > { %561 = vmatpush3.bf16.msra.mxu0 %v592_v13 }
  0x25   : > { %562 = vmatprep.subr.bf16.mxu0 %v605_v1 }
  0x28   : > { %563 = vmatpush3.bf16.msra.mxu0 %v593_v14 }
  0x2b   : > { %565 = vmatmul.mubr.msk.bf16.vlgmr.msra.gmra.mrb[0].mxu0 %vm322_vm1, %v594_v15 }
  0x89   : > { %v274_v16 = vpop.permute.xlu0 %273 }
  0x8d   : > { %v279_v19 = vpop.permute.xlu0 %278 }
  0x91   : > { %v410_v48 = vpop.permute.xlu0 %409 }
  0x95   : > { %v424_v49 = vpop.permute.xlu0 %423 }
  0x99   : > { %v429_v54 = vpop.permute.xlu0 %428 }
  0x9d   : > { %v445_v61 = vpop.permute.xlu0 %444 }
  0xfe   : > { %v360_v17 = vpop.f32.mrb[0].mxu0 }
  0xff   : > { %v566_v18 = vpop.f32.mrb[1].mxu0  ;;  %v361_v21 = vadd.f32 %v360_v17, %v274_v16 }
 0x100   : > { %v363_v20 = vpop.f32.mrb[2].mxu0 }
 0x101   : > { %v364_v22 = vadd.f32 %v363_v20, %v279_v19  ;;  %v567_v23 = vpop.f32.mrb[3].mxu0 }
 0x103   : > { %v367_v24 = vadd.f32 %v364_v22, %v361_v21 }
 0x105   : > { %368 = vadd.xlane.f32.xlu1 %v367_v24 }
 0x192   : > { %v369_v25 = vpop.xlane.xlu1 %368 }
 0x193   : > { %v370_v26 = vrot.slane %v369_v25, 4 }
 0x195   : > { %v371_v27 = vadd.f32 %v370_v26, %v369_v25 }
 0x197   : > { %v372_v28 = vrot.slane %v371_v27, 2 }
 0x199   : > { %v373_v29 = vadd.f32 %v372_v28, %v371_v27 }
 0x19b   : > { %v374_v30 = vrot.slane %v373_v29, 1 }
 0x19d   : > { %v375_v31 = vadd.f32 %v374_v30, %v373_v29 }
 0x19f   : > { %569 = vpush %v375_v31 }
 0x1d0   : > { %s570_s16 = spop %569 }
 0x1d1   : > { %s379_s17 = smul.f32 0.00048828125, %s570_s16 }
 0x1d3   : > { %v380_v32 = vstv %s379_s17 }
 0x1d4   : > { %v381_v33 = vsub.f32 %v361_v21, %v380_v32  ;;  %v382_v34 = vsub.f32 %v364_v22, %v380_v32 }
 0x1d6   : > { %v383_v35 = vmul.f32 %v381_v33, %v381_v33  ;;  %v384_v36 = vmul.f32 %v382_v34, %v382_v34 }
 0x1d8   : > { %v385_v37 = vadd.f32 %v384_v36, %v383_v35 }
 0x1da   : > { %386 = vadd.xlane.f32.xlu1 %v385_v37 }
 0x1eb   : > { %414 = vperm.xlu1 %587, %v406_v38  }
 0x267   : > { %v387_v39 = vpop.xlane.xlu1 %386 }
 0x268   : > { %v388_v40 = vrot.slane %v387_v39, 4 }
 0x26a   : > { %v389_v41 = vadd.f32 %v388_v40, %v387_v39 }
 0x26b   : > { %v415_v51 = vpop.permute.xlu1 %414 }
 0x26c   : > { %v390_v42 = vrot.slane %v389_v41, 2 }
 0x26e   : > { %v391_v43 = vadd.f32 %v390_v42, %v389_v41 }
 0x270   : > { %v392_v44 = vrot.slane %v391_v43, 1 }
 0x272   : > { %v393_v45 = vadd.f32 %v392_v44, %v391_v43 }
 0x274   : > { %571 = vpush %v393_v45 }
 0x2a5   : > { %s572_s20 = spop %571 }
 0x2a6   : > { %s397_s21 = smul.f32 0.00048828125, %s572_s20 }
 0x2a8   : > { %s398_s22 = sadd.f32 1e-08, %s397_s21 }
 0x2aa   : > { %v399_v46 = vstv %s398_s22 }
 0x2ab   : > { %595 = vrsqrt.f32 %v399_v46 }
 0x2b5   : > { %v596_v47 = vpop.eup %595 }
 0x2b6   : > { %573 = vpush %v596_v47 }
 0x2e7   : > { %s574_s5 = spop %573 }
 0x2e8   : > { %v402_v50 = vstv %s574_s5 }
 0x2e9   : > { %v403_v52 = vmul.f32 %v402_v50, %v381_v33  ;;  %v404_v53 = vmul.f32 %v402_v50, %v382_v34 }
 0x2eb   : > { %v417_v55 = vmul.f32 %v410_v48, %v403_v52  ;;  %v418_v56 = vmul.f32 %v415_v51, %v404_v53 }
 0x2ed   : > { %v431_v57 = vadd.f32 %v424_v49, %v417_v55  ;;  %v432_v58 = vadd.f32 %v429_v54, %v418_v56 }
 0x2ef   : > { %v436_v59 = vmin.f32 %v431_v57, 0.0  ;;  %v437_v60 = vmin.f32 %v432_v58, 0.0  ;;  %v434_v62 = vmax.f32 %v431_v57, 0.0  ;;  %v435_v0 = vmax.f32 %v432_v58, 0.0 }
 0x2f1   : > { %v447_v63 = vmul.f32 %v445_v61, %v436_v59  ;;  %v448_v1 = vmul.f32 %v445_v61, %v437_v60 }
 0x2f3   : > { %v449_v2 = vadd.f32 %v447_v63, %v434_v62  ;;  %v450_v3 = vadd.f32 %v448_v1, %v435_v0 }
 0x2f5   : > { %v543_v4 = vpack.c.bf16 %v450_v3, %v449_v2 }
 0x2f7   : > { %544 = vst [vmem:[%s253_s28] sm:$0xff] %v543_v4  }
 0x2f8 PF: > { %s18_s23 = sadd.s32 1, %s603_s23  }
 0x2f9   : > { %p15_p4 = scmp.ge.s32.totalorder %s18_s23, 4  }
 0x2fb   :  { %17 = sbr.rel (!%p15_p4) target bundleno = 3 (0x3), region = 74 }

// kernel: msfed4_forward.34
= control target key start
LH: loop header
LB: loop body
LE: loop exit
PB: predicated region body
PF: predicated region fallthrough
CT: control target
= control target key end

     0   :  { %s465_s17 = smov 0   ;;  %s495_s0 = inlined_call_operand.vmem [shape: bf16[16,24], index: 0, kind: input, shape index: {}]   ;;  %s496_s1 = inlined_call_operand.vmem [shape: bf16[2,24,256], index: 1, kind: input, shape index: {}]   ;;  %s497_s2 = inlined_call_operand.vmem [shape: f32[16,1], index: 2, kind: input, shape index: {}]   ;;  %s498_s3 = inlined_call_operand.<no memory space> [shape: f32[1,1], index: 3, kind: input, shape index: {}]   ;;  %s499_s4 = inlined_call_operand.vmem [shape: bf16[2,16,256], index: 4, kind: output, shape index: {}]  }
   0x1   :  { %v9_v0 = vstv %s498_s3 }
   0x2   :  { %10 = vst [vmem:[#allocation2] sm:$0x1] %v9_v0 }
   0x3 LB: > { %s387_s18 = sadd.s32 4294967295, %s434_s17   ;;  %p391_p0 = scmp.ge.s32.totalorder %s434_s17, 1  ;;  %s434_s17 = sphi %s465_s17, %s16_s17  }
   0x4   : > { %p164_p1 = scmp.lt.s32.totalorder %s434_s17, 3 }
   0x6   : > { %p165_p2 = pnand %p391_p0, %p164_p1 }
   0x7   : > { %p190_p3 = scmp.lt.s32.totalorder (!%p165_p2), %s387_s18, 1  ;;  %v436_v1 = vmov (!%p165_p2), 0   ;;  %v206_v2 = vld [vmem:[%s497_s2] sm:$0xff] (!%p165_p2)  ;;  %v207_v4 = vld [vmem:[%s497_s2 + $0x8] sm:$0xff] (!%p165_p2)  ;;  %vm242_vm0 = vcmask (!%p165_p2), 1043456   ;;  %vm238_vm1 = vcmask (!%p165_p2), 195584  }
   0x8   : > { %168 = sbr.rel (%p165_p2) target bundleno = 254 (0xfe), region = 36  ;;  %281 = vmatprep.mubr.bf16.mxu0 (!%p165_p2), %v436_v1  ;;  %420 = vset.pattern.permute.xlu0 (!%p165_p2), %v436_v1  ;;  %v427_v11 = vld [vmem:[%s495_s0] sm:$0xff] (!%p165_p2)  }
   0x9   : > { %210 = vperm.xlu0 (!%p165_p2), %420, %v206_v2   ;;  %421 = vset.pattern.permute.xlu1 (!%p165_p2), %v436_v1  ;;  %v402_v3 = vld [vmem:[#allocation2] ss:$0 sm:$0xff] (!%p165_p2) }
   0xa   : > { %307 = vperm.xlu1 (!%p165_p2), %421, %v402_v3  }
   0xd   : > { %215 = vperm.xlu0 (!%p165_p2), %420, %v207_v4  }
   0xf   : > { %s501_s18 = smov (!%p190_p3, %s387_s18), 1 }
  0x10   : > { %s410_s22 = smul.u32 24, %s501_s18  ;;  %s407_s28 = sshll.u32 %s501_s18, 4 }
  0x11   : > { %s199_s5 = scalar_lea.vmem %s499_s4, %s407_s28 }
  0x12   : > { %s194_s25 = scalar_lea.vmem %s496_s1, %s410_s22 }
  0x13   : > { %v205_v5 = vld [vmem:[%s194_s25 + $0x10] sm:$0xff]  ;;  %v422_v6 = vld [vmem:[%s194_s25 + $0x4] ss:$8 sps:$4 sm:$0xff]   ;;  %v425_v8 = vld [vmem:[%s194_s25] ss:$8 sps:$4 sm:$0xff]  }
  0x14   : > { %v399_v7 = vcombine.high %v205_v5, %v205_v5  ;;  %v398_v9 = vcombine.low %v205_v5, %v205_v5  ;;  %249 = vmatprep.subr.bf16.mxu0 %v422_v6 }
  0x15   : > { %250 = vmatpush1.bf16.msra.mxu0 %v425_v8 }
  0x16   : > { %400 = vmatprep.subr.msk.bf16.mxu0 %vm242_vm0, %v399_v7  ;;  %v244_v10 = vsel %vm242_vm0, %v398_v9, 0 }
  0x19   : > { %252 = vmatpush1.bf16.msra.mxu0 %v244_v10 }
  0x1c   : > { %401 = vmatmul.mubr.msk.bf16.vlgmr.msra.gmra.mrb[0].mxu0 %vm238_vm1, %v427_v11 }
  0x88   : > { %v211_v12 = vpop.permute.xlu0 %210 }
  0x89   : > { %v308_v16 = vpop.permute.xlu1 %307 }
  0x8c   : > { %v216_v17 = vpop.permute.xlu0 %215 }
  0xef   : > { %v283_v13 = vpop.f32.mrb[0].mxu0 }
  0xf0   : > { %v284_v14 = vadd.f32 %v283_v13, %v211_v12  ;;  %v285_v15 = vpop.f32.mrb[1].mxu0 }
  0xf1   : > { %v286_v18 = vadd.f32 %v285_v15, %v211_v12  ;;  %v287_v19 = vpop.f32.mrb[2].mxu0 }
  0xf2   : > { %v297_v20 = vmin.f32 %v284_v14, 0.0  ;;  %v288_v21 = vadd.f32 %v287_v19, %v216_v17  ;;  %v289_v22 = vpop.f32.mrb[3].mxu0  ;;  %v293_v25 = vmax.f32 %v284_v14, 0.0 }
  0xf3   : > { %v298_v23 = vmin.f32 %v286_v18, 0.0  ;;  %v290_v24 = vadd.f32 %v289_v22, %v216_v17  ;;  %v294_v28 = vmax.f32 %v286_v18, 0.0 }
  0xf4   : > { %v299_v26 = vmin.f32 %v288_v21, 0.0  ;;  %v310_v27 = vmul.f32 %v308_v16, %v297_v20  ;;  %v295_v31 = vmax.f32 %v288_v21, 0.0 }
  0xf5   : > { %v300_v29 = vmin.f32 %v290_v24, 0.0  ;;  %v311_v30 = vmul.f32 %v308_v16, %v298_v23  ;;  %v296_v34 = vmax.f32 %v290_v24, 0.0 }
  0xf6   : > { %v312_v32 = vmul.f32 %v308_v16, %v299_v26  ;;  %v314_v33 = vadd.f32 %v310_v27, %v293_v25 }
  0xf7   : > { %v313_v35 = vmul.f32 %v308_v16, %v300_v29  ;;  %v315_v36 = vadd.f32 %v311_v30, %v294_v28 }
  0xf8   : > { %v316_v37 = vadd.f32 %v312_v32, %v295_v31 }
  0xf9   : > { %v317_v38 = vadd.f32 %v313_v35, %v296_v34  ;;  %v408_v39 = vpack.c.bf16 %v315_v36, %v314_v33 }
  0xfb   : > { %v409_v40 = vpack.c.bf16 %v317_v38, %v316_v37  ;;  %330 = vst [vmem:[%s199_s5] sm:$0xff] %v408_v39 }
  0xfd   : > { %331 = vst [vmem:[%s199_s5 + $0x8] sm:$0xff] %v409_v40 }
  0xfe PF: > { %s16_s17 = sadd.s32 1, %s434_s17  }
  0xff   : > { %p13_p4 = scmp.ge.s32.totalorder %s16_s17, 4  }
 0x101   :  { %15 = sbr.rel (!%p13_p4) target bundleno = 3 (0x3), region = 66 }

// kernel: msfed4_forward.35
= control target key start
LH: loop header
LB: loop body
LE: loop exit
PB: predicated region body
PF: predicated region fallthrough
CT: control target
= control target key end

     0   :  { %s627_s23 = smov 0   ;;  %s660_s0 = inlined_call_operand.vmem [shape: bf16[8,96], index: 0, kind: input, shape index: {}]   ;;  %s661_s1 = inlined_call_operand.vmem [shape: bf16[2,96,256], index: 1, kind: input, shape index: {}]   ;;  %s662_s2 = inlined_call_operand.vmem [shape: f32[8,1], index: 2, kind: input, shape index: {}]   ;;  %s663_s3 = inlined_call_operand.vmem [shape: f32[8,1], index: 3, kind: input, shape index: {}]   ;;  %s664_s4 = inlined_call_operand.vmem [shape: f32[8,1], index: 4, kind: input, shape index: {}]   ;;  %s665_s5 = inlined_call_operand.<no memory space> [shape: f32[1,1], index: 5, kind: input, shape index: {}]   ;;  %s666_s6 = inlined_call_operand.vmem [shape: bf16[2,8,256], index: 6, kind: output, shape index: {}]  }
   0x1   :  { %v11_v0 = vstv %s665_s5 }
   0x2   :  { %12 = vst [vmem:[#allocation2] sm:$0x1] %v11_v0 }
   0x3 LB: > { %s515_s24 = sadd.s32 4294967295, %s586_s23   ;;  %p519_p0 = scmp.ge.s32.totalorder %s586_s23, 1  ;;  %s586_s23 = sphi %s627_s23, %s18_s23  }
   0x4   : > { %p214_p1 = scmp.lt.s32.totalorder %s586_s23, 3 }
   0x6   : > { %p215_p2 = pnand %p519_p0, %p214_p1 }
   0x7   : > { %p244_p3 = scmp.lt.s32.totalorder (!%p215_p2), %s515_s24, 1  ;;  %v268_v1 = vld [vmem:[%s662_s2] sm:$0xff] (!%p215_p2)  ;;  %v588_v2 = vmov (!%p215_p2), 0   ;;  %vm334_vm0 = vcmask (!%p215_p2), 785408  }
   0x8   : > { %218 = sbr.rel (%p215_p2) target bundleno = 760 (0x2f8), region = 44  ;;  %370 = vmatprep.mubr.bf16.mxu0 (!%p215_p2), %v588_v2  ;;  %558 = vset.pattern.permute.xlu0 (!%p215_p2), %v588_v2  ;;  %v255_v15 = vld [vmem:[%s660_s0] sm:$0xf] (!%p215_p2) }
   0x9   : > { %271 = vperm.xlu0 (!%p215_p2), %558, %v268_v1   ;;  %559 = vset.pattern.permute.xlu1 (!%p215_p2), %v588_v2  ;;  %v417_v37 = vld [vmem:[%s663_s3] sm:$0xff] (!%p215_p2) }
   0xa   : > { %v425_v38 = vld [vmem:[%s664_s4] sm:$0xff] (!%p215_p2) }
   0xb   : > { %v536_v39 = vld [vmem:[#allocation2] ss:$0 sm:$0xff] (!%p215_p2) }
   0xf   : > { %s668_s24 = smov (!%p244_p3, %s515_s24), 1 }
  0x10   : > { %s542_s5 = smul.u32 96, %s668_s24  ;;  %s540_s18 = sshll.u32 %s668_s24, 3 }
  0x11   : > { %s253_s21 = scalar_lea.vmem %s666_s6, %s540_s18 }
  0x12   : > { %s248_s29 = scalar_lea.vmem %s661_s1, %s542_s5 }
  0x13   : > { %v560_v3 = vld [vmem:[%s248_s29 + $0x4] ss:$8 sps:$4 sm:$0xff]   ;;  %v562_v4 = vld [vmem:[%s248_s29] ss:$8 sps:$4 sm:$0xff]   ;;  %v563_v5 = vld [vmem:[%s248_s29 + $0x14] ss:$8 sps:$4 sm:$0xff]  }
  0x14   : > { %338 = vmatprep.subr.bf16.mxu0 %v560_v3  ;;  %v565_v6 = vld [vmem:[%s248_s29 + $0x10] ss:$8 sps:$4 sm:$0xff]   ;;  %v566_v7 = vld [vmem:[%s248_s29 + $0x24] ss:$8 sps:$4 sm:$0xff]   ;;  %v568_v8 = vld [vmem:[%s248_s29 + $0x20] ss:$8 sps:$4 sm:$0xff]  }
  0x15   : > { %339 = vmatpush1.bf16.msra.mxu0 %v562_v4  ;;  %v569_v9 = vld [vmem:[%s248_s29 + $0x34] ss:$8 sps:$4 sm:$0xff]   ;;  %v571_v10 = vld [vmem:[%s248_s29 + $0x30] ss:$8 sps:$4 sm:$0xff]   ;;  %v572_v11 = vld [vmem:[%s248_s29 + $0x44] ss:$8 sps:$4 sm:$0xff]  }
  0x16   : > { %340 = vmatprep.subr.bf16.mxu0 %v563_v5  ;;  %v574_v12 = vld [vmem:[%s248_s29 + $0x40] ss:$8 sps:$4 sm:$0xff]   ;;  %v575_v13 = vld [vmem:[%s248_s29 + $0x54] ss:$8 sps:$4 sm:$0xff]   ;;  %v577_v14 = vld [vmem:[%s248_s29 + $0x50] ss:$8 sps:$4 sm:$0xff]  }
  0x19   : > { %341 = vmatpush1.bf16.msra.mxu0 %v565_v6 }
  0x1a   : > { %342 = vmatprep.subr.bf16.mxu0 %v566_v7 }
  0x1d   : > { %343 = vmatpush1.bf16.msra.mxu0 %v568_v8 }
  0x1e   : > { %344 = vmatprep.subr.bf16.mxu0 %v569_v9 }
  0x21   : > { %345 = vmatpush1.bf16.msra.mxu0 %v571_v10 }
  0x22   : > { %346 = vmatprep.subr.bf16.mxu0 %v572_v11 }
  0x25   : > { %347 = vmatpush1.bf16.msra.mxu0 %v574_v12 }
  0x26   : > { %348 = vmatprep.subr.bf16.mxu0 %v575_v13 }
  0x29   : > { %349 = vmatpush1.bf16.msra.mxu0 %v577_v14 }
  0x2c   : > { %535 = vmatmul.mubr.msk.bf16.vlgmr.msra.gmra.mrb[0].mxu0 %vm334_vm0, %v255_v15 }
  0x88   : > { %v272_v16 = vpop.permute.xlu0 %271 }
  0xff   : > { %v372_v17 = vpop.f32.mrb[0].mxu0 }
 0x100   : > { %v373_v18 = vadd.f32 %v372_v17, %v272_v16  ;;  %v374_v19 = vpop.f32.mrb[1].mxu0 }
 0x101   : > { %v375_v20 = vadd.f32 %v374_v19, %v272_v16  ;;  %v376_v21 = vpop.f32.mrb[2].mxu0 }
 0x102   : > { %v377_v22 = vpop.f32.mrb[3].mxu0 }
 0x103   : > { %v379_v23 = vadd.f32 %v375_v20, %v373_v18 }
 0x105   : > { %380 = vadd.xlane.f32.xlu0 %v379_v23 }
 0x192   : > { %v381_v24 = vpop.xlane.xlu0 %380 }
 0x193   : > { %v382_v25 = vrot.slane %v381_v24, 4 }
 0x195   : > { %v383_v26 = vadd.f32 %v382_v25, %v381_v24 }
 0x197   : > { %v384_v27 = vrot.slane %v383_v26, 2 }
 0x199   : > { %v385_v28 = vadd.f32 %v384_v27, %v383_v26 }
 0x19b   : > { %v386_v29 = vrot.slane %v385_v28, 1 }
 0x19d   : > { %v387_v30 = vadd.f32 %v386_v29, %v385_v28 }
 0x19f   : > { %543 = vpush %v387_v30 }
 0x1d0   : > { %s544_s8 = spop %543 }
 0x1d1   : > { %s391_s9 = smul.f32 0.00048828125, %s544_s8 }
 0x1d3   : > { %v392_v31 = vstv %s391_s9 }
 0x1d4   : > { %v393_v32 = vsub.f32 %v373_v18, %v392_v31  ;;  %v394_v33 = vsub.f32 %v375_v20, %v392_v31 }
 0x1d6   : > { %v395_v34 = vmul.f32 %v393_v32, %v393_v32  ;;  %v396_v35 = vmul.f32 %v394_v33, %v394_v33 }
 0x1d8   : > { %v397_v36 = vadd.f32 %v396_v35, %v395_v34 }
 0x1da   : > { %398 = vadd.xlane.f32.xlu1 %v397_v36 }
 0x1eb   : > { %420 = vperm.xlu1 %559, %v417_v37  }
 0x1ef   : > { %428 = vperm.xlu1 %559, %v425_v38  }
 0x1f3   : > { %444 = vperm.xlu1 %559, %v536_v39  }
 0x267   : > { %v399_v40 = vpop.xlane.xlu1 %398 }
 0x268   : > { %v400_v41 = vrot.slane %v399_v40, 4 }
 0x26a   : > { %v401_v42 = vadd.f32 %v400_v41, %v399_v40 }
 0x26b   : > { %v421_v49 = vpop.permute.xlu1 %420 }
 0x26c   : > { %v402_v43 = vrot.slane %v401_v42, 2 }
 0x26e   : > { %v403_v44 = vadd.f32 %v402_v43, %v401_v42 }
 0x26f   : > { %v429_v53 = vpop.permute.xlu1 %428 }
 0x270   : > { %v404_v45 = vrot.slane %v403_v44, 1 }
 0x272   : > { %v405_v46 = vadd.f32 %v404_v45, %v403_v44 }
 0x273   : > { %v445_v60 = vpop.permute.xlu1 %444 }
 0x274   : > { %545 = vpush %v405_v46 }
 0x2a5   : > { %s546_s14 = spop %545 }
 0x2a6   : > { %s409_s15 = smul.f32 0.00048828125, %s546_s14 }
 0x2a8   : > { %s410_s16 = sadd.f32 1e-08, %s409_s15 }
 0x2aa   : > { %v411_v47 = vstv %s410_s16 }
 0x2ab   : > { %578 = vrsqrt.f32 %v411_v47 }
 0x2b5   : > { %v579_v48 = vpop.eup %578 }
 0x2b6   : > { %547 = vpush %v579_v48 }
 0x2e7   : > { %s548_s17 = spop %547 }
 0x2e8   : > { %v414_v50 = vstv %s548_s17 }
 0x2e9   : > { %v415_v51 = vmul.f32 %v414_v50, %v393_v32  ;;  %v416_v52 = vmul.f32 %v414_v50, %v394_v33 }
 0x2eb   : > { %v423_v54 = vmul.f32 %v421_v49, %v415_v51  ;;  %v424_v55 = vmul.f32 %v421_v49, %v416_v52 }
 0x2ed   : > { %v431_v56 = vadd.f32 %v429_v53, %v423_v54  ;;  %v432_v57 = vadd.f32 %v429_v53, %v424_v55 }
 0x2ef   : > { %v436_v58 = vmin.f32 %v431_v56, 0.0  ;;  %v437_v59 = vmin.f32 %v432_v57, 0.0  ;;  %v434_v61 = vmax.f32 %v431_v56, 0.0  ;;  %v435_v62 = vmax.f32 %v432_v57, 0.0 }
 0x2f1   : > { %v447_v63 = vmul.f32 %v445_v60, %v436_v58  ;;  %v448_v0 = vmul.f32 %v445_v60, %v437_v59 }
 0x2f3   : > { %v449_v1 = vadd.f32 %v447_v63, %v434_v61  ;;  %v450_v2 = vadd.f32 %v448_v0, %v435_v62 }
 0x2f5   : > { %v541_v3 = vpack.c.bf16 %v450_v2, %v449_v1 }
 0x2f7   : > { %459 = vst [vmem:[%s253_s21] sm:$0xff] %v541_v3 }
 0x2f8 PF: > { %s18_s23 = sadd.s32 1, %s586_s23  }
 0x2f9   : > { %p15_p4 = scmp.ge.s32.totalorder %s18_s23, 4  }
 0x2fb   :  { %17 = sbr.rel (!%p15_p4) target bundleno = 3 (0x3), region = 74 }

</bundles_post_ra>
